<compile_context>
chip_gen: v5e
topology: v5e:2x2
jax: 0.10.0
libtpu: 0.0.40
codegen_flags: <defaults>
</compile_context>

<pallas_src>
import functools

import jax
import jax.numpy as jnp
from jax.experimental import pallas as pl
from jax.experimental.pallas import tpu as pltpu


def _round_up(x, m):
    return (x + m - 1) // m * m


# ----------------------------------------------------------------------------
# Pallas kernels
# ----------------------------------------------------------------------------
def _matmul_bn_stats_kernel(a_ref, w_ref, z_ref, stats_ref, acc_ref):
    """Tiled bf16 matmul with f32 accumulation.

    Epilogue (last K step) writes the bf16 result tile and per-channel
    (sum, sum-of-squares) partials for the following BatchNorm, so no extra
    HBM pass over z is needed for the statistics.
    """
    @pl.when(pl.program_id(2) == 0)
    def _():
        acc_ref[...] = jnp.zeros_like(acc_ref)

    acc_ref[...] += jnp.dot(a_ref[...], w_ref[...],
                            preferred_element_type=jnp.float32)

    @pl.when(pl.program_id(2) == pl.num_programs(2) - 1)
    def _():
        z = acc_ref[...]
        z_ref[...] = z.astype(z_ref.dtype)
        s = jnp.sum(z, axis=0, keepdims=True)        # (1, tn) per-channel sum
        q = jnp.sum(z * z, axis=0, keepdims=True)    # (1, tn) sum of squares
        zero_rows = jnp.zeros((6, z.shape[1]), jnp.float32)
        stats_ref[...] = jnp.concatenate([s, q, zero_rows], axis=0)[None]


def _affine_kernel(z_ref, s_ref, t_ref, o_ref, *, relu):
    # y = z * scale + shift (folded BatchNorm), optional ReLU. f32 math,
    # bf16 storage.
    y = z_ref[...].astype(jnp.float32) * s_ref[...] + t_ref[...]
    if relu:
        y = jnp.maximum(y, 0.0)
    o_ref[...] = y.astype(o_ref.dtype)


def _affine_add_relu_kernel(z_ref, s_ref, t_ref, r_ref, o_ref):
    # y = relu(z * scale + shift + residual)  — fused BN + skip-add + ReLU.
    y = (z_ref[...].astype(jnp.float32) * s_ref[...] + t_ref[...]
         + r_ref[...].astype(jnp.float32))
    o_ref[...] = jnp.maximum(y, 0.0).astype(o_ref.dtype)


def _maxpool3_s1_kernel(x_ref, o_ref):
    # x: (1, H+2, W+2, C) padded with -inf, o: (1, H, W, C); 3x3 window, s=1.
    x = x_ref[...]
    _, hp, wp, c = x.shape
    ho, wo = hp - 2, wp - 2
    # Reduce the H taps first, then the W (sublane-shifting) taps, so only one
    # shifted operand is live at a time.
    t = jax.lax.slice(x, (0, 0, 0, 0), (1, ho, wp, c))
    for dh in (1, 2):
        t = jnp.maximum(t, jax.lax.slice(x, (0, dh, 0, 0), (1, dh + ho, wp, c)))
    m = jax.lax.slice(t, (0, 0, 0, 0), (1, ho, wo, c))
    for dw in (1, 2):
        m = jnp.maximum(m, jax.lax.slice(t, (0, 0, dw, 0), (1, ho, dw + wo, c)))
    o_ref[...] = m


def _avgpool_fc_kernel(x_ref, w_ref, b_ref, o_ref):
    # x: (N, H*W, C) bf16, w: (C, num_classes) f32, b: (1, num_classes) f32.
    pooled = jnp.mean(x_ref[...].astype(jnp.float32), axis=1)   # (N, C)
    o_ref[...] = (jnp.dot(pooled, w_ref[...],
                          preferred_element_type=jnp.float32) + b_ref[...])


# ----------------------------------------------------------------------------
# Pallas wrappers
# ----------------------------------------------------------------------------
def conv_matmul_bn_stats(patches, w2d):
    """patches: (M, K) bf16, w2d: (K, Cout) bf16.

    Returns z_pad (M_pad, N_pad) bf16 and stats (Mg, 8, N_pad) f32 where
    stats[:, 0] / stats[:, 1] are per-channel partial sum / sum-of-squares.
    """
    m, k = patches.shape
    cout = w2d.shape[1]

    # Tile selection. 256 on M keeps worst-case row-padding modest; 256 on N
    # matches the v6e/v7x 256-wide MXU (v5e would prefer 128, still correct).
    tm = min(256, _round_up(m, 8))
    tn = min(256, _round_up(cout, 128))
    k128 = _round_up(k, 128)
    tk = k128 if k128 <= 1536 else 512

    m_pad = _round_up(m, tm)
    n_pad = _round_up(cout, tn)
    k_pad = _round_up(k, tk)

    if (m_pad, k_pad) != (m, k):
        patches = jnp.pad(patches, ((0, m_pad - m), (0, k_pad - k)))
    if (k_pad, n_pad) != (k, cout):
        w2d = jnp.pad(w2d, ((0, k_pad - k), (0, n_pad - cout)))

    mg, ng, kg = m_pad // tm, n_pad // tn, k_pad // tk

    grid_spec = pltpu.PrefetchScalarGridSpec(
        num_scalar_prefetch=0,
        grid=(mg, ng, kg),
        in_specs=[
            pl.BlockSpec((tm, tk), lambda i, j, kk: (i, kk)),
            pl.BlockSpec((tk, tn), lambda i, j, kk: (kk, j)),
        ],
        out_specs=[
            pl.BlockSpec((tm, tn), lambda i, j, kk: (i, j)),
            pl.BlockSpec((1, 8, tn), lambda i, j, kk: (i, 0, j)),
        ],
        scratch_shapes=[pltpu.VMEM((tm, tn), jnp.float32)],
    )
    z, stats = pl.pallas_call(
        _matmul_bn_stats_kernel,
        out_shape=(
            jax.ShapeDtypeStruct((m_pad, n_pad), jnp.bfloat16),
            jax.ShapeDtypeStruct((mg, 8, n_pad), jnp.float32),
        ),
        grid_spec=grid_spec,
        compiler_params=pltpu.CompilerParams(
            dimension_semantics=("parallel", "parallel", "arbitrary")),
    )(patches, w2d)
    return z, stats


def bn_apply(z2d, scale, shift, *, relu, residual=None):
    """y = [relu](z * scale + shift [+ residual]); bf16 out, row-tiled grid."""
    m, c = z2d.shape

    # Lane densification: fold rows so the last (lane) dim is a full 128-wide
    # slab -> unmasked vector stores for the narrow (C=64) early stages.
    f = 1
    if c < 128 and 128 % c == 0 and m % (128 // c) == 0:
        f = 128 // c
    cd, r = c * f, m // f

    zd = z2d.reshape(r, cd)
    sd = jnp.tile(scale.astype(jnp.float32), f).reshape(1, cd)
    td = jnp.tile(shift.astype(jnp.float32), f).reshape(1, cd)
    rd = residual.reshape(r, cd) if residual is not None else None

    tr = min(1024, _round_up(r, 8))
    r_pad = _round_up(r, tr)
    if r_pad != r:
        zd = jnp.pad(zd, ((0, r_pad - r), (0, 0)))
        if rd is not None:
            rd = jnp.pad(rd, ((0, r_pad - r), (0, 0)))

    row_spec = pl.BlockSpec((tr, cd), lambda i: (i, 0))
    vec_spec = pl.BlockSpec((1, cd), lambda i: (0, 0))

    if rd is None:
        kern = functools.partial(_affine_kernel, relu=relu)
        in_specs = [row_spec, vec_spec, vec_spec]
        args = (zd, sd, td)
    else:
        kern = _affine_add_relu_kernel
        in_specs = [row_spec, vec_spec, vec_spec, row_spec]
        args = (zd, sd, td, rd)

    out = pl.pallas_call(
        kern,
        out_shape=jax.ShapeDtypeStruct((r_pad, cd), jnp.bfloat16),
        grid=(r_pad // tr,),
        in_specs=in_specs,
        out_specs=row_spec,
        compiler_params=pltpu.CompilerParams(dimension_semantics=("parallel",)),
    )(*args)
    return out[:r].reshape(m, c)


def maxpool3x3_s1(x_nhwc):
    n, h, w, c = x_nhwc.shape
    xp = jnp.pad(x_nhwc, ((0, 0), (1, 1), (1, 1), (0, 0)),
                 constant_values=-jnp.inf)
    return pl.pallas_call(
        _maxpool3_s1_kernel,
        out_shape=jax.ShapeDtypeStruct((n, h, w, c), x_nhwc.dtype),
        grid=(n,),
        in_specs=[pl.BlockSpec((1, h + 2, w + 2, c), lambda i: (i, 0, 0, 0))],
        out_specs=pl.BlockSpec((1, h, w, c), lambda i: (i, 0, 0, 0)),
        compiler_params=pltpu.CompilerParams(dimension_semantics=("parallel",)),
    )(xp)


def _full_spec(shape):
    n = len(shape)
    return pl.BlockSpec(shape, lambda i, _n=n: (0,) * _n)


def avgpool_fc(x_nlc, w, b):
    n, l, c = x_nlc.shape
    num_classes = w.shape[1]
    return pl.pallas_call(
        _avgpool_fc_kernel,
        out_shape=jax.ShapeDtypeStruct((n, num_classes), jnp.float32),
        grid=(1,),
        in_specs=[_full_spec((n, l, c)), _full_spec((c, num_classes)),
                  _full_spec((1, num_classes))],
        out_specs=_full_spec((n, num_classes)),
    )(x_nlc, w, b.reshape(1, num_classes))


# ----------------------------------------------------------------------------
# Plain-JAX glue: im2col, BN finalize, parameter init
# ----------------------------------------------------------------------------
def im2col(x_nhwc, kh, kw, stride, pad):
    # TODO(synk): fuse the KhxKw taps into the matmul kernel (k-tap
    # accumulation over shifted activation slices) instead of materializing
    # the KhKw*C patch matrix in HBM. Patches are bf16 here to halve traffic.
    n, h, w, c = x_nhwc.shape
    xp = jnp.pad(x_nhwc, ((0, 0), (pad, pad), (pad, pad), (0, 0)))
    ho = (h + 2 * pad - kh) // stride + 1
    wo = (w + 2 * pad - kw) // stride + 1
    cols = []
    for i in range(kh):
        for j in range(kw):
            cols.append(
                xp[:, i: i + stride * ho: stride, j: j + stride * wo: stride, :])
    patches = jnp.concatenate(cols, axis=-1)        # (N, Ho, Wo, kh*kw*C)
    return patches.reshape(n * ho * wo, kh * kw * c), ho, wo


def conv_bn(x_nhwc, p, *, stride, pad, relu, residual=None, eps=1e-5):
    w, gamma, beta = p["w"], p["gamma"], p["beta"]
    kh, kw, cin, cout = w.shape

    x_bf = x_nhwc.astype(jnp.bfloat16)
    patches, ho, wo = im2col(x_bf, kh, kw, stride, pad)
    m = patches.shape[0]

    z_pad, stats = conv_matmul_bn_stats(
        patches, w.reshape(kh * kw * cin, cout).astype(jnp.bfloat16))
    z = z_pad[:m, :cout]

    # Finalize training-mode BatchNorm statistics (tiny per-channel math).
    # NOTE: the conv bias is omitted entirely — train-mode BN subtracts the
    # batch mean, so a per-channel bias cancels exactly (identical output).
    ssum = jnp.sum(stats[:, 0, :cout], axis=0)
    ssq = jnp.sum(stats[:, 1, :cout], axis=0)
    mean = ssum / m
    var = jnp.maximum(ssq / m - mean * mean, 0.0)    # biased var (PyTorch train)
    scale = gamma * jax.lax.rsqrt(var + eps)
    shift = beta - mean * scale

    if residual is not None:
        out = bn_apply(z, scale, shift, relu=True,
                       residual=residual.astype(jnp.bfloat16).reshape(-1, cout))
    else:
        out = bn_apply(z, scale, shift, relu=relu)
    n = x_nhwc.shape[0]
    return out.reshape(n, ho, wo, cout)


def init_conv_bn(key, cin, cout, k):
    k1, k2, k3 = jax.random.split(key, 3)
    # No conv bias: it is a mathematical no-op under training-mode BatchNorm.
    return dict(
        w=jax.random.normal(k1, (k, k, cin, cout), jnp.float32)
        * (1.0 / jnp.sqrt(k * k * cin)),
        gamma=1.0 + 0.1 * jax.random.normal(k2, (cout,), jnp.float32),
        beta=0.1 * jax.random.normal(k3, (cout,), jnp.float32),
    )


def init_resnet34_params(key, in_channels, num_classes):
    keys = iter(jax.random.split(key, 64))
    params = {}
    params["conv1"] = init_conv_bn(next(keys), in_channels, 64, 7)

    def make_block(cin, cout, downsample):
        p = {
            "conv1": init_conv_bn(next(keys), cin, cout, 3),
            "conv2": init_conv_bn(next(keys), cout, cout, 3),
        }
        if downsample:
            p["down"] = init_conv_bn(next(keys), cin, cout, 3)
        return p

    params["conv2_x"] = [make_block(64, 64, True)] + [
        make_block(64, 64, False) for _ in range(2)
    ]
    params["conv3_x"] = [make_block(64, 128, True)] + [
        make_block(128, 128, False) for _ in range(3)
    ]
    params["conv4_x"] = [make_block(128, 256, True)] + [
        make_block(256, 256, False) for _ in range(5)
    ]
    params["conv5_x"] = [make_block(256, 512, True)] + [
        make_block(512, 512, False) for _ in range(2)
    ]
    kfc1, kfc2 = jax.random.split(next(keys))
    params["fc"] = {
        "w": jax.random.normal(kfc1, (512, num_classes), jnp.float32)
        / jnp.sqrt(512.0),
        "b": 0.1 * jax.random.normal(kfc2, (num_classes,), jnp.float32),
    }
    return params


# ----------------------------------------------------------------------------
# Model forward (mirrors the PyTorch module structure)
# ----------------------------------------------------------------------------
def block_forward(x, p, stride):
    identity = x
    h = conv_bn(x, p["conv1"], stride=stride, pad=1, relu=True)
    if "down" in p:  # fix_identity_shape: conv(k3, s=stride, p=1) + BN, no ReLU
        identity = conv_bn(identity, p["down"], stride=stride, pad=1, relu=False)
    # conv2 + BN + residual add + ReLU fused in one Pallas elementwise kernel.
    return conv_bn(h, p["conv2"], stride=1, pad=1, relu=True, residual=identity)


@jax.jit
def resnet34_forward(params, x_nchw):
    x = jnp.transpose(x_nchw.astype(jnp.float32), (0, 2, 3, 1))  # NCHW -> NHWC
    # conv1_block
    x = conv_bn(x, params["conv1"], stride=2, pad=3, relu=True)
    # conv2_x: MaxPool(3, stride=1, pad=1), then 3 blocks (first: stride 2 + down)
    x = maxpool3x3_s1(x)
    for stage in ("conv2_x", "conv3_x", "conv4_x", "conv5_x"):
        for i, p in enumerate(params[stage]):
            x = block_forward(x, p, stride=2 if i == 0 else 1)
    # fc: AdaptiveAvgPool2d((1,1)) + Flatten + Linear(512, num_classes)
    n, h, w, c = x.shape
    return avgpool_fc(x.reshape(n, h * w, c), params["fc"]["w"], params["fc"]["b"])


if __name__ == "__main__":
    key = jax.random.PRNGKey(0)
    k_param, k_input = jax.random.split(key)

    in_channels, num_classes = 4, 10
    x = jax.random.normal(k_input, (2, in_channels, 16, 16), jnp.float32)  # NCHW

    params = init_resnet34_params(k_param, in_channels, num_classes)
    logits = resnet34_forward(params, x)
    logits = jax.block_until_ready(logits)

    assert logits.shape == (2, num_classes)
    assert bool(jnp.all(jnp.isfinite(logits)))
    print("KERNEL_OK")
</pallas_src>

<mosaic_0001>
module attributes {stable_mosaic.version = 11 : i64} {
  func.func @_matmul_bn_stats_kernel(%arg0: i32, %arg1: i32, %arg2: i32, %arg3: memref<128x256xbf16, #tpu.memory_space<vmem>>, %arg4: memref<256x128xbf16, #tpu.memory_space<vmem>>, %arg5: memref<128x128xbf16, #tpu.memory_space<vmem>>, %arg6: memref<1x8x128xf32, #tpu.memory_space<vmem>>, %arg7: memref<128x128xf32, #tpu.memory_space<vmem>>) attributes {dimension_semantics = [#tpu.dimension_semantics<parallel>, #tpu.dimension_semantics<parallel>, #tpu.dimension_semantics<arbitrary>], iteration_bounds = array<i64: 1, 1, 1>, scalar_prefetch = 0 : i64, scratch_operands = 1 : i64, tpu.core_type = #tpu.core_type<tc>, window_params = [{transform_indices = @transform_0, window_bounds = array<i64: 128, 256>}, {transform_indices = @transform_1, window_bounds = array<i64: 256, 128>}, {transform_indices = @transform_2, window_bounds = array<i64: 128, 128>}, {transform_indices = @transform_3, window_bounds = array<i64: 1, 8, 128>}]} {
    %c0_i32 = arith.constant 0 : i32
    %0 = arith.cmpi eq, %arg2, %c0_i32 : i32
    %1 = arith.extui %0 : i1 to i32
    %c0_i32_0 = arith.constant 0 : i32
    %2 = arith.cmpi ne, %1, %c0_i32_0 : i32
    scf.if %2 {
      %cst_10 = arith.constant 0.000000e+00 : f32
      %12 = vector.broadcast %cst_10 : f32 to vector<128x128xf32>
      %c0_11 = arith.constant 0 : index
      %c0_12 = arith.constant 0 : index
      %13 = vector.load %arg7[%c0_11, %c0_12] : memref<128x128xf32, #tpu.memory_space<vmem>>, vector<128x128xf32>
      tpu.vector_store %arg7[%c0_11, %c0_12], %12 {strides = array<i32>} : memref<128x128xf32, #tpu.memory_space<vmem>>, vector<128x128xf32>,
    } else {
    }
    %c0 = arith.constant 0 : index
    %c0_1 = arith.constant 0 : index
    %3 = vector.load %arg7[%c0, %c0_1] : memref<128x128xf32, #tpu.memory_space<vmem>>, vector<128x128xf32>
    %c0_2 = arith.constant 0 : index
    %c0_3 = arith.constant 0 : index
    %4 = vector.load %arg3[%c0_2, %c0_3] : memref<128x256xbf16, #tpu.memory_space<vmem>>, vector<128x256xbf16>
    %c0_4 = arith.constant 0 : index
    %c0_5 = arith.constant 0 : index
    %5 = vector.load %arg4[%c0_4, %c0_5] : memref<256x128xbf16, #tpu.memory_space<vmem>>, vector<256x128xbf16>
    %cst = arith.constant dense<0.000000e+00> : vector<128x128xf32>
    %6 = tpu.matmul %4, %5, %cst {dimension_numbers = #tpu.dot_dimension_numbers<[1], [0], [0], [1], [0, 0, 1, 1], [], []>} : vector<128x256xbf16>, vector<256x128xbf16>, vector<128x128xf32> -> vector<128x128xf32>
    %7 = arith.addf %3, %6 : vector<128x128xf32>
    %c0_6 = arith.constant 0 : index
    %c0_7 = arith.constant 0 : index
    %8 = vector.load %arg7[%c0_6, %c0_7] : memref<128x128xf32, #tpu.memory_space<vmem>>, vector<128x128xf32>
    tpu.vector_store %arg7[%c0_6, %c0_7], %7 {strides = array<i32>} : memref<128x128xf32, #tpu.memory_space<vmem>>, vector<128x128xf32>,
    %c0_i32_8 = arith.constant 0 : i32
    %9 = arith.cmpi eq, %arg2, %c0_i32_8 : i32
    %10 = arith.extui %9 : i1 to i32
    %c0_i32_9 = arith.constant 0 : i32
    %11 = arith.cmpi ne, %10, %c0_i32_9 : i32
    scf.if %11 {
      %c0_10 = arith.constant 0 : index
      %c0_11 = arith.constant 0 : index
      %12 = vector.load %arg7[%c0_10, %c0_11] : memref<128x128xf32, #tpu.memory_space<vmem>>, vector<128x128xf32>
      %13 = arith.truncf %12 : vector<128x128xf32> to vector<128x128xbf16>
      %c0_12 = arith.constant 0 : index
      %c0_13 = arith.constant 0 : index
      %14 = vector.load %arg5[%c0_12, %c0_13] : memref<128x128xbf16, #tpu.memory_space<vmem>>, vector<128x128xbf16>
      tpu.vector_store %arg5[%c0_12, %c0_13], %13 {strides = array<i32>} : memref<128x128xbf16, #tpu.memory_space<vmem>>, vector<128x128xbf16>,
      %cst_14 = arith.constant dense<0.000000e+00> : vector<128xf32>
      %15 = vector.multi_reduction <add>, %12, %cst_14 [0] : vector<128x128xf32> to vector<128xf32>
      %16 = vector.shape_cast %15 : vector<128xf32> to vector<1x128xf32>
      %17 = arith.mulf %12, %12 : vector<128x128xf32>
      %cst_15 = arith.constant dense<0.000000e+00> : vector<128xf32>
      %18 = vector.multi_reduction <add>, %17, %cst_15 [0] : vector<128x128xf32> to vector<128xf32>
      %19 = vector.shape_cast %18 : vector<128xf32> to vector<1x128xf32>
      %cst_16 = arith.constant 0.000000e+00 : f32
      %20 = vector.broadcast %cst_16 : f32 to vector<6x128xf32>
      %21 = tpu.concatenate %16, %19, %20 in 0 : vector<1x128xf32>, vector<1x128xf32>, vector<6x128xf32> -> vector<8x128xf32>
      %22 = vector.shape_cast %21 : vector<8x128xf32> to vector<1x8x128xf32>
      %c0_17 = arith.constant 0 : index
      %c0_18 = arith.constant 0 : index
      %c0_19 = arith.constant 0 : index
      %23 = vector.load %arg6[%c0_17, %c0_18, %c0_19] : memref<1x8x128xf32, #tpu.memory_space<vmem>>, vector<1x8x128xf32>
      tpu.vector_store %arg6[%c0_17, %c0_18, %c0_19], %22 {strides = array<i32>} : memref<1x8x128xf32, #tpu.memory_space<vmem>>, vector<1x8x128xf32>,
    } else {
    }
    return
  }
  func.func @transform_0(%arg0: i32, %arg1: i32, %arg2: i32) -> (i32, i32) {
    %c0_i32 = arith.constant 0 : i32
    return %arg0, %arg2 : i32, i32
  }
  func.func @transform_1(%arg0: i32, %arg1: i32, %arg2: i32) -> (i32, i32) {
    %c0_i32 = arith.constant 0 : i32
    return %arg2, %arg1 : i32, i32
  }
  func.func @transform_2(%arg0: i32, %arg1: i32, %arg2: i32) -> (i32, i32) {
    %c0_i32 = arith.constant 0 : i32
    return %arg0, %arg1 : i32, i32
  }
  func.func @transform_3(%arg0: i32, %arg1: i32, %arg2: i32) -> (i32, i32, i32) {
    %c0_i32 = arith.constant 0 : i32
    %c0_i32_0 = arith.constant 0 : i32
    return %arg0, %c0_i32, %arg1 : i32, i32, i32
  }
}

module attributes {stable_mosaic.version = 11 : i64} {
  func.func @_affine_kernel(%arg0: i32, %arg1: memref<64x128xbf16, #tpu.memory_space<vmem>>, %arg2: memref<1x128xf32, #tpu.memory_space<vmem>>, %arg3: memref<1x128xf32, #tpu.memory_space<vmem>>, %arg4: memref<64x128xbf16, #tpu.memory_space<vmem>>) attributes {dimension_semantics = [#tpu.dimension_semantics<parallel>], iteration_bounds = array<i64: 1>, scalar_prefetch = 0 : i64, scratch_operands = 0 : i64, tpu.core_type = #tpu.core_type<tc>, window_params = [{transform_indices = @transform_0, window_bounds = array<i64: 64, 128>}, {pipeline_mode = #tpu.pipeline_mode<synchronous>, transform_indices = @transform_1, window_bounds = array<i64: 1, 128>}, {pipeline_mode = #tpu.pipeline_mode<synchronous>, transform_indices = @transform_2, window_bounds = array<i64: 1, 128>}, {transform_indices = @transform_3, window_bounds = array<i64: 64, 128>}]} {
    %c0 = arith.constant 0 : index
    %c0_0 = arith.constant 0 : index
    %0 = vector.load %arg1[%c0, %c0_0] : memref<64x128xbf16, #tpu.memory_space<vmem>>, vector<64x128xbf16>
    %1 = arith.extf %0 : vector<64x128xbf16> to vector<64x128xf32>
    %c0_1 = arith.constant 0 : index
    %c0_2 = arith.constant 0 : index
    %2 = vector.load %arg2[%c0_1, %c0_2] : memref<1x128xf32, #tpu.memory_space<vmem>>, vector<1x128xf32>
    %3 = vector.broadcast %2 : vector<1x128xf32> to vector<64x128xf32>
    %4 = arith.mulf %1, %3 : vector<64x128xf32>
    %c0_3 = arith.constant 0 : index
    %c0_4 = arith.constant 0 : index
    %5 = vector.load %arg3[%c0_3, %c0_4] : memref<1x128xf32, #tpu.memory_space<vmem>>, vector<1x128xf32>
    %6 = vector.broadcast %5 : vector<1x128xf32> to vector<64x128xf32>
    %7 = arith.addf %4, %6 : vector<64x128xf32>
    %cst = arith.constant 0.000000e+00 : f32
    %8 = vector.broadcast %cst : f32 to vector<64x128xf32>
    %9 = arith.maximumf %7, %8 : vector<64x128xf32>
    %10 = arith.truncf %9 : vector<64x128xf32> to vector<64x128xbf16>
    %c0_5 = arith.constant 0 : index
    %c0_6 = arith.constant 0 : index
    %11 = vector.load %arg4[%c0_5, %c0_6] : memref<64x128xbf16, #tpu.memory_space<vmem>>, vector<64x128xbf16>
    tpu.vector_store %arg4[%c0_5, %c0_6], %10 {strides = array<i32>} : memref<64x128xbf16, #tpu.memory_space<vmem>>, vector<64x128xbf16>,
    return
  }
  func.func @transform_0(%arg0: i32) -> (i32, i32) {
    %c0_i32 = arith.constant 0 : i32
    %c0_i32_0 = arith.constant 0 : i32
    return %arg0, %c0_i32 : i32, i32
  }
  func.func @transform_1(%arg0: i32) -> (i32, i32) {
    %c0_i32 = arith.constant 0 : i32
    %c0_i32_0 = arith.constant 0 : i32
    %c0_i32_1 = arith.constant 0 : i32
    return %c0_i32, %c0_i32_0 : i32, i32
  }
  func.func @transform_2(%arg0: i32) -> (i32, i32) {
    %c0_i32 = arith.constant 0 : i32
    %c0_i32_0 = arith.constant 0 : i32
    %c0_i32_1 = arith.constant 0 : i32
    return %c0_i32, %c0_i32_0 : i32, i32
  }
  func.func @transform_3(%arg0: i32) -> (i32, i32) {
    %c0_i32 = arith.constant 0 : i32
    %c0_i32_0 = arith.constant 0 : i32
    return %arg0, %c0_i32 : i32, i32
  }
}

module attributes {stable_mosaic.version = 11 : i64} {
  func.func @_maxpool3_s1_kernel(%arg0: i32, %arg1: memref<1x10x10x64xbf16, #tpu.memory_space<vmem>>, %arg2: memref<1x8x8x64xbf16, #tpu.memory_space<vmem>>) attributes {dimension_semantics = [#tpu.dimension_semantics<parallel>], iteration_bounds = array<i64: 2>, scalar_prefetch = 0 : i64, scratch_operands = 0 : i64, tpu.core_type = #tpu.core_type<tc>, window_params = [{transform_indices = @transform_0, window_bounds = array<i64: 1, 10, 10, 64>}, {transform_indices = @transform_1, window_bounds = array<i64: 1, 8, 8, 64>}]} {
    %c0 = arith.constant 0 : index
    %c0_0 = arith.constant 0 : index
    %c0_1 = arith.constant 0 : index
    %c0_2 = arith.constant 0 : index
    %0 = vector.load %arg1[%c0, %c0_0, %c0_1, %c0_2] : memref<1x10x10x64xbf16, #tpu.memory_space<vmem>>, vector<1x10x10x64xbf16>
    %1 = vector.extract_strided_slice %0 {offsets = [0, 0, 0, 0], sizes = [1, 8, 10, 64], strides = [1, 1, 1, 1]} : vector<1x10x10x64xbf16> to vector<1x8x10x64xbf16>
    %2 = vector.extract_strided_slice %0 {offsets = [0, 1, 0, 0], sizes = [1, 8, 10, 64], strides = [1, 1, 1, 1]} : vector<1x10x10x64xbf16> to vector<1x8x10x64xbf16>
    %3 = arith.maximumf %1, %2 : vector<1x8x10x64xbf16>
    %4 = vector.extract_strided_slice %0 {offsets = [0, 2, 0, 0], sizes = [1, 8, 10, 64], strides = [1, 1, 1, 1]} : vector<1x10x10x64xbf16> to vector<1x8x10x64xbf16>
    %5 = arith.maximumf %3, %4 : vector<1x8x10x64xbf16>
    %6 = vector.extract_strided_slice %5 {offsets = [0, 0, 0, 0], sizes = [1, 8, 8, 64], strides = [1, 1, 1, 1]} : vector<1x8x10x64xbf16> to vector<1x8x8x64xbf16>
    %7 = vector.extract_strided_slice %5 {offsets = [0, 0, 1, 0], sizes = [1, 8, 8, 64], strides = [1, 1, 1, 1]} : vector<1x8x10x64xbf16> to vector<1x8x8x64xbf16>
    %8 = arith.maximumf %6, %7 : vector<1x8x8x64xbf16>
    %9 = vector.extract_strided_slice %5 {offsets = [0, 0, 2, 0], sizes = [1, 8, 8, 64], strides = [1, 1, 1, 1]} : vector<1x8x10x64xbf16> to vector<1x8x8x64xbf16>
    %10 = arith.maximumf %8, %9 : vector<1x8x8x64xbf16>
    %c0_3 = arith.constant 0 : index
    %c0_4 = arith.constant 0 : index
    %c0_5 = arith.constant 0 : index
    %c0_6 = arith.constant 0 : index
    %11 = vector.load %arg2[%c0_3, %c0_4, %c0_5, %c0_6] : memref<1x8x8x64xbf16, #tpu.memory_space<vmem>>, vector<1x8x8x64xbf16>
    tpu.vector_store %arg2[%c0_3, %c0_4, %c0_5, %c0_6], %10 {strides = array<i32>} : memref<1x8x8x64xbf16, #tpu.memory_space<vmem>>, vector<1x8x8x64xbf16>,
    return
  }
  func.func @transform_0(%arg0: i32) -> (i32, i32, i32, i32) {
    %c0_i32 = arith.constant 0 : i32
    %c0_i32_0 = arith.constant 0 : i32
    %c0_i32_1 = arith.constant 0 : i32
    %c0_i32_2 = arith.constant 0 : i32
    return %arg0, %c0_i32, %c0_i32_0, %c0_i32_1 : i32, i32, i32, i32
  }
  func.func @transform_1(%arg0: i32) -> (i32, i32, i32, i32) {
    %c0_i32 = arith.constant 0 : i32
    %c0_i32_0 = arith.constant 0 : i32
    %c0_i32_1 = arith.constant 0 : i32
    %c0_i32_2 = arith.constant 0 : i32
    return %arg0, %c0_i32, %c0_i32_0, %c0_i32_1 : i32, i32, i32, i32
  }
}

module attributes {stable_mosaic.version = 11 : i64} {
  func.func @_matmul_bn_stats_kernel(%arg0: i32, %arg1: i32, %arg2: i32, %arg3: memref<32x640xbf16, #tpu.memory_space<vmem>>, %arg4: memref<640x128xbf16, #tpu.memory_space<vmem>>, %arg5: memref<32x128xbf16, #tpu.memory_space<vmem>>, %arg6: memref<1x8x128xf32, #tpu.memory_space<vmem>>, %arg7: memref<32x128xf32, #tpu.memory_space<vmem>>) attributes {dimension_semantics = [#tpu.dimension_semantics<parallel>, #tpu.dimension_semantics<parallel>, #tpu.dimension_semantics<arbitrary>], iteration_bounds = array<i64: 1, 1, 1>, scalar_prefetch = 0 : i64, scratch_operands = 1 : i64, tpu.core_type = #tpu.core_type<tc>, window_params = [{transform_indices = @transform_0, window_bounds = array<i64: 32, 640>}, {transform_indices = @transform_1, window_bounds = array<i64: 640, 128>}, {transform_indices = @transform_2, window_bounds = array<i64: 32, 128>}, {transform_indices = @transform_3, window_bounds = array<i64: 1, 8, 128>}]} {
    %c0_i32 = arith.constant 0 : i32
    %0 = arith.cmpi eq, %arg2, %c0_i32 : i32
    %1 = arith.extui %0 : i1 to i32
    %c0_i32_0 = arith.constant 0 : i32
    %2 = arith.cmpi ne, %1, %c0_i32_0 : i32
    scf.if %2 {
      %cst_10 = arith.constant 0.000000e+00 : f32
      %12 = vector.broadcast %cst_10 : f32 to vector<32x128xf32>
      %c0_11 = arith.constant 0 : index
      %c0_12 = arith.constant 0 : index
      %13 = vector.load %arg7[%c0_11, %c0_12] : memref<32x128xf32, #tpu.memory_space<vmem>>, vector<32x128xf32>
      tpu.vector_store %arg7[%c0_11, %c0_12], %12 {strides = array<i32>} : memref<32x128xf32, #tpu.memory_space<vmem>>, vector<32x128xf32>,
    } else {
    }
    %c0 = arith.constant 0 : index
    %c0_1 = arith.constant 0 : index
    %3 = vector.load %arg7[%c0, %c0_1] : memref<32x128xf32, #tpu.memory_space<vmem>>, vector<32x128xf32>
    %c0_2 = arith.constant 0 : index
    %c0_3 = arith.constant 0 : index
    %4 = vector.load %arg3[%c0_2, %c0_3] : memref<32x640xbf16, #tpu.memory_space<vmem>>, vector<32x640xbf16>
    %c0_4 = arith.constant 0 : index
    %c0_5 = arith.constant 0 : index
    %5 = vector.load %arg4[%c0_4, %c0_5] : memref<640x128xbf16, #tpu.memory_space<vmem>>, vector<640x128xbf16>
    %cst = arith.constant dense<0.000000e+00> : vector<32x128xf32>
    %6 = tpu.matmul %4, %5, %cst {dimension_numbers = #tpu.dot_dimension_numbers<[1], [0], [0], [1], [0, 0, 1, 1], [], []>} : vector<32x640xbf16>, vector<640x128xbf16>, vector<32x128xf32> -> vector<32x128xf32>
    %7 = arith.addf %3, %6 : vector<32x128xf32>
    %c0_6 = arith.constant 0 : index
    %c0_7 = arith.constant 0 : index
    %8 = vector.load %arg7[%c0_6, %c0_7] : memref<32x128xf32, #tpu.memory_space<vmem>>, vector<32x128xf32>
    tpu.vector_store %arg7[%c0_6, %c0_7], %7 {strides = array<i32>} : memref<32x128xf32, #tpu.memory_space<vmem>>, vector<32x128xf32>,
    %c0_i32_8 = arith.constant 0 : i32
    %9 = arith.cmpi eq, %arg2, %c0_i32_8 : i32
    %10 = arith.extui %9 : i1 to i32
    %c0_i32_9 = arith.constant 0 : i32
    %11 = arith.cmpi ne, %10, %c0_i32_9 : i32
    scf.if %11 {
      %c0_10 = arith.constant 0 : index
      %c0_11 = arith.constant 0 : index
      %12 = vector.load %arg7[%c0_10, %c0_11] : memref<32x128xf32, #tpu.memory_space<vmem>>, vector<32x128xf32>
      %13 = arith.truncf %12 : vector<32x128xf32> to vector<32x128xbf16>
      %c0_12 = arith.constant 0 : index
      %c0_13 = arith.constant 0 : index
      %14 = vector.load %arg5[%c0_12, %c0_13] : memref<32x128xbf16, #tpu.memory_space<vmem>>, vector<32x128xbf16>
      tpu.vector_store %arg5[%c0_12, %c0_13], %13 {strides = array<i32>} : memref<32x128xbf16, #tpu.memory_space<vmem>>, vector<32x128xbf16>,
      %cst_14 = arith.constant dense<0.000000e+00> : vector<128xf32>
      %15 = vector.multi_reduction <add>, %12, %cst_14 [0] : vector<32x128xf32> to vector<128xf32>
      %16 = vector.shape_cast %15 : vector<128xf32> to vector<1x128xf32>
      %17 = arith.mulf %12, %12 : vector<32x128xf32>
      %cst_15 = arith.constant dense<0.000000e+00> : vector<128xf32>
      %18 = vector.multi_reduction <add>, %17, %cst_15 [0] : vector<32x128xf32> to vector<128xf32>
      %19 = vector.shape_cast %18 : vector<128xf32> to vector<1x128xf32>
      %cst_16 = arith.constant 0.000000e+00 : f32
      %20 = vector.broadcast %cst_16 : f32 to vector<6x128xf32>
      %21 = tpu.concatenate %16, %19, %20 in 0 : vector<1x128xf32>, vector<1x128xf32>, vector<6x128xf32> -> vector<8x128xf32>
      %22 = vector.shape_cast %21 : vector<8x128xf32> to vector<1x8x128xf32>
      %c0_17 = arith.constant 0 : index
      %c0_18 = arith.constant 0 : index
      %c0_19 = arith.constant 0 : index
      %23 = vector.load %arg6[%c0_17, %c0_18, %c0_19] : memref<1x8x128xf32, #tpu.memory_space<vmem>>, vector<1x8x128xf32>
      tpu.vector_store %arg6[%c0_17, %c0_18, %c0_19], %22 {strides = array<i32>} : memref<1x8x128xf32, #tpu.memory_space<vmem>>, vector<1x8x128xf32>,
    } else {
    }
    return
  }
  func.func @transform_0(%arg0: i32, %arg1: i32, %arg2: i32) -> (i32, i32) {
    %c0_i32 = arith.constant 0 : i32
    return %arg0, %arg2 : i32, i32
  }
  func.func @transform_1(%arg0: i32, %arg1: i32, %arg2: i32) -> (i32, i32) {
    %c0_i32 = arith.constant 0 : i32
    return %arg2, %arg1 : i32, i32
  }
  func.func @transform_2(%arg0: i32, %arg1: i32, %arg2: i32) -> (i32, i32) {
    %c0_i32 = arith.constant 0 : i32
    return %arg0, %arg1 : i32, i32
  }
  func.func @transform_3(%arg0: i32, %arg1: i32, %arg2: i32) -> (i32, i32, i32) {
    %c0_i32 = arith.constant 0 : i32
    %c0_i32_0 = arith.constant 0 : i32
    return %arg0, %c0_i32, %arg1 : i32, i32, i32
  }
}

module attributes {stable_mosaic.version = 11 : i64} {
  func.func @_affine_kernel(%arg0: i32, %arg1: memref<16x128xbf16, #tpu.memory_space<vmem>>, %arg2: memref<1x128xf32, #tpu.memory_space<vmem>>, %arg3: memref<1x128xf32, #tpu.memory_space<vmem>>, %arg4: memref<16x128xbf16, #tpu.memory_space<vmem>>) attributes {dimension_semantics = [#tpu.dimension_semantics<parallel>], iteration_bounds = array<i64: 1>, scalar_prefetch = 0 : i64, scratch_operands = 0 : i64, tpu.core_type = #tpu.core_type<tc>, window_params = [{transform_indices = @transform_0, window_bounds = array<i64: 16, 128>}, {pipeline_mode = #tpu.pipeline_mode<synchronous>, transform_indices = @transform_1, window_bounds = array<i64: 1, 128>}, {pipeline_mode = #tpu.pipeline_mode<synchronous>, transform_indices = @transform_2, window_bounds = array<i64: 1, 128>}, {transform_indices = @transform_3, window_bounds = array<i64: 16, 128>}]} {
    %c0 = arith.constant 0 : index
    %c0_0 = arith.constant 0 : index
    %0 = vector.load %arg1[%c0, %c0_0] : memref<16x128xbf16, #tpu.memory_space<vmem>>, vector<16x128xbf16>
    %1 = arith.extf %0 : vector<16x128xbf16> to vector<16x128xf32>
    %c0_1 = arith.constant 0 : index
    %c0_2 = arith.constant 0 : index
    %2 = vector.load %arg2[%c0_1, %c0_2] : memref<1x128xf32, #tpu.memory_space<vmem>>, vector<1x128xf32>
    %3 = vector.broadcast %2 : vector<1x128xf32> to vector<16x128xf32>
    %4 = arith.mulf %1, %3 : vector<16x128xf32>
    %c0_3 = arith.constant 0 : index
    %c0_4 = arith.constant 0 : index
    %5 = vector.load %arg3[%c0_3, %c0_4] : memref<1x128xf32, #tpu.memory_space<vmem>>, vector<1x128xf32>
    %6 = vector.broadcast %5 : vector<1x128xf32> to vector<16x128xf32>
    %7 = arith.addf %4, %6 : vector<16x128xf32>
    %8 = arith.truncf %7 : vector<16x128xf32> to vector<16x128xbf16>
    %c0_5 = arith.constant 0 : index
    %c0_6 = arith.constant 0 : index
    %9 = vector.load %arg4[%c0_5, %c0_6] : memref<16x128xbf16, #tpu.memory_space<vmem>>, vector<16x128xbf16>
    tpu.vector_store %arg4[%c0_5, %c0_6], %8 {strides = array<i32>} : memref<16x128xbf16, #tpu.memory_space<vmem>>, vector<16x128xbf16>,
    return
  }
  func.func @transform_0(%arg0: i32) -> (i32, i32) {
    %c0_i32 = arith.constant 0 : i32
    %c0_i32_0 = arith.constant 0 : i32
    return %arg0, %c0_i32 : i32, i32
  }
  func.func @transform_1(%arg0: i32) -> (i32, i32) {
    %c0_i32 = arith.constant 0 : i32
    %c0_i32_0 = arith.constant 0 : i32
    %c0_i32_1 = arith.constant 0 : i32
    return %c0_i32, %c0_i32_0 : i32, i32
  }
  func.func @transform_2(%arg0: i32) -> (i32, i32) {
    %c0_i32 = arith.constant 0 : i32
    %c0_i32_0 = arith.constant 0 : i32
    %c0_i32_1 = arith.constant 0 : i32
    return %c0_i32, %c0_i32_0 : i32, i32
  }
  func.func @transform_3(%arg0: i32) -> (i32, i32) {
    %c0_i32 = arith.constant 0 : i32
    %c0_i32_0 = arith.constant 0 : i32
    return %arg0, %c0_i32 : i32, i32
  }
}

module attributes {stable_mosaic.version = 11 : i64} {
  func.func @_affine_kernel(%arg0: i32, %arg1: memref<16x128xbf16, #tpu.memory_space<vmem>>, %arg2: memref<1x128xf32, #tpu.memory_space<vmem>>, %arg3: memref<1x128xf32, #tpu.memory_space<vmem>>, %arg4: memref<16x128xbf16, #tpu.memory_space<vmem>>) attributes {dimension_semantics = [#tpu.dimension_semantics<parallel>], iteration_bounds = array<i64: 1>, scalar_prefetch = 0 : i64, scratch_operands = 0 : i64, tpu.core_type = #tpu.core_type<tc>, window_params = [{transform_indices = @transform_0, window_bounds = array<i64: 16, 128>}, {pipeline_mode = #tpu.pipeline_mode<synchronous>, transform_indices = @transform_1, window_bounds = array<i64: 1, 128>}, {pipeline_mode = #tpu.pipeline_mode<synchronous>, transform_indices = @transform_2, window_bounds = array<i64: 1, 128>}, {transform_indices = @transform_3, window_bounds = array<i64: 16, 128>}]} {
    %c0 = arith.constant 0 : index
    %c0_0 = arith.constant 0 : index
    %0 = vector.load %arg1[%c0, %c0_0] : memref<16x128xbf16, #tpu.memory_space<vmem>>, vector<16x128xbf16>
    %1 = arith.extf %0 : vector<16x128xbf16> to vector<16x128xf32>
    %c0_1 = arith.constant 0 : index
    %c0_2 = arith.constant 0 : index
    %2 = vector.load %arg2[%c0_1, %c0_2] : memref<1x128xf32, #tpu.memory_space<vmem>>, vector<1x128xf32>
    %3 = vector.broadcast %2 : vector<1x128xf32> to vector<16x128xf32>
    %4 = arith.mulf %1, %3 : vector<16x128xf32>
    %c0_3 = arith.constant 0 : index
    %c0_4 = arith.constant 0 : index
    %5 = vector.load %arg3[%c0_3, %c0_4] : memref<1x128xf32, #tpu.memory_space<vmem>>, vector<1x128xf32>
    %6 = vector.broadcast %5 : vector<1x128xf32> to vector<16x128xf32>
    %7 = arith.addf %4, %6 : vector<16x128xf32>
    %cst = arith.constant 0.000000e+00 : f32
    %8 = vector.broadcast %cst : f32 to vector<16x128xf32>
    %9 = arith.maximumf %7, %8 : vector<16x128xf32>
    %10 = arith.truncf %9 : vector<16x128xf32> to vector<16x128xbf16>
    %c0_5 = arith.constant 0 : index
    %c0_6 = arith.constant 0 : index
    %11 = vector.load %arg4[%c0_5, %c0_6] : memref<16x128xbf16, #tpu.memory_space<vmem>>, vector<16x128xbf16>
    tpu.vector_store %arg4[%c0_5, %c0_6], %10 {strides = array<i32>} : memref<16x128xbf16, #tpu.memory_space<vmem>>, vector<16x128xbf16>,
    return
  }
  func.func @transform_0(%arg0: i32) -> (i32, i32) {
    %c0_i32 = arith.constant 0 : i32
    %c0_i32_0 = arith.constant 0 : i32
    return %arg0, %c0_i32 : i32, i32
  }
  func.func @transform_1(%arg0: i32) -> (i32, i32) {
    %c0_i32 = arith.constant 0 : i32
    %c0_i32_0 = arith.constant 0 : i32
    %c0_i32_1 = arith.constant 0 : i32
    return %c0_i32, %c0_i32_0 : i32, i32
  }
  func.func @transform_2(%arg0: i32) -> (i32, i32) {
    %c0_i32 = arith.constant 0 : i32
    %c0_i32_0 = arith.constant 0 : i32
    %c0_i32_1 = arith.constant 0 : i32
    return %c0_i32, %c0_i32_0 : i32, i32
  }
  func.func @transform_3(%arg0: i32) -> (i32, i32) {
    %c0_i32 = arith.constant 0 : i32
    %c0_i32_0 = arith.constant 0 : i32
    return %arg0, %c0_i32 : i32, i32
  }
}

module attributes {stable_mosaic.version = 11 : i64} {
  func.func @_affine_add_relu_kernel(%arg0: i32, %arg1: memref<16x128xbf16, #tpu.memory_space<vmem>>, %arg2: memref<1x128xf32, #tpu.memory_space<vmem>>, %arg3: memref<1x128xf32, #tpu.memory_space<vmem>>, %arg4: memref<16x128xbf16, #tpu.memory_space<vmem>>, %arg5: memref<16x128xbf16, #tpu.memory_space<vmem>>) attributes {dimension_semantics = [#tpu.dimension_semantics<parallel>], iteration_bounds = array<i64: 1>, scalar_prefetch = 0 : i64, scratch_operands = 0 : i64, tpu.core_type = #tpu.core_type<tc>, window_params = [{transform_indices = @transform_0, window_bounds = array<i64: 16, 128>}, {pipeline_mode = #tpu.pipeline_mode<synchronous>, transform_indices = @transform_1, window_bounds = array<i64: 1, 128>}, {pipeline_mode = #tpu.pipeline_mode<synchronous>, transform_indices = @transform_2, window_bounds = array<i64: 1, 128>}, {transform_indices = @transform_3, window_bounds = array<i64: 16, 128>}, {transform_indices = @transform_4, window_bounds = array<i64: 16, 128>}]} {
    %c0 = arith.constant 0 : index
    %c0_0 = arith.constant 0 : index
    %0 = vector.load %arg1[%c0, %c0_0] : memref<16x128xbf16, #tpu.memory_space<vmem>>, vector<16x128xbf16>
    %1 = arith.extf %0 : vector<16x128xbf16> to vector<16x128xf32>
    %c0_1 = arith.constant 0 : index
    %c0_2 = arith.constant 0 : index
    %2 = vector.load %arg2[%c0_1, %c0_2] : memref<1x128xf32, #tpu.memory_space<vmem>>, vector<1x128xf32>
    %3 = vector.broadcast %2 : vector<1x128xf32> to vector<16x128xf32>
    %4 = arith.mulf %1, %3 : vector<16x128xf32>
    %c0_3 = arith.constant 0 : index
    %c0_4 = arith.constant 0 : index
    %5 = vector.load %arg3[%c0_3, %c0_4] : memref<1x128xf32, #tpu.memory_space<vmem>>, vector<1x128xf32>
    %6 = vector.broadcast %5 : vector<1x128xf32> to vector<16x128xf32>
    %7 = arith.addf %4, %6 : vector<16x128xf32>
    %c0_5 = arith.constant 0 : index
    %c0_6 = arith.constant 0 : index
    %8 = vector.load %arg4[%c0_5, %c0_6] : memref<16x128xbf16, #tpu.memory_space<vmem>>, vector<16x128xbf16>
    %9 = arith.extf %8 : vector<16x128xbf16> to vector<16x128xf32>
    %10 = arith.addf %7, %9 : vector<16x128xf32>
    %cst = arith.constant 0.000000e+00 : f32
    %11 = vector.broadcast %cst : f32 to vector<16x128xf32>
    %12 = arith.maximumf %10, %11 : vector<16x128xf32>
    %13 = arith.truncf %12 : vector<16x128xf32> to vector<16x128xbf16>
    %c0_7 = arith.constant 0 : index
    %c0_8 = arith.constant 0 : index
    %14 = vector.load %arg5[%c0_7, %c0_8] : memref<16x128xbf16, #tpu.memory_space<vmem>>, vector<16x128xbf16>
    tpu.vector_store %arg5[%c0_7, %c0_8], %13 {strides = array<i32>} : memref<16x128xbf16, #tpu.memory_space<vmem>>, vector<16x128xbf16>,
    return
  }
  func.func @transform_0(%arg0: i32) -> (i32, i32) {
    %c0_i32 = arith.constant 0 : i32
    %c0_i32_0 = arith.constant 0 : i32
    return %arg0, %c0_i32 : i32, i32
  }
  func.func @transform_1(%arg0: i32) -> (i32, i32) {
    %c0_i32 = arith.constant 0 : i32
    %c0_i32_0 = arith.constant 0 : i32
    %c0_i32_1 = arith.constant 0 : i32
    return %c0_i32, %c0_i32_0 : i32, i32
  }
  func.func @transform_2(%arg0: i32) -> (i32, i32) {
    %c0_i32 = arith.constant 0 : i32
    %c0_i32_0 = arith.constant 0 : i32
    %c0_i32_1 = arith.constant 0 : i32
    return %c0_i32, %c0_i32_0 : i32, i32
  }
  func.func @transform_3(%arg0: i32) -> (i32, i32) {
    %c0_i32 = arith.constant 0 : i32
    %c0_i32_0 = arith.constant 0 : i32
    return %arg0, %c0_i32 : i32, i32
  }
  func.func @transform_4(%arg0: i32) -> (i32, i32) {
    %c0_i32 = arith.constant 0 : i32
    %c0_i32_0 = arith.constant 0 : i32
    return %arg0, %c0_i32 : i32, i32
  }
}

module attributes {stable_mosaic.version = 11 : i64} {
  func.func @_matmul_bn_stats_kernel(%arg0: i32, %arg1: i32, %arg2: i32, %arg3: memref<8x640xbf16, #tpu.memory_space<vmem>>, %arg4: memref<640x128xbf16, #tpu.memory_space<vmem>>, %arg5: memref<8x128xbf16, #tpu.memory_space<vmem>>, %arg6: memref<1x8x128xf32, #tpu.memory_space<vmem>>, %arg7: memref<8x128xf32, #tpu.memory_space<vmem>>) attributes {dimension_semantics = [#tpu.dimension_semantics<parallel>, #tpu.dimension_semantics<parallel>, #tpu.dimension_semantics<arbitrary>], iteration_bounds = array<i64: 1, 1, 1>, scalar_prefetch = 0 : i64, scratch_operands = 1 : i64, tpu.core_type = #tpu.core_type<tc>, window_params = [{transform_indices = @transform_0, window_bounds = array<i64: 8, 640>}, {transform_indices = @transform_1, window_bounds = array<i64: 640, 128>}, {transform_indices = @transform_2, window_bounds = array<i64: 8, 128>}, {transform_indices = @transform_3, window_bounds = array<i64: 1, 8, 128>}]} {
    %c0_i32 = arith.constant 0 : i32
    %0 = arith.cmpi eq, %arg2, %c0_i32 : i32
    %1 = arith.extui %0 : i1 to i32
    %c0_i32_0 = arith.constant 0 : i32
    %2 = arith.cmpi ne, %1, %c0_i32_0 : i32
    scf.if %2 {
      %cst_10 = arith.constant 0.000000e+00 : f32
      %12 = vector.broadcast %cst_10 : f32 to vector<8x128xf32>
      %c0_11 = arith.constant 0 : index
      %c0_12 = arith.constant 0 : index
      %13 = vector.load %arg7[%c0_11, %c0_12] : memref<8x128xf32, #tpu.memory_space<vmem>>, vector<8x128xf32>
      tpu.vector_store %arg7[%c0_11, %c0_12], %12 {strides = array<i32>} : memref<8x128xf32, #tpu.memory_space<vmem>>, vector<8x128xf32>,
    } else {
    }
    %c0 = arith.constant 0 : index
    %c0_1 = arith.constant 0 : index
    %3 = vector.load %arg7[%c0, %c0_1] : memref<8x128xf32, #tpu.memory_space<vmem>>, vector<8x128xf32>
    %c0_2 = arith.constant 0 : index
    %c0_3 = arith.constant 0 : index
    %4 = vector.load %arg3[%c0_2, %c0_3] : memref<8x640xbf16, #tpu.memory_space<vmem>>, vector<8x640xbf16>
    %c0_4 = arith.constant 0 : index
    %c0_5 = arith.constant 0 : index
    %5 = vector.load %arg4[%c0_4, %c0_5] : memref<640x128xbf16, #tpu.memory_space<vmem>>, vector<640x128xbf16>
    %cst = arith.constant dense<0.000000e+00> : vector<8x128xf32>
    %6 = tpu.matmul %4, %5, %cst {dimension_numbers = #tpu.dot_dimension_numbers<[1], [0], [0], [1], [0, 0, 1, 1], [], []>} : vector<8x640xbf16>, vector<640x128xbf16>, vector<8x128xf32> -> vector<8x128xf32>
    %7 = arith.addf %3, %6 : vector<8x128xf32>
    %c0_6 = arith.constant 0 : index
    %c0_7 = arith.constant 0 : index
    %8 = vector.load %arg7[%c0_6, %c0_7] : memref<8x128xf32, #tpu.memory_space<vmem>>, vector<8x128xf32>
    tpu.vector_store %arg7[%c0_6, %c0_7], %7 {strides = array<i32>} : memref<8x128xf32, #tpu.memory_space<vmem>>, vector<8x128xf32>,
    %c0_i32_8 = arith.constant 0 : i32
    %9 = arith.cmpi eq, %arg2, %c0_i32_8 : i32
    %10 = arith.extui %9 : i1 to i32
    %c0_i32_9 = arith.constant 0 : i32
    %11 = arith.cmpi ne, %10, %c0_i32_9 : i32
    scf.if %11 {
      %c0_10 = arith.constant 0 : index
      %c0_11 = arith.constant 0 : index
      %12 = vector.load %arg7[%c0_10, %c0_11] : memref<8x128xf32, #tpu.memory_space<vmem>>, vector<8x128xf32>
      %13 = arith.truncf %12 : vector<8x128xf32> to vector<8x128xbf16>
      %c0_12 = arith.constant 0 : index
      %c0_13 = arith.constant 0 : index
      %14 = vector.load %arg5[%c0_12, %c0_13] : memref<8x128xbf16, #tpu.memory_space<vmem>>, vector<8x128xbf16>
      tpu.vector_store %arg5[%c0_12, %c0_13], %13 {strides = array<i32>} : memref<8x128xbf16, #tpu.memory_space<vmem>>, vector<8x128xbf16>,
      %cst_14 = arith.constant dense<0.000000e+00> : vector<128xf32>
      %15 = vector.multi_reduction <add>, %12, %cst_14 [0] : vector<8x128xf32> to vector<128xf32>
      %16 = vector.shape_cast %15 : vector<128xf32> to vector<1x128xf32>
      %17 = arith.mulf %12, %12 : vector<8x128xf32>
      %cst_15 = arith.constant dense<0.000000e+00> : vector<128xf32>
      %18 = vector.multi_reduction <add>, %17, %cst_15 [0] : vector<8x128xf32> to vector<128xf32>
      %19 = vector.shape_cast %18 : vector<128xf32> to vector<1x128xf32>
      %cst_16 = arith.constant 0.000000e+00 : f32
      %20 = vector.broadcast %cst_16 : f32 to vector<6x128xf32>
      %21 = tpu.concatenate %16, %19, %20 in 0 : vector<1x128xf32>, vector<1x128xf32>, vector<6x128xf32> -> vector<8x128xf32>
      %22 = vector.shape_cast %21 : vector<8x128xf32> to vector<1x8x128xf32>
      %c0_17 = arith.constant 0 : index
      %c0_18 = arith.constant 0 : index
      %c0_19 = arith.constant 0 : index
      %23 = vector.load %arg6[%c0_17, %c0_18, %c0_19] : memref<1x8x128xf32, #tpu.memory_space<vmem>>, vector<1x8x128xf32>
      tpu.vector_store %arg6[%c0_17, %c0_18, %c0_19], %22 {strides = array<i32>} : memref<1x8x128xf32, #tpu.memory_space<vmem>>, vector<1x8x128xf32>,
    } else {
    }
    return
  }
  func.func @transform_0(%arg0: i32, %arg1: i32, %arg2: i32) -> (i32, i32) {
    %c0_i32 = arith.constant 0 : i32
    return %arg0, %arg2 : i32, i32
  }
  func.func @transform_1(%arg0: i32, %arg1: i32, %arg2: i32) -> (i32, i32) {
    %c0_i32 = arith.constant 0 : i32
    return %arg2, %arg1 : i32, i32
  }
  func.func @transform_2(%arg0: i32, %arg1: i32, %arg2: i32) -> (i32, i32) {
    %c0_i32 = arith.constant 0 : i32
    return %arg0, %arg1 : i32, i32
  }
  func.func @transform_3(%arg0: i32, %arg1: i32, %arg2: i32) -> (i32, i32, i32) {
    %c0_i32 = arith.constant 0 : i32
    %c0_i32_0 = arith.constant 0 : i32
    return %arg0, %c0_i32, %arg1 : i32, i32, i32
  }
}

module attributes {stable_mosaic.version = 11 : i64} {
  func.func @_affine_kernel(%arg0: i32, %arg1: memref<8x128xbf16, #tpu.memory_space<vmem>>, %arg2: memref<1x128xf32, #tpu.memory_space<vmem>>, %arg3: memref<1x128xf32, #tpu.memory_space<vmem>>, %arg4: memref<8x128xbf16, #tpu.memory_space<vmem>>) attributes {dimension_semantics = [#tpu.dimension_semantics<parallel>], iteration_bounds = array<i64: 1>, scalar_prefetch = 0 : i64, scratch_operands = 0 : i64, tpu.core_type = #tpu.core_type<tc>, window_params = [{transform_indices = @transform_0, window_bounds = array<i64: 8, 128>}, {pipeline_mode = #tpu.pipeline_mode<synchronous>, transform_indices = @transform_1, window_bounds = array<i64: 1, 128>}, {pipeline_mode = #tpu.pipeline_mode<synchronous>, transform_indices = @transform_2, window_bounds = array<i64: 1, 128>}, {transform_indices = @transform_3, window_bounds = array<i64: 8, 128>}]} {
    %c0 = arith.constant 0 : index
    %c0_0 = arith.constant 0 : index
    %0 = vector.load %arg1[%c0, %c0_0] : memref<8x128xbf16, #tpu.memory_space<vmem>>, vector<8x128xbf16>
    %1 = arith.extf %0 : vector<8x128xbf16> to vector<8x128xf32>
    %c0_1 = arith.constant 0 : index
    %c0_2 = arith.constant 0 : index
    %2 = vector.load %arg2[%c0_1, %c0_2] : memref<1x128xf32, #tpu.memory_space<vmem>>, vector<1x128xf32>
    %3 = vector.broadcast %2 : vector<1x128xf32> to vector<8x128xf32>
    %4 = arith.mulf %1, %3 : vector<8x128xf32>
    %c0_3 = arith.constant 0 : index
    %c0_4 = arith.constant 0 : index
    %5 = vector.load %arg3[%c0_3, %c0_4] : memref<1x128xf32, #tpu.memory_space<vmem>>, vector<1x128xf32>
    %6 = vector.broadcast %5 : vector<1x128xf32> to vector<8x128xf32>
    %7 = arith.addf %4, %6 : vector<8x128xf32>
    %8 = arith.truncf %7 : vector<8x128xf32> to vector<8x128xbf16>
    %c0_5 = arith.constant 0 : index
    %c0_6 = arith.constant 0 : index
    %9 = vector.load %arg4[%c0_5, %c0_6] : memref<8x128xbf16, #tpu.memory_space<vmem>>, vector<8x128xbf16>
    tpu.vector_store %arg4[%c0_5, %c0_6], %8 {strides = array<i32>} : memref<8x128xbf16, #tpu.memory_space<vmem>>, vector<8x128xbf16>,
    return
  }
  func.func @transform_0(%arg0: i32) -> (i32, i32) {
    %c0_i32 = arith.constant 0 : i32
    %c0_i32_0 = arith.constant 0 : i32
    return %arg0, %c0_i32 : i32, i32
  }
  func.func @transform_1(%arg0: i32) -> (i32, i32) {
    %c0_i32 = arith.constant 0 : i32
    %c0_i32_0 = arith.constant 0 : i32
    %c0_i32_1 = arith.constant 0 : i32
    return %c0_i32, %c0_i32_0 : i32, i32
  }
  func.func @transform_2(%arg0: i32) -> (i32, i32) {
    %c0_i32 = arith.constant 0 : i32
    %c0_i32_0 = arith.constant 0 : i32
    %c0_i32_1 = arith.constant 0 : i32
    return %c0_i32, %c0_i32_0 : i32, i32
  }
  func.func @transform_3(%arg0: i32) -> (i32, i32) {
    %c0_i32 = arith.constant 0 : i32
    %c0_i32_0 = arith.constant 0 : i32
    return %arg0, %c0_i32 : i32, i32
  }
}

module attributes {stable_mosaic.version = 11 : i64} {
  func.func @_affine_kernel(%arg0: i32, %arg1: memref<8x128xbf16, #tpu.memory_space<vmem>>, %arg2: memref<1x128xf32, #tpu.memory_space<vmem>>, %arg3: memref<1x128xf32, #tpu.memory_space<vmem>>, %arg4: memref<8x128xbf16, #tpu.memory_space<vmem>>) attributes {dimension_semantics = [#tpu.dimension_semantics<parallel>], iteration_bounds = array<i64: 1>, scalar_prefetch = 0 : i64, scratch_operands = 0 : i64, tpu.core_type = #tpu.core_type<tc>, window_params = [{transform_indices = @transform_0, window_bounds = array<i64: 8, 128>}, {pipeline_mode = #tpu.pipeline_mode<synchronous>, transform_indices = @transform_1, window_bounds = array<i64: 1, 128>}, {pipeline_mode = #tpu.pipeline_mode<synchronous>, transform_indices = @transform_2, window_bounds = array<i64: 1, 128>}, {transform_indices = @transform_3, window_bounds = array<i64: 8, 128>}]} {
    %c0 = arith.constant 0 : index
    %c0_0 = arith.constant 0 : index
    %0 = vector.load %arg1[%c0, %c0_0] : memref<8x128xbf16, #tpu.memory_space<vmem>>, vector<8x128xbf16>
    %1 = arith.extf %0 : vector<8x128xbf16> to vector<8x128xf32>
    %c0_1 = arith.constant 0 : index
    %c0_2 = arith.constant 0 : index
    %2 = vector.load %arg2[%c0_1, %c0_2] : memref<1x128xf32, #tpu.memory_space<vmem>>, vector<1x128xf32>
    %3 = vector.broadcast %2 : vector<1x128xf32> to vector<8x128xf32>
    %4 = arith.mulf %1, %3 : vector<8x128xf32>
    %c0_3 = arith.constant 0 : index
    %c0_4 = arith.constant 0 : index
    %5 = vector.load %arg3[%c0_3, %c0_4] : memref<1x128xf32, #tpu.memory_space<vmem>>, vector<1x128xf32>
    %6 = vector.broadcast %5 : vector<1x128xf32> to vector<8x128xf32>
    %7 = arith.addf %4, %6 : vector<8x128xf32>
    %cst = arith.constant 0.000000e+00 : f32
    %8 = vector.broadcast %cst : f32 to vector<8x128xf32>
    %9 = arith.maximumf %7, %8 : vector<8x128xf32>
    %10 = arith.truncf %9 : vector<8x128xf32> to vector<8x128xbf16>
    %c0_5 = arith.constant 0 : index
    %c0_6 = arith.constant 0 : index
    %11 = vector.load %arg4[%c0_5, %c0_6] : memref<8x128xbf16, #tpu.memory_space<vmem>>, vector<8x128xbf16>
    tpu.vector_store %arg4[%c0_5, %c0_6], %10 {strides = array<i32>} : memref<8x128xbf16, #tpu.memory_space<vmem>>, vector<8x128xbf16>,
    return
  }
  func.func @transform_0(%arg0: i32) -> (i32, i32) {
    %c0_i32 = arith.constant 0 : i32
    %c0_i32_0 = arith.constant 0 : i32
    return %arg0, %c0_i32 : i32, i32
  }
  func.func @transform_1(%arg0: i32) -> (i32, i32) {
    %c0_i32 = arith.constant 0 : i32
    %c0_i32_0 = arith.constant 0 : i32
    %c0_i32_1 = arith.constant 0 : i32
    return %c0_i32, %c0_i32_0 : i32, i32
  }
  func.func @transform_2(%arg0: i32) -> (i32, i32) {
    %c0_i32 = arith.constant 0 : i32
    %c0_i32_0 = arith.constant 0 : i32
    %c0_i32_1 = arith.constant 0 : i32
    return %c0_i32, %c0_i32_0 : i32, i32
  }
  func.func @transform_3(%arg0: i32) -> (i32, i32) {
    %c0_i32 = arith.constant 0 : i32
    %c0_i32_0 = arith.constant 0 : i32
    return %arg0, %c0_i32 : i32, i32
  }
}

module attributes {stable_mosaic.version = 11 : i64} {
  func.func @_matmul_bn_stats_kernel(%arg0: i32, %arg1: i32, %arg2: i32, %arg3: memref<8x1152xbf16, #tpu.memory_space<vmem>>, %arg4: memref<1152x128xbf16, #tpu.memory_space<vmem>>, %arg5: memref<8x128xbf16, #tpu.memory_space<vmem>>, %arg6: memref<1x8x128xf32, #tpu.memory_space<vmem>>, %arg7: memref<8x128xf32, #tpu.memory_space<vmem>>) attributes {dimension_semantics = [#tpu.dimension_semantics<parallel>, #tpu.dimension_semantics<parallel>, #tpu.dimension_semantics<arbitrary>], iteration_bounds = array<i64: 1, 1, 1>, scalar_prefetch = 0 : i64, scratch_operands = 1 : i64, tpu.core_type = #tpu.core_type<tc>, window_params = [{transform_indices = @transform_0, window_bounds = array<i64: 8, 1152>}, {transform_indices = @transform_1, window_bounds = array<i64: 1152, 128>}, {transform_indices = @transform_2, window_bounds = array<i64: 8, 128>}, {transform_indices = @transform_3, window_bounds = array<i64: 1, 8, 128>}]} {
    %c0_i32 = arith.constant 0 : i32
    %0 = arith.cmpi eq, %arg2, %c0_i32 : i32
    %1 = arith.extui %0 : i1 to i32
    %c0_i32_0 = arith.constant 0 : i32
    %2 = arith.cmpi ne, %1, %c0_i32_0 : i32
    scf.if %2 {
      %cst_10 = arith.constant 0.000000e+00 : f32
      %12 = vector.broadcast %cst_10 : f32 to vector<8x128xf32>
      %c0_11 = arith.constant 0 : index
      %c0_12 = arith.constant 0 : index
      %13 = vector.load %arg7[%c0_11, %c0_12] : memref<8x128xf32, #tpu.memory_space<vmem>>, vector<8x128xf32>
      tpu.vector_store %arg7[%c0_11, %c0_12], %12 {strides = array<i32>} : memref<8x128xf32, #tpu.memory_space<vmem>>, vector<8x128xf32>,
    } else {
    }
    %c0 = arith.constant 0 : index
    %c0_1 = arith.constant 0 : index
    %3 = vector.load %arg7[%c0, %c0_1] : memref<8x128xf32, #tpu.memory_space<vmem>>, vector<8x128xf32>
    %c0_2 = arith.constant 0 : index
    %c0_3 = arith.constant 0 : index
    %4 = vector.load %arg3[%c0_2, %c0_3] : memref<8x1152xbf16, #tpu.memory_space<vmem>>, vector<8x1152xbf16>
    %c0_4 = arith.constant 0 : index
    %c0_5 = arith.constant 0 : index
    %5 = vector.load %arg4[%c0_4, %c0_5] : memref<1152x128xbf16, #tpu.memory_space<vmem>>, vector<1152x128xbf16>
    %cst = arith.constant dense<0.000000e+00> : vector<8x128xf32>
    %6 = tpu.matmul %4, %5, %cst {dimension_numbers = #tpu.dot_dimension_numbers<[1], [0], [0], [1], [0, 0, 1, 1], [], []>} : vector<8x1152xbf16>, vector<1152x128xbf16>, vector<8x128xf32> -> vector<8x128xf32>
    %7 = arith.addf %3, %6 : vector<8x128xf32>
    %c0_6 = arith.constant 0 : index
    %c0_7 = arith.constant 0 : index
    %8 = vector.load %arg7[%c0_6, %c0_7] : memref<8x128xf32, #tpu.memory_space<vmem>>, vector<8x128xf32>
    tpu.vector_store %arg7[%c0_6, %c0_7], %7 {strides = array<i32>} : memref<8x128xf32, #tpu.memory_space<vmem>>, vector<8x128xf32>,
    %c0_i32_8 = arith.constant 0 : i32
    %9 = arith.cmpi eq, %arg2, %c0_i32_8 : i32
    %10 = arith.extui %9 : i1 to i32
    %c0_i32_9 = arith.constant 0 : i32
    %11 = arith.cmpi ne, %10, %c0_i32_9 : i32
    scf.if %11 {
      %c0_10 = arith.constant 0 : index
      %c0_11 = arith.constant 0 : index
      %12 = vector.load %arg7[%c0_10, %c0_11] : memref<8x128xf32, #tpu.memory_space<vmem>>, vector<8x128xf32>
      %13 = arith.truncf %12 : vector<8x128xf32> to vector<8x128xbf16>
      %c0_12 = arith.constant 0 : index
      %c0_13 = arith.constant 0 : index
      %14 = vector.load %arg5[%c0_12, %c0_13] : memref<8x128xbf16, #tpu.memory_space<vmem>>, vector<8x128xbf16>
      tpu.vector_store %arg5[%c0_12, %c0_13], %13 {strides = array<i32>} : memref<8x128xbf16, #tpu.memory_space<vmem>>, vector<8x128xbf16>,
      %cst_14 = arith.constant dense<0.000000e+00> : vector<128xf32>
      %15 = vector.multi_reduction <add>, %12, %cst_14 [0] : vector<8x128xf32> to vector<128xf32>
      %16 = vector.shape_cast %15 : vector<128xf32> to vector<1x128xf32>
      %17 = arith.mulf %12, %12 : vector<8x128xf32>
      %cst_15 = arith.constant dense<0.000000e+00> : vector<128xf32>
      %18 = vector.multi_reduction <add>, %17, %cst_15 [0] : vector<8x128xf32> to vector<128xf32>
      %19 = vector.shape_cast %18 : vector<128xf32> to vector<1x128xf32>
      %cst_16 = arith.constant 0.000000e+00 : f32
      %20 = vector.broadcast %cst_16 : f32 to vector<6x128xf32>
      %21 = tpu.concatenate %16, %19, %20 in 0 : vector<1x128xf32>, vector<1x128xf32>, vector<6x128xf32> -> vector<8x128xf32>
      %22 = vector.shape_cast %21 : vector<8x128xf32> to vector<1x8x128xf32>
      %c0_17 = arith.constant 0 : index
      %c0_18 = arith.constant 0 : index
      %c0_19 = arith.constant 0 : index
      %23 = vector.load %arg6[%c0_17, %c0_18, %c0_19] : memref<1x8x128xf32, #tpu.memory_space<vmem>>, vector<1x8x128xf32>
      tpu.vector_store %arg6[%c0_17, %c0_18, %c0_19], %22 {strides = array<i32>} : memref<1x8x128xf32, #tpu.memory_space<vmem>>, vector<1x8x128xf32>,
    } else {
    }
    return
  }
  func.func @transform_0(%arg0: i32, %arg1: i32, %arg2: i32) -> (i32, i32) {
    %c0_i32 = arith.constant 0 : i32
    return %arg0, %arg2 : i32, i32
  }
  func.func @transform_1(%arg0: i32, %arg1: i32, %arg2: i32) -> (i32, i32) {
    %c0_i32 = arith.constant 0 : i32
    return %arg2, %arg1 : i32, i32
  }
  func.func @transform_2(%arg0: i32, %arg1: i32, %arg2: i32) -> (i32, i32) {
    %c0_i32 = arith.constant 0 : i32
    return %arg0, %arg1 : i32, i32
  }
  func.func @transform_3(%arg0: i32, %arg1: i32, %arg2: i32) -> (i32, i32, i32) {
    %c0_i32 = arith.constant 0 : i32
    %c0_i32_0 = arith.constant 0 : i32
    return %arg0, %c0_i32, %arg1 : i32, i32, i32
  }
}

module attributes {stable_mosaic.version = 11 : i64} {
  func.func @_affine_add_relu_kernel(%arg0: i32, %arg1: memref<8x128xbf16, #tpu.memory_space<vmem>>, %arg2: memref<1x128xf32, #tpu.memory_space<vmem>>, %arg3: memref<1x128xf32, #tpu.memory_space<vmem>>, %arg4: memref<8x128xbf16, #tpu.memory_space<vmem>>, %arg5: memref<8x128xbf16, #tpu.memory_space<vmem>>) attributes {dimension_semantics = [#tpu.dimension_semantics<parallel>], iteration_bounds = array<i64: 1>, scalar_prefetch = 0 : i64, scratch_operands = 0 : i64, tpu.core_type = #tpu.core_type<tc>, window_params = [{transform_indices = @transform_0, window_bounds = array<i64: 8, 128>}, {pipeline_mode = #tpu.pipeline_mode<synchronous>, transform_indices = @transform_1, window_bounds = array<i64: 1, 128>}, {pipeline_mode = #tpu.pipeline_mode<synchronous>, transform_indices = @transform_2, window_bounds = array<i64: 1, 128>}, {transform_indices = @transform_3, window_bounds = array<i64: 8, 128>}, {transform_indices = @transform_4, window_bounds = array<i64: 8, 128>}]} {
    %c0 = arith.constant 0 : index
    %c0_0 = arith.constant 0 : index
    %0 = vector.load %arg1[%c0, %c0_0] : memref<8x128xbf16, #tpu.memory_space<vmem>>, vector<8x128xbf16>
    %1 = arith.extf %0 : vector<8x128xbf16> to vector<8x128xf32>
    %c0_1 = arith.constant 0 : index
    %c0_2 = arith.constant 0 : index
    %2 = vector.load %arg2[%c0_1, %c0_2] : memref<1x128xf32, #tpu.memory_space<vmem>>, vector<1x128xf32>
    %3 = vector.broadcast %2 : vector<1x128xf32> to vector<8x128xf32>
    %4 = arith.mulf %1, %3 : vector<8x128xf32>
    %c0_3 = arith.constant 0 : index
    %c0_4 = arith.constant 0 : index
    %5 = vector.load %arg3[%c0_3, %c0_4] : memref<1x128xf32, #tpu.memory_space<vmem>>, vector<1x128xf32>
    %6 = vector.broadcast %5 : vector<1x128xf32> to vector<8x128xf32>
    %7 = arith.addf %4, %6 : vector<8x128xf32>
    %c0_5 = arith.constant 0 : index
    %c0_6 = arith.constant 0 : index
    %8 = vector.load %arg4[%c0_5, %c0_6] : memref<8x128xbf16, #tpu.memory_space<vmem>>, vector<8x128xbf16>
    %9 = arith.extf %8 : vector<8x128xbf16> to vector<8x128xf32>
    %10 = arith.addf %7, %9 : vector<8x128xf32>
    %cst = arith.constant 0.000000e+00 : f32
    %11 = vector.broadcast %cst : f32 to vector<8x128xf32>
    %12 = arith.maximumf %10, %11 : vector<8x128xf32>
    %13 = arith.truncf %12 : vector<8x128xf32> to vector<8x128xbf16>
    %c0_7 = arith.constant 0 : index
    %c0_8 = arith.constant 0 : index
    %14 = vector.load %arg5[%c0_7, %c0_8] : memref<8x128xbf16, #tpu.memory_space<vmem>>, vector<8x128xbf16>
    tpu.vector_store %arg5[%c0_7, %c0_8], %13 {strides = array<i32>} : memref<8x128xbf16, #tpu.memory_space<vmem>>, vector<8x128xbf16>,
    return
  }
  func.func @transform_0(%arg0: i32) -> (i32, i32) {
    %c0_i32 = arith.constant 0 : i32
    %c0_i32_0 = arith.constant 0 : i32
    return %arg0, %c0_i32 : i32, i32
  }
  func.func @transform_1(%arg0: i32) -> (i32, i32) {
    %c0_i32 = arith.constant 0 : i32
    %c0_i32_0 = arith.constant 0 : i32
    %c0_i32_1 = arith.constant 0 : i32
    return %c0_i32, %c0_i32_0 : i32, i32
  }
  func.func @transform_2(%arg0: i32) -> (i32, i32) {
    %c0_i32 = arith.constant 0 : i32
    %c0_i32_0 = arith.constant 0 : i32
    %c0_i32_1 = arith.constant 0 : i32
    return %c0_i32, %c0_i32_0 : i32, i32
  }
  func.func @transform_3(%arg0: i32) -> (i32, i32) {
    %c0_i32 = arith.constant 0 : i32
    %c0_i32_0 = arith.constant 0 : i32
    return %arg0, %c0_i32 : i32, i32
  }
  func.func @transform_4(%arg0: i32) -> (i32, i32) {
    %c0_i32 = arith.constant 0 : i32
    %c0_i32_0 = arith.constant 0 : i32
    return %arg0, %c0_i32 : i32, i32
  }
}

module attributes {stable_mosaic.version = 11 : i64} {
  func.func @_matmul_bn_stats_kernel(%arg0: i32, %arg1: i32, %arg2: i32, %arg3: memref<8x1152xbf16, #tpu.memory_space<vmem>>, %arg4: memref<1152x256xbf16, #tpu.memory_space<vmem>>, %arg5: memref<8x256xbf16, #tpu.memory_space<vmem>>, %arg6: memref<1x8x256xf32, #tpu.memory_space<vmem>>, %arg7: memref<8x256xf32, #tpu.memory_space<vmem>>) attributes {dimension_semantics = [#tpu.dimension_semantics<parallel>, #tpu.dimension_semantics<parallel>, #tpu.dimension_semantics<arbitrary>], iteration_bounds = array<i64: 1, 1, 1>, scalar_prefetch = 0 : i64, scratch_operands = 1 : i64, tpu.core_type = #tpu.core_type<tc>, window_params = [{transform_indices = @transform_0, window_bounds = array<i64: 8, 1152>}, {transform_indices = @transform_1, window_bounds = array<i64: 1152, 256>}, {transform_indices = @transform_2, window_bounds = array<i64: 8, 256>}, {transform_indices = @transform_3, window_bounds = array<i64: 1, 8, 256>}]} {
    %c0_i32 = arith.constant 0 : i32
    %0 = arith.cmpi eq, %arg2, %c0_i32 : i32
    %1 = arith.extui %0 : i1 to i32
    %c0_i32_0 = arith.constant 0 : i32
    %2 = arith.cmpi ne, %1, %c0_i32_0 : i32
    scf.if %2 {
      %cst_10 = arith.constant 0.000000e+00 : f32
      %12 = vector.broadcast %cst_10 : f32 to vector<8x256xf32>
      %c0_11 = arith.constant 0 : index
      %c0_12 = arith.constant 0 : index
      %13 = vector.load %arg7[%c0_11, %c0_12] : memref<8x256xf32, #tpu.memory_space<vmem>>, vector<8x256xf32>
      tpu.vector_store %arg7[%c0_11, %c0_12], %12 {strides = array<i32>} : memref<8x256xf32, #tpu.memory_space<vmem>>, vector<8x256xf32>,
    } else {
    }
    %c0 = arith.constant 0 : index
    %c0_1 = arith.constant 0 : index
    %3 = vector.load %arg7[%c0, %c0_1] : memref<8x256xf32, #tpu.memory_space<vmem>>, vector<8x256xf32>
    %c0_2 = arith.constant 0 : index
    %c0_3 = arith.constant 0 : index
    %4 = vector.load %arg3[%c0_2, %c0_3] : memref<8x1152xbf16, #tpu.memory_space<vmem>>, vector<8x1152xbf16>
    %c0_4 = arith.constant 0 : index
    %c0_5 = arith.constant 0 : index
    %5 = vector.load %arg4[%c0_4, %c0_5] : memref<1152x256xbf16, #tpu.memory_space<vmem>>, vector<1152x256xbf16>
    %cst = arith.constant dense<0.000000e+00> : vector<8x256xf32>
    %6 = tpu.matmul %4, %5, %cst {dimension_numbers = #tpu.dot_dimension_numbers<[1], [0], [0], [1], [0, 0, 1, 1], [], []>} : vector<8x1152xbf16>, vector<1152x256xbf16>, vector<8x256xf32> -> vector<8x256xf32>
    %7 = arith.addf %3, %6 : vector<8x256xf32>
    %c0_6 = arith.constant 0 : index
    %c0_7 = arith.constant 0 : index
    %8 = vector.load %arg7[%c0_6, %c0_7] : memref<8x256xf32, #tpu.memory_space<vmem>>, vector<8x256xf32>
    tpu.vector_store %arg7[%c0_6, %c0_7], %7 {strides = array<i32>} : memref<8x256xf32, #tpu.memory_space<vmem>>, vector<8x256xf32>,
    %c0_i32_8 = arith.constant 0 : i32
    %9 = arith.cmpi eq, %arg2, %c0_i32_8 : i32
    %10 = arith.extui %9 : i1 to i32
    %c0_i32_9 = arith.constant 0 : i32
    %11 = arith.cmpi ne, %10, %c0_i32_9 : i32
    scf.if %11 {
      %c0_10 = arith.constant 0 : index
      %c0_11 = arith.constant 0 : index
      %12 = vector.load %arg7[%c0_10, %c0_11] : memref<8x256xf32, #tpu.memory_space<vmem>>, vector<8x256xf32>
      %13 = arith.truncf %12 : vector<8x256xf32> to vector<8x256xbf16>
      %c0_12 = arith.constant 0 : index
      %c0_13 = arith.constant 0 : index
      %14 = vector.load %arg5[%c0_12, %c0_13] : memref<8x256xbf16, #tpu.memory_space<vmem>>, vector<8x256xbf16>
      tpu.vector_store %arg5[%c0_12, %c0_13], %13 {strides = array<i32>} : memref<8x256xbf16, #tpu.memory_space<vmem>>, vector<8x256xbf16>,
      %cst_14 = arith.constant dense<0.000000e+00> : vector<256xf32>
      %15 = vector.multi_reduction <add>, %12, %cst_14 [0] : vector<8x256xf32> to vector<256xf32>
      %16 = vector.shape_cast %15 : vector<256xf32> to vector<1x256xf32>
      %17 = arith.mulf %12, %12 : vector<8x256xf32>
      %cst_15 = arith.constant dense<0.000000e+00> : vector<256xf32>
      %18 = vector.multi_reduction <add>, %17, %cst_15 [0] : vector<8x256xf32> to vector<256xf32>
      %19 = vector.shape_cast %18 : vector<256xf32> to vector<1x256xf32>
      %cst_16 = arith.constant 0.000000e+00 : f32
      %20 = vector.broadcast %cst_16 : f32 to vector<6x256xf32>
      %21 = tpu.concatenate %16, %19, %20 in 0 : vector<1x256xf32>, vector<1x256xf32>, vector<6x256xf32> -> vector<8x256xf32>
      %22 = vector.shape_cast %21 : vector<8x256xf32> to vector<1x8x256xf32>
      %c0_17 = arith.constant 0 : index
      %c0_18 = arith.constant 0 : index
      %c0_19 = arith.constant 0 : index
      %23 = vector.load %arg6[%c0_17, %c0_18, %c0_19] : memref<1x8x256xf32, #tpu.memory_space<vmem>>, vector<1x8x256xf32>
      tpu.vector_store %arg6[%c0_17, %c0_18, %c0_19], %22 {strides = array<i32>} : memref<1x8x256xf32, #tpu.memory_space<vmem>>, vector<1x8x256xf32>,
    } else {
    }
    return
  }
  func.func @transform_0(%arg0: i32, %arg1: i32, %arg2: i32) -> (i32, i32) {
    %c0_i32 = arith.constant 0 : i32
    return %arg0, %arg2 : i32, i32
  }
  func.func @transform_1(%arg0: i32, %arg1: i32, %arg2: i32) -> (i32, i32) {
    %c0_i32 = arith.constant 0 : i32
    return %arg2, %arg1 : i32, i32
  }
  func.func @transform_2(%arg0: i32, %arg1: i32, %arg2: i32) -> (i32, i32) {
    %c0_i32 = arith.constant 0 : i32
    return %arg0, %arg1 : i32, i32
  }
  func.func @transform_3(%arg0: i32, %arg1: i32, %arg2: i32) -> (i32, i32, i32) {
    %c0_i32 = arith.constant 0 : i32
    %c0_i32_0 = arith.constant 0 : i32
    return %arg0, %c0_i32, %arg1 : i32, i32, i32
  }
}

module attributes {stable_mosaic.version = 11 : i64} {
  func.func @_affine_kernel(%arg0: i32, %arg1: memref<8x256xbf16, #tpu.memory_space<vmem>>, %arg2: memref<1x256xf32, #tpu.memory_space<vmem>>, %arg3: memref<1x256xf32, #tpu.memory_space<vmem>>, %arg4: memref<8x256xbf16, #tpu.memory_space<vmem>>) attributes {dimension_semantics = [#tpu.dimension_semantics<parallel>], iteration_bounds = array<i64: 1>, scalar_prefetch = 0 : i64, scratch_operands = 0 : i64, tpu.core_type = #tpu.core_type<tc>, window_params = [{transform_indices = @transform_0, window_bounds = array<i64: 8, 256>}, {pipeline_mode = #tpu.pipeline_mode<synchronous>, transform_indices = @transform_1, window_bounds = array<i64: 1, 256>}, {pipeline_mode = #tpu.pipeline_mode<synchronous>, transform_indices = @transform_2, window_bounds = array<i64: 1, 256>}, {transform_indices = @transform_3, window_bounds = array<i64: 8, 256>}]} {
    %c0 = arith.constant 0 : index
    %c0_0 = arith.constant 0 : index
    %0 = vector.load %arg1[%c0, %c0_0] : memref<8x256xbf16, #tpu.memory_space<vmem>>, vector<8x256xbf16>
    %1 = arith.extf %0 : vector<8x256xbf16> to vector<8x256xf32>
    %c0_1 = arith.constant 0 : index
    %c0_2 = arith.constant 0 : index
    %2 = vector.load %arg2[%c0_1, %c0_2] : memref<1x256xf32, #tpu.memory_space<vmem>>, vector<1x256xf32>
    %3 = vector.broadcast %2 : vector<1x256xf32> to vector<8x256xf32>
    %4 = arith.mulf %1, %3 : vector<8x256xf32>
    %c0_3 = arith.constant 0 : index
    %c0_4 = arith.constant 0 : index
    %5 = vector.load %arg3[%c0_3, %c0_4] : memref<1x256xf32, #tpu.memory_space<vmem>>, vector<1x256xf32>
    %6 = vector.broadcast %5 : vector<1x256xf32> to vector<8x256xf32>
    %7 = arith.addf %4, %6 : vector<8x256xf32>
    %cst = arith.constant 0.000000e+00 : f32
    %8 = vector.broadcast %cst : f32 to vector<8x256xf32>
    %9 = arith.maximumf %7, %8 : vector<8x256xf32>
    %10 = arith.truncf %9 : vector<8x256xf32> to vector<8x256xbf16>
    %c0_5 = arith.constant 0 : index
    %c0_6 = arith.constant 0 : index
    %11 = vector.load %arg4[%c0_5, %c0_6] : memref<8x256xbf16, #tpu.memory_space<vmem>>, vector<8x256xbf16>
    tpu.vector_store %arg4[%c0_5, %c0_6], %10 {strides = array<i32>} : memref<8x256xbf16, #tpu.memory_space<vmem>>, vector<8x256xbf16>,
    return
  }
  func.func @transform_0(%arg0: i32) -> (i32, i32) {
    %c0_i32 = arith.constant 0 : i32
    %c0_i32_0 = arith.constant 0 : i32
    return %arg0, %c0_i32 : i32, i32
  }
  func.func @transform_1(%arg0: i32) -> (i32, i32) {
    %c0_i32 = arith.constant 0 : i32
    %c0_i32_0 = arith.constant 0 : i32
    %c0_i32_1 = arith.constant 0 : i32
    return %c0_i32, %c0_i32_0 : i32, i32
  }
  func.func @transform_2(%arg0: i32) -> (i32, i32) {
    %c0_i32 = arith.constant 0 : i32
    %c0_i32_0 = arith.constant 0 : i32
    %c0_i32_1 = arith.constant 0 : i32
    return %c0_i32, %c0_i32_0 : i32, i32
  }
  func.func @transform_3(%arg0: i32) -> (i32, i32) {
    %c0_i32 = arith.constant 0 : i32
    %c0_i32_0 = arith.constant 0 : i32
    return %arg0, %c0_i32 : i32, i32
  }
}

module attributes {stable_mosaic.version = 11 : i64} {
  func.func @_affine_kernel(%arg0: i32, %arg1: memref<8x256xbf16, #tpu.memory_space<vmem>>, %arg2: memref<1x256xf32, #tpu.memory_space<vmem>>, %arg3: memref<1x256xf32, #tpu.memory_space<vmem>>, %arg4: memref<8x256xbf16, #tpu.memory_space<vmem>>) attributes {dimension_semantics = [#tpu.dimension_semantics<parallel>], iteration_bounds = array<i64: 1>, scalar_prefetch = 0 : i64, scratch_operands = 0 : i64, tpu.core_type = #tpu.core_type<tc>, window_params = [{transform_indices = @transform_0, window_bounds = array<i64: 8, 256>}, {pipeline_mode = #tpu.pipeline_mode<synchronous>, transform_indices = @transform_1, window_bounds = array<i64: 1, 256>}, {pipeline_mode = #tpu.pipeline_mode<synchronous>, transform_indices = @transform_2, window_bounds = array<i64: 1, 256>}, {transform_indices = @transform_3, window_bounds = array<i64: 8, 256>}]} {
    %c0 = arith.constant 0 : index
    %c0_0 = arith.constant 0 : index
    %0 = vector.load %arg1[%c0, %c0_0] : memref<8x256xbf16, #tpu.memory_space<vmem>>, vector<8x256xbf16>
    %1 = arith.extf %0 : vector<8x256xbf16> to vector<8x256xf32>
    %c0_1 = arith.constant 0 : index
    %c0_2 = arith.constant 0 : index
    %2 = vector.load %arg2[%c0_1, %c0_2] : memref<1x256xf32, #tpu.memory_space<vmem>>, vector<1x256xf32>
    %3 = vector.broadcast %2 : vector<1x256xf32> to vector<8x256xf32>
    %4 = arith.mulf %1, %3 : vector<8x256xf32>
    %c0_3 = arith.constant 0 : index
    %c0_4 = arith.constant 0 : index
    %5 = vector.load %arg3[%c0_3, %c0_4] : memref<1x256xf32, #tpu.memory_space<vmem>>, vector<1x256xf32>
    %6 = vector.broadcast %5 : vector<1x256xf32> to vector<8x256xf32>
    %7 = arith.addf %4, %6 : vector<8x256xf32>
    %8 = arith.truncf %7 : vector<8x256xf32> to vector<8x256xbf16>
    %c0_5 = arith.constant 0 : index
    %c0_6 = arith.constant 0 : index
    %9 = vector.load %arg4[%c0_5, %c0_6] : memref<8x256xbf16, #tpu.memory_space<vmem>>, vector<8x256xbf16>
    tpu.vector_store %arg4[%c0_5, %c0_6], %8 {strides = array<i32>} : memref<8x256xbf16, #tpu.memory_space<vmem>>, vector<8x256xbf16>,
    return
  }
  func.func @transform_0(%arg0: i32) -> (i32, i32) {
    %c0_i32 = arith.constant 0 : i32
    %c0_i32_0 = arith.constant 0 : i32
    return %arg0, %c0_i32 : i32, i32
  }
  func.func @transform_1(%arg0: i32) -> (i32, i32) {
    %c0_i32 = arith.constant 0 : i32
    %c0_i32_0 = arith.constant 0 : i32
    %c0_i32_1 = arith.constant 0 : i32
    return %c0_i32, %c0_i32_0 : i32, i32
  }
  func.func @transform_2(%arg0: i32) -> (i32, i32) {
    %c0_i32 = arith.constant 0 : i32
    %c0_i32_0 = arith.constant 0 : i32
    %c0_i32_1 = arith.constant 0 : i32
    return %c0_i32, %c0_i32_0 : i32, i32
  }
  func.func @transform_3(%arg0: i32) -> (i32, i32) {
    %c0_i32 = arith.constant 0 : i32
    %c0_i32_0 = arith.constant 0 : i32
    return %arg0, %c0_i32 : i32, i32
  }
}

module attributes {stable_mosaic.version = 11 : i64} {
  func.func @_matmul_bn_stats_kernel(%arg0: i32, %arg1: i32, %arg2: i32, %arg3: memref<8x512xbf16, #tpu.memory_space<vmem>>, %arg4: memref<512x256xbf16, #tpu.memory_space<vmem>>, %arg5: memref<8x256xbf16, #tpu.memory_space<vmem>>, %arg6: memref<1x8x256xf32, #tpu.memory_space<vmem>>, %arg7: memref<8x256xf32, #tpu.memory_space<vmem>>) attributes {dimension_semantics = [#tpu.dimension_semantics<parallel>, #tpu.dimension_semantics<parallel>, #tpu.dimension_semantics<arbitrary>], iteration_bounds = array<i64: 1, 1, 5>, scalar_prefetch = 0 : i64, scratch_operands = 1 : i64, tpu.core_type = #tpu.core_type<tc>, window_params = [{transform_indices = @transform_0, window_bounds = array<i64: 8, 512>}, {transform_indices = @transform_1, window_bounds = array<i64: 512, 256>}, {transform_indices = @transform_2, window_bounds = array<i64: 8, 256>}, {transform_indices = @transform_3, window_bounds = array<i64: 1, 8, 256>}]} {
    %c0_i32 = arith.constant 0 : i32
    %0 = arith.cmpi eq, %arg2, %c0_i32 : i32
    %1 = arith.extui %0 : i1 to i32
    %c0_i32_0 = arith.constant 0 : i32
    %2 = arith.cmpi ne, %1, %c0_i32_0 : i32
    scf.if %2 {
      %cst_9 = arith.constant 0.000000e+00 : f32
      %12 = vector.broadcast %cst_9 : f32 to vector<8x256xf32>
      %c0_10 = arith.constant 0 : index
      %c0_11 = arith.constant 0 : index
      %13 = vector.load %arg7[%c0_10, %c0_11] : memref<8x256xf32, #tpu.memory_space<vmem>>, vector<8x256xf32>
      tpu.vector_store %arg7[%c0_10, %c0_11], %12 {strides = array<i32>} : memref<8x256xf32, #tpu.memory_space<vmem>>, vector<8x256xf32>,
    } else {
    }
    %c0 = arith.constant 0 : index
    %c0_1 = arith.constant 0 : index
    %3 = vector.load %arg7[%c0, %c0_1] : memref<8x256xf32, #tpu.memory_space<vmem>>, vector<8x256xf32>
    %c0_2 = arith.constant 0 : index
    %c0_3 = arith.constant 0 : index
    %4 = vector.load %arg3[%c0_2, %c0_3] : memref<8x512xbf16, #tpu.memory_space<vmem>>, vector<8x512xbf16>
    %c0_4 = arith.constant 0 : index
    %c0_5 = arith.constant 0 : index
    %5 = vector.load %arg4[%c0_4, %c0_5] : memref<512x256xbf16, #tpu.memory_space<vmem>>, vector<512x256xbf16>
    %cst = arith.constant dense<0.000000e+00> : vector<8x256xf32>
    %6 = tpu.matmul %4, %5, %cst {dimension_numbers = #tpu.dot_dimension_numbers<[1], [0], [0], [1], [0, 0, 1, 1], [], []>} : vector<8x512xbf16>, vector<512x256xbf16>, vector<8x256xf32> -> vector<8x256xf32>
    %7 = arith.addf %3, %6 : vector<8x256xf32>
    %c0_6 = arith.constant 0 : index
    %c0_7 = arith.constant 0 : index
    %8 = vector.load %arg7[%c0_6, %c0_7] : memref<8x256xf32, #tpu.memory_space<vmem>>, vector<8x256xf32>
    tpu.vector_store %arg7[%c0_6, %c0_7], %7 {strides = array<i32>} : memref<8x256xf32, #tpu.memory_space<vmem>>, vector<8x256xf32>,
    %c4_i32 = arith.constant 4 : i32
    %9 = arith.cmpi eq, %arg2, %c4_i32 : i32
    %10 = arith.extui %9 : i1 to i32
    %c0_i32_8 = arith.constant 0 : i32
    %11 = arith.cmpi ne, %10, %c0_i32_8 : i32
    scf.if %11 {
      %c0_9 = arith.constant 0 : index
      %c0_10 = arith.constant 0 : index
      %12 = vector.load %arg7[%c0_9, %c0_10] : memref<8x256xf32, #tpu.memory_space<vmem>>, vector<8x256xf32>
      %13 = arith.truncf %12 : vector<8x256xf32> to vector<8x256xbf16>
      %c0_11 = arith.constant 0 : index
      %c0_12 = arith.constant 0 : index
      %14 = vector.load %arg5[%c0_11, %c0_12] : memref<8x256xbf16, #tpu.memory_space<vmem>>, vector<8x256xbf16>
      tpu.vector_store %arg5[%c0_11, %c0_12], %13 {strides = array<i32>} : memref<8x256xbf16, #tpu.memory_space<vmem>>, vector<8x256xbf16>,
      %cst_13 = arith.constant dense<0.000000e+00> : vector<256xf32>
      %15 = vector.multi_reduction <add>, %12, %cst_13 [0] : vector<8x256xf32> to vector<256xf32>
      %16 = vector.shape_cast %15 : vector<256xf32> to vector<1x256xf32>
      %17 = arith.mulf %12, %12 : vector<8x256xf32>
      %cst_14 = arith.constant dense<0.000000e+00> : vector<256xf32>
      %18 = vector.multi_reduction <add>, %17, %cst_14 [0] : vector<8x256xf32> to vector<256xf32>
      %19 = vector.shape_cast %18 : vector<256xf32> to vector<1x256xf32>
      %cst_15 = arith.constant 0.000000e+00 : f32
      %20 = vector.broadcast %cst_15 : f32 to vector<6x256xf32>
      %21 = tpu.concatenate %16, %19, %20 in 0 : vector<1x256xf32>, vector<1x256xf32>, vector<6x256xf32> -> vector<8x256xf32>
      %22 = vector.shape_cast %21 : vector<8x256xf32> to vector<1x8x256xf32>
      %c0_16 = arith.constant 0 : index
      %c0_17 = arith.constant 0 : index
      %c0_18 = arith.constant 0 : index
      %23 = vector.load %arg6[%c0_16, %c0_17, %c0_18] : memref<1x8x256xf32, #tpu.memory_space<vmem>>, vector<1x8x256xf32>
      tpu.vector_store %arg6[%c0_16, %c0_17, %c0_18], %22 {strides = array<i32>} : memref<1x8x256xf32, #tpu.memory_space<vmem>>, vector<1x8x256xf32>,
    } else {
    }
    return
  }
  func.func @transform_0(%arg0: i32, %arg1: i32, %arg2: i32) -> (i32, i32) {
    %c0_i32 = arith.constant 0 : i32
    return %arg0, %arg2 : i32, i32
  }
  func.func @transform_1(%arg0: i32, %arg1: i32, %arg2: i32) -> (i32, i32) {
    %c0_i32 = arith.constant 0 : i32
    return %arg2, %arg1 : i32, i32
  }
  func.func @transform_2(%arg0: i32, %arg1: i32, %arg2: i32) -> (i32, i32) {
    %c0_i32 = arith.constant 0 : i32
    return %arg0, %arg1 : i32, i32
  }
  func.func @transform_3(%arg0: i32, %arg1: i32, %arg2: i32) -> (i32, i32, i32) {
    %c0_i32 = arith.constant 0 : i32
    %c0_i32_0 = arith.constant 0 : i32
    return %arg0, %c0_i32, %arg1 : i32, i32, i32
  }
}

module attributes {stable_mosaic.version = 11 : i64} {
  func.func @_affine_add_relu_kernel(%arg0: i32, %arg1: memref<8x256xbf16, #tpu.memory_space<vmem>>, %arg2: memref<1x256xf32, #tpu.memory_space<vmem>>, %arg3: memref<1x256xf32, #tpu.memory_space<vmem>>, %arg4: memref<8x256xbf16, #tpu.memory_space<vmem>>, %arg5: memref<8x256xbf16, #tpu.memory_space<vmem>>) attributes {dimension_semantics = [#tpu.dimension_semantics<parallel>], iteration_bounds = array<i64: 1>, scalar_prefetch = 0 : i64, scratch_operands = 0 : i64, tpu.core_type = #tpu.core_type<tc>, window_params = [{transform_indices = @transform_0, window_bounds = array<i64: 8, 256>}, {pipeline_mode = #tpu.pipeline_mode<synchronous>, transform_indices = @transform_1, window_bounds = array<i64: 1, 256>}, {pipeline_mode = #tpu.pipeline_mode<synchronous>, transform_indices = @transform_2, window_bounds = array<i64: 1, 256>}, {transform_indices = @transform_3, window_bounds = array<i64: 8, 256>}, {transform_indices = @transform_4, window_bounds = array<i64: 8, 256>}]} {
    %c0 = arith.constant 0 : index
    %c0_0 = arith.constant 0 : index
    %0 = vector.load %arg1[%c0, %c0_0] : memref<8x256xbf16, #tpu.memory_space<vmem>>, vector<8x256xbf16>
    %1 = arith.extf %0 : vector<8x256xbf16> to vector<8x256xf32>
    %c0_1 = arith.constant 0 : index
    %c0_2 = arith.constant 0 : index
    %2 = vector.load %arg2[%c0_1, %c0_2] : memref<1x256xf32, #tpu.memory_space<vmem>>, vector<1x256xf32>
    %3 = vector.broadcast %2 : vector<1x256xf32> to vector<8x256xf32>
    %4 = arith.mulf %1, %3 : vector<8x256xf32>
    %c0_3 = arith.constant 0 : index
    %c0_4 = arith.constant 0 : index
    %5 = vector.load %arg3[%c0_3, %c0_4] : memref<1x256xf32, #tpu.memory_space<vmem>>, vector<1x256xf32>
    %6 = vector.broadcast %5 : vector<1x256xf32> to vector<8x256xf32>
    %7 = arith.addf %4, %6 : vector<8x256xf32>
    %c0_5 = arith.constant 0 : index
    %c0_6 = arith.constant 0 : index
    %8 = vector.load %arg4[%c0_5, %c0_6] : memref<8x256xbf16, #tpu.memory_space<vmem>>, vector<8x256xbf16>
    %9 = arith.extf %8 : vector<8x256xbf16> to vector<8x256xf32>
    %10 = arith.addf %7, %9 : vector<8x256xf32>
    %cst = arith.constant 0.000000e+00 : f32
    %11 = vector.broadcast %cst : f32 to vector<8x256xf32>
    %12 = arith.maximumf %10, %11 : vector<8x256xf32>
    %13 = arith.truncf %12 : vector<8x256xf32> to vector<8x256xbf16>
    %c0_7 = arith.constant 0 : index
    %c0_8 = arith.constant 0 : index
    %14 = vector.load %arg5[%c0_7, %c0_8] : memref<8x256xbf16, #tpu.memory_space<vmem>>, vector<8x256xbf16>
    tpu.vector_store %arg5[%c0_7, %c0_8], %13 {strides = array<i32>} : memref<8x256xbf16, #tpu.memory_space<vmem>>, vector<8x256xbf16>,
    return
  }
  func.func @transform_0(%arg0: i32) -> (i32, i32) {
    %c0_i32 = arith.constant 0 : i32
    %c0_i32_0 = arith.constant 0 : i32
    return %arg0, %c0_i32 : i32, i32
  }
  func.func @transform_1(%arg0: i32) -> (i32, i32) {
    %c0_i32 = arith.constant 0 : i32
    %c0_i32_0 = arith.constant 0 : i32
    %c0_i32_1 = arith.constant 0 : i32
    return %c0_i32, %c0_i32_0 : i32, i32
  }
  func.func @transform_2(%arg0: i32) -> (i32, i32) {
    %c0_i32 = arith.constant 0 : i32
    %c0_i32_0 = arith.constant 0 : i32
    %c0_i32_1 = arith.constant 0 : i32
    return %c0_i32, %c0_i32_0 : i32, i32
  }
  func.func @transform_3(%arg0: i32) -> (i32, i32) {
    %c0_i32 = arith.constant 0 : i32
    %c0_i32_0 = arith.constant 0 : i32
    return %arg0, %c0_i32 : i32, i32
  }
  func.func @transform_4(%arg0: i32) -> (i32, i32) {
    %c0_i32 = arith.constant 0 : i32
    %c0_i32_0 = arith.constant 0 : i32
    return %arg0, %c0_i32 : i32, i32
  }
}

module attributes {stable_mosaic.version = 11 : i64} {
  func.func @_matmul_bn_stats_kernel(%arg0: i32, %arg1: i32, %arg2: i32, %arg3: memref<8x512xbf16, #tpu.memory_space<vmem>>, %arg4: memref<512x256xbf16, #tpu.memory_space<vmem>>, %arg5: memref<8x256xbf16, #tpu.memory_space<vmem>>, %arg6: memref<1x8x256xf32, #tpu.memory_space<vmem>>, %arg7: memref<8x256xf32, #tpu.memory_space<vmem>>) attributes {dimension_semantics = [#tpu.dimension_semantics<parallel>, #tpu.dimension_semantics<parallel>, #tpu.dimension_semantics<arbitrary>], iteration_bounds = array<i64: 1, 2, 5>, scalar_prefetch = 0 : i64, scratch_operands = 1 : i64, tpu.core_type = #tpu.core_type<tc>, window_params = [{transform_indices = @transform_0, window_bounds = array<i64: 8, 512>}, {transform_indices = @transform_1, window_bounds = array<i64: 512, 256>}, {transform_indices = @transform_2, window_bounds = array<i64: 8, 256>}, {transform_indices = @transform_3, window_bounds = array<i64: 1, 8, 256>}]} {
    %c0_i32 = arith.constant 0 : i32
    %0 = arith.cmpi eq, %arg2, %c0_i32 : i32
    %1 = arith.extui %0 : i1 to i32
    %c0_i32_0 = arith.constant 0 : i32
    %2 = arith.cmpi ne, %1, %c0_i32_0 : i32
    scf.if %2 {
      %cst_9 = arith.constant 0.000000e+00 : f32
      %12 = vector.broadcast %cst_9 : f32 to vector<8x256xf32>
      %c0_10 = arith.constant 0 : index
      %c0_11 = arith.constant 0 : index
      %13 = vector.load %arg7[%c0_10, %c0_11] : memref<8x256xf32, #tpu.memory_space<vmem>>, vector<8x256xf32>
      tpu.vector_store %arg7[%c0_10, %c0_11], %12 {strides = array<i32>} : memref<8x256xf32, #tpu.memory_space<vmem>>, vector<8x256xf32>,
    } else {
    }
    %c0 = arith.constant 0 : index
    %c0_1 = arith.constant 0 : index
    %3 = vector.load %arg7[%c0, %c0_1] : memref<8x256xf32, #tpu.memory_space<vmem>>, vector<8x256xf32>
    %c0_2 = arith.constant 0 : index
    %c0_3 = arith.constant 0 : index
    %4 = vector.load %arg3[%c0_2, %c0_3] : memref<8x512xbf16, #tpu.memory_space<vmem>>, vector<8x512xbf16>
    %c0_4 = arith.constant 0 : index
    %c0_5 = arith.constant 0 : index
    %5 = vector.load %arg4[%c0_4, %c0_5] : memref<512x256xbf16, #tpu.memory_space<vmem>>, vector<512x256xbf16>
    %cst = arith.constant dense<0.000000e+00> : vector<8x256xf32>
    %6 = tpu.matmul %4, %5, %cst {dimension_numbers = #tpu.dot_dimension_numbers<[1], [0], [0], [1], [0, 0, 1, 1], [], []>} : vector<8x512xbf16>, vector<512x256xbf16>, vector<8x256xf32> -> vector<8x256xf32>
    %7 = arith.addf %3, %6 : vector<8x256xf32>
    %c0_6 = arith.constant 0 : index
    %c0_7 = arith.constant 0 : index
    %8 = vector.load %arg7[%c0_6, %c0_7] : memref<8x256xf32, #tpu.memory_space<vmem>>, vector<8x256xf32>
    tpu.vector_store %arg7[%c0_6, %c0_7], %7 {strides = array<i32>} : memref<8x256xf32, #tpu.memory_space<vmem>>, vector<8x256xf32>,
    %c4_i32 = arith.constant 4 : i32
    %9 = arith.cmpi eq, %arg2, %c4_i32 : i32
    %10 = arith.extui %9 : i1 to i32
    %c0_i32_8 = arith.constant 0 : i32
    %11 = arith.cmpi ne, %10, %c0_i32_8 : i32
    scf.if %11 {
      %c0_9 = arith.constant 0 : index
      %c0_10 = arith.constant 0 : index
      %12 = vector.load %arg7[%c0_9, %c0_10] : memref<8x256xf32, #tpu.memory_space<vmem>>, vector<8x256xf32>
      %13 = arith.truncf %12 : vector<8x256xf32> to vector<8x256xbf16>
      %c0_11 = arith.constant 0 : index
      %c0_12 = arith.constant 0 : index
      %14 = vector.load %arg5[%c0_11, %c0_12] : memref<8x256xbf16, #tpu.memory_space<vmem>>, vector<8x256xbf16>
      tpu.vector_store %arg5[%c0_11, %c0_12], %13 {strides = array<i32>} : memref<8x256xbf16, #tpu.memory_space<vmem>>, vector<8x256xbf16>,
      %cst_13 = arith.constant dense<0.000000e+00> : vector<256xf32>
      %15 = vector.multi_reduction <add>, %12, %cst_13 [0] : vector<8x256xf32> to vector<256xf32>
      %16 = vector.shape_cast %15 : vector<256xf32> to vector<1x256xf32>
      %17 = arith.mulf %12, %12 : vector<8x256xf32>
      %cst_14 = arith.constant dense<0.000000e+00> : vector<256xf32>
      %18 = vector.multi_reduction <add>, %17, %cst_14 [0] : vector<8x256xf32> to vector<256xf32>
      %19 = vector.shape_cast %18 : vector<256xf32> to vector<1x256xf32>
      %cst_15 = arith.constant 0.000000e+00 : f32
      %20 = vector.broadcast %cst_15 : f32 to vector<6x256xf32>
      %21 = tpu.concatenate %16, %19, %20 in 0 : vector<1x256xf32>, vector<1x256xf32>, vector<6x256xf32> -> vector<8x256xf32>
      %22 = vector.shape_cast %21 : vector<8x256xf32> to vector<1x8x256xf32>
      %c0_16 = arith.constant 0 : index
      %c0_17 = arith.constant 0 : index
      %c0_18 = arith.constant 0 : index
      %23 = vector.load %arg6[%c0_16, %c0_17, %c0_18] : memref<1x8x256xf32, #tpu.memory_space<vmem>>, vector<1x8x256xf32>
      tpu.vector_store %arg6[%c0_16, %c0_17, %c0_18], %22 {strides = array<i32>} : memref<1x8x256xf32, #tpu.memory_space<vmem>>, vector<1x8x256xf32>,
    } else {
    }
    return
  }
  func.func @transform_0(%arg0: i32, %arg1: i32, %arg2: i32) -> (i32, i32) {
    %c0_i32 = arith.constant 0 : i32
    return %arg0, %arg2 : i32, i32
  }
  func.func @transform_1(%arg0: i32, %arg1: i32, %arg2: i32) -> (i32, i32) {
    %c0_i32 = arith.constant 0 : i32
    return %arg2, %arg1 : i32, i32
  }
  func.func @transform_2(%arg0: i32, %arg1: i32, %arg2: i32) -> (i32, i32) {
    %c0_i32 = arith.constant 0 : i32
    return %arg0, %arg1 : i32, i32
  }
  func.func @transform_3(%arg0: i32, %arg1: i32, %arg2: i32) -> (i32, i32, i32) {
    %c0_i32 = arith.constant 0 : i32
    %c0_i32_0 = arith.constant 0 : i32
    return %arg0, %c0_i32, %arg1 : i32, i32, i32
  }
}

module attributes {stable_mosaic.version = 11 : i64} {
  func.func @_affine_kernel(%arg0: i32, %arg1: memref<8x512xbf16, #tpu.memory_space<vmem>>, %arg2: memref<1x512xf32, #tpu.memory_space<vmem>>, %arg3: memref<1x512xf32, #tpu.memory_space<vmem>>, %arg4: memref<8x512xbf16, #tpu.memory_space<vmem>>) attributes {dimension_semantics = [#tpu.dimension_semantics<parallel>], iteration_bounds = array<i64: 1>, scalar_prefetch = 0 : i64, scratch_operands = 0 : i64, tpu.core_type = #tpu.core_type<tc>, window_params = [{transform_indices = @transform_0, window_bounds = array<i64: 8, 512>}, {pipeline_mode = #tpu.pipeline_mode<synchronous>, transform_indices = @transform_1, window_bounds = array<i64: 1, 512>}, {pipeline_mode = #tpu.pipeline_mode<synchronous>, transform_indices = @transform_2, window_bounds = array<i64: 1, 512>}, {transform_indices = @transform_3, window_bounds = array<i64: 8, 512>}]} {
    %c0 = arith.constant 0 : index
    %c0_0 = arith.constant 0 : index
    %0 = vector.load %arg1[%c0, %c0_0] : memref<8x512xbf16, #tpu.memory_space<vmem>>, vector<8x512xbf16>
    %1 = arith.extf %0 : vector<8x512xbf16> to vector<8x512xf32>
    %c0_1 = arith.constant 0 : index
    %c0_2 = arith.constant 0 : index
    %2 = vector.load %arg2[%c0_1, %c0_2] : memref<1x512xf32, #tpu.memory_space<vmem>>, vector<1x512xf32>
    %3 = vector.broadcast %2 : vector<1x512xf32> to vector<8x512xf32>
    %4 = arith.mulf %1, %3 : vector<8x512xf32>
    %c0_3 = arith.constant 0 : index
    %c0_4 = arith.constant 0 : index
    %5 = vector.load %arg3[%c0_3, %c0_4] : memref<1x512xf32, #tpu.memory_space<vmem>>, vector<1x512xf32>
    %6 = vector.broadcast %5 : vector<1x512xf32> to vector<8x512xf32>
    %7 = arith.addf %4, %6 : vector<8x512xf32>
    %cst = arith.constant 0.000000e+00 : f32
    %8 = vector.broadcast %cst : f32 to vector<8x512xf32>
    %9 = arith.maximumf %7, %8 : vector<8x512xf32>
    %10 = arith.truncf %9 : vector<8x512xf32> to vector<8x512xbf16>
    %c0_5 = arith.constant 0 : index
    %c0_6 = arith.constant 0 : index
    %11 = vector.load %arg4[%c0_5, %c0_6] : memref<8x512xbf16, #tpu.memory_space<vmem>>, vector<8x512xbf16>
    tpu.vector_store %arg4[%c0_5, %c0_6], %10 {strides = array<i32>} : memref<8x512xbf16, #tpu.memory_space<vmem>>, vector<8x512xbf16>,
    return
  }
  func.func @transform_0(%arg0: i32) -> (i32, i32) {
    %c0_i32 = arith.constant 0 : i32
    %c0_i32_0 = arith.constant 0 : i32
    return %arg0, %c0_i32 : i32, i32
  }
  func.func @transform_1(%arg0: i32) -> (i32, i32) {
    %c0_i32 = arith.constant 0 : i32
    %c0_i32_0 = arith.constant 0 : i32
    %c0_i32_1 = arith.constant 0 : i32
    return %c0_i32, %c0_i32_0 : i32, i32
  }
  func.func @transform_2(%arg0: i32) -> (i32, i32) {
    %c0_i32 = arith.constant 0 : i32
    %c0_i32_0 = arith.constant 0 : i32
    %c0_i32_1 = arith.constant 0 : i32
    return %c0_i32, %c0_i32_0 : i32, i32
  }
  func.func @transform_3(%arg0: i32) -> (i32, i32) {
    %c0_i32 = arith.constant 0 : i32
    %c0_i32_0 = arith.constant 0 : i32
    return %arg0, %c0_i32 : i32, i32
  }
}

module attributes {stable_mosaic.version = 11 : i64} {
  func.func @_affine_kernel(%arg0: i32, %arg1: memref<8x512xbf16, #tpu.memory_space<vmem>>, %arg2: memref<1x512xf32, #tpu.memory_space<vmem>>, %arg3: memref<1x512xf32, #tpu.memory_space<vmem>>, %arg4: memref<8x512xbf16, #tpu.memory_space<vmem>>) attributes {dimension_semantics = [#tpu.dimension_semantics<parallel>], iteration_bounds = array<i64: 1>, scalar_prefetch = 0 : i64, scratch_operands = 0 : i64, tpu.core_type = #tpu.core_type<tc>, window_params = [{transform_indices = @transform_0, window_bounds = array<i64: 8, 512>}, {pipeline_mode = #tpu.pipeline_mode<synchronous>, transform_indices = @transform_1, window_bounds = array<i64: 1, 512>}, {pipeline_mode = #tpu.pipeline_mode<synchronous>, transform_indices = @transform_2, window_bounds = array<i64: 1, 512>}, {transform_indices = @transform_3, window_bounds = array<i64: 8, 512>}]} {
    %c0 = arith.constant 0 : index
    %c0_0 = arith.constant 0 : index
    %0 = vector.load %arg1[%c0, %c0_0] : memref<8x512xbf16, #tpu.memory_space<vmem>>, vector<8x512xbf16>
    %1 = arith.extf %0 : vector<8x512xbf16> to vector<8x512xf32>
    %c0_1 = arith.constant 0 : index
    %c0_2 = arith.constant 0 : index
    %2 = vector.load %arg2[%c0_1, %c0_2] : memref<1x512xf32, #tpu.memory_space<vmem>>, vector<1x512xf32>
    %3 = vector.broadcast %2 : vector<1x512xf32> to vector<8x512xf32>
    %4 = arith.mulf %1, %3 : vector<8x512xf32>
    %c0_3 = arith.constant 0 : index
    %c0_4 = arith.constant 0 : index
    %5 = vector.load %arg3[%c0_3, %c0_4] : memref<1x512xf32, #tpu.memory_space<vmem>>, vector<1x512xf32>
    %6 = vector.broadcast %5 : vector<1x512xf32> to vector<8x512xf32>
    %7 = arith.addf %4, %6 : vector<8x512xf32>
    %8 = arith.truncf %7 : vector<8x512xf32> to vector<8x512xbf16>
    %c0_5 = arith.constant 0 : index
    %c0_6 = arith.constant 0 : index
    %9 = vector.load %arg4[%c0_5, %c0_6] : memref<8x512xbf16, #tpu.memory_space<vmem>>, vector<8x512xbf16>
    tpu.vector_store %arg4[%c0_5, %c0_6], %8 {strides = array<i32>} : memref<8x512xbf16, #tpu.memory_space<vmem>>, vector<8x512xbf16>,
    return
  }
  func.func @transform_0(%arg0: i32) -> (i32, i32) {
    %c0_i32 = arith.constant 0 : i32
    %c0_i32_0 = arith.constant 0 : i32
    return %arg0, %c0_i32 : i32, i32
  }
  func.func @transform_1(%arg0: i32) -> (i32, i32) {
    %c0_i32 = arith.constant 0 : i32
    %c0_i32_0 = arith.constant 0 : i32
    %c0_i32_1 = arith.constant 0 : i32
    return %c0_i32, %c0_i32_0 : i32, i32
  }
  func.func @transform_2(%arg0: i32) -> (i32, i32) {
    %c0_i32 = arith.constant 0 : i32
    %c0_i32_0 = arith.constant 0 : i32
    %c0_i32_1 = arith.constant 0 : i32
    return %c0_i32, %c0_i32_0 : i32, i32
  }
  func.func @transform_3(%arg0: i32) -> (i32, i32) {
    %c0_i32 = arith.constant 0 : i32
    %c0_i32_0 = arith.constant 0 : i32
    return %arg0, %c0_i32 : i32, i32
  }
}

module attributes {stable_mosaic.version = 11 : i64} {
  func.func @_matmul_bn_stats_kernel(%arg0: i32, %arg1: i32, %arg2: i32, %arg3: memref<8x512xbf16, #tpu.memory_space<vmem>>, %arg4: memref<512x256xbf16, #tpu.memory_space<vmem>>, %arg5: memref<8x256xbf16, #tpu.memory_space<vmem>>, %arg6: memref<1x8x256xf32, #tpu.memory_space<vmem>>, %arg7: memref<8x256xf32, #tpu.memory_space<vmem>>) attributes {dimension_semantics = [#tpu.dimension_semantics<parallel>, #tpu.dimension_semantics<parallel>, #tpu.dimension_semantics<arbitrary>], iteration_bounds = array<i64: 1, 2, 9>, scalar_prefetch = 0 : i64, scratch_operands = 1 : i64, tpu.core_type = #tpu.core_type<tc>, window_params = [{transform_indices = @transform_0, window_bounds = array<i64: 8, 512>}, {transform_indices = @transform_1, window_bounds = array<i64: 512, 256>}, {transform_indices = @transform_2, window_bounds = array<i64: 8, 256>}, {transform_indices = @transform_3, window_bounds = array<i64: 1, 8, 256>}]} {
    %c0_i32 = arith.constant 0 : i32
    %0 = arith.cmpi eq, %arg2, %c0_i32 : i32
    %1 = arith.extui %0 : i1 to i32
    %c0_i32_0 = arith.constant 0 : i32
    %2 = arith.cmpi ne, %1, %c0_i32_0 : i32
    scf.if %2 {
      %cst_9 = arith.constant 0.000000e+00 : f32
      %12 = vector.broadcast %cst_9 : f32 to vector<8x256xf32>
      %c0_10 = arith.constant 0 : index
      %c0_11 = arith.constant 0 : index
      %13 = vector.load %arg7[%c0_10, %c0_11] : memref<8x256xf32, #tpu.memory_space<vmem>>, vector<8x256xf32>
      tpu.vector_store %arg7[%c0_10, %c0_11], %12 {strides = array<i32>} : memref<8x256xf32, #tpu.memory_space<vmem>>, vector<8x256xf32>,
    } else {
    }
    %c0 = arith.constant 0 : index
    %c0_1 = arith.constant 0 : index
    %3 = vector.load %arg7[%c0, %c0_1] : memref<8x256xf32, #tpu.memory_space<vmem>>, vector<8x256xf32>
    %c0_2 = arith.constant 0 : index
    %c0_3 = arith.constant 0 : index
    %4 = vector.load %arg3[%c0_2, %c0_3] : memref<8x512xbf16, #tpu.memory_space<vmem>>, vector<8x512xbf16>
    %c0_4 = arith.constant 0 : index
    %c0_5 = arith.constant 0 : index
    %5 = vector.load %arg4[%c0_4, %c0_5] : memref<512x256xbf16, #tpu.memory_space<vmem>>, vector<512x256xbf16>
    %cst = arith.constant dense<0.000000e+00> : vector<8x256xf32>
    %6 = tpu.matmul %4, %5, %cst {dimension_numbers = #tpu.dot_dimension_numbers<[1], [0], [0], [1], [0, 0, 1, 1], [], []>} : vector<8x512xbf16>, vector<512x256xbf16>, vector<8x256xf32> -> vector<8x256xf32>
    %7 = arith.addf %3, %6 : vector<8x256xf32>
    %c0_6 = arith.constant 0 : index
    %c0_7 = arith.constant 0 : index
    %8 = vector.load %arg7[%c0_6, %c0_7] : memref<8x256xf32, #tpu.memory_space<vmem>>, vector<8x256xf32>
    tpu.vector_store %arg7[%c0_6, %c0_7], %7 {strides = array<i32>} : memref<8x256xf32, #tpu.memory_space<vmem>>, vector<8x256xf32>,
    %c8_i32 = arith.constant 8 : i32
    %9 = arith.cmpi eq, %arg2, %c8_i32 : i32
    %10 = arith.extui %9 : i1 to i32
    %c0_i32_8 = arith.constant 0 : i32
    %11 = arith.cmpi ne, %10, %c0_i32_8 : i32
    scf.if %11 {
      %c0_9 = arith.constant 0 : index
      %c0_10 = arith.constant 0 : index
      %12 = vector.load %arg7[%c0_9, %c0_10] : memref<8x256xf32, #tpu.memory_space<vmem>>, vector<8x256xf32>
      %13 = arith.truncf %12 : vector<8x256xf32> to vector<8x256xbf16>
      %c0_11 = arith.constant 0 : index
      %c0_12 = arith.constant 0 : index
      %14 = vector.load %arg5[%c0_11, %c0_12] : memref<8x256xbf16, #tpu.memory_space<vmem>>, vector<8x256xbf16>
      tpu.vector_store %arg5[%c0_11, %c0_12], %13 {strides = array<i32>} : memref<8x256xbf16, #tpu.memory_space<vmem>>, vector<8x256xbf16>,
      %cst_13 = arith.constant dense<0.000000e+00> : vector<256xf32>
      %15 = vector.multi_reduction <add>, %12, %cst_13 [0] : vector<8x256xf32> to vector<256xf32>
      %16 = vector.shape_cast %15 : vector<256xf32> to vector<1x256xf32>
      %17 = arith.mulf %12, %12 : vector<8x256xf32>
      %cst_14 = arith.constant dense<0.000000e+00> : vector<256xf32>
      %18 = vector.multi_reduction <add>, %17, %cst_14 [0] : vector<8x256xf32> to vector<256xf32>
      %19 = vector.shape_cast %18 : vector<256xf32> to vector<1x256xf32>
      %cst_15 = arith.constant 0.000000e+00 : f32
      %20 = vector.broadcast %cst_15 : f32 to vector<6x256xf32>
      %21 = tpu.concatenate %16, %19, %20 in 0 : vector<1x256xf32>, vector<1x256xf32>, vector<6x256xf32> -> vector<8x256xf32>
      %22 = vector.shape_cast %21 : vector<8x256xf32> to vector<1x8x256xf32>
      %c0_16 = arith.constant 0 : index
      %c0_17 = arith.constant 0 : index
      %c0_18 = arith.constant 0 : index
      %23 = vector.load %arg6[%c0_16, %c0_17, %c0_18] : memref<1x8x256xf32, #tpu.memory_space<vmem>>, vector<1x8x256xf32>
      tpu.vector_store %arg6[%c0_16, %c0_17, %c0_18], %22 {strides = array<i32>} : memref<1x8x256xf32, #tpu.memory_space<vmem>>, vector<1x8x256xf32>,
    } else {
    }
    return
  }
  func.func @transform_0(%arg0: i32, %arg1: i32, %arg2: i32) -> (i32, i32) {
    %c0_i32 = arith.constant 0 : i32
    return %arg0, %arg2 : i32, i32
  }
  func.func @transform_1(%arg0: i32, %arg1: i32, %arg2: i32) -> (i32, i32) {
    %c0_i32 = arith.constant 0 : i32
    return %arg2, %arg1 : i32, i32
  }
  func.func @transform_2(%arg0: i32, %arg1: i32, %arg2: i32) -> (i32, i32) {
    %c0_i32 = arith.constant 0 : i32
    return %arg0, %arg1 : i32, i32
  }
  func.func @transform_3(%arg0: i32, %arg1: i32, %arg2: i32) -> (i32, i32, i32) {
    %c0_i32 = arith.constant 0 : i32
    %c0_i32_0 = arith.constant 0 : i32
    return %arg0, %c0_i32, %arg1 : i32, i32, i32
  }
}

module attributes {stable_mosaic.version = 11 : i64} {
  func.func @_affine_add_relu_kernel(%arg0: i32, %arg1: memref<8x512xbf16, #tpu.memory_space<vmem>>, %arg2: memref<1x512xf32, #tpu.memory_space<vmem>>, %arg3: memref<1x512xf32, #tpu.memory_space<vmem>>, %arg4: memref<8x512xbf16, #tpu.memory_space<vmem>>, %arg5: memref<8x512xbf16, #tpu.memory_space<vmem>>) attributes {dimension_semantics = [#tpu.dimension_semantics<parallel>], iteration_bounds = array<i64: 1>, scalar_prefetch = 0 : i64, scratch_operands = 0 : i64, tpu.core_type = #tpu.core_type<tc>, window_params = [{transform_indices = @transform_0, window_bounds = array<i64: 8, 512>}, {pipeline_mode = #tpu.pipeline_mode<synchronous>, transform_indices = @transform_1, window_bounds = array<i64: 1, 512>}, {pipeline_mode = #tpu.pipeline_mode<synchronous>, transform_indices = @transform_2, window_bounds = array<i64: 1, 512>}, {transform_indices = @transform_3, window_bounds = array<i64: 8, 512>}, {transform_indices = @transform_4, window_bounds = array<i64: 8, 512>}]} {
    %c0 = arith.constant 0 : index
    %c0_0 = arith.constant 0 : index
    %0 = vector.load %arg1[%c0, %c0_0] : memref<8x512xbf16, #tpu.memory_space<vmem>>, vector<8x512xbf16>
    %1 = arith.extf %0 : vector<8x512xbf16> to vector<8x512xf32>
    %c0_1 = arith.constant 0 : index
    %c0_2 = arith.constant 0 : index
    %2 = vector.load %arg2[%c0_1, %c0_2] : memref<1x512xf32, #tpu.memory_space<vmem>>, vector<1x512xf32>
    %3 = vector.broadcast %2 : vector<1x512xf32> to vector<8x512xf32>
    %4 = arith.mulf %1, %3 : vector<8x512xf32>
    %c0_3 = arith.constant 0 : index
    %c0_4 = arith.constant 0 : index
    %5 = vector.load %arg3[%c0_3, %c0_4] : memref<1x512xf32, #tpu.memory_space<vmem>>, vector<1x512xf32>
    %6 = vector.broadcast %5 : vector<1x512xf32> to vector<8x512xf32>
    %7 = arith.addf %4, %6 : vector<8x512xf32>
    %c0_5 = arith.constant 0 : index
    %c0_6 = arith.constant 0 : index
    %8 = vector.load %arg4[%c0_5, %c0_6] : memref<8x512xbf16, #tpu.memory_space<vmem>>, vector<8x512xbf16>
    %9 = arith.extf %8 : vector<8x512xbf16> to vector<8x512xf32>
    %10 = arith.addf %7, %9 : vector<8x512xf32>
    %cst = arith.constant 0.000000e+00 : f32
    %11 = vector.broadcast %cst : f32 to vector<8x512xf32>
    %12 = arith.maximumf %10, %11 : vector<8x512xf32>
    %13 = arith.truncf %12 : vector<8x512xf32> to vector<8x512xbf16>
    %c0_7 = arith.constant 0 : index
    %c0_8 = arith.constant 0 : index
    %14 = vector.load %arg5[%c0_7, %c0_8] : memref<8x512xbf16, #tpu.memory_space<vmem>>, vector<8x512xbf16>
    tpu.vector_store %arg5[%c0_7, %c0_8], %13 {strides = array<i32>} : memref<8x512xbf16, #tpu.memory_space<vmem>>, vector<8x512xbf16>,
    return
  }
  func.func @transform_0(%arg0: i32) -> (i32, i32) {
    %c0_i32 = arith.constant 0 : i32
    %c0_i32_0 = arith.constant 0 : i32
    return %arg0, %c0_i32 : i32, i32
  }
  func.func @transform_1(%arg0: i32) -> (i32, i32) {
    %c0_i32 = arith.constant 0 : i32
    %c0_i32_0 = arith.constant 0 : i32
    %c0_i32_1 = arith.constant 0 : i32
    return %c0_i32, %c0_i32_0 : i32, i32
  }
  func.func @transform_2(%arg0: i32) -> (i32, i32) {
    %c0_i32 = arith.constant 0 : i32
    %c0_i32_0 = arith.constant 0 : i32
    %c0_i32_1 = arith.constant 0 : i32
    return %c0_i32, %c0_i32_0 : i32, i32
  }
  func.func @transform_3(%arg0: i32) -> (i32, i32) {
    %c0_i32 = arith.constant 0 : i32
    %c0_i32_0 = arith.constant 0 : i32
    return %arg0, %c0_i32 : i32, i32
  }
  func.func @transform_4(%arg0: i32) -> (i32, i32) {
    %c0_i32 = arith.constant 0 : i32
    %c0_i32_0 = arith.constant 0 : i32
    return %arg0, %c0_i32 : i32, i32
  }
}

module attributes {stable_mosaic.version = 11 : i64} {
  func.func @_avgpool_fc_kernel(%arg0: i32, %arg1: memref<2x1x512xbf16, #tpu.memory_space<vmem>>, %arg2: memref<512x10xf32, #tpu.memory_space<vmem>>, %arg3: memref<1x10xf32, #tpu.memory_space<vmem>>, %arg4: memref<2x10xf32, #tpu.memory_space<vmem>>) attributes {dimension_semantics = [#tpu.dimension_semantics<arbitrary>], iteration_bounds = array<i64: 1>, scalar_prefetch = 0 : i64, scratch_operands = 0 : i64, tpu.core_type = #tpu.core_type<tc>, window_params = [{pipeline_mode = #tpu.pipeline_mode<synchronous>, transform_indices = @transform_0, window_bounds = array<i64: 2, 1, 512>}, {pipeline_mode = #tpu.pipeline_mode<synchronous>, transform_indices = @transform_1, window_bounds = array<i64: 512, 10>}, {pipeline_mode = #tpu.pipeline_mode<synchronous>, transform_indices = @transform_2, window_bounds = array<i64: 1, 10>}, {pipeline_mode = #tpu.pipeline_mode<synchronous>, transform_indices = @transform_3, window_bounds = array<i64: 2, 10>}]} {
    %c0 = arith.constant 0 : index
    %c0_0 = arith.constant 0 : index
    %c0_1 = arith.constant 0 : index
    %0 = vector.load %arg1[%c0, %c0_0, %c0_1] : memref<2x1x512xbf16, #tpu.memory_space<vmem>>, vector<2x1x512xbf16>
    %1 = arith.extf %0 : vector<2x1x512xbf16> to vector<2x1x512xf32>
    %cst = arith.constant dense<0.000000e+00> : vector<2x512xf32>
    %2 = vector.multi_reduction <add>, %1, %cst [1] : vector<2x1x512xf32> to vector<2x512xf32>
    %cst_2 = arith.constant 1.000000e+00 : f32
    %3 = vector.broadcast %cst_2 : f32 to vector<2x512xf32>
    %4 = arith.divf %2, %3 : vector<2x512xf32>
    %c0_3 = arith.constant 0 : index
    %c0_4 = arith.constant 0 : index
    %5 = vector.load %arg2[%c0_3, %c0_4] : memref<512x10xf32, #tpu.memory_space<vmem>>, vector<512x10xf32>
    %cst_5 = arith.constant dense<0.000000e+00> : vector<2x10xf32>
    %6 = tpu.matmul %4, %5, %cst_5 {dimension_numbers = #tpu.dot_dimension_numbers<[1], [0], [0], [1], [0, 0, 1, 1], [], []>} : vector<2x512xf32>, vector<512x10xf32>, vector<2x10xf32> -> vector<2x10xf32>
    %c0_6 = arith.constant 0 : index
    %c0_7 = arith.constant 0 : index
    %7 = vector.load %arg3[%c0_6, %c0_7] : memref<1x10xf32, #tpu.memory_space<vmem>>, vector<1x10xf32>
    %8 = vector.broadcast %7 : vector<1x10xf32> to vector<2x10xf32>
    %9 = arith.addf %6, %8 : vector<2x10xf32>
    %c0_8 = arith.constant 0 : index
    %c0_9 = arith.constant 0 : index
    %10 = vector.load %arg4[%c0_8, %c0_9] : memref<2x10xf32, #tpu.memory_space<vmem>>, vector<2x10xf32>
    tpu.vector_store %arg4[%c0_8, %c0_9], %9 {strides = array<i32>} : memref<2x10xf32, #tpu.memory_space<vmem>>, vector<2x10xf32>,
    return
  }
  func.func @transform_0(%arg0: i32) -> (i32, i32, i32) {
    %c0_i32 = arith.constant 0 : i32
    %c0_i32_0 = arith.constant 0 : i32
    %c0_i32_1 = arith.constant 0 : i32
    %c0_i32_2 = arith.constant 0 : i32
    return %c0_i32, %c0_i32_0, %c0_i32_1 : i32, i32, i32
  }
  func.func @transform_1(%arg0: i32) -> (i32, i32) {
    %c0_i32 = arith.constant 0 : i32
    %c0_i32_0 = arith.constant 0 : i32
    %c0_i32_1 = arith.constant 0 : i32
    return %c0_i32, %c0_i32_0 : i32, i32
  }
  func.func @transform_2(%arg0: i32) -> (i32, i32) {
    %c0_i32 = arith.constant 0 : i32
    %c0_i32_0 = arith.constant 0 : i32
    %c0_i32_1 = arith.constant 0 : i32
    return %c0_i32, %c0_i32_0 : i32, i32
  }
  func.func @transform_3(%arg0: i32) -> (i32, i32) {
    %c0_i32 = arith.constant 0 : i32
    %c0_i32_0 = arith.constant 0 : i32
    %c0_i32_1 = arith.constant 0 : i32
    return %c0_i32, %c0_i32_0 : i32, i32
  }
}

</mosaic_0001>

<bundles_post_ra>
// kernel: tile.141
= control target key start
LH: loop header
LB: loop body
LE: loop exit
PB: predicated region body
PF: predicated region fallthrough
CT: control target
= control target key end

     0   :  { %s22_s0 = inlined_call_operand.vmem [shape: f32[64], index: 0, kind: input, shape index: {}]   ;;  %s23_s1 = inlined_call_operand.vmem [shape: f32[2,64], index: 1, kind: output, shape index: {}]  }
   0x1   :  { %v4_v0 = vld [vmem:[%s22_s0] ss:$0 sm:$0xff] }
   0x2   :  { %5 = vst [vmem:[%s23_s1] sm:$0x3] %v4_v0 }

// kernel: tile.142
= control target key start
LH: loop header
LB: loop body
LE: loop exit
PB: predicated region body
PF: predicated region fallthrough
CT: control target
= control target key end

     0   :  { %vm7_vm0 = vcmask 523264   ;;  %vm13_vm1 = vcmask 1048064   ;;  %s39_s0 = inlined_call_operand.vmem [shape: f32[2,64], index: 0, kind: input, shape index: {}]   ;;  %s40_s1 = inlined_call_operand.vmem [shape: f32[1,128], index: 1, kind: output, shape index: {}]  }
   0x1   :  { %v4_v0 = vld [vmem:[%s39_s0] sm:$0x3]  ;;  %s22_s0 = smov 64  }
   0x2   :  { %5 = vst [vmem:[#allocation1] sm:$0x3] %v4_v0 }
   0x9   :  { %v10_v1 = vld [vmem:[#allocation1 + $0x1] sm:$0x1]   ;;  %v6_v2 = vld [vmem:[#allocation1] sm:$0x1]  }
   0xa   :  { %11 = vrot.lane.b32.xlu0 %v10_v1, %s22_s0  ;;  %8 = vst.msk [vmem:[#allocation0] sm:$0x1] %vm7_vm0, %v6_v2  }
  0x7c   :  { %v12_v3 = vpop.permute.xlu0 %11  }
  0x7d   :  { %14 = vst.msk [vmem:[#allocation0] sm:$0x1] %vm13_vm1, %v12_v3  }
  0x84   :  { %v17_v4 = vld [vmem:[#allocation0] sm:$0x1] }
  0x85   :  { %20 = vst [vmem:[%s40_s1] sm:$0x1] %v17_v4 }

// kernel: resnet34_forward.77
= control target key start
LH: loop header
LB: loop body
LE: loop exit
PB: predicated region body
PF: predicated region fallthrough
CT: control target
= control target key end

     0   :  { %s176_s0 = inlined_call_operand.vmem [shape: bf16[64,128], index: 0, kind: input, shape index: {}]   ;;  %s177_s1 = inlined_call_operand.vmem [shape: f32[1,128], index: 1, kind: input, shape index: {}]   ;;  %s178_s2 = inlined_call_operand.vmem [shape: f32[1,128], index: 2, kind: input, shape index: {}]   ;;  %s179_s3 = inlined_call_operand.vmem [shape: bf16[64,128], index: 3, kind: output, shape index: {}]  }
   0x1   :  { %v83_v0 = vld [vmem:[%s176_s0] sm:$0xff]   ;;  %v118_v5 = vld [vmem:[%s176_s0 + $0x8] sm:$0xff]   ;;  %v119_v8 = vld [vmem:[%s176_s0 + $0x10] sm:$0xff]  }
   0x2   :  { %v124_v1 = vld [vmem:[%s177_s1] ss:$0 sm:$0xff]  ;;  %v84_v2 = vunpack.c.l.bf16 %v83_v0  ;;  %v85_v3 = vunpack.c.h.bf16 %v83_v0  ;;  %v88_v6 = vunpack.c.l.bf16 %v118_v5  ;;  %v89_v7 = vunpack.c.h.bf16 %v118_v5  ;;  %v120_v9 = vld [vmem:[%s176_s0 + $0x18] sm:$0xff]  }
   0x3   :  { %v125_v4 = vld [vmem:[%s178_s2] ss:$0 sm:$0xff]  ;;  %v92_v12 = vunpack.c.l.bf16 %v119_v8  ;;  %v93_v13 = vunpack.c.h.bf16 %v119_v8  ;;  %v96_v16 = vunpack.c.l.bf16 %v120_v9  ;;  %v97_v17 = vunpack.c.h.bf16 %v120_v9 }
   0x4   :  { %v34_v10 = vmul.f32 %v124_v1, %v84_v2  ;;  %v35_v11 = vmul.f32 %v124_v1, %v85_v3  ;;  %v36_v14 = vmul.f32 %v124_v1, %v88_v6  ;;  %v37_v15 = vmul.f32 %v124_v1, %v89_v7 }
   0x5   :  { %v38_v20 = vmul.f32 %v124_v1, %v92_v12  ;;  %v39_v21 = vmul.f32 %v124_v1, %v93_v13  ;;  %v40_v24 = vmul.f32 %v124_v1, %v96_v16  ;;  %v41_v25 = vmul.f32 %v124_v1, %v97_v17 }
   0x6   :  { %v46_v18 = vadd.f32 %v125_v4, %v34_v10  ;;  %v47_v19 = vadd.f32 %v125_v4, %v35_v11  ;;  %v48_v22 = vadd.f32 %v125_v4, %v36_v14  ;;  %v49_v23 = vadd.f32 %v125_v4, %v37_v15 }
   0x7   :  { %v50_v28 = vadd.f32 %v125_v4, %v38_v20  ;;  %v51_v29 = vadd.f32 %v125_v4, %v39_v21  ;;  %v52_v32 = vadd.f32 %v125_v4, %v40_v24  ;;  %v53_v33 = vadd.f32 %v125_v4, %v41_v25 }
   0x8   :  { %v54_v26 = vmax.f32 %v46_v18, 0.0  ;;  %v55_v27 = vmax.f32 %v47_v19, 0.0  ;;  %v56_v30 = vmax.f32 %v48_v22, 0.0  ;;  %v57_v31 = vmax.f32 %v49_v23, 0.0 }
   0x9   :  { %v58_v35 = vmax.f32 %v50_v28, 0.0  ;;  %v59_v36 = vmax.f32 %v51_v29, 0.0  ;;  %v60_v38 = vmax.f32 %v52_v32, 0.0  ;;  %v61_v39 = vmax.f32 %v53_v33, 0.0 }
   0xa   :  { %v101_v34 = vpack.c.bf16 %v55_v27, %v54_v26  ;;  %v106_v37 = vpack.c.bf16 %v57_v31, %v56_v30 }
   0xb   :  { %v111_v40 = vpack.c.bf16 %v59_v36, %v58_v35  ;;  %v116_v41 = vpack.c.bf16 %v61_v39, %v60_v38 }
   0xc   :  { %102 = vst [vmem:[%s179_s3] sm:$0xff] %v101_v34  }
   0xd   :  { %121 = vst [vmem:[%s179_s3 + $0x8] sm:$0xff] %v106_v37  }
   0xe   :  { %122 = vst [vmem:[%s179_s3 + $0x10] sm:$0xff] %v111_v40  }
   0xf   :  { %123 = vst [vmem:[%s179_s3 + $0x18] sm:$0xff] %v116_v41  }

// kernel: resnet34_forward.76
= control target key start
LH: loop header
LB: loop body
LE: loop exit
PB: predicated region body
PF: predicated region fallthrough
CT: control target
= control target key end

     0   :  { %vm512_vm0 = vcmask 1040384   ;;  %vm514_vm1 = vcmask 1041408   ;;  %s963_s1 = inlined_call_operand.vmem [shape: bf16[256,128], index: 1, kind: input, shape index: {}]   ;;  %s964_s0 = inlined_call_operand.vmem [shape: bf16[128,256], index: 0, kind: input, shape index: {}]   ;;  %s965_s2 = inlined_call_operand.vmem [shape: bf16[128,128], index: 2, kind: output, shape index: {0}]   ;;  %s966_s3 = inlined_call_operand.vmem [shape: f32[1,8,128], index: 3, kind: output, shape index: {1}]  }
   0x1   :  { %v676_v0 = vld [vmem:[%s963_s1 + $0x38] sm:$0xff]  ;;  %v675_v2 = vld [vmem:[%s963_s1 + $0x30] sm:$0xff]  ;;  %v674_v4 = vld [vmem:[%s963_s1 + $0x28] sm:$0xff] }
   0x2   :  { %v684_v1 = vld [vmem:[%s963_s1 + $0x78] sm:$0xff]  ;;  %273 = vmatpush.bf16.msra.mxu0 %v676_v0  ;;  %v683_v3 = vld [vmem:[%s963_s1 + $0x70] sm:$0xff]  ;;  %732 = vmatpush.bf16.msra.mxu2 %v676_v0  ;;  %v682_v5 = vld [vmem:[%s963_s1 + $0x68] sm:$0xff] }
   0x3   :  { %322 = vmatpush.bf16.msra.mxu1 %v684_v1  ;;  %740 = vmatpush.bf16.msra.mxu3 %v684_v1  ;;  %v673_v6 = vld [vmem:[%s963_s1 + $0x20] sm:$0xff]  ;;  %v672_v8 = vld [vmem:[%s963_s1 + $0x18] sm:$0xff]  ;;  %v671_v10 = vld [vmem:[%s963_s1 + $0x10] sm:$0xff] }
   0x4   :  { %v681_v7 = vld [vmem:[%s963_s1 + $0x60] sm:$0xff]  ;;  %v680_v9 = vld [vmem:[%s963_s1 + $0x58] sm:$0xff]  ;;  %v679_v11 = vld [vmem:[%s963_s1 + $0x50] sm:$0xff] }
   0x5   :  { %v670_v12 = vld [vmem:[%s963_s1 + $0x8] sm:$0xff]  ;;  %v669_v14 = vld [vmem:[%s963_s1] sm:$0xff]  ;;  %v535_v28 = vld [vmem:[%s964_s0 + $0x10] sm:$0xf] }
   0x6   :  { %274 = vmatpush.bf16.msra.mxu0 %v675_v2  ;;  %733 = vmatpush.bf16.msra.mxu2 %v675_v2  ;;  %v678_v13 = vld [vmem:[%s963_s1 + $0x48] sm:$0xff]  ;;  %v677_v15 = vld [vmem:[%s963_s1 + $0x40] sm:$0xff]  ;;  %v656_v29 = vld [vmem:[%s964_s0 + $0x14] sm:$0xf0] }
   0x7   :  { %323 = vmatpush.bf16.msra.mxu1 %v683_v3  ;;  %741 = vmatpush.bf16.msra.mxu3 %v683_v3  ;;  %v527_v16 = vld [vmem:[%s964_s0] sm:$0xf]  ;;  %v654_v17 = vld [vmem:[%s964_s0 + $0x4] sm:$0xf0]  ;;  %v653_v18 = vld [vmem:[%s964_s0 + $0x4] sm:$0xf]  ;;  %v536_v36 = vor.u32 %v656_v29, %v535_v28 }
   0x8   :  { %v529_v19 = vld [vmem:[%s964_s0 + $0x8] sm:$0xf0]  ;;  %v559_v20 = vld [vmem:[%s964_s0 + $0x40] sm:$0xf]  ;;  %v662_v21 = vld [vmem:[%s964_s0 + $0x44] sm:$0xf0]  ;;  %v528_v24 = vor.u32 %v654_v17, %v527_v16 }
   0x9   :  { %v661_v22 = vld [vmem:[%s964_s0 + $0x44] sm:$0xf]  ;;  %v561_v23 = vld [vmem:[%s964_s0 + $0x48] sm:$0xf0]  ;;  %v532_v25 = vor.u32 %v653_v18, %v529_v19  ;;  %v560_v26 = vor.u32 %v662_v21, %v559_v20  ;;  %v655_v30 = vld [vmem:[%s964_s0 + $0x14] sm:$0xf] }
   0xa   :  { %275 = vmatpush.bf16.msra.mxu0 %v674_v4  ;;  %734 = vmatpush.bf16.msra.mxu2 %v674_v4  ;;  %v564_v27 = vor.u32 %v661_v22, %v561_v23  ;;  %v537_v31 = vld [vmem:[%s964_s0 + $0x18] sm:$0xf0]  ;;  %v567_v32 = vld [vmem:[%s964_s0 + $0x50] sm:$0xf]  ;;  %v664_v33 = vld [vmem:[%s964_s0 + $0x54] sm:$0xf0] }
   0xb   :  { %324 = vmatpush.bf16.msra.mxu1 %v682_v5  ;;  %742 = vmatpush.bf16.msra.mxu3 %v682_v5  ;;  %v663_v34 = vld [vmem:[%s964_s0 + $0x54] sm:$0xf]  ;;  %v569_v35 = vld [vmem:[%s964_s0 + $0x58] sm:$0xf0]  ;;  %v540_v37 = vor.u32 %v655_v30, %v537_v31  ;;  %v568_v38 = vor.u32 %v664_v33, %v567_v32  ;;  %v543_v40 = vld [vmem:[%s964_s0 + $0x20] sm:$0xf] }
   0xc   :  { %v572_v39 = vor.u32 %v663_v34, %v569_v35  ;;  %v658_v41 = vld [vmem:[%s964_s0 + $0x24] sm:$0xf0]  ;;  %v657_v42 = vld [vmem:[%s964_s0 + $0x24] sm:$0xf]  ;;  %v545_v43 = vld [vmem:[%s964_s0 + $0x28] sm:$0xf0] }
   0xd   :  { %v575_v44 = vld [vmem:[%s964_s0 + $0x60] sm:$0xf]  ;;  %v666_v45 = vld [vmem:[%s964_s0 + $0x64] sm:$0xf0]  ;;  %v665_v46 = vld [vmem:[%s964_s0 + $0x64] sm:$0xf]  ;;  %v544_v48 = vor.u32 %v658_v41, %v543_v40  ;;  %v548_v49 = vor.u32 %v657_v42, %v545_v43 }
   0xe   :  { %276 = vmatpush.bf16.msra.mxu0 %v673_v6  ;;  %735 = vmatpush.bf16.msra.mxu2 %v673_v6  ;;  %v577_v47 = vld [vmem:[%s964_s0 + $0x68] sm:$0xf0]  ;;  %v576_v50 = vor.u32 %v666_v45, %v575_v44  ;;  %v551_v52 = vld [vmem:[%s964_s0 + $0x30] sm:$0xf]  ;;  %v660_v53 = vld [vmem:[%s964_s0 + $0x34] sm:$0xf0] }
   0xf   :  { %325 = vmatpush.bf16.msra.mxu1 %v681_v7  ;;  %743 = vmatpush.bf16.msra.mxu3 %v681_v7  ;;  %v580_v51 = vor.u32 %v665_v46, %v577_v47  ;;  %v659_v54 = vld [vmem:[%s964_s0 + $0x34] sm:$0xf]  ;;  %v553_v55 = vld [vmem:[%s964_s0 + $0x38] sm:$0xf0]  ;;  %v583_v56 = vld [vmem:[%s964_s0 + $0x70] sm:$0xf]  ;;  %v552_v60 = vor.u32 %v660_v53, %v551_v52 }
  0x10   :  { %v668_v57 = vld [vmem:[%s964_s0 + $0x74] sm:$0xf0]  ;;  %v667_v58 = vld [vmem:[%s964_s0 + $0x74] sm:$0xf]  ;;  %v585_v59 = vld [vmem:[%s964_s0 + $0x78] sm:$0xf0]  ;;  %v556_v61 = vor.u32 %v659_v54, %v553_v55 }
  0x11   :  { %v584_v62 = vor.u32 %v668_v57, %v583_v56  ;;  %v588_v63 = vor.u32 %v667_v58, %v585_v59 }
  0x12   :  { %277 = vmatpush.bf16.msra.mxu0 %v672_v8  ;;  %736 = vmatpush.bf16.msra.mxu2 %v672_v8 }
  0x13   :  { %326 = vmatpush.bf16.msra.mxu1 %v680_v9  ;;  %744 = vmatpush.bf16.msra.mxu3 %v680_v9 }
  0x16   :  { %278 = vmatpush.bf16.msra.mxu0 %v671_v10  ;;  %737 = vmatpush.bf16.msra.mxu2 %v671_v10 }
  0x17   :  { %327 = vmatpush.bf16.msra.mxu1 %v679_v11  ;;  %745 = vmatpush.bf16.msra.mxu3 %v679_v11 }
  0x1a   :  { %279 = vmatpush.bf16.msra.mxu0 %v670_v12  ;;  %738 = vmatpush.bf16.msra.mxu2 %v670_v12 }
  0x1b   :  { %328 = vmatpush.bf16.msra.mxu1 %v678_v13  ;;  %746 = vmatpush.bf16.msra.mxu3 %v678_v13 }
  0x1e   :  { %280 = vmatpush.bf16.msra.mxu0 %v669_v14  ;;  %739 = vmatpush.bf16.msra.mxu2 %v669_v14 }
  0x1f   :  { %329 = vmatpush.bf16.msra.mxu1 %v677_v15  ;;  %747 = vmatpush.bf16.msra.mxu3 %v677_v15 }
  0x21   :  { %281 = vmatmul.bf16.vlgmr.msra.gmra.mxu0 %v528_v24  ;;  %301 = vmatmul.bf16.vlgmr.msra.gmra.mxu2 %v560_v26 }
  0x22   :  { %330 = vmatmul.bf16.vlgmr.msra.gmra.mxu1 %v532_v25  ;;  %350 = vmatmul.bf16.vlgmr.msra.gmra.mxu3 %v564_v27 }
  0x31   :  { %286 = vmatmul.bf16.gmra.mxu0 %v536_v36  ;;  %306 = vmatmul.bf16.gmra.mxu2 %v568_v38 }
  0x32   :  { %335 = vmatmul.bf16.gmra.mxu1 %v540_v37  ;;  %355 = vmatmul.bf16.gmra.mxu3 %v572_v39 }
  0x41   :  { %291 = vmatmul.bf16.gmra.mxu0 %v544_v48  ;;  %311 = vmatmul.bf16.gmra.mxu2 %v576_v50 }
  0x42   :  { %340 = vmatmul.bf16.gmra.mxu1 %v548_v49  ;;  %360 = vmatmul.bf16.gmra.mxu3 %v580_v51 }
  0x51   :  { %296 = vmatmul.bf16.gmra.mxu0 %v552_v60  ;;  %316 = vmatmul.bf16.gmra.mxu2 %v584_v62 }
  0x52   :  { %345 = vmatmul.bf16.gmra.mxu1 %v556_v61  ;;  %365 = vmatmul.bf16.gmra.mxu3 %v588_v63 }
  0x9e   :  { %v282_v0 = vpop.f32.mrf.mxu0 }
  0x9f   :  { %v331_v1 = vpop.f32.mrf.mxu1 }
  0xa0   :  { %v332_v6 = vadd.f32 %v331_v1, %v282_v0 }
  0xa2   :  { %v475_v39 = vmul.f32 %v332_v6, %v332_v6 }
  0xa4   :  { %v302_v2 = vpop.f32.mrf.mxu2 }
  0xa5   :  { %v351_v3 = vpop.f32.mrf.mxu3 }
  0xa6   :  { %v284_v4 = vpop.f32.mrf.mxu0  ;;  %v915_v9 = vadd.f32 %v351_v3, %v302_v2 }
  0xa7   :  { %v333_v5 = vpop.f32.mrf.mxu1 }
  0xa8   :  { %v334_v7 = vadd.f32 %v333_v5, %v284_v4 }
  0xaa   :  { %v688_v8 = vpack.c.bf16 %v334_v7, %v332_v6  ;;  %v476_v37 = vmul.f32 %v334_v7, %v334_v7  ;;  %v454_v40 = vadd.f32 %v334_v7, %v332_v6 }
  0xac   :  { %689 = vst [vmem:[%s965_s2] sm:$0xff] %v688_v8   ;;  %v304_v10 = vpop.f32.mrf.mxu2  ;;  %v491_v47 = vadd.f32 %v476_v37, %v475_v39  ;;  %v483_v8 = vmul.f32 %v915_v9, %v915_v9 }
  0xad   :  { %v353_v11 = vpop.f32.mrf.mxu3 }
  0xae   :  { %v287_v12 = vpop.f32.mrf.mxu0  ;;  %v917_v14 = vadd.f32 %v353_v11, %v304_v10 }
  0xaf   :  { %v336_v13 = vpop.f32.mrf.mxu1 }
  0xb0   :  { %v708_v15 = vpack.c.bf16 %v917_v14, %v915_v9  ;;  %v337_v20 = vadd.f32 %v336_v13, %v287_v12  ;;  %v484_v13 = vmul.f32 %v917_v14, %v917_v14 }
  0xb2   :  { %728 = vst [vmem:[%s965_s2 + $0x20] sm:$0xff] %v708_v15   ;;  %v477_v41 = vmul.f32 %v337_v20, %v337_v20  ;;  %v455_v48 = vadd.f32 %v454_v40, %v337_v20 }
  0xb4   :  { %v307_v16 = vpop.f32.mrf.mxu2  ;;  %v492_v51 = vadd.f32 %v491_v47, %v477_v41 }
  0xb5   :  { %v356_v17 = vpop.f32.mrf.mxu3 }
  0xb6   :  { %v289_v18 = vpop.f32.mrf.mxu0  ;;  %v927_v23 = vadd.f32 %v356_v17, %v307_v16 }
  0xb7   :  { %v338_v19 = vpop.f32.mrf.mxu1 }
  0xb8   :  { %v339_v21 = vadd.f32 %v338_v19, %v289_v18 }
  0xba   :  { %v693_v22 = vpack.c.bf16 %v339_v21, %v337_v20  ;;  %v478_v49 = vmul.f32 %v339_v21, %v339_v21  ;;  %v456_v52 = vadd.f32 %v455_v48, %v339_v21  ;;  %v485_v20 = vmul.f32 %v927_v23, %v927_v23 }
  0xbc   :  { %725 = vst [vmem:[%s965_s2 + $0x8] sm:$0xff] %v693_v22   ;;  %v309_v24 = vpop.f32.mrf.mxu2  ;;  %v493_v55 = vadd.f32 %v492_v51, %v478_v49 }
  0xbd   :  { %v358_v25 = vpop.f32.mrf.mxu3 }
  0xbe   :  { %v292_v26 = vpop.f32.mrf.mxu0  ;;  %v929_v28 = vadd.f32 %v358_v25, %v309_v24 }
  0xbf   :  { %v341_v27 = vpop.f32.mrf.mxu1 }
  0xc0   :  { %v713_v29 = vpack.c.bf16 %v929_v28, %v927_v23  ;;  %v342_v34 = vadd.f32 %v341_v27, %v292_v26 }
  0xc2   :  { %729 = vst [vmem:[%s965_s2 + $0x28] sm:$0xff] %v713_v29   ;;  %v479_v53 = vmul.f32 %v342_v34, %v342_v34  ;;  %v457_v56 = vadd.f32 %v456_v52, %v342_v34 }
  0xc4   :  { %v312_v30 = vpop.f32.mrf.mxu2  ;;  %v494_v58 = vadd.f32 %v493_v55, %v479_v53 }
  0xc5   :  { %v361_v31 = vpop.f32.mrf.mxu3 }
  0xc6   :  { %v294_v32 = vpop.f32.mrf.mxu0  ;;  %v362_v38 = vadd.f32 %v361_v31, %v312_v30 }
  0xc7   :  { %v343_v33 = vpop.f32.mrf.mxu1 }
  0xc8   :  { %v344_v35 = vadd.f32 %v343_v33, %v294_v32 }
  0xca   :  { %v698_v36 = vpack.c.bf16 %v344_v35, %v342_v34  ;;  %v480_v57 = vmul.f32 %v344_v35, %v344_v35  ;;  %v458_v59 = vadd.f32 %v457_v56, %v344_v35 }
  0xcc   :  { %726 = vst [vmem:[%s965_s2 + $0x10] sm:$0xff] %v698_v36   ;;  %v314_v42 = vpop.f32.mrf.mxu2  ;;  %v495_v1 = vadd.f32 %v494_v58, %v480_v57 }
  0xcd   :  { %v363_v43 = vpop.f32.mrf.mxu3 }
  0xce   :  { %v297_v44 = vpop.f32.mrf.mxu0  ;;  %v364_v46 = vadd.f32 %v363_v43, %v314_v42 }
  0xcf   :  { %v346_v45 = vpop.f32.mrf.mxu1 }
  0xd0   :  { %v718_v50 = vpack.c.bf16 %v364_v46, %v362_v38  ;;  %v347_v54 = vadd.f32 %v346_v45, %v297_v44  ;;  %v488_v30 = vmul.f32 %v364_v46, %v364_v46 }
  0xd2   :  { %730 = vst [vmem:[%s965_s2 + $0x30] sm:$0xff] %v718_v50   ;;  %v481_v60 = vmul.f32 %v347_v54, %v347_v54  ;;  %v459_v2 = vadd.f32 %v458_v59, %v347_v54 }
  0xd4   :  { %v317_v61 = vpop.f32.mrf.mxu2  ;;  %v496_v4 = vadd.f32 %v495_v1, %v481_v60 }
  0xd5   :  { %v366_v62 = vpop.f32.mrf.mxu3 }
  0xd6   :  { %v299_v63 = vpop.f32.mrf.mxu0  ;;  %v367_v12 = vadd.f32 %v366_v62, %v317_v61 }
  0xd7   :  { %v348_v0 = vpop.f32.mrf.mxu1 }
  0xd8   :  { %v349_v3 = vadd.f32 %v348_v0, %v299_v63 }
  0xda   :  { %v703_v5 = vpack.c.bf16 %v349_v3, %v347_v54  ;;  %v460_v6 = vadd.f32 %v459_v2, %v349_v3  ;;  %v482_v7 = vmul.f32 %v349_v3, %v349_v3 }
  0xdc   :  { %727 = vst [vmem:[%s965_s2 + $0x18] sm:$0xff] %v703_v5   ;;  %v461_v10 = vadd.f32 %v460_v6, %v915_v9  ;;  %v497_v11 = vadd.f32 %v496_v4, %v482_v7  ;;  %v319_v17 = vpop.f32.mrf.mxu2  ;;  %v486_v9 = vmul.f32 %v929_v28, %v929_v28 }
  0xdd   :  { %v368_v18 = vpop.f32.mrf.mxu3 }
  0xde   :  { %v462_v15 = vadd.f32 %v461_v10, %v917_v14  ;;  %v498_v16 = vadd.f32 %v497_v11, %v483_v8  ;;  %v369_v19 = vadd.f32 %v368_v18, %v319_v17  ;;  %v487_v14 = vmul.f32 %v362_v38, %v362_v38 }
  0xe0   :  { %v463_v21 = vadd.f32 %v462_v15, %v927_v23  ;;  %v499_v22 = vadd.f32 %v498_v16, %v484_v13  ;;  %v723_v24 = vpack.c.bf16 %v369_v19, %v367_v12  ;;  %v489_v23 = vmul.f32 %v367_v12, %v367_v12 }
  0xe1   :  { %v490_v37 = vmul.f32 %v369_v19, %v369_v19 }
  0xe2   :  { %v500_v25 = vadd.f32 %v499_v22, %v485_v20  ;;  %v464_v26 = vadd.f32 %v463_v21, %v929_v28  ;;  %731 = vst [vmem:[%s965_s2 + $0x38] sm:$0xff] %v723_v24  }
  0xe4   :  { %v465_v27 = vadd.f32 %v464_v26, %v362_v38  ;;  %v501_v29 = vadd.f32 %v500_v25, %v486_v9 }
  0xe6   :  { %v466_v31 = vadd.f32 %v465_v27, %v364_v46  ;;  %v502_v32 = vadd.f32 %v501_v29, %v487_v14 }
  0xe8   :  { %v467_v33 = vadd.f32 %v466_v31, %v367_v12  ;;  %v503_v34 = vadd.f32 %v502_v32, %v488_v30 }
  0xea   :  { %v504_v35 = vadd.f32 %v503_v34, %v489_v23  ;;  %v468_v36 = vadd.f32 %v467_v33, %v369_v19 }
  0xec   :  { %v469_v39 = vrot.slane %v468_v36, 4  ;;  %v505_v40 = vadd.f32 %v504_v35, %v490_v37 }
  0xee   :  { %v470_v41 = vadd.f32 %v469_v39, %v468_v36  ;;  %v506_v28 = vrot.slane %v505_v40, 4 }
  0xf0   :  { %v471_v42 = vrot.slane %v470_v41, 2  ;;  %v507_v43 = vadd.f32 %v506_v28, %v505_v40 }
  0xf2   :  { %v472_v44 = vadd.f32 %v471_v42, %v470_v41  ;;  %v508_v45 = vrot.slane %v507_v43, 2 }
  0xf4   :  { %v473_v47 = vrot.slane %v472_v44, 1  ;;  %v509_v38 = vadd.f32 %v508_v45, %v507_v43 }
  0xf6   :  { %v510_v48 = vrot.slane %v509_v38, 1  ;;  %v474_v46 = vadd.f32 %v473_v47, %v472_v44 }
  0xf8   :  { %v511_v49 = vadd.f32 %v510_v48, %v509_v38 }
  0xfa   :  { %v513_v50 = vsel %vm512_vm0, %v474_v46, %v511_v49 }
  0xfb   :  { %v515_v51 = vsel %vm514_vm1, %v513_v50, 0.0 }
  0xfc   :  { %516 = vst [vmem:[%s966_s3] sm:$0xff] %v515_v51 }

// kernel: resnet34_forward.78
= control target key start
LH: loop header
LB: loop body
LE: loop exit
PB: predicated region body
PF: predicated region fallthrough
CT: control target
= control target key end

     0   :  { %s477_s6 = smov 0   ;;  %s569_s0 = inlined_call_operand.vmem [shape: bf16[2,10,10,64], index: 0, kind: input, shape index: {}]   ;;  %s570_s1 = inlined_call_operand.vmem [shape: bf16[2,8,8,64], index: 1, kind: output, shape index: {}]  }
   0x1 LB: > { %s439_s7 = sadd.s32 4294967295, %s465_s6   ;;  %p443_p0 = scmp.ge.s32.totalorder %s465_s6, 1  ;;  %s465_s6 = sphi %s477_s6, %s11_s6  }
   0x2   : > { %p87_p1 = scmp.lt.s32.totalorder %s465_s6, 3 }
   0x4   : > { %p88_p2 = pnand %p443_p0, %p87_p1 }
   0x5   : > { %p107_p3 = scmp.lt.s32.totalorder (!%p88_p2), %s439_s7, 1 }
   0x6   : > { %91 = sbr.rel (%p88_p2) target bundleno = 56 (0x38), region = 24 }
   0xb   : > { %s572_s7 = smov (!%p107_p3, %s439_s7), 1  ;;  %vm269_vm0 = vcmask 1046528   ;;  %vm326_vm1 = vcmask 1045504   ;;  %vm375_vm2 = vcmask 519168  }
   0xc   : > { %s450_s8 = smul.u32 80, %s572_s7  ;;  %s449_s12 = sshll.u32 %s572_s7, 5 }
   0xd   : > { %s524_s15 = scalar_lea.vmem %s570_s1, %s449_s12 }
   0xe   : > { %s491_s11 = scalar_lea.vmem %s569_s0, %s450_s8 }
   0xf   : > { %v117_v0 = vld [vmem:[%s491_s11] sm:$0xf]  ;;  %v118_v1 = vld [vmem:[%s491_s11 + $0x4] sm:$0x1]  ;;  %v119_v2 = vld [vmem:[%s491_s11 + $0x8] sm:$0xf] }
  0x10   : > { %v120_v3 = vld [vmem:[%s491_s11 + $0xc] sm:$0x1]  ;;  %v121_v4 = vld [vmem:[%s491_s11 + $0x10] sm:$0xf]  ;;  %v122_v5 = vld [vmem:[%s491_s11 + $0x14] sm:$0x1]  ;;  %v137_v6 = vunpack.c.l.bf16 %v117_v0  ;;  %v138_v7 = vunpack.c.l.bf16 %v118_v1  ;;  %v139_v8 = vunpack.c.l.bf16 %v119_v2 }
  0x11   : > { %v140_v9 = vunpack.c.l.bf16 %v120_v3  ;;  %v141_v10 = vunpack.c.l.bf16 %v121_v4  ;;  %v142_v11 = vunpack.c.l.bf16 %v122_v5  ;;  %v123_v12 = vld [vmem:[%s491_s11 + $0x18] sm:$0xf]  ;;  %v124_v13 = vld [vmem:[%s491_s11 + $0x1c] sm:$0x1]  ;;  %v125_v14 = vld [vmem:[%s491_s11 + $0x20] sm:$0xf] }
  0x12   : > { %v155_v15 = vmax.f32 %v137_v6, %v139_v8  ;;  %v143_v16 = vunpack.c.l.bf16 %v123_v12  ;;  %v144_v17 = vunpack.c.l.bf16 %v124_v13  ;;  %v126_v18 = vld [vmem:[%s491_s11 + $0x24] sm:$0x1]  ;;  %v503_v19 = vunpack.c.l.bf16 %v125_v14  ;;  %v127_v20 = vld [vmem:[%s491_s11 + $0x28] sm:$0xf]  ;;  %v128_v21 = vld [vmem:[%s491_s11 + $0x2c] sm:$0x1] }
  0x13   : > { %v156_v22 = vmax.f32 %v138_v7, %v140_v9  ;;  %v157_v23 = vmax.f32 %v139_v8, %v141_v10  ;;  %v158_v24 = vmax.f32 %v140_v9, %v142_v11  ;;  %v146_v25 = vunpack.c.l.bf16 %v126_v18  ;;  %v129_v50 = vld [vmem:[%s491_s11 + $0x30] sm:$0xf]  ;;  %v130_v51 = vld [vmem:[%s491_s11 + $0x34] sm:$0x1]  ;;  %v131_v4 = vld [vmem:[%s491_s11 + $0x38] sm:$0xf] }
  0x14   : > { %v205_v26 = vmax.f32 %v155_v15, %v141_v10  ;;  %v159_v27 = vmax.f32 %v141_v10, %v143_v16  ;;  %v160_v28 = vmax.f32 %v142_v11, %v144_v17  ;;  %v507_v29 = vunpack.c.l.bf16 %v127_v20  ;;  %v132_v9 = vld [vmem:[%s491_s11 + $0x3c] sm:$0x1]  ;;  %v133_v18 = vld [vmem:[%s491_s11 + $0x40] sm:$0xf] }
  0x15   : > { %v206_v30 = vmax.f32 %v156_v22, %v142_v11  ;;  %v207_v31 = vmax.f32 %v157_v23, %v143_v16  ;;  %v208_v32 = vmax.f32 %v158_v24, %v144_v17  ;;  %v509_v33 = vunpack.c.l.bf16 %v128_v21  ;;  %v134_v23 = vld [vmem:[%s491_s11 + $0x44] sm:$0x1] }
  0x16   : > { %v270_v34 = vrot.slane %v205_v26, 1  ;;  %v327_v35 = vrot.slane %v205_v26, 2  ;;  %v209_v36 = vmax.f32 %v159_v27, %v503_v19  ;;  %v210_v37 = vmax.f32 %v160_v28, %v146_v25 }
  0x17   : > { %v271_v38 = vrot.slane %v206_v30, 1  ;;  %v328_v39 = vrot.slane %v206_v30, 2  ;;  %v273_v40 = vrot.slane %v207_v31, 1  ;;  %v274_v41 = vrot.slane %v208_v32, 1 }
  0x18   : > { %v330_v42 = vrot.slane %v207_v31, 2  ;;  %v331_v43 = vrot.slane %v208_v32, 2  ;;  %v276_v44 = vrot.slane %v209_v36, 1  ;;  %v277_v45 = vrot.slane %v210_v37, 1 }
  0x19   : > { %v272_v46 = vsel %vm269_vm0, %v270_v34, %v271_v38  ;;  %v329_v47 = vsel %vm326_vm1, %v327_v35, %v328_v39  ;;  %v275_v48 = vsel %vm269_vm0, %v273_v40, %v274_v41  ;;  %v333_v49 = vrot.slane %v209_v36, 2 }
  0x1a   : > { %v302_v52 = vmax.f32 %v205_v26, %v272_v46  ;;  %v303_v53 = vmax.f32 %v207_v31, %v275_v48  ;;  %v332_v54 = vsel %vm326_vm1, %v330_v42, %v331_v43  ;;  %v278_v55 = vsel %vm269_vm0, %v276_v44, %v277_v45  ;;  %v135_v45 = vld [vmem:[%s491_s11 + $0x48] sm:$0xf]  ;;  %v136_v48 = vld [vmem:[%s491_s11 + $0x4c] sm:$0x1] }
  0x1b   : > { %v304_v56 = vmax.f32 %v209_v36, %v278_v55  ;;  %v334_v57 = vrot.slane %v210_v37, 2  ;;  %v161_v58 = vmax.f32 %v143_v16, %v503_v19  ;;  %v162_v59 = vmax.f32 %v144_v17, %v146_v25 }
  0x1c   : > { %v359_v60 = vmax.f32 %v302_v52, %v329_v47  ;;  %v360_v61 = vmax.f32 %v303_v53, %v332_v54  ;;  %v149_v62 = vunpack.c.l.bf16 %v129_v50  ;;  %v150_v63 = vunpack.c.l.bf16 %v130_v51 }
  0x1d   : > { %v335_v0 = vsel %vm326_vm1, %v333_v49, %v334_v57  ;;  %v211_v1 = vmax.f32 %v161_v58, %v507_v29  ;;  %v212_v2 = vmax.f32 %v162_v59, %v509_v33  ;;  %v163_v3 = vmax.f32 %v503_v19, %v507_v29 }
  0x1e   : > { %v367_v5 = vpack.c.bf16 %v359_v60, %v359_v60  ;;  %v368_v6 = vpack.c.bf16 %v360_v61, %v360_v61  ;;  %v361_v7 = vmax.f32 %v304_v56, %v335_v0  ;;  %v164_v8 = vmax.f32 %v146_v25, %v509_v33 }
  0x1f   : > { %v279_v10 = vrot.slane %v211_v1, 1  ;;  %v280_v11 = vrot.slane %v212_v2, 1  ;;  %v336_v12 = vrot.slane %v211_v1, 2  ;;  %v337_v13 = vrot.slane %v212_v2, 2 }
  0x20   : > { %376 = vst.msk [vmem:[%s524_s15] sm:$0xf] %vm375_vm2, %v367_v5  ;;  %v369_v14 = vpack.c.bf16 %v361_v7, %v361_v7  ;;  %v213_v15 = vmax.f32 %v163_v3, %v149_v62  ;;  %v214_v16 = vmax.f32 %v164_v8, %v150_v63  ;;  %v151_v17 = vunpack.c.l.bf16 %v131_v4 }
  0x21   : > { %377 = vst.msk [vmem:[%s524_s15 + $0x4] sm:$0xf] %vm375_vm2, %v368_v6  ;;  %v281_v19 = vsel %vm269_vm0, %v279_v10, %v280_v11  ;;  %v338_v20 = vsel %vm326_vm1, %v336_v12, %v337_v13  ;;  %v152_v21 = vunpack.c.l.bf16 %v132_v9  ;;  %v165_v22 = vmax.f32 %v507_v29, %v149_v62 }
  0x22   : > { %378 = vst.msk [vmem:[%s524_s15 + $0x8] sm:$0xf] %vm375_vm2, %v369_v14  ;;  %v305_v24 = vmax.f32 %v211_v1, %v281_v19  ;;  %v282_v25 = vrot.slane %v213_v15, 1  ;;  %v283_v26 = vrot.slane %v214_v16, 1  ;;  %v339_v27 = vrot.slane %v213_v15, 2 }
  0x23   : > { %v340_v28 = vrot.slane %v214_v16, 2  ;;  %v166_v30 = vmax.f32 %v509_v33, %v150_v63  ;;  %v215_v31 = vmax.f32 %v165_v22, %v151_v17  ;;  %v153_v32 = vunpack.c.l.bf16 %v133_v18 }
  0x24   : > { %v362_v34 = vmax.f32 %v305_v24, %v338_v20  ;;  %v284_v35 = vsel %vm269_vm0, %v282_v25, %v283_v26  ;;  %v154_v36 = vunpack.c.l.bf16 %v134_v23  ;;  %v167_v29 = vmax.f32 %v149_v62, %v151_v17 }
  0x25   : > { %v306_v37 = vmax.f32 %v213_v15, %v284_v35  ;;  %v341_v38 = vsel %vm326_vm1, %v339_v27, %v340_v28  ;;  %v216_v39 = vmax.f32 %v166_v30, %v152_v21  ;;  %v285_v40 = vrot.slane %v215_v31, 1 }
  0x26   : > { %v370_v41 = vpack.c.bf16 %v362_v34, %v362_v34  ;;  %v342_v42 = vrot.slane %v215_v31, 2  ;;  %v168_v43 = vmax.f32 %v150_v63, %v152_v21  ;;  %v217_v44 = vmax.f32 %v167_v29, %v153_v32 }
  0x27   : > { %v363_v33 = vmax.f32 %v306_v37, %v341_v38  ;;  %v286_v46 = vrot.slane %v216_v39, 1  ;;  %v343_v47 = vrot.slane %v216_v39, 2  ;;  %v169_v49 = vmax.f32 %v151_v17, %v153_v32 }
  0x28   : > { %379 = vst.msk [vmem:[%s524_s15 + $0xc] sm:$0xf] %vm375_vm2, %v370_v41  ;;  %v218_v50 = vmax.f32 %v168_v43, %v154_v36  ;;  %v288_v51 = vrot.slane %v217_v44, 1  ;;  %v345_v52 = vrot.slane %v217_v44, 2  ;;  %v170_v53 = vmax.f32 %v152_v21, %v154_v36 }
  0x29   : > { %v371_v54 = vpack.c.bf16 %v363_v33, %v363_v33  ;;  %v287_v55 = vsel %vm269_vm0, %v285_v40, %v286_v46  ;;  %v344_v56 = vsel %vm326_vm1, %v342_v42, %v343_v47  ;;  %v203_v57 = vunpack.c.l.bf16 %v135_v45 }
  0x2a   : > { %v307_v58 = vmax.f32 %v215_v31, %v287_v55  ;;  %v289_v59 = vrot.slane %v218_v50, 1  ;;  %v346_v60 = vrot.slane %v218_v50, 2  ;;  %v204_v61 = vunpack.c.l.bf16 %v136_v48 }
  0x2b   : > { %380 = vst.msk [vmem:[%s524_s15 + $0x10] sm:$0xf] %vm375_vm2, %v371_v54  ;;  %v219_v62 = vmax.f32 %v169_v49, %v203_v57 }
  0x2c   : > { %v364_v63 = vmax.f32 %v307_v58, %v344_v56  ;;  %v290_v0 = vsel %vm269_vm0, %v288_v51, %v289_v59  ;;  %v347_v1 = vsel %vm326_vm1, %v345_v52, %v346_v60  ;;  %v220_v2 = vmax.f32 %v170_v53, %v204_v61 }
  0x2d   : > { %v308_v3 = vmax.f32 %v217_v44, %v290_v0  ;;  %v291_v4 = vrot.slane %v219_v62, 1  ;;  %v348_v5 = vrot.slane %v219_v62, 2 }
  0x2e   : > { %v372_v6 = vpack.c.bf16 %v364_v63, %v364_v63  ;;  %v292_v7 = vrot.slane %v220_v2, 1  ;;  %v349_v8 = vrot.slane %v220_v2, 2 }
  0x2f   : > { %v365_v9 = vmax.f32 %v308_v3, %v347_v1 }
  0x30   : > { %381 = vst.msk [vmem:[%s524_s15 + $0x14] sm:$0xf] %vm375_vm2, %v372_v6  ;;  %v293_v10 = vsel %vm269_vm0, %v291_v4, %v292_v7  ;;  %v350_v11 = vsel %vm326_vm1, %v348_v5, %v349_v8 }
  0x31   : > { %v373_v12 = vpack.c.bf16 %v365_v9, %v365_v9  ;;  %v309_v13 = vmax.f32 %v219_v62, %v293_v10 }
  0x33   : > { %382 = vst.msk [vmem:[%s524_s15 + $0x18] sm:$0xf] %vm375_vm2, %v373_v12  ;;  %v366_v14 = vmax.f32 %v309_v13, %v350_v11 }
  0x35   : > { %v374_v15 = vpack.c.bf16 %v366_v14, %v366_v14 }
  0x37   : > { %383 = vst.msk [vmem:[%s524_s15 + $0x1c] sm:$0xf] %vm375_vm2, %v374_v15 }
  0x38 PF: > { %s11_s6 = sadd.s32 1, %s465_s6  }
  0x39   : > { %p8_p4 = scmp.ge.s32.totalorder %s11_s6, 4  }
  0x3b   :  { %10 = sbr.rel (!%p8_p4) target bundleno = 1 (0x1), region = 54 }

// kernel: resnet34_forward.80
= control target key start
LH: loop header
LB: loop body
LE: loop exit
PB: predicated region body
PF: predicated region fallthrough
CT: control target
= control target key end

     0   :  { %s83_s0 = inlined_call_operand.vmem [shape: bf16[16,128], index: 0, kind: input, shape index: {}]   ;;  %s84_s1 = inlined_call_operand.vmem [shape: f32[1,128], index: 1, kind: input, shape index: {}]   ;;  %s85_s2 = inlined_call_operand.vmem [shape: f32[1,128], index: 2, kind: input, shape index: {}]   ;;  %s86_s3 = inlined_call_operand.vmem [shape: bf16[16,128], index: 3, kind: output, shape index: {}]  }
   0x1   :  { %v41_v0 = vld [vmem:[%s83_s0] sm:$0xff]  }
   0x2   :  { %v49_v1 = vld [vmem:[%s84_s1] ss:$0 sm:$0xff]  ;;  %v42_v2 = vunpack.c.l.bf16 %v41_v0  ;;  %v43_v3 = vunpack.c.h.bf16 %v41_v0 }
   0x3   :  { %v50_v4 = vld [vmem:[%s85_s2] ss:$0 sm:$0xff] }
   0x4   :  { %v22_v5 = vmul.f32 %v49_v1, %v42_v2  ;;  %v23_v6 = vmul.f32 %v49_v1, %v43_v3 }
   0x6   :  { %v28_v7 = vadd.f32 %v50_v4, %v22_v5  ;;  %v29_v8 = vadd.f32 %v50_v4, %v23_v6 }
   0x8   :  { %v30_v9 = vmax.f32 %v28_v7, 0.0  ;;  %v31_v10 = vmax.f32 %v29_v8, 0.0 }
   0xa   :  { %v47_v11 = vpack.c.bf16 %v31_v10, %v30_v9 }
   0xc   :  { %48 = vst [vmem:[%s86_s3] sm:$0xff] %v47_v11  }

// kernel: resnet34_forward.82
= control target key start
LH: loop header
LB: loop body
LE: loop exit
PB: predicated region body
PF: predicated region fallthrough
CT: control target
= control target key end

     0   :  { %s81_s0 = inlined_call_operand.vmem [shape: bf16[16,128], index: 0, kind: input, shape index: {}]   ;;  %s82_s1 = inlined_call_operand.vmem [shape: f32[1,128], index: 1, kind: input, shape index: {}]   ;;  %s83_s2 = inlined_call_operand.vmem [shape: f32[1,128], index: 2, kind: input, shape index: {}]   ;;  %s84_s3 = inlined_call_operand.vmem [shape: bf16[16,128], index: 3, kind: output, shape index: {}]  }
   0x1   :  { %v39_v0 = vld [vmem:[%s81_s0] sm:$0xff]  }
   0x2   :  { %v47_v1 = vld [vmem:[%s82_s1] ss:$0 sm:$0xff]  ;;  %v40_v2 = vunpack.c.l.bf16 %v39_v0  ;;  %v41_v3 = vunpack.c.h.bf16 %v39_v0 }
   0x3   :  { %v48_v4 = vld [vmem:[%s83_s2] ss:$0 sm:$0xff] }
   0x4   :  { %v22_v5 = vmul.f32 %v47_v1, %v40_v2  ;;  %v23_v6 = vmul.f32 %v47_v1, %v41_v3 }
   0x6   :  { %v28_v7 = vadd.f32 %v48_v4, %v22_v5  ;;  %v29_v8 = vadd.f32 %v48_v4, %v23_v6 }
   0x8   :  { %v45_v9 = vpack.c.bf16 %v29_v8, %v28_v7 }
   0xa   :  { %46 = vst [vmem:[%s84_s3] sm:$0xff] %v45_v9  }

// kernel: resnet34_forward.81
= control target key start
LH: loop header
LB: loop body
LE: loop exit
PB: predicated region body
PF: predicated region fallthrough
CT: control target
= control target key end

     0   :  { %vm549_vm0 = vcmask 1040384   ;;  %vm551_vm1 = vcmask 1041408   ;;  %s1040_s1 = inlined_call_operand.vmem [shape: bf16[640,128], index: 1, kind: input, shape index: {}]   ;;  %s1041_s0 = inlined_call_operand.vmem [shape: bf16[32,640], index: 0, kind: input, shape index: {}]   ;;  %s1042_s2 = inlined_call_operand.vmem [shape: bf16[32,128], index: 2, kind: output, shape index: {0}]   ;;  %s1043_s3 = inlined_call_operand.vmem [shape: f32[1,8,128], index: 3, kind: output, shape index: {1}]  }
   0x1   :  { %v779_v0 = vld [vmem:[%s1040_s1 + $0x38] sm:$0xff]  ;;  %v778_v4 = vld [vmem:[%s1040_s1 + $0x30] sm:$0xff]  ;;  %v777_v8 = vld [vmem:[%s1040_s1 + $0x28] sm:$0xff] }
   0x2   :  { %v787_v1 = vld [vmem:[%s1040_s1 + $0x78] sm:$0xff]  ;;  %409 = vmatpush.bf16.msra.mxu0 %v779_v0  ;;  %v786_v5 = vld [vmem:[%s1040_s1 + $0x70] sm:$0xff]  ;;  %v785_v9 = vld [vmem:[%s1040_s1 + $0x68] sm:$0xff] }
   0x3   :  { %v795_v2 = vld [vmem:[%s1040_s1 + $0xb8] sm:$0xff]  ;;  %428 = vmatpush.bf16.msra.mxu1 %v787_v1  ;;  %v794_v6 = vld [vmem:[%s1040_s1 + $0xb0] sm:$0xff]  ;;  %v793_v10 = vld [vmem:[%s1040_s1 + $0xa8] sm:$0xff] }
   0x4   :  { %v803_v3 = vld [vmem:[%s1040_s1 + $0xf8] sm:$0xff]  ;;  %447 = vmatpush.bf16.msra.mxu2 %v795_v2  ;;  %v802_v7 = vld [vmem:[%s1040_s1 + $0xf0] sm:$0xff]  ;;  %v801_v11 = vld [vmem:[%s1040_s1 + $0xe8] sm:$0xff] }
   0x5   :  { %466 = vmatpush.bf16.msra.mxu3 %v803_v3  ;;  %v776_v12 = vld [vmem:[%s1040_s1 + $0x20] sm:$0xff]  ;;  %v775_v16 = vld [vmem:[%s1040_s1 + $0x18] sm:$0xff]  ;;  %v774_v20 = vld [vmem:[%s1040_s1 + $0x10] sm:$0xff] }
   0x6   :  { %410 = vmatpush.bf16.msra.mxu0 %v778_v4  ;;  %v784_v13 = vld [vmem:[%s1040_s1 + $0x60] sm:$0xff]  ;;  %v783_v17 = vld [vmem:[%s1040_s1 + $0x58] sm:$0xff]  ;;  %v782_v21 = vld [vmem:[%s1040_s1 + $0x50] sm:$0xff] }
   0x7   :  { %429 = vmatpush.bf16.msra.mxu1 %v786_v5  ;;  %v792_v14 = vld [vmem:[%s1040_s1 + $0xa0] sm:$0xff]  ;;  %v791_v18 = vld [vmem:[%s1040_s1 + $0x98] sm:$0xff]  ;;  %v790_v22 = vld [vmem:[%s1040_s1 + $0x90] sm:$0xff] }
   0x8   :  { %448 = vmatpush.bf16.msra.mxu2 %v794_v6  ;;  %v800_v15 = vld [vmem:[%s1040_s1 + $0xe0] sm:$0xff]  ;;  %v799_v19 = vld [vmem:[%s1040_s1 + $0xd8] sm:$0xff]  ;;  %v798_v23 = vld [vmem:[%s1040_s1 + $0xd0] sm:$0xff] }
   0x9   :  { %467 = vmatpush.bf16.msra.mxu3 %v802_v7  ;;  %v773_v24 = vld [vmem:[%s1040_s1 + $0x8] sm:$0xff]  ;;  %v772_v28 = vld [vmem:[%s1040_s1] sm:$0xff]  ;;  %v764_v33 = vld [vmem:[%s1041_s0 + $0x10] sm:$0xf0] }
   0xa   :  { %411 = vmatpush.bf16.msra.mxu0 %v777_v8  ;;  %v781_v25 = vld [vmem:[%s1040_s1 + $0x48] sm:$0xff]  ;;  %v780_v29 = vld [vmem:[%s1040_s1 + $0x40] sm:$0xff]  ;;  %v566_v35 = vld [vmem:[%s1041_s0 + $0x14] sm:$0xf0] }
   0xb   :  { %430 = vmatpush.bf16.msra.mxu1 %v785_v9  ;;  %v789_v26 = vld [vmem:[%s1040_s1 + $0x88] sm:$0xff]  ;;  %v788_v30 = vld [vmem:[%s1040_s1 + $0x80] sm:$0xff]  ;;  %v765_v37 = vld [vmem:[%s1041_s0 + $0x18] sm:$0xf0] }
   0xc   :  { %449 = vmatpush.bf16.msra.mxu2 %v793_v10  ;;  %v797_v27 = vld [vmem:[%s1040_s1 + $0xc8] sm:$0xff]  ;;  %v796_v31 = vld [vmem:[%s1040_s1 + $0xc0] sm:$0xff]  ;;  %v811_v40 = vld [vmem:[%s1040_s1 + $0x138] sm:$0xff] }
   0xd   :  { %468 = vmatpush.bf16.msra.mxu3 %v801_v11  ;;  %v564_v32 = vld [vmem:[%s1041_s0] sm:$0xf]  ;;  %v762_v34 = vld [vmem:[%s1041_s0 + $0x4] sm:$0xf]  ;;  %v572_v36 = vld [vmem:[%s1041_s0 + $0x8] sm:$0xf] }
   0xe   :  { %412 = vmatpush.bf16.msra.mxu0 %v776_v12  ;;  %v763_v38 = vld [vmem:[%s1041_s0 + $0xc] sm:$0xf]  ;;  %v574_v39 = vld [vmem:[%s1041_s0 + $0x1c] sm:$0xf0]  ;;  %v565_v41 = vor.u32 %v764_v33, %v564_v32  ;;  %v569_v42 = vor.u32 %v762_v34, %v566_v35  ;;  %v573_v43 = vor.u32 %v765_v37, %v572_v36  ;;  %v810_v45 = vld [vmem:[%s1040_s1 + $0x130] sm:$0xff] }
   0xf   :  { %431 = vmatpush.bf16.msra.mxu1 %v784_v13  ;;  %v577_v44 = vor.u32 %v763_v38, %v574_v39  ;;  %v809_v46 = vld [vmem:[%s1040_s1 + $0x128] sm:$0xff]  ;;  %v808_v47 = vld [vmem:[%s1040_s1 + $0x120] sm:$0xff]  ;;  %v769_v49 = vld [vmem:[%s1041_s0 + $0x38] sm:$0xf0] }
  0x10   :  { %450 = vmatpush.bf16.msra.mxu2 %v792_v14  ;;  %v584_v48 = vld [vmem:[%s1041_s0 + $0x28] sm:$0xf]  ;;  %v767_v50 = vld [vmem:[%s1041_s0 + $0x2c] sm:$0xf]  ;;  %v586_v51 = vld [vmem:[%s1041_s0 + $0x3c] sm:$0xf0] }
  0x11   :  { %469 = vmatpush.bf16.msra.mxu3 %v800_v15  ;;  %v592_v52 = vld [vmem:[%s1041_s0 + $0x30] sm:$0xf]  ;;  %v770_v53 = vld [vmem:[%s1041_s0 + $0x40] sm:$0xf0]  ;;  %v768_v54 = vld [vmem:[%s1041_s0 + $0x34] sm:$0xf]  ;;  %v585_v57 = vor.u32 %v769_v49, %v584_v48  ;;  %v589_v58 = vor.u32 %v767_v50, %v586_v51 }
  0x12   :  { %413 = vmatpush.bf16.msra.mxu0 %v775_v16  ;;  %v594_v55 = vld [vmem:[%s1041_s0 + $0x44] sm:$0xf0]  ;;  %v807_v56 = vld [vmem:[%s1040_s1 + $0x118] sm:$0xff]  ;;  %v593_v59 = vor.u32 %v770_v53, %v592_v52  ;;  %v806_v61 = vld [vmem:[%s1040_s1 + $0x110] sm:$0xff] }
  0x13   :  { %432 = vmatpush.bf16.msra.mxu1 %v783_v17  ;;  %v597_v60 = vor.u32 %v768_v54, %v594_v55  ;;  %v805_v62 = vld [vmem:[%s1040_s1 + $0x108] sm:$0xff]  ;;  %v804_v63 = vld [vmem:[%s1040_s1 + $0x100] sm:$0xff]  ;;  %v580_v0 = vld [vmem:[%s1041_s0 + $0x10] sm:$0xf] }
  0x14   :  { %451 = vmatpush.bf16.msra.mxu2 %v791_v18  ;;  %v766_v1 = vld [vmem:[%s1041_s0 + $0x20] sm:$0xf0]  ;;  %v600_v2 = vld [vmem:[%s1041_s0 + $0x38] sm:$0xf]  ;;  %v771_v3 = vld [vmem:[%s1041_s0 + $0x48] sm:$0xf0] }
  0x15   :  { %470 = vmatpush.bf16.msra.mxu3 %v799_v19  ;;  %v581_v4 = vor.u32 %v766_v1, %v580_v0  ;;  %v601_v5 = vor.u32 %v771_v3, %v600_v2 }
  0x16   :  { %414 = vmatpush.bf16.msra.mxu0 %v774_v20 }
  0x17   :  { %433 = vmatpush.bf16.msra.mxu1 %v782_v21 }
  0x18   :  { %452 = vmatpush.bf16.msra.mxu2 %v790_v22 }
  0x19   :  { %471 = vmatpush.bf16.msra.mxu3 %v798_v23 }
  0x1a   :  { %415 = vmatpush.bf16.msra.mxu0 %v773_v24 }
  0x1b   :  { %434 = vmatpush.bf16.msra.mxu1 %v781_v25 }
  0x1c   :  { %453 = vmatpush.bf16.msra.mxu2 %v789_v26 }
  0x1d   :  { %472 = vmatpush.bf16.msra.mxu3 %v797_v27 }
  0x1e   :  { %416 = vmatpush.bf16.msra.mxu0 %v772_v28 }
  0x1f   :  { %435 = vmatpush.bf16.msra.mxu1 %v780_v29 }
  0x20   :  { %454 = vmatpush.bf16.msra.mxu2 %v788_v30 }
  0x21   :  { %473 = vmatpush.bf16.msra.mxu3 %v796_v31  ;;  %417 = vmatmul.bf16.vlgmr.msra.gmra.mxu0 %v565_v41 }
  0x22   :  { %485 = vmatpush.bf16.msrb.mxu0 %v811_v40  ;;  %436 = vmatmul.bf16.vlgmr.msra.gmra.mxu1 %v569_v42 }
  0x23   :  { %823 = vmatpush.bf16.msrb.mxu1 %v811_v40  ;;  %455 = vmatmul.bf16.vlgmr.msra.gmra.mxu2 %v573_v43 }
  0x24   :  { %474 = vmatmul.bf16.vlgmr.msra.gmra.mxu3 %v577_v44 }
  0x26   :  { %486 = vmatpush.bf16.msrb.mxu0 %v810_v45 }
  0x27   :  { %824 = vmatpush.bf16.msrb.mxu1 %v810_v45 }
  0x2a   :  { %487 = vmatpush.bf16.msrb.mxu0 %v809_v46 }
  0x2b   :  { %825 = vmatpush.bf16.msrb.mxu1 %v809_v46 }
  0x2e   :  { %488 = vmatpush.bf16.msrb.mxu0 %v808_v47 }
  0x2f   :  { %826 = vmatpush.bf16.msrb.mxu1 %v808_v47 }
  0x31   :  { %422 = vmatmul.bf16.gmra.mxu0 %v585_v57 }
  0x32   :  { %489 = vmatpush.bf16.msrb.mxu0 %v807_v56  ;;  %441 = vmatmul.bf16.gmra.mxu1 %v589_v58 }
  0x33   :  { %827 = vmatpush.bf16.msrb.mxu1 %v807_v56  ;;  %460 = vmatmul.bf16.gmra.mxu2 %v593_v59 }
  0x34   :  { %479 = vmatmul.bf16.gmra.mxu3 %v597_v60 }
  0x36   :  { %490 = vmatpush.bf16.msrb.mxu0 %v806_v61 }
  0x37   :  { %828 = vmatpush.bf16.msrb.mxu1 %v806_v61 }
  0x3a   :  { %491 = vmatpush.bf16.msrb.mxu0 %v805_v62 }
  0x3b   :  { %829 = vmatpush.bf16.msrb.mxu1 %v805_v62 }
  0x3e   :  { %492 = vmatpush.bf16.msrb.mxu0 %v804_v63 }
  0x3f   :  { %830 = vmatpush.bf16.msrb.mxu1 %v804_v63 }
  0x41   :  { %493 = vmatmul.bf16.vlgmr.msrb.gmra.mxu0 %v581_v4 }
  0x42   :  { %498 = vmatmul.bf16.vlgmr.msrb.gmra.mxu1 %v601_v5 }
  0x9e   :  { %v418_v6 = vpop.f32.mrf.mxu0 }
  0x9f   :  { %v437_v7 = vpop.f32.mrf.mxu1 }
  0xa0   :  { %v438_v20 = vadd.f32 %v437_v7, %v418_v6 }
  0xa6   :  { %v456_v8 = vpop.f32.mrf.mxu2  ;;  %v420_v10 = vpop.f32.mrf.mxu0 }
  0xa7   :  { %v475_v9 = vpop.f32.mrf.mxu3  ;;  %v439_v11 = vpop.f32.mrf.mxu1  ;;  %v457_v22 = vadd.f32 %v456_v8, %v438_v20 }
  0xa8   :  { %v440_v25 = vadd.f32 %v439_v11, %v420_v10 }
  0xa9   :  { %v476_v31 = vadd.f32 %v475_v9, %v457_v22 }
  0xae   :  { %v458_v12 = vpop.f32.mrf.mxu2  ;;  %v423_v14 = vpop.f32.mrf.mxu0 }
  0xaf   :  { %v477_v13 = vpop.f32.mrf.mxu3  ;;  %v442_v15 = vpop.f32.mrf.mxu1  ;;  %v459_v28 = vadd.f32 %v458_v12, %v440_v25 }
  0xb0   :  { %v443_v26 = vadd.f32 %v442_v15, %v423_v14 }
  0xb1   :  { %v478_v34 = vadd.f32 %v477_v13, %v459_v28 }
  0xb6   :  { %v461_v16 = vpop.f32.mrf.mxu2  ;;  %v425_v17 = vpop.f32.mrf.mxu0 }
  0xb7   :  { %v444_v18 = vpop.f32.mrf.mxu1  ;;  %v480_v19 = vpop.f32.mrf.mxu3  ;;  %v462_v29 = vadd.f32 %v461_v16, %v443_v26 }
  0xb8   :  { %v445_v27 = vadd.f32 %v444_v18, %v425_v17 }
  0xb9   :  { %v481_v35 = vadd.f32 %v480_v19, %v462_v29 }
  0xbe   :  { %v463_v21 = vpop.f32.mrf.mxu2  ;;  %v494_v23 = vpop.f32.mrf.mxu0 }
  0xbf   :  { %v499_v24 = vpop.f32.mrf.mxu1  ;;  %v464_v30 = vadd.f32 %v463_v21, %v445_v27  ;;  %v482_v32 = vpop.f32.mrf.mxu3  ;;  %v495_v33 = vadd.f32 %v494_v23, %v476_v31 }
  0xc0   :  { %v500_v39 = vadd.f32 %v499_v24, %v481_v35 }
  0xc1   :  { %v483_v36 = vadd.f32 %v482_v32, %v464_v30  ;;  %v536_v42 = vmul.f32 %v495_v33, %v495_v33 }
  0xc2   :  { %v538_v47 = vmul.f32 %v500_v39, %v500_v39 }
  0xc6   :  { %v496_v37 = vpop.f32.mrf.mxu0 }
  0xc7   :  { %v501_v38 = vpop.f32.mrf.mxu1  ;;  %v497_v40 = vadd.f32 %v496_v37, %v478_v34 }
  0xc8   :  { %v502_v41 = vadd.f32 %v501_v38, %v483_v36 }
  0xc9   :  { %v815_v43 = vpack.c.bf16 %v497_v40, %v495_v33  ;;  %v527_v44 = vadd.f32 %v497_v40, %v495_v33  ;;  %v537_v45 = vmul.f32 %v497_v40, %v497_v40 }
  0xca   :  { %v820_v46 = vpack.c.bf16 %v502_v41, %v500_v39  ;;  %v539_v51 = vmul.f32 %v502_v41, %v502_v41 }
  0xcb   :  { %816 = vst [vmem:[%s1042_s2] sm:$0xff] %v815_v43   ;;  %v540_v48 = vadd.f32 %v537_v45, %v536_v42  ;;  %v528_v49 = vadd.f32 %v527_v44, %v500_v39 }
  0xcc   :  { %822 = vst [vmem:[%s1042_s2 + $0x8] sm:$0xff] %v820_v46  }
  0xcd   :  { %v529_v50 = vadd.f32 %v528_v49, %v502_v41  ;;  %v541_v52 = vadd.f32 %v540_v48, %v538_v47 }
  0xcf   :  { %v530_v53 = vrot.slane %v529_v50, 4  ;;  %v542_v54 = vadd.f32 %v541_v52, %v539_v51 }
  0xd1   :  { %v531_v55 = vadd.f32 %v530_v53, %v529_v50  ;;  %v543_v56 = vrot.slane %v542_v54, 4 }
  0xd3   :  { %v532_v57 = vrot.slane %v531_v55, 2  ;;  %v544_v58 = vadd.f32 %v543_v56, %v542_v54 }
  0xd5   :  { %v533_v59 = vadd.f32 %v532_v57, %v531_v55  ;;  %v545_v60 = vrot.slane %v544_v58, 2 }
  0xd7   :  { %v534_v61 = vrot.slane %v533_v59, 1  ;;  %v546_v62 = vadd.f32 %v545_v60, %v544_v58 }
  0xd9   :  { %v547_v63 = vrot.slane %v546_v62, 1  ;;  %v535_v0 = vadd.f32 %v534_v61, %v533_v59 }
  0xdb   :  { %v548_v1 = vadd.f32 %v547_v63, %v546_v62 }
  0xdd   :  { %v550_v2 = vsel %vm549_vm0, %v535_v0, %v548_v1 }
  0xde   :  { %v552_v3 = vsel %vm551_vm1, %v550_v2, 0.0 }
  0xdf   :  { %553 = vst [vmem:[%s1043_s3] sm:$0xff] %v552_v3 }

// kernel: resnet34_forward.84
= control target key start
LH: loop header
LB: loop body
LE: loop exit
PB: predicated region body
PF: predicated region fallthrough
CT: control target
= control target key end

     0   :  { %s104_s0 = inlined_call_operand.vmem [shape: bf16[16,128], index: 0, kind: input, shape index: {}]   ;;  %s105_s1 = inlined_call_operand.vmem [shape: f32[1,128], index: 1, kind: input, shape index: {}]   ;;  %s106_s2 = inlined_call_operand.vmem [shape: f32[1,128], index: 2, kind: input, shape index: {}]   ;;  %s107_s3 = inlined_call_operand.vmem [shape: bf16[16,128], index: 3, kind: input, shape index: {}]   ;;  %s108_s4 = inlined_call_operand.vmem [shape: bf16[16,128], index: 4, kind: output, shape index: {}]  }
   0x1   :  { %v50_v0 = vld [vmem:[%s104_s0] sm:$0xff]  }
   0x2   :  { %v62_v1 = vld [vmem:[%s105_s1] ss:$0 sm:$0xff]  ;;  %v51_v2 = vunpack.c.l.bf16 %v50_v0  ;;  %v52_v3 = vunpack.c.h.bf16 %v50_v0 }
   0x3   :  { %v63_v4 = vld [vmem:[%s106_s2] ss:$0 sm:$0xff] }
   0x4   :  { %v54_v5 = vld [vmem:[%s107_s3] sm:$0xff]   ;;  %v25_v6 = vmul.f32 %v62_v1, %v51_v2  ;;  %v26_v7 = vmul.f32 %v62_v1, %v52_v3 }
   0x5   :  { %v55_v8 = vunpack.c.l.bf16 %v54_v5  ;;  %v56_v9 = vunpack.c.h.bf16 %v54_v5 }
   0x6   :  { %v31_v10 = vadd.f32 %v63_v4, %v25_v6  ;;  %v32_v11 = vadd.f32 %v63_v4, %v26_v7 }
   0x8   :  { %v37_v12 = vadd.f32 %v55_v8, %v31_v10  ;;  %v38_v13 = vadd.f32 %v56_v9, %v32_v11 }
   0xa   :  { %v39_v14 = vmax.f32 %v37_v12, 0.0  ;;  %v40_v15 = vmax.f32 %v38_v13, 0.0 }
   0xc   :  { %v60_v16 = vpack.c.bf16 %v40_v15, %v39_v14 }
   0xe   :  { %61 = vst [vmem:[%s108_s4] sm:$0xff] %v60_v16  }

// kernel: resnet34_forward.96
= control target key start
LH: loop header
LB: loop body
LE: loop exit
PB: predicated region body
PF: predicated region fallthrough
CT: control target
= control target key end

     0   :  { %s66_s0 = inlined_call_operand.vmem [shape: bf16[8,128], index: 0, kind: input, shape index: {}]   ;;  %s67_s1 = inlined_call_operand.vmem [shape: f32[1,128], index: 1, kind: input, shape index: {}]   ;;  %s68_s2 = inlined_call_operand.vmem [shape: f32[1,128], index: 2, kind: input, shape index: {}]   ;;  %s69_s3 = inlined_call_operand.vmem [shape: bf16[8,128], index: 3, kind: output, shape index: {}]  }
   0x1   :  { %v14_v0 = vld [vmem:[%s66_s0] sm:$0xf] }
   0x2   :  { %v32_v1 = vld [vmem:[%s67_s1] ss:$0 sm:$0xff]  ;;  %v15_v2 = vunpack.c.l.bf16 %v14_v0 }
   0x3   :  { %v33_v3 = vld [vmem:[%s68_s2] ss:$0 sm:$0xff] }
   0x4   :  { %v20_v4 = vmul.f32 %v32_v1, %v15_v2 }
   0x6   :  { %v25_v5 = vadd.f32 %v33_v3, %v20_v4 }
   0x8   :  { %v26_v6 = vpack.c.bf16 %v25_v5, %v25_v5 }
   0xa   :  { %27 = vst [vmem:[%s69_s3] sm:$0xf] %v26_v6 }

// kernel: resnet34_forward.95
= control target key start
LH: loop header
LB: loop body
LE: loop exit
PB: predicated region body
PF: predicated region fallthrough
CT: control target
= control target key end

     0   :  { %vm446_vm0 = vcmask 1040384   ;;  %vm448_vm1 = vcmask 1041408   ;;  %s814_s1 = inlined_call_operand.vmem [shape: bf16[640,128], index: 1, kind: input, shape index: {}]   ;;  %s815_s0 = inlined_call_operand.vmem [shape: bf16[8,640], index: 0, kind: input, shape index: {}]   ;;  %s816_s2 = inlined_call_operand.vmem [shape: bf16[8,128], index: 2, kind: output, shape index: {0}]   ;;  %s817_s3 = inlined_call_operand.vmem [shape: f32[1,8,128], index: 3, kind: output, shape index: {1}]  }
   0x1   :  { %v626_v0 = vld [vmem:[%s814_s1 + $0x38] sm:$0xff]  ;;  %v625_v3 = vld [vmem:[%s814_s1 + $0x30] sm:$0xff]  ;;  %v624_v8 = vld [vmem:[%s814_s1 + $0x28] sm:$0xff] }
   0x2   :  { %v642_v1 = vld [vmem:[%s814_s1 + $0xb8] sm:$0xff]  ;;  %360 = vmatpush.bf16.msra.mxu0 %v626_v0  ;;  %v641_v5 = vld [vmem:[%s814_s1 + $0xb0] sm:$0xff]  ;;  %v640_v9 = vld [vmem:[%s814_s1 + $0xa8] sm:$0xff] }
   0x3   :  { %v650_v2 = vld [vmem:[%s814_s1 + $0xf8] sm:$0xff]  ;;  %386 = vmatpush.bf16.msra.mxu2 %v642_v1  ;;  %v649_v6 = vld [vmem:[%s814_s1 + $0xf0] sm:$0xff]  ;;  %v648_v10 = vld [vmem:[%s814_s1 + $0xe8] sm:$0xff] }
   0x4   :  { %v634_v4 = vld [vmem:[%s814_s1 + $0x78] sm:$0xff]  ;;  %399 = vmatpush.bf16.msra.mxu3 %v650_v2  ;;  %v633_v7 = vld [vmem:[%s814_s1 + $0x70] sm:$0xff]  ;;  %v632_v11 = vld [vmem:[%s814_s1 + $0x68] sm:$0xff] }
   0x5   :  { %373 = vmatpush.bf16.msra.mxu1 %v634_v4  ;;  %v623_v12 = vld [vmem:[%s814_s1 + $0x20] sm:$0xff]  ;;  %v622_v16 = vld [vmem:[%s814_s1 + $0x18] sm:$0xff]  ;;  %v621_v20 = vld [vmem:[%s814_s1 + $0x10] sm:$0xff] }
   0x6   :  { %361 = vmatpush.bf16.msra.mxu0 %v625_v3  ;;  %v639_v13 = vld [vmem:[%s814_s1 + $0xa0] sm:$0xff]  ;;  %v638_v17 = vld [vmem:[%s814_s1 + $0x98] sm:$0xff]  ;;  %v637_v21 = vld [vmem:[%s814_s1 + $0x90] sm:$0xff] }
   0x7   :  { %387 = vmatpush.bf16.msra.mxu2 %v641_v5  ;;  %v647_v14 = vld [vmem:[%s814_s1 + $0xe0] sm:$0xff]  ;;  %v646_v18 = vld [vmem:[%s814_s1 + $0xd8] sm:$0xff]  ;;  %v645_v22 = vld [vmem:[%s814_s1 + $0xd0] sm:$0xff] }
   0x8   :  { %400 = vmatpush.bf16.msra.mxu3 %v649_v6  ;;  %v631_v15 = vld [vmem:[%s814_s1 + $0x60] sm:$0xff]  ;;  %v630_v19 = vld [vmem:[%s814_s1 + $0x58] sm:$0xff]  ;;  %v629_v23 = vld [vmem:[%s814_s1 + $0x50] sm:$0xff] }
   0x9   :  { %374 = vmatpush.bf16.msra.mxu1 %v633_v7  ;;  %v620_v24 = vld [vmem:[%s814_s1 + $0x8] sm:$0xff]  ;;  %v19_v25 = vld [vmem:[%s815_s0] sm:$0xff]  ;;  %v658_v33 = vld [vmem:[%s814_s1 + $0x138] sm:$0xff] }
   0xa   :  { %362 = vmatpush.bf16.msra.mxu0 %v624_v8  ;;  %v636_v26 = vld [vmem:[%s814_s1 + $0x88] sm:$0xff]  ;;  %v105_v30 = vunpack.c.l.b16 %v19_v25  ;;  %v619_v31 = vld [vmem:[%s814_s1] sm:$0xff]  ;;  %v106_v38 = vunpack.c.h.b16 %v19_v25  ;;  %v657_v41 = vld [vmem:[%s814_s1 + $0x130] sm:$0xff] }
   0xb   :  { %388 = vmatpush.bf16.msra.mxu2 %v640_v9  ;;  %v644_v27 = vld [vmem:[%s814_s1 + $0xc8] sm:$0xff]  ;;  %v635_v34 = vld [vmem:[%s814_s1 + $0x80] sm:$0xff]  ;;  %v654_v46 = vld [vmem:[%s814_s1 + $0x118] sm:$0xff] }
   0xc   :  { %401 = vmatpush.bf16.msra.mxu3 %v648_v10  ;;  %v20_v28 = vld [vmem:[%s815_s0 + $0x8] sm:$0xff]  ;;  %v643_v36 = vld [vmem:[%s814_s1 + $0xc0] sm:$0xff]  ;;  %v110_v39 = vpack.c.b16 %v105_v30, %v105_v30  ;;  %v111_v43 = vpack.c.b16 %v106_v38, %v106_v38  ;;  %v653_v47 = vld [vmem:[%s814_s1 + $0x110] sm:$0xff] }
   0xd   :  { %375 = vmatpush.bf16.msra.mxu1 %v632_v11  ;;  %v628_v29 = vld [vmem:[%s814_s1 + $0x48] sm:$0xff]  ;;  %v107_v32 = vunpack.c.l.b16 %v20_v28  ;;  %v108_v35 = vunpack.c.h.b16 %v20_v28  ;;  %v627_v37 = vld [vmem:[%s814_s1 + $0x40] sm:$0xff]  ;;  %v21_v49 = vld [vmem:[%s815_s0 + $0x10] sm:$0xf] }
   0xe   :  { %363 = vmatpush.bf16.msra.mxu0 %v623_v12  ;;  %v656_v44 = vld [vmem:[%s814_s1 + $0x128] sm:$0xff]  ;;  %v655_v45 = vld [vmem:[%s814_s1 + $0x120] sm:$0xff]  ;;  %v109_v50 = vunpack.c.l.b16 %v21_v49 }
   0xf   :  { %389 = vmatpush.bf16.msra.mxu2 %v639_v13  ;;  %v112_v40 = vpack.c.b16 %v107_v32, %v107_v32  ;;  %v113_v42 = vpack.c.b16 %v108_v35, %v108_v35  ;;  %v652_v48 = vld [vmem:[%s814_s1 + $0x108] sm:$0xff]  ;;  %v651_v51 = vld [vmem:[%s814_s1 + $0x100] sm:$0xff] }
  0x10   :  { %402 = vmatpush.bf16.msra.mxu3 %v647_v14  ;;  %v114_v52 = vpack.c.b16 %v109_v50, %v109_v50 }
  0x11   :  { %376 = vmatpush.bf16.msra.mxu1 %v631_v15 }
  0x12   :  { %364 = vmatpush.bf16.msra.mxu0 %v622_v16 }
  0x13   :  { %390 = vmatpush.bf16.msra.mxu2 %v638_v17 }
  0x14   :  { %403 = vmatpush.bf16.msra.mxu3 %v646_v18 }
  0x15   :  { %377 = vmatpush.bf16.msra.mxu1 %v630_v19 }
  0x16   :  { %365 = vmatpush.bf16.msra.mxu0 %v621_v20 }
  0x17   :  { %391 = vmatpush.bf16.msra.mxu2 %v637_v21 }
  0x18   :  { %404 = vmatpush.bf16.msra.mxu3 %v645_v22 }
  0x19   :  { %378 = vmatpush.bf16.msra.mxu1 %v629_v23 }
  0x1a   :  { %366 = vmatpush.bf16.msra.mxu0 %v620_v24 }
  0x1b   :  { %392 = vmatpush.bf16.msra.mxu2 %v636_v26 }
  0x1c   :  { %405 = vmatpush.bf16.msra.mxu3 %v644_v27 }
  0x1d   :  { %379 = vmatpush.bf16.msra.mxu1 %v628_v29 }
  0x1e   :  { %367 = vmatpush.bf16.msra.mxu0 %v619_v31 }
  0x1f   :  { %393 = vmatpush.bf16.msra.mxu2 %v635_v34 }
  0x20   :  { %406 = vmatpush.bf16.msra.mxu3 %v643_v36 }
  0x21   :  { %380 = vmatpush.bf16.msra.mxu1 %v627_v37  ;;  %368 = vmatmul.bf16.vlgmr.msra.gmra.mxu0 %v110_v39 }
  0x22   :  { %412 = vmatpush.bf16.msrb.mxu0 %v658_v33  ;;  %394 = vmatmul.bf16.vlgmr.msra.gmra.mxu2 %v112_v40 }
  0x23   :  { %407 = vmatmul.bf16.vlgmr.msra.gmra.mxu3 %v113_v42 }
  0x24   :  { %381 = vmatmul.bf16.vlgmr.msra.gmra.mxu1 %v111_v43 }
  0x26   :  { %413 = vmatpush.bf16.msrb.mxu0 %v657_v41 }
  0x2a   :  { %414 = vmatpush.bf16.msrb.mxu0 %v656_v44 }
  0x2e   :  { %415 = vmatpush.bf16.msrb.mxu0 %v655_v45 }
  0x32   :  { %416 = vmatpush.bf16.msrb.mxu0 %v654_v46 }
  0x36   :  { %417 = vmatpush.bf16.msrb.mxu0 %v653_v47 }
  0x3a   :  { %418 = vmatpush.bf16.msrb.mxu0 %v652_v48 }
  0x3e   :  { %419 = vmatpush.bf16.msrb.mxu0 %v651_v51 }
  0x41   :  { %420 = vmatmul.bf16.vlgmr.msrb.gmra.mxu0 %v114_v52 }
  0x9e   :  { %v369_v53 = vpop.f32.mrf.mxu0 }
  0xa1   :  { %v382_v54 = vpop.f32.mrf.mxu1 }
  0xa2   :  { %v383_v61 = vadd.f32 %v382_v54, %v369_v53 }
  0xa5   :  { %v395_v55 = vpop.f32.mrf.mxu2 }
  0xa6   :  { %v371_v56 = vpop.f32.mrf.mxu0  ;;  %v408_v57 = vpop.f32.mrf.mxu3  ;;  %v396_v62 = vadd.f32 %v395_v55, %v383_v61 }
  0xa8   :  { %v409_v63 = vadd.f32 %v408_v57, %v396_v62 }
  0xa9   :  { %v384_v58 = vpop.f32.mrf.mxu1 }
  0xad   :  { %v397_v59 = vpop.f32.mrf.mxu2 }
  0xae   :  { %v410_v60 = vpop.f32.mrf.mxu3 }
  0xbe   :  { %v421_v0 = vpop.f32.mrf.mxu0 }
  0xbf   :  { %v422_v1 = vadd.f32 %v421_v0, %v409_v63 }
  0xc1   :  { %v431_v2 = vpack.c.bf16 %v422_v1, %v422_v1  ;;  %v433_v3 = vrot.slane %v422_v1, 4  ;;  %v439_v4 = vmul.f32 %v422_v1, %v422_v1 }
  0xc3   :  { %432 = vst [vmem:[%s816_s2] sm:$0xf] %v431_v2  ;;  %v434_v5 = vadd.f32 %v433_v3, %v422_v1  ;;  %v440_v6 = vrot.slane %v439_v4, 4 }
  0xc5   :  { %v435_v7 = vrot.slane %v434_v5, 2  ;;  %v441_v8 = vadd.f32 %v440_v6, %v439_v4 }
  0xc6   :  { %v423_v9 = vpop.f32.mrf.mxu0 }
  0xc7   :  { %v436_v10 = vadd.f32 %v435_v7, %v434_v5  ;;  %v442_v11 = vrot.slane %v441_v8, 2 }
  0xc9   :  { %v437_v12 = vrot.slane %v436_v10, 1  ;;  %v443_v13 = vadd.f32 %v442_v11, %v441_v8 }
  0xcb   :  { %v444_v14 = vrot.slane %v443_v13, 1  ;;  %v438_v15 = vadd.f32 %v437_v12, %v436_v10 }
  0xcd   :  { %v445_v16 = vadd.f32 %v444_v14, %v443_v13 }
  0xcf   :  { %v447_v17 = vsel %vm446_vm0, %v438_v15, %v445_v16 }
  0xd0   :  { %v449_v18 = vsel %vm448_vm1, %v447_v17, 0.0 }
  0xd1   :  { %450 = vst [vmem:[%s817_s3] sm:$0xff] %v449_v18 }

// kernel: resnet34_forward.94
= control target key start
LH: loop header
LB: loop body
LE: loop exit
PB: predicated region body
PF: predicated region fallthrough
CT: control target
= control target key end

     0   :  { %s67_s0 = inlined_call_operand.vmem [shape: bf16[8,128], index: 0, kind: input, shape index: {}]   ;;  %s68_s1 = inlined_call_operand.vmem [shape: f32[1,128], index: 1, kind: input, shape index: {}]   ;;  %s69_s2 = inlined_call_operand.vmem [shape: f32[1,128], index: 2, kind: input, shape index: {}]   ;;  %s70_s3 = inlined_call_operand.vmem [shape: bf16[8,128], index: 3, kind: output, shape index: {}]  }
   0x1   :  { %v14_v0 = vld [vmem:[%s67_s0] sm:$0xf] }
   0x2   :  { %v33_v1 = vld [vmem:[%s68_s1] ss:$0 sm:$0xff]  ;;  %v15_v2 = vunpack.c.l.bf16 %v14_v0 }
   0x3   :  { %v34_v3 = vld [vmem:[%s69_s2] ss:$0 sm:$0xff] }
   0x4   :  { %v20_v4 = vmul.f32 %v33_v1, %v15_v2 }
   0x6   :  { %v25_v5 = vadd.f32 %v34_v3, %v20_v4 }
   0x8   :  { %v26_v6 = vmax.f32 %v25_v5, 0.0 }
   0xa   :  { %v27_v7 = vpack.c.bf16 %v26_v6, %v26_v6 }
   0xc   :  { %28 = vst [vmem:[%s70_s3] sm:$0xf] %v27_v7 }

// kernel: resnet34_forward.98
= control target key start
LH: loop header
LB: loop body
LE: loop exit
PB: predicated region body
PF: predicated region fallthrough
CT: control target
= control target key end

     0   :  { %s81_s0 = inlined_call_operand.vmem [shape: bf16[8,128], index: 0, kind: input, shape index: {}]   ;;  %s82_s1 = inlined_call_operand.vmem [shape: f32[1,128], index: 1, kind: input, shape index: {}]   ;;  %s83_s2 = inlined_call_operand.vmem [shape: f32[1,128], index: 2, kind: input, shape index: {}]   ;;  %s84_s3 = inlined_call_operand.vmem [shape: bf16[8,128], index: 3, kind: input, shape index: {}]   ;;  %s85_s4 = inlined_call_operand.vmem [shape: bf16[8,128], index: 4, kind: output, shape index: {}]  }
   0x1   :  { %v17_v0 = vld [vmem:[%s81_s0] sm:$0xf] }
   0x2   :  { %v39_v1 = vld [vmem:[%s82_s1] ss:$0 sm:$0xff]  ;;  %v18_v2 = vunpack.c.l.bf16 %v17_v0 }
   0x3   :  { %v40_v3 = vld [vmem:[%s83_s2] ss:$0 sm:$0xff] }
   0x4   :  { %v29_v4 = vld [vmem:[%s84_s3] sm:$0xf]  ;;  %v23_v5 = vmul.f32 %v39_v1, %v18_v2 }
   0x5   :  { %v30_v6 = vunpack.c.l.bf16 %v29_v4 }
   0x6   :  { %v28_v7 = vadd.f32 %v40_v3, %v23_v5 }
   0x8   :  { %v31_v8 = vadd.f32 %v30_v6, %v28_v7 }
   0xa   :  { %v32_v9 = vmax.f32 %v31_v8, 0.0 }
   0xc   :  { %v33_v10 = vpack.c.bf16 %v32_v9, %v32_v9 }
   0xe   :  { %34 = vst [vmem:[%s85_s4] sm:$0xf] %v33_v10 }

// kernel: resnet34_forward.97
= control target key start
LH: loop header
LB: loop body
LE: loop exit
PB: predicated region body
PF: predicated region fallthrough
CT: control target
= control target key end

     0   :  { %vm770_vm0 = vcmask 1040384   ;;  %vm772_vm1 = vcmask 1041408   ;;  %s1400_s1 = inlined_call_operand.vmem [shape: bf16[1152,128], index: 1, kind: input, shape index: {}]   ;;  %s1401_s0 = inlined_call_operand.vmem [shape: bf16[8,1152], index: 0, kind: input, shape index: {}]   ;;  %s1402_s2 = inlined_call_operand.vmem [shape: bf16[8,128], index: 2, kind: output, shape index: {0}]   ;;  %s1403_s3 = inlined_call_operand.vmem [shape: f32[1,8,128], index: 3, kind: output, shape index: {1}]  }
   0x1   :  { %v1078_v0 = vld [vmem:[%s1400_s1 + $0x38] sm:$0xff]  ;;  %v1077_v4 = vld [vmem:[%s1400_s1 + $0x30] sm:$0xff]  ;;  %v1076_v8 = vld [vmem:[%s1400_s1 + $0x28] sm:$0xff] }
   0x2   :  { %v1094_v1 = vld [vmem:[%s1400_s1 + $0xb8] sm:$0xff]  ;;  %632 = vmatpush.bf16.msra.mxu0 %v1078_v0  ;;  %v1093_v5 = vld [vmem:[%s1400_s1 + $0xb0] sm:$0xff]  ;;  %v1092_v9 = vld [vmem:[%s1400_s1 + $0xa8] sm:$0xff] }
   0x3   :  { %v1102_v2 = vld [vmem:[%s1400_s1 + $0xf8] sm:$0xff]  ;;  %658 = vmatpush.bf16.msra.mxu2 %v1094_v1  ;;  %v1101_v6 = vld [vmem:[%s1400_s1 + $0xf0] sm:$0xff]  ;;  %v1100_v10 = vld [vmem:[%s1400_s1 + $0xe8] sm:$0xff] }
   0x4   :  { %v1086_v3 = vld [vmem:[%s1400_s1 + $0x78] sm:$0xff]  ;;  %671 = vmatpush.bf16.msra.mxu3 %v1102_v2  ;;  %v1085_v7 = vld [vmem:[%s1400_s1 + $0x70] sm:$0xff]  ;;  %v1084_v11 = vld [vmem:[%s1400_s1 + $0x68] sm:$0xff] }
   0x5   :  { %645 = vmatpush.bf16.msra.mxu1 %v1086_v3  ;;  %v1075_v12 = vld [vmem:[%s1400_s1 + $0x20] sm:$0xff]  ;;  %v1074_v16 = vld [vmem:[%s1400_s1 + $0x18] sm:$0xff]  ;;  %v1073_v20 = vld [vmem:[%s1400_s1 + $0x10] sm:$0xff] }
   0x6   :  { %633 = vmatpush.bf16.msra.mxu0 %v1077_v4  ;;  %v1091_v13 = vld [vmem:[%s1400_s1 + $0xa0] sm:$0xff]  ;;  %v1090_v17 = vld [vmem:[%s1400_s1 + $0x98] sm:$0xff]  ;;  %v1089_v21 = vld [vmem:[%s1400_s1 + $0x90] sm:$0xff] }
   0x7   :  { %659 = vmatpush.bf16.msra.mxu2 %v1093_v5  ;;  %v1099_v14 = vld [vmem:[%s1400_s1 + $0xe0] sm:$0xff]  ;;  %v1098_v18 = vld [vmem:[%s1400_s1 + $0xd8] sm:$0xff]  ;;  %v1097_v22 = vld [vmem:[%s1400_s1 + $0xd0] sm:$0xff] }
   0x8   :  { %672 = vmatpush.bf16.msra.mxu3 %v1101_v6  ;;  %v1083_v15 = vld [vmem:[%s1400_s1 + $0x60] sm:$0xff]  ;;  %v1082_v19 = vld [vmem:[%s1400_s1 + $0x58] sm:$0xff]  ;;  %v1081_v23 = vld [vmem:[%s1400_s1 + $0x50] sm:$0xff] }
   0x9   :  { %646 = vmatpush.bf16.msra.mxu1 %v1085_v7  ;;  %v1072_v24 = vld [vmem:[%s1400_s1 + $0x8] sm:$0xff]  ;;  %v19_v29 = vld [vmem:[%s1401_s0] sm:$0xff]  ;;  %v1110_v34 = vld [vmem:[%s1400_s1 + $0x138] sm:$0xff] }
   0xa   :  { %634 = vmatpush.bf16.msra.mxu0 %v1076_v8  ;;  %v1088_v25 = vld [vmem:[%s1400_s1 + $0x88] sm:$0xff]  ;;  %v1071_v30 = vld [vmem:[%s1400_s1] sm:$0xff]  ;;  %v173_v33 = vunpack.c.l.b16 %v19_v29  ;;  %v1126_v35 = vld [vmem:[%s1400_s1 + $0x1b8] sm:$0xff]  ;;  %v174_v39 = vunpack.c.h.b16 %v19_v29 }
   0xb   :  { %660 = vmatpush.bf16.msra.mxu2 %v1092_v9  ;;  %v1096_v26 = vld [vmem:[%s1400_s1 + $0xc8] sm:$0xff]  ;;  %v1087_v31 = vld [vmem:[%s1400_s1 + $0x80] sm:$0xff]  ;;  %v1134_v40 = vld [vmem:[%s1400_s1 + $0x1f8] sm:$0xff] }
   0xc   :  { %673 = vmatpush.bf16.msra.mxu3 %v1100_v10  ;;  %v1080_v27 = vld [vmem:[%s1400_s1 + $0x48] sm:$0xff]  ;;  %v1095_v36 = vld [vmem:[%s1400_s1 + $0xc0] sm:$0xff]  ;;  %v1118_v41 = vld [vmem:[%s1400_s1 + $0x178] sm:$0xff]  ;;  %v182_v43 = vpack.c.b16 %v173_v33, %v173_v33  ;;  %v183_v47 = vpack.c.b16 %v174_v39, %v174_v39 }
   0xd   :  { %647 = vmatpush.bf16.msra.mxu1 %v1084_v11  ;;  %v20_v28 = vld [vmem:[%s1401_s0 + $0x8] sm:$0xff]  ;;  %v1079_v37 = vld [vmem:[%s1400_s1 + $0x40] sm:$0xff]  ;;  %v1109_v44 = vld [vmem:[%s1400_s1 + $0x130] sm:$0xff] }
   0xe   :  { %635 = vmatpush.bf16.msra.mxu0 %v1075_v12  ;;  %v175_v32 = vunpack.c.l.b16 %v20_v28  ;;  %v176_v38 = vunpack.c.h.b16 %v20_v28  ;;  %v1125_v45 = vld [vmem:[%s1400_s1 + $0x1b0] sm:$0xff]  ;;  %v1108_v50 = vld [vmem:[%s1400_s1 + $0x128] sm:$0xff]  ;;  %v1107_v54 = vld [vmem:[%s1400_s1 + $0x120] sm:$0xff] }
   0xf   :  { %661 = vmatpush.bf16.msra.mxu2 %v1091_v13  ;;  %v1133_v48 = vld [vmem:[%s1400_s1 + $0x1f0] sm:$0xff]  ;;  %v1124_v51 = vld [vmem:[%s1400_s1 + $0x1a8] sm:$0xff]  ;;  %v1123_v55 = vld [vmem:[%s1400_s1 + $0x1a0] sm:$0xff] }
  0x10   :  { %674 = vmatpush.bf16.msra.mxu3 %v1099_v14  ;;  %v184_v42 = vpack.c.b16 %v175_v32, %v175_v32  ;;  %v185_v46 = vpack.c.b16 %v176_v38, %v176_v38  ;;  %v1117_v49 = vld [vmem:[%s1400_s1 + $0x170] sm:$0xff]  ;;  %v1132_v52 = vld [vmem:[%s1400_s1 + $0x1e8] sm:$0xff]  ;;  %v1131_v56 = vld [vmem:[%s1400_s1 + $0x1e0] sm:$0xff] }
  0x11   :  { %648 = vmatpush.bf16.msra.mxu1 %v1083_v15  ;;  %v1116_v53 = vld [vmem:[%s1400_s1 + $0x168] sm:$0xff]  ;;  %v1115_v57 = vld [vmem:[%s1400_s1 + $0x160] sm:$0xff]  ;;  %v1106_v58 = vld [vmem:[%s1400_s1 + $0x118] sm:$0xff] }
  0x12   :  { %636 = vmatpush.bf16.msra.mxu0 %v1074_v16  ;;  %v1122_v59 = vld [vmem:[%s1400_s1 + $0x198] sm:$0xff]  ;;  %v1105_v62 = vld [vmem:[%s1400_s1 + $0x110] sm:$0xff]  ;;  %v1104_v2 = vld [vmem:[%s1400_s1 + $0x108] sm:$0xff] }
  0x13   :  { %662 = vmatpush.bf16.msra.mxu2 %v1090_v17  ;;  %v1130_v60 = vld [vmem:[%s1400_s1 + $0x1d8] sm:$0xff]  ;;  %v1121_v63 = vld [vmem:[%s1400_s1 + $0x190] sm:$0xff]  ;;  %v1120_v3 = vld [vmem:[%s1400_s1 + $0x188] sm:$0xff] }
  0x14   :  { %675 = vmatpush.bf16.msra.mxu3 %v1098_v18  ;;  %v1114_v61 = vld [vmem:[%s1400_s1 + $0x158] sm:$0xff]  ;;  %v1129_v0 = vld [vmem:[%s1400_s1 + $0x1d0] sm:$0xff]  ;;  %v1128_v6 = vld [vmem:[%s1400_s1 + $0x1c8] sm:$0xff] }
  0x15   :  { %649 = vmatpush.bf16.msra.mxu1 %v1082_v19  ;;  %v1113_v1 = vld [vmem:[%s1400_s1 + $0x150] sm:$0xff]  ;;  %v22_v4 = vld [vmem:[%s1401_s0 + $0x18] sm:$0xff]  ;;  %v1112_v7 = vld [vmem:[%s1400_s1 + $0x148] sm:$0xff] }
  0x16   :  { %637 = vmatpush.bf16.msra.mxu0 %v1073_v20  ;;  %v21_v5 = vld [vmem:[%s1401_s0 + $0x10] sm:$0xff]  ;;  %v179_v8 = vunpack.c.l.b16 %v22_v4  ;;  %v1103_v10 = vld [vmem:[%s1400_s1 + $0x100] sm:$0xff]  ;;  %v1142_v12 = vld [vmem:[%s1400_s1 + $0x238] sm:$0xff]  ;;  %v180_v13 = vunpack.c.h.b16 %v22_v4 }
  0x17   :  { %663 = vmatpush.bf16.msra.mxu2 %v1089_v21  ;;  %v177_v9 = vunpack.c.l.b16 %v21_v5  ;;  %v1119_v11 = vld [vmem:[%s1400_s1 + $0x180] sm:$0xff]  ;;  %v178_v16 = vunpack.c.h.b16 %v21_v5  ;;  %v1141_v19 = vld [vmem:[%s1400_s1 + $0x230] sm:$0xff] }
  0x18   :  { %676 = vmatpush.bf16.msra.mxu3 %v1097_v22  ;;  %v1127_v14 = vld [vmem:[%s1400_s1 + $0x1c0] sm:$0xff]  ;;  %v188_v17 = vpack.c.b16 %v179_v8, %v179_v8  ;;  %v189_v20 = vpack.c.b16 %v180_v13, %v180_v13  ;;  %v1140_v22 = vld [vmem:[%s1400_s1 + $0x228] sm:$0xff] }
  0x19   :  { %650 = vmatpush.bf16.msra.mxu1 %v1081_v23  ;;  %v1111_v15 = vld [vmem:[%s1400_s1 + $0x140] sm:$0xff]  ;;  %v186_v18 = vpack.c.b16 %v177_v9, %v177_v9  ;;  %v187_v21 = vpack.c.b16 %v178_v16, %v178_v16 }
  0x1a   :  { %638 = vmatpush.bf16.msra.mxu0 %v1072_v24  ;;  %v1139_v23 = vld [vmem:[%s1400_s1 + $0x220] sm:$0xff]  ;;  %v1138_v24 = vld [vmem:[%s1400_s1 + $0x218] sm:$0xff] }
  0x1b   :  { %664 = vmatpush.bf16.msra.mxu2 %v1088_v25  ;;  %v1137_v25 = vld [vmem:[%s1400_s1 + $0x210] sm:$0xff]  ;;  %v1135_v29 = vld [vmem:[%s1400_s1 + $0x200] sm:$0xff] }
  0x1c   :  { %677 = vmatpush.bf16.msra.mxu3 %v1096_v26  ;;  %v1136_v26 = vld [vmem:[%s1400_s1 + $0x208] sm:$0xff] }
  0x1d   :  { %651 = vmatpush.bf16.msra.mxu1 %v1080_v27  ;;  %v23_v27 = vld [vmem:[%s1401_s0 + $0x20] sm:$0xf] }
  0x1e   :  { %639 = vmatpush.bf16.msra.mxu0 %v1071_v30  ;;  %v181_v28 = vunpack.c.l.b16 %v23_v27 }
  0x1f   :  { %665 = vmatpush.bf16.msra.mxu2 %v1087_v31 }
  0x20   :  { %678 = vmatpush.bf16.msra.mxu3 %v1095_v36  ;;  %v190_v30 = vpack.c.b16 %v181_v28, %v181_v28 }
  0x21   :  { %652 = vmatpush.bf16.msra.mxu1 %v1079_v37  ;;  %640 = vmatmul.bf16.vlgmr.msra.gmra.mxu0 %v182_v43 }
  0x22   :  { %684 = vmatpush.bf16.msrb.mxu0 %v1110_v34  ;;  %666 = vmatmul.bf16.vlgmr.msra.gmra.mxu2 %v184_v42 }
  0x23   :  { %710 = vmatpush.bf16.msrb.mxu2 %v1126_v35  ;;  %679 = vmatmul.bf16.vlgmr.msra.gmra.mxu3 %v185_v46 }
  0x24   :  { %723 = vmatpush.bf16.msrb.mxu3 %v1134_v40  ;;  %653 = vmatmul.bf16.vlgmr.msra.gmra.mxu1 %v183_v47 }
  0x25   :  { %697 = vmatpush.bf16.msrb.mxu1 %v1118_v41 }
  0x26   :  { %685 = vmatpush.bf16.msrb.mxu0 %v1109_v44 }
  0x27   :  { %711 = vmatpush.bf16.msrb.mxu2 %v1125_v45 }
  0x28   :  { %724 = vmatpush.bf16.msrb.mxu3 %v1133_v48 }
  0x29   :  { %698 = vmatpush.bf16.msrb.mxu1 %v1117_v49 }
  0x2a   :  { %686 = vmatpush.bf16.msrb.mxu0 %v1108_v50 }
  0x2b   :  { %712 = vmatpush.bf16.msrb.mxu2 %v1124_v51 }
  0x2c   :  { %725 = vmatpush.bf16.msrb.mxu3 %v1132_v52 }
  0x2d   :  { %699 = vmatpush.bf16.msrb.mxu1 %v1116_v53 }
  0x2e   :  { %687 = vmatpush.bf16.msrb.mxu0 %v1107_v54 }
  0x2f   :  { %713 = vmatpush.bf16.msrb.mxu2 %v1123_v55 }
  0x30   :  { %726 = vmatpush.bf16.msrb.mxu3 %v1131_v56 }
  0x31   :  { %700 = vmatpush.bf16.msrb.mxu1 %v1115_v57 }
  0x32   :  { %688 = vmatpush.bf16.msrb.mxu0 %v1106_v58 }
  0x33   :  { %714 = vmatpush.bf16.msrb.mxu2 %v1122_v59 }
  0x34   :  { %727 = vmatpush.bf16.msrb.mxu3 %v1130_v60 }
  0x35   :  { %701 = vmatpush.bf16.msrb.mxu1 %v1114_v61 }
  0x36   :  { %689 = vmatpush.bf16.msrb.mxu0 %v1105_v62 }
  0x37   :  { %715 = vmatpush.bf16.msrb.mxu2 %v1121_v63 }
  0x38   :  { %728 = vmatpush.bf16.msrb.mxu3 %v1129_v0 }
  0x39   :  { %702 = vmatpush.bf16.msrb.mxu1 %v1113_v1 }
  0x3a   :  { %690 = vmatpush.bf16.msrb.mxu0 %v1104_v2 }
  0x3b   :  { %716 = vmatpush.bf16.msrb.mxu2 %v1120_v3 }
  0x3c   :  { %729 = vmatpush.bf16.msrb.mxu3 %v1128_v6 }
  0x3d   :  { %703 = vmatpush.bf16.msrb.mxu1 %v1112_v7 }
  0x3e   :  { %691 = vmatpush.bf16.msrb.mxu0 %v1103_v10 }
  0x3f   :  { %717 = vmatpush.bf16.msrb.mxu2 %v1119_v11 }
  0x40   :  { %730 = vmatpush.bf16.msrb.mxu3 %v1127_v14 }
  0x41   :  { %704 = vmatpush.bf16.msrb.mxu1 %v1111_v15  ;;  %692 = vmatmul.bf16.vlgmr.msrb.gmra.mxu0 %v186_v18 }
  0x42   :  { %736 = vmatpush.bf16.msra.mxu0 %v1142_v12  ;;  %718 = vmatmul.bf16.vlgmr.msrb.gmra.mxu2 %v188_v17 }
  0x43   :  { %731 = vmatmul.bf16.vlgmr.msrb.gmra.mxu3 %v189_v20 }
  0x44   :  { %705 = vmatmul.bf16.vlgmr.msrb.gmra.mxu1 %v187_v21 }
  0x46   :  { %737 = vmatpush.bf16.msra.mxu0 %v1141_v19 }
  0x4a   :  { %738 = vmatpush.bf16.msra.mxu0 %v1140_v22 }
  0x4e   :  { %739 = vmatpush.bf16.msra.mxu0 %v1139_v23 }
  0x52   :  { %740 = vmatpush.bf16.msra.mxu0 %v1138_v24 }
  0x56   :  { %741 = vmatpush.bf16.msra.mxu0 %v1137_v25 }
  0x5a   :  { %742 = vmatpush.bf16.msra.mxu0 %v1136_v26 }
  0x5e   :  { %743 = vmatpush.bf16.msra.mxu0 %v1135_v29 }
  0x61   :  { %744 = vmatmul.bf16.vlgmr.msra.gmra.mxu0 %v190_v30 }
  0x9e   :  { %v641_v31 = vpop.f32.mrf.mxu0 }
  0xa1   :  { %v654_v32 = vpop.f32.mrf.mxu1 }
  0xa2   :  { %v655_v41 = vadd.f32 %v654_v32, %v641_v31 }
  0xa5   :  { %v667_v33 = vpop.f32.mrf.mxu2 }
  0xa6   :  { %v680_v34 = vpop.f32.mrf.mxu3  ;;  %v643_v35 = vpop.f32.mrf.mxu0  ;;  %v668_v43 = vadd.f32 %v667_v33, %v655_v41 }
  0xa8   :  { %v681_v47 = vadd.f32 %v680_v34, %v668_v43 }
  0xa9   :  { %v656_v36 = vpop.f32.mrf.mxu1 }
  0xad   :  { %v669_v37 = vpop.f32.mrf.mxu2 }
  0xae   :  { %v682_v38 = vpop.f32.mrf.mxu3 }
  0xbe   :  { %v693_v39 = vpop.f32.mrf.mxu0 }
  0xbf   :  { %v694_v49 = vadd.f32 %v693_v39, %v681_v47 }
  0xc1   :  { %v706_v40 = vpop.f32.mrf.mxu1 }
  0xc2   :  { %v707_v51 = vadd.f32 %v706_v40, %v694_v49 }
  0xc5   :  { %v719_v42 = vpop.f32.mrf.mxu2 }
  0xc6   :  { %v732_v44 = vpop.f32.mrf.mxu3  ;;  %v695_v45 = vpop.f32.mrf.mxu0  ;;  %v720_v52 = vadd.f32 %v719_v42, %v707_v51 }
  0xc8   :  { %v733_v53 = vadd.f32 %v732_v44, %v720_v52 }
  0xc9   :  { %v708_v46 = vpop.f32.mrf.mxu1 }
  0xcd   :  { %v721_v48 = vpop.f32.mrf.mxu2 }
  0xce   :  { %v734_v50 = vpop.f32.mrf.mxu3 }
  0xde   :  { %v745_v54 = vpop.f32.mrf.mxu0 }
  0xdf   :  { %v746_v55 = vadd.f32 %v745_v54, %v733_v53 }
  0xe1   :  { %v755_v56 = vpack.c.bf16 %v746_v55, %v746_v55  ;;  %v757_v57 = vrot.slane %v746_v55, 4  ;;  %v763_v58 = vmul.f32 %v746_v55, %v746_v55 }
  0xe3   :  { %756 = vst [vmem:[%s1402_s2] sm:$0xf] %v755_v56  ;;  %v758_v59 = vadd.f32 %v757_v57, %v746_v55  ;;  %v764_v60 = vrot.slane %v763_v58, 4 }
  0xe5   :  { %v759_v61 = vrot.slane %v758_v59, 2  ;;  %v765_v62 = vadd.f32 %v764_v60, %v763_v58 }
  0xe6   :  { %v747_v63 = vpop.f32.mrf.mxu0 }
  0xe7   :  { %v760_v0 = vadd.f32 %v759_v61, %v758_v59  ;;  %v766_v1 = vrot.slane %v765_v62, 2 }
  0xe9   :  { %v761_v2 = vrot.slane %v760_v0, 1  ;;  %v767_v3 = vadd.f32 %v766_v1, %v765_v62 }
  0xeb   :  { %v768_v4 = vrot.slane %v767_v3, 1  ;;  %v762_v5 = vadd.f32 %v761_v2, %v760_v0 }
  0xed   :  { %v769_v6 = vadd.f32 %v768_v4, %v767_v3 }
  0xef   :  { %v771_v7 = vsel %vm770_vm0, %v762_v5, %v769_v6 }
  0xf0   :  { %v773_v8 = vsel %vm772_vm1, %v771_v7, 0.0 }
  0xf1   :  { %774 = vst [vmem:[%s1403_s3] sm:$0xff] %v773_v8 }

// kernel: resnet34_forward.112
= control target key start
LH: loop header
LB: loop body
LE: loop exit
PB: predicated region body
PF: predicated region fallthrough
CT: control target
= control target key end

     0   :  { %s73_s0 = inlined_call_operand.vmem [shape: bf16[8,256], index: 0, kind: input, shape index: {}]   ;;  %s74_s1 = inlined_call_operand.vmem [shape: f32[1,256], index: 1, kind: input, shape index: {}]   ;;  %s75_s2 = inlined_call_operand.vmem [shape: f32[1,256], index: 2, kind: input, shape index: {}]   ;;  %s76_s3 = inlined_call_operand.vmem [shape: bf16[8,256], index: 3, kind: output, shape index: {}]  }
   0x1   :  { %v14_v0 = vld [vmem:[%s73_s0] sm:$0xff] }
   0x2   :  { %v17_v1 = vld [vmem:[%s74_s1] sm:$0x3]  ;;  %v15_v3 = vunpack.c.l.bf16 %v14_v0  ;;  %v16_v4 = vunpack.c.h.bf16 %v14_v0 }
   0x3   :  { %v25_v2 = vld [vmem:[%s75_s2] sm:$0x3]  ;;  %v19_v5 = vperm.slane %v17_v1, 0  ;;  %v20_v6 = vperm.slane %v17_v1, 1 }
   0x4   :  { %v27_v7 = vperm.slane %v25_v2, 0  ;;  %v28_v8 = vperm.slane %v25_v2, 1 }
   0x5   :  { %v23_v9 = vmul.f32 %v19_v5, %v15_v3  ;;  %v24_v10 = vmul.f32 %v20_v6, %v16_v4 }
   0x7   :  { %v31_v11 = vadd.f32 %v27_v7, %v23_v9  ;;  %v32_v12 = vadd.f32 %v28_v8, %v24_v10 }
   0x9   :  { %v33_v13 = vmax.f32 %v31_v11, 0.0  ;;  %v34_v14 = vmax.f32 %v32_v12, 0.0 }
   0xb   :  { %v35_v15 = vpack.c.bf16 %v34_v14, %v33_v13 }
   0xd   :  { %36 = vst [vmem:[%s76_s3] sm:$0xff] %v35_v15 }

// kernel: resnet34_forward.111
= control target key start
LH: loop header
LB: loop body
LE: loop exit
PB: predicated region body
PF: predicated region fallthrough
CT: control target
= control target key end

     0   :  { %vm1193_vm0 = vcmask 1040384   ;;  %vm1196_vm1 = vcmask 1041408   ;;  %s2877_s1 = inlined_call_operand.vmem [shape: bf16[1152,256], index: 1, kind: input, shape index: {}]   ;;  %s2878_s0 = inlined_call_operand.vmem [shape: bf16[8,1152], index: 0, kind: input, shape index: {}]   ;;  %s2879_s3 = inlined_call_operand.vmem [shape: f32[1,8,256], index: 3, kind: output, shape index: {1}]   ;;  %s2880_s2 = inlined_call_operand.vmem [shape: bf16[8,256], index: 2, kind: output, shape index: {0}]  }
   0x1   :  { %v1267_v0 = vld [vmem:[%s2877_s1 + $0x70] sm:$0xf]  ;;  %v1800_v1 = vld [vmem:[%s2877_s1 + $0x74] sm:$0xf0]  ;;  %v1259_v11 = vld [vmem:[%s2877_s1 + $0x60] sm:$0xf] }
   0x2   :  { %v1331_v2 = vld [vmem:[%s2877_s1 + $0xf0] sm:$0xf]  ;;  %v1268_v3 = vor.u32 %v1800_v1, %v1267_v0  ;;  %v1816_v4 = vld [vmem:[%s2877_s1 + $0xf4] sm:$0xf0]  ;;  %v1798_v13 = vld [vmem:[%s2877_s1 + $0x64] sm:$0xf0] }
   0x3   :  { %v1395_v5 = vld [vmem:[%s2877_s1 + $0x170] sm:$0xf]  ;;  %v1832_v6 = vld [vmem:[%s2877_s1 + $0x174] sm:$0xf0]  ;;  %v1332_v7 = vor.u32 %v1816_v4, %v1331_v2  ;;  %v1323_v14 = vld [vmem:[%s2877_s1 + $0xe0] sm:$0xf]  ;;  %v1260_v16 = vor.u32 %v1798_v13, %v1259_v11 }
   0x4   :  { %v1396_v8 = vor.u32 %v1832_v6, %v1395_v5  ;;  %v1459_v9 = vld [vmem:[%s2877_s1 + $0x1f0] sm:$0xf]  ;;  %v1848_v10 = vld [vmem:[%s2877_s1 + $0x1f4] sm:$0xf0]  ;;  %922 = vmatpush.bf16.msra.mxu0 %v1268_v3  ;;  %v1814_v15 = vld [vmem:[%s2877_s1 + $0xe4] sm:$0xf0] }
   0x5   :  { %v1460_v12 = vor.u32 %v1848_v10, %v1459_v9  ;;  %935 = vmatpush.bf16.msra.mxu1 %v1332_v7  ;;  %v1324_v17 = vor.u32 %v1814_v15, %v1323_v14  ;;  %v1387_v18 = vld [vmem:[%s2877_s1 + $0x160] sm:$0xf]  ;;  %v1830_v19 = vld [vmem:[%s2877_s1 + $0x164] sm:$0xf0]  ;;  %v1251_v23 = vld [vmem:[%s2877_s1 + $0x50] sm:$0xf] }
   0x6   :  { %948 = vmatpush.bf16.msra.mxu2 %v1396_v8  ;;  %v1451_v20 = vld [vmem:[%s2877_s1 + $0x1e0] sm:$0xf]  ;;  %v1388_v21 = vor.u32 %v1830_v19, %v1387_v18  ;;  %v1846_v22 = vld [vmem:[%s2877_s1 + $0x1e4] sm:$0xf0]  ;;  %v1796_v24 = vld [vmem:[%s2877_s1 + $0x54] sm:$0xf0] }
   0x7   :  { %961 = vmatpush.bf16.msra.mxu3 %v1460_v12  ;;  %v1452_v25 = vor.u32 %v1846_v22, %v1451_v20  ;;  %v1315_v26 = vld [vmem:[%s2877_s1 + $0xd0] sm:$0xf]  ;;  %v1812_v27 = vld [vmem:[%s2877_s1 + $0xd4] sm:$0xf0]  ;;  %v1252_v29 = vor.u32 %v1796_v24, %v1251_v23  ;;  %v1243_v35 = vld [vmem:[%s2877_s1 + $0x40] sm:$0xf] }
   0x8   :  { %v1379_v28 = vld [vmem:[%s2877_s1 + $0x150] sm:$0xf]  ;;  %923 = vmatpush.bf16.msra.mxu0 %v1260_v16  ;;  %v1828_v30 = vld [vmem:[%s2877_s1 + $0x154] sm:$0xf0]  ;;  %v1316_v33 = vor.u32 %v1812_v27, %v1315_v26  ;;  %v1794_v36 = vld [vmem:[%s2877_s1 + $0x44] sm:$0xf0] }
   0x9   :  { %v1443_v31 = vld [vmem:[%s2877_s1 + $0x1d0] sm:$0xf]  ;;  %v1844_v32 = vld [vmem:[%s2877_s1 + $0x1d4] sm:$0xf0]  ;;  %936 = vmatpush.bf16.msra.mxu1 %v1324_v17  ;;  %v1380_v34 = vor.u32 %v1828_v30, %v1379_v28  ;;  %v1307_v37 = vld [vmem:[%s2877_s1 + $0xc0] sm:$0xf]  ;;  %v1244_v44 = vor.u32 %v1794_v36, %v1243_v35 }
   0xa   :  { %949 = vmatpush.bf16.msra.mxu2 %v1388_v21  ;;  %v1444_v38 = vor.u32 %v1844_v32, %v1443_v31  ;;  %v1810_v39 = vld [vmem:[%s2877_s1 + $0xc4] sm:$0xf0]  ;;  %v1371_v40 = vld [vmem:[%s2877_s1 + $0x140] sm:$0xf]  ;;  %v1235_v47 = vld [vmem:[%s2877_s1 + $0x30] sm:$0xf] }
   0xb   :  { %962 = vmatpush.bf16.msra.mxu3 %v1452_v25  ;;  %v1826_v41 = vld [vmem:[%s2877_s1 + $0x144] sm:$0xf0]  ;;  %v1435_v42 = vld [vmem:[%s2877_s1 + $0x1c0] sm:$0xf]  ;;  %v1308_v45 = vor.u32 %v1810_v39, %v1307_v37  ;;  %v1792_v48 = vld [vmem:[%s2877_s1 + $0x34] sm:$0xf0] }
   0xc   :  { %v1842_v43 = vld [vmem:[%s2877_s1 + $0x1c4] sm:$0xf0]  ;;  %924 = vmatpush.bf16.msra.mxu0 %v1252_v29  ;;  %v1372_v46 = vor.u32 %v1826_v41, %v1371_v40  ;;  %v1299_v49 = vld [vmem:[%s2877_s1 + $0xb0] sm:$0xf]  ;;  %v1808_v51 = vld [vmem:[%s2877_s1 + $0xb4] sm:$0xf0]  ;;  %v1236_v56 = vor.u32 %v1792_v48, %v1235_v47 }
   0xd   :  { %937 = vmatpush.bf16.msra.mxu1 %v1316_v33  ;;  %v1436_v50 = vor.u32 %v1842_v43, %v1435_v42  ;;  %v1363_v52 = vld [vmem:[%s2877_s1 + $0x130] sm:$0xf]  ;;  %v1824_v53 = vld [vmem:[%s2877_s1 + $0x134] sm:$0xf0]  ;;  %v1300_v57 = vor.u32 %v1808_v51, %v1299_v49  ;;  %v1227_v59 = vld [vmem:[%s2877_s1 + $0x20] sm:$0xf] }
   0xe   :  { %950 = vmatpush.bf16.msra.mxu2 %v1380_v34  ;;  %v1427_v54 = vld [vmem:[%s2877_s1 + $0x1b0] sm:$0xf]  ;;  %v1840_v55 = vld [vmem:[%s2877_s1 + $0x1b4] sm:$0xf0]  ;;  %v1364_v58 = vor.u32 %v1824_v53, %v1363_v52  ;;  %v1790_v60 = vld [vmem:[%s2877_s1 + $0x24] sm:$0xf0] }
   0xf   :  { %963 = vmatpush.bf16.msra.mxu3 %v1444_v38  ;;  %v1291_v61 = vld [vmem:[%s2877_s1 + $0xa0] sm:$0xf]  ;;  %v1428_v62 = vor.u32 %v1840_v55, %v1427_v54  ;;  %v1806_v63 = vld [vmem:[%s2877_s1 + $0xa4] sm:$0xf0]  ;;  %v1228_v4 = vor.u32 %v1790_v60, %v1227_v59  ;;  %v1219_v7 = vld [vmem:[%s2877_s1 + $0x10] sm:$0xf] }
  0x10   :  { %925 = vmatpush.bf16.msra.mxu0 %v1244_v44  ;;  %v1355_v0 = vld [vmem:[%s2877_s1 + $0x120] sm:$0xf]  ;;  %v1822_v1 = vld [vmem:[%s2877_s1 + $0x124] sm:$0xf0]  ;;  %v1292_v5 = vor.u32 %v1806_v63, %v1291_v61  ;;  %v1788_v8 = vld [vmem:[%s2877_s1 + $0x14] sm:$0xf0] }
  0x11   :  { %938 = vmatpush.bf16.msra.mxu1 %v1308_v45  ;;  %v1419_v2 = vld [vmem:[%s2877_s1 + $0x1a0] sm:$0xf]  ;;  %v1838_v3 = vld [vmem:[%s2877_s1 + $0x1a4] sm:$0xf0]  ;;  %v1356_v6 = vor.u32 %v1822_v1, %v1355_v0  ;;  %v1283_v9 = vld [vmem:[%s2877_s1 + $0x90] sm:$0xf]  ;;  %v1220_v16 = vor.u32 %v1788_v8, %v1219_v7 }
  0x12   :  { %951 = vmatpush.bf16.msra.mxu2 %v1372_v46  ;;  %v1420_v10 = vor.u32 %v1838_v3, %v1419_v2  ;;  %v1804_v11 = vld [vmem:[%s2877_s1 + $0x94] sm:$0xf0]  ;;  %v1347_v12 = vld [vmem:[%s2877_s1 + $0x110] sm:$0xf]  ;;  %v1211_v17 = vld [vmem:[%s2877_s1] sm:$0xf] }
  0x13   :  { %964 = vmatpush.bf16.msra.mxu3 %v1436_v50  ;;  %v1820_v13 = vld [vmem:[%s2877_s1 + $0x114] sm:$0xf0]  ;;  %v1411_v14 = vld [vmem:[%s2877_s1 + $0x190] sm:$0xf]  ;;  %v1786_v18 = vld [vmem:[%s2877_s1 + $0x4] sm:$0xf0]  ;;  %v1284_v19 = vor.u32 %v1804_v11, %v1283_v9 }
  0x14   :  { %926 = vmatpush.bf16.msra.mxu0 %v1236_v56  ;;  %v1836_v15 = vld [vmem:[%s2877_s1 + $0x194] sm:$0xf0]  ;;  %v1348_v20 = vor.u32 %v1820_v13, %v1347_v12  ;;  %v1275_v21 = vld [vmem:[%s2877_s1 + $0x80] sm:$0xf]  ;;  %v1802_v22 = vld [vmem:[%s2877_s1 + $0x84] sm:$0xf0]  ;;  %v1212_v31 = vor.u32 %v1786_v18, %v1211_v17 }
  0x15   :  { %939 = vmatpush.bf16.msra.mxu1 %v1300_v57  ;;  %v1339_v23 = vld [vmem:[%s2877_s1 + $0x100] sm:$0xf]  ;;  %v1412_v24 = vor.u32 %v1836_v15, %v1411_v14  ;;  %v1818_v25 = vld [vmem:[%s2877_s1 + $0x104] sm:$0xf0]  ;;  %v1523_v26 = vld [vmem:[%s2877_s1 + $0x270] sm:$0xf]  ;;  %v1276_v35 = vor.u32 %v1802_v22, %v1275_v21 }
  0x16   :  { %952 = vmatpush.bf16.msra.mxu2 %v1364_v58  ;;  %v1864_v27 = vld [vmem:[%s2877_s1 + $0x274] sm:$0xf0]  ;;  %v1587_v28 = vld [vmem:[%s2877_s1 + $0x2f0] sm:$0xf]  ;;  %v1403_v33 = vld [vmem:[%s2877_s1 + $0x180] sm:$0xf]  ;;  %v1340_v36 = vor.u32 %v1818_v25, %v1339_v23 }
  0x17   :  { %965 = vmatpush.bf16.msra.mxu3 %v1428_v62  ;;  %v1880_v29 = vld [vmem:[%s2877_s1 + $0x2f4] sm:$0xf0]  ;;  %v1651_v30 = vld [vmem:[%s2877_s1 + $0x370] sm:$0xf]  ;;  %v1834_v34 = vld [vmem:[%s2877_s1 + $0x184] sm:$0xf0]  ;;  %v1524_v39 = vor.u32 %v1864_v27, %v1523_v26 }
  0x18   :  { %927 = vmatpush.bf16.msra.mxu0 %v1228_v4  ;;  %v1896_v32 = vld [vmem:[%s2877_s1 + $0x374] sm:$0xf0]  ;;  %v1715_v37 = vld [vmem:[%s2877_s1 + $0x3f0] sm:$0xf]  ;;  %v1588_v40 = vor.u32 %v1880_v29, %v1587_v28  ;;  %v1515_v41 = vld [vmem:[%s2877_s1 + $0x260] sm:$0xf]  ;;  %v1404_v43 = vor.u32 %v1834_v34, %v1403_v33 }
  0x19   :  { %940 = vmatpush.bf16.msra.mxu1 %v1292_v5  ;;  %v1912_v38 = vld [vmem:[%s2877_s1 + $0x3f4] sm:$0xf0]  ;;  %v1652_v42 = vor.u32 %v1896_v32, %v1651_v30  ;;  %v1862_v44 = vld [vmem:[%s2877_s1 + $0x264] sm:$0xf0]  ;;  %v1579_v45 = vld [vmem:[%s2877_s1 + $0x2e0] sm:$0xf] }
  0x1a   :  { %953 = vmatpush.bf16.msra.mxu2 %v1356_v6  ;;  %v1878_v46 = vld [vmem:[%s2877_s1 + $0x2e4] sm:$0xf0]  ;;  %v1716_v47 = vor.u32 %v1912_v38, %v1715_v37  ;;  %v1643_v48 = vld [vmem:[%s2877_s1 + $0x360] sm:$0xf]  ;;  %v1516_v52 = vor.u32 %v1862_v44, %v1515_v41  ;;  %v1507_v54 = vld [vmem:[%s2877_s1 + $0x250] sm:$0xf] }
  0x1b   :  { %966 = vmatpush.bf16.msra.mxu3 %v1420_v10  ;;  %v1894_v49 = vld [vmem:[%s2877_s1 + $0x364] sm:$0xf0]  ;;  %v1707_v50 = vld [vmem:[%s2877_s1 + $0x3e0] sm:$0xf]  ;;  %v1580_v53 = vor.u32 %v1878_v46, %v1579_v45  ;;  %v1860_v55 = vld [vmem:[%s2877_s1 + $0x254] sm:$0xf0] }
  0x1c   :  { %928 = vmatpush.bf16.msra.mxu0 %v1220_v16  ;;  %v1910_v51 = vld [vmem:[%s2877_s1 + $0x3e4] sm:$0xf0]  ;;  %v1644_v57 = vor.u32 %v1894_v49, %v1643_v48  ;;  %v1571_v58 = vld [vmem:[%s2877_s1 + $0x2d0] sm:$0xf]  ;;  %v1876_v59 = vld [vmem:[%s2877_s1 + $0x2d4] sm:$0xf0]  ;;  %v1508_v4 = vor.u32 %v1860_v55, %v1507_v54 }
  0x1d   :  { %941 = vmatpush.bf16.msra.mxu1 %v1284_v19  ;;  %v22_v56 = vld [vmem:[%s2878_s0 + $0x8] sm:$0xff]  ;;  %v21_v61 = vld [vmem:[%s2878_s0] sm:$0xff]  ;;  %v1708_v63 = vor.u32 %v1910_v51, %v1707_v50  ;;  %v1635_v0 = vld [vmem:[%s2877_s1 + $0x350] sm:$0xf]  ;;  %v1572_v9 = vor.u32 %v1876_v59, %v1571_v58 }
  0x1e   :  { %954 = vmatpush.bf16.msra.mxu2 %v1348_v20  ;;  %v177_v60 = vunpack.c.l.b16 %v22_v56  ;;  %v178_v62 = vunpack.c.h.b16 %v22_v56  ;;  %v1892_v1 = vld [vmem:[%s2877_s1 + $0x354] sm:$0xf0]  ;;  %v175_v2 = vunpack.c.l.b16 %v21_v61  ;;  %v176_v3 = vunpack.c.h.b16 %v21_v61  ;;  %v1699_v5 = vld [vmem:[%s2877_s1 + $0x3d0] sm:$0xf]  ;;  %v1499_v10 = vld [vmem:[%s2877_s1 + $0x240] sm:$0xf] }
  0x1f   :  { %967 = vmatpush.bf16.msra.mxu3 %v1412_v24  ;;  %v1908_v6 = vld [vmem:[%s2877_s1 + $0x3d4] sm:$0xf0]  ;;  %v1636_v13 = vor.u32 %v1892_v1, %v1635_v0  ;;  %v1858_v14 = vld [vmem:[%s2877_s1 + $0x244] sm:$0xf0]  ;;  %v1563_v15 = vld [vmem:[%s2877_s1 + $0x2c0] sm:$0xf] }
  0x20   :  { %929 = vmatpush.bf16.msra.mxu0 %v1212_v31  ;;  %v2219_v7 = vpack.c.b16 %v177_v60, %v177_v60  ;;  %v2221_v8 = vpack.c.b16 %v178_v62, %v178_v62  ;;  %v2226_v11 = vpack.c.b16 %v175_v2, %v175_v2  ;;  %v2228_v12 = vpack.c.b16 %v176_v3, %v176_v3  ;;  %v1874_v16 = vld [vmem:[%s2877_s1 + $0x2c4] sm:$0xf0]  ;;  %v1627_v18 = vld [vmem:[%s2877_s1 + $0x340] sm:$0xf]  ;;  %v1491_v24 = vld [vmem:[%s2877_s1 + $0x230] sm:$0xf] }
  0x21   :  { %942 = vmatpush.bf16.msra.mxu1 %v1276_v35  ;;  %v1700_v17 = vor.u32 %v1908_v6, %v1699_v5  ;;  %v1890_v19 = vld [vmem:[%s2877_s1 + $0x344] sm:$0xf0]  ;;  %v1691_v20 = vld [vmem:[%s2877_s1 + $0x3c0] sm:$0xf]  ;;  %v1500_v22 = vor.u32 %v1858_v14, %v1499_v10  ;;  %v1564_v23 = vor.u32 %v1874_v16, %v1563_v15  ;;  %v1856_v26 = vld [vmem:[%s2877_s1 + $0x234] sm:$0xf0] }
  0x22   :  { %955 = vmatpush.bf16.msra.mxu2 %v1340_v36  ;;  %v1906_v21 = vld [vmem:[%s2877_s1 + $0x3c4] sm:$0xf0]  ;;  %v1628_v25 = vor.u32 %v1890_v19, %v1627_v18  ;;  %v1555_v27 = vld [vmem:[%s2877_s1 + $0x2b0] sm:$0xf]  ;;  %v1872_v28 = vld [vmem:[%s2877_s1 + $0x2b4] sm:$0xf0]  ;;  %v1492_v34 = vor.u32 %v1856_v26, %v1491_v24 }
  0x23   :  { %968 = vmatpush.bf16.msra.mxu3 %v1404_v43  ;;  %930 = vmatmul.bf16.vlgmr.msra.gmra.mxu0 %v2226_v11  ;;  %v1692_v29 = vor.u32 %v1906_v21, %v1691_v20  ;;  %v1619_v30 = vld [vmem:[%s2877_s1 + $0x330] sm:$0xf]  ;;  %v1888_v31 = vld [vmem:[%s2877_s1 + $0x334] sm:$0xf0]  ;;  %v1556_v35 = vor.u32 %v1872_v28, %v1555_v27  ;;  %v1483_v36 = vld [vmem:[%s2877_s1 + $0x220] sm:$0xf] }
  0x24   :  { %974 = vmatpush.bf16.msrb.mxu0 %v1524_v39  ;;  %943 = vmatmul.bf16.vlgmr.msra.gmra.mxu1 %v2228_v12  ;;  %v1683_v32 = vld [vmem:[%s2877_s1 + $0x3b0] sm:$0xf]  ;;  %v1904_v33 = vld [vmem:[%s2877_s1 + $0x3b4] sm:$0xf0]  ;;  %v1620_v37 = vor.u32 %v1888_v31, %v1619_v30  ;;  %v1854_v38 = vld [vmem:[%s2877_s1 + $0x224] sm:$0xf0] }
  0x25   :  { %987 = vmatpush.bf16.msrb.mxu1 %v1588_v40  ;;  %956 = vmatmul.bf16.vlgmr.msra.gmra.mxu2 %v2219_v7  ;;  %v1547_v39 = vld [vmem:[%s2877_s1 + $0x2a0] sm:$0xf]  ;;  %v1870_v40 = vld [vmem:[%s2877_s1 + $0x2a4] sm:$0xf0]  ;;  %v1684_v41 = vor.u32 %v1904_v33, %v1683_v32  ;;  %v1484_v46 = vor.u32 %v1854_v38, %v1483_v36  ;;  %v1475_v48 = vld [vmem:[%s2877_s1 + $0x210] sm:$0xf] }
  0x26   :  { %1000 = vmatpush.bf16.msrb.mxu2 %v1652_v42  ;;  %969 = vmatmul.bf16.vlgmr.msra.gmra.mxu3 %v2221_v8  ;;  %v1611_v42 = vld [vmem:[%s2877_s1 + $0x320] sm:$0xf]  ;;  %v1886_v43 = vld [vmem:[%s2877_s1 + $0x324] sm:$0xf0]  ;;  %v1852_v50 = vld [vmem:[%s2877_s1 + $0x214] sm:$0xf0] }
  0x27   :  { %1013 = vmatpush.bf16.msrb.mxu3 %v1716_v47  ;;  %v1675_v44 = vld [vmem:[%s2877_s1 + $0x3a0] sm:$0xf]  ;;  %v1902_v45 = vld [vmem:[%s2877_s1 + $0x3a4] sm:$0xf0]  ;;  %v1548_v47 = vor.u32 %v1870_v40, %v1547_v39  ;;  %v1612_v49 = vor.u32 %v1886_v43, %v1611_v42  ;;  %v1539_v51 = vld [vmem:[%s2877_s1 + $0x290] sm:$0xf]  ;;  %v1476_v60 = vor.u32 %v1852_v50, %v1475_v48 }
  0x28   :  { %975 = vmatpush.bf16.msrb.mxu0 %v1516_v52  ;;  %v1868_v52 = vld [vmem:[%s2877_s1 + $0x294] sm:$0xf0]  ;;  %v1603_v54 = vld [vmem:[%s2877_s1 + $0x310] sm:$0xf]  ;;  %v1467_v58 = vld [vmem:[%s2877_s1 + $0x200] sm:$0xf] }
  0x29   :  { %988 = vmatpush.bf16.msrb.mxu1 %v1580_v53  ;;  %v1676_v53 = vor.u32 %v1902_v45, %v1675_v44  ;;  %v1884_v55 = vld [vmem:[%s2877_s1 + $0x314] sm:$0xf0]  ;;  %v1667_v56 = vld [vmem:[%s2877_s1 + $0x390] sm:$0xf]  ;;  %v1850_v59 = vld [vmem:[%s2877_s1 + $0x204] sm:$0xf0]  ;;  %v1540_v61 = vor.u32 %v1868_v52, %v1539_v51 }
  0x2a   :  { %1001 = vmatpush.bf16.msrb.mxu2 %v1644_v57  ;;  %v1900_v57 = vld [vmem:[%s2877_s1 + $0x394] sm:$0xf0]  ;;  %v1531_v62 = vld [vmem:[%s2877_s1 + $0x280] sm:$0xf]  ;;  %v23_v0 = vld [vmem:[%s2878_s0 + $0x10] sm:$0xff]  ;;  %v1604_v1 = vor.u32 %v1884_v55, %v1603_v54 }
  0x2b   :  { %1014 = vmatpush.bf16.msrb.mxu3 %v1708_v63  ;;  %v1866_v63 = vld [vmem:[%s2877_s1 + $0x284] sm:$0xf0]  ;;  %v1595_v2 = vld [vmem:[%s2877_s1 + $0x300] sm:$0xf]  ;;  %v1668_v5 = vor.u32 %v1900_v57, %v1667_v56  ;;  %v1779_v6 = vld [vmem:[%s2877_s1 + $0x470] sm:$0xf]  ;;  %v179_v16 = vunpack.c.l.b16 %v23_v0  ;;  %v180_v26 = vunpack.c.h.b16 %v23_v0 }
  0x2c   :  { %976 = vmatpush.bf16.msrb.mxu0 %v1508_v4  ;;  %v1882_v3 = vld [vmem:[%s2877_s1 + $0x304] sm:$0xf0]  ;;  %v24_v4 = vld [vmem:[%s2878_s0 + $0x18] sm:$0xff]  ;;  %v1799_v10 = vld [vmem:[%s2877_s1 + $0x74] sm:$0xf]  ;;  %v1532_v18 = vor.u32 %v1866_v63, %v1531_v62 }
  0x2d   :  { %989 = vmatpush.bf16.msrb.mxu1 %v1572_v9  ;;  %v1928_v9 = vld [vmem:[%s2877_s1 + $0x474] sm:$0xf0]  ;;  %v1815_v14 = vld [vmem:[%s2877_s1 + $0xf4] sm:$0xf]  ;;  %v1333_v15 = vld [vmem:[%s2877_s1 + $0xf8] sm:$0xf0]  ;;  %v181_v21 = vunpack.c.l.b16 %v24_v4  ;;  %v2399_v36 = vpack.c.b16 %v179_v16, %v179_v16  ;;  %v2409_v43 = vpack.c.b16 %v180_v26, %v180_v26 }
  0x2e   :  { %1002 = vmatpush.bf16.msrb.mxu2 %v1636_v13  ;;  %v1269_v13 = vld [vmem:[%s2877_s1 + $0x78] sm:$0xf0]  ;;  %v1659_v19 = vld [vmem:[%s2877_s1 + $0x380] sm:$0xf]  ;;  %v1898_v20 = vld [vmem:[%s2877_s1 + $0x384] sm:$0xf0]  ;;  %v1336_v28 = vor.u32 %v1815_v14, %v1333_v15 }
  0x2f   :  { %1015 = vmatpush.bf16.msrb.mxu3 %v1700_v17  ;;  %v1468_v17 = vor.u32 %v1850_v59, %v1467_v58  ;;  %v1831_v24 = vld [vmem:[%s2877_s1 + $0x174] sm:$0xf]  ;;  %v1272_v27 = vor.u32 %v1799_v10, %v1269_v13  ;;  %v1926_v30 = vld [vmem:[%s2877_s1 + $0x464] sm:$0xf0]  ;;  %v1797_v31 = vld [vmem:[%s2877_s1 + $0x64] sm:$0xf]  ;;  %v1660_v32 = vor.u32 %v1898_v20, %v1659_v19  ;;  %v2401_v39 = vpack.c.b16 %v181_v21, %v181_v21 }
  0x30   :  { %977 = vmatpush.bf16.msrb.mxu0 %v1500_v22  ;;  %v1596_v22 = vor.u32 %v1882_v3, %v1595_v2  ;;  %v1261_v33 = vld [vmem:[%s2877_s1 + $0x68] sm:$0xf0]  ;;  %v1795_v48 = vld [vmem:[%s2877_s1 + $0x54] sm:$0xf]  ;;  %v1253_v50 = vld [vmem:[%s2877_s1 + $0x58] sm:$0xf0] }
  0x31   :  { %990 = vmatpush.bf16.msrb.mxu1 %v1564_v23  ;;  %v1780_v23 = vor.u32 %v1928_v9, %v1779_v6  ;;  %v1389_v42 = vld [vmem:[%s2877_s1 + $0x168] sm:$0xf0]  ;;  %v1264_v44 = vor.u32 %v1797_v31, %v1261_v33  ;;  %v1811_v51 = vld [vmem:[%s2877_s1 + $0xd4] sm:$0xf]  ;;  %v1317_v52 = vld [vmem:[%s2877_s1 + $0xd8] sm:$0xf0]  ;;  %v1256_v57 = vor.u32 %v1795_v48, %v1253_v50 }
  0x32   :  { %1003 = vmatpush.bf16.msrb.mxu2 %v1628_v25  ;;  %v1397_v25 = vld [vmem:[%s2877_s1 + $0x178] sm:$0xf0]  ;;  %v1827_v55 = vld [vmem:[%s2877_s1 + $0x154] sm:$0xf]  ;;  %v1320_v58 = vor.u32 %v1811_v51, %v1317_v52  ;;  %v1755_v59 = vld [vmem:[%s2877_s1 + $0x440] sm:$0xf] }
  0x33   :  { %1016 = vmatpush.bf16.msrb.mxu3 %v1692_v29  ;;  %v1771_v29 = vld [vmem:[%s2877_s1 + $0x460] sm:$0xf]  ;;  %v1400_v38 = vor.u32 %v1831_v24, %v1397_v25  ;;  %v1381_v56 = vld [vmem:[%s2877_s1 + $0x158] sm:$0xf0]  ;;  %v1245_v62 = vld [vmem:[%s2877_s1 + $0x48] sm:$0xf0] }
  0x34   :  { %978 = vmatpush.bf16.msrb.mxu0 %v1492_v34  ;;  %v1813_v34 = vld [vmem:[%s2877_s1 + $0xe4] sm:$0xf]  ;;  %v1772_v40 = vor.u32 %v1926_v30, %v1771_v29  ;;  %v1309_v0 = vld [vmem:[%s2877_s1 + $0xc8] sm:$0xf0]  ;;  %v1747_v9 = vld [vmem:[%s2877_s1 + $0x430] sm:$0xf] }
  0x35   :  { %991 = vmatpush.bf16.msrb.mxu1 %v1556_v35  ;;  %v1325_v35 = vld [vmem:[%s2877_s1 + $0xe8] sm:$0xf0]  ;;  %v1809_v63 = vld [vmem:[%s2877_s1 + $0xc4] sm:$0xf]  ;;  %v1920_v10 = vld [vmem:[%s2877_s1 + $0x434] sm:$0xf0] }
  0x36   :  { %1004 = vmatpush.bf16.msrb.mxu2 %v1620_v37  ;;  %v182_v37 = vunpack.c.h.b16 %v24_v4  ;;  %v1328_v45 = vor.u32 %v1813_v34, %v1325_v35  ;;  %v1825_v3 = vld [vmem:[%s2877_s1 + $0x144] sm:$0xf]  ;;  %v1373_v4 = vld [vmem:[%s2877_s1 + $0x148] sm:$0xf0]  ;;  %v1312_v6 = vor.u32 %v1809_v63, %v1309_v0  ;;  %v1791_v13 = vld [vmem:[%s2877_s1 + $0x34] sm:$0xf] }
  0x37   :  { %1017 = vmatpush.bf16.msrb.mxu3 %v1684_v41  ;;  %v1829_v41 = vld [vmem:[%s2877_s1 + $0x164] sm:$0xf]  ;;  %v1237_v14 = vld [vmem:[%s2877_s1 + $0x38] sm:$0xf0]  ;;  %v1807_v15 = vld [vmem:[%s2877_s1 + $0xb4] sm:$0xf] }
  0x38   :  { %979 = vmatpush.bf16.msrb.mxu0 %v1484_v46  ;;  %v1763_v46 = vld [vmem:[%s2877_s1 + $0x450] sm:$0xf]  ;;  %v1301_v16 = vld [vmem:[%s2877_s1 + $0xb8] sm:$0xf0]  ;;  %v1823_v19 = vld [vmem:[%s2877_s1 + $0x134] sm:$0xf]  ;;  %v1240_v21 = vor.u32 %v1791_v13, %v1237_v14 }
  0x39   :  { %992 = vmatpush.bf16.msrb.mxu1 %v1548_v47  ;;  %v1924_v47 = vld [vmem:[%s2877_s1 + $0x454] sm:$0xf0]  ;;  %v1365_v20 = vld [vmem:[%s2877_s1 + $0x138] sm:$0xf0]  ;;  %v1918_v24 = vld [vmem:[%s2877_s1 + $0x424] sm:$0xf0] }
  0x3a   :  { %1005 = vmatpush.bf16.msrb.mxu2 %v1612_v49  ;;  %v2421_v49 = vpack.c.b16 %v182_v37, %v182_v37  ;;  %v1764_v54 = vor.u32 %v1924_v47, %v1763_v46  ;;  %v1789_v25 = vld [vmem:[%s2877_s1 + $0x24] sm:$0xf]  ;;  %v1229_v26 = vld [vmem:[%s2877_s1 + $0x28] sm:$0xf0]  ;;  %v1368_v29 = vor.u32 %v1823_v19, %v1365_v20  ;;  %v1731_v35 = vld [vmem:[%s2877_s1 + $0x410] sm:$0xf] }
  0x3b   :  { %1018 = vmatpush.bf16.msrb.mxu3 %v1676_v53  ;;  %v1392_v53 = vor.u32 %v1829_v41, %v1389_v42  ;;  %v1821_v31 = vld [vmem:[%s2877_s1 + $0x124] sm:$0xf]  ;;  %v1232_v33 = vor.u32 %v1789_v25, %v1229_v26  ;;  %v1916_v37 = vld [vmem:[%s2877_s1 + $0x414] sm:$0xf0]  ;;  %v1803_v41 = vld [vmem:[%s2877_s1 + $0x94] sm:$0xf] }
  0x3c   :  { %980 = vmatpush.bf16.msrb.mxu0 %v1476_v60  ;;  %v1922_v60 = vld [vmem:[%s2877_s1 + $0x444] sm:$0xf0]  ;;  %v1285_v42 = vld [vmem:[%s2877_s1 + $0x98] sm:$0xf0]  ;;  %v1732_v46 = vor.u32 %v1916_v37, %v1731_v35  ;;  %v1723_v48 = vld [vmem:[%s2877_s1 + $0x400] sm:$0xf] }
  0x3d   :  { %993 = vmatpush.bf16.msrb.mxu1 %v1540_v61  ;;  %v1793_v61 = vld [vmem:[%s2877_s1 + $0x44] sm:$0xf]  ;;  %v1756_v2 = vor.u32 %v1922_v60, %v1755_v59  ;;  %v1349_v47 = vld [vmem:[%s2877_s1 + $0x118] sm:$0xf0]  ;;  %v25_v50 = vld [vmem:[%s2878_s0 + $0x20] sm:$0xf]  ;;  %v1288_v52 = vor.u32 %v1803_v41, %v1285_v42 }
  0x3e   :  { %1006 = vmatpush.bf16.msrb.mxu2 %v1604_v1  ;;  %v1384_v1 = vor.u32 %v1827_v55, %v1381_v56  ;;  %v1213_v55 = vld [vmem:[%s2877_s1 + $0x8] sm:$0xf0]  ;;  %v1801_v56 = vld [vmem:[%s2877_s1 + $0x84] sm:$0xf]  ;;  %v1461_v60 = vld [vmem:[%s2877_s1 + $0x1f8] sm:$0xf0]  ;;  %v183_v63 = vunpack.c.l.b16 %v25_v50 }
  0x3f   :  { %1019 = vmatpush.bf16.msrb.mxu3 %v1668_v5  ;;  %v1248_v5 = vor.u32 %v1793_v61, %v1245_v62  ;;  %v1863_v61 = vld [vmem:[%s2877_s1 + $0x274] sm:$0xf]  ;;  %v1525_v62 = vld [vmem:[%s2877_s1 + $0x278] sm:$0xf0]  ;;  %v1861_v19 = vld [vmem:[%s2877_s1 + $0x264] sm:$0xf] }
  0x40   :  { %981 = vmatpush.bf16.msrb.mxu0 %v1468_v17  ;;  %v1376_v17 = vor.u32 %v1825_v3, %v1373_v4  ;;  %v1895_v13 = vld [vmem:[%s2877_s1 + $0x374] sm:$0xf]  ;;  %v1653_v14 = vld [vmem:[%s2877_s1 + $0x378] sm:$0xf0]  ;;  %v1517_v20 = vld [vmem:[%s2877_s1 + $0x268] sm:$0xf0] }
  0x41   :  { %994 = vmatpush.bf16.msrb.mxu1 %v1532_v18  ;;  %v1748_v18 = vor.u32 %v1920_v10, %v1747_v9  ;;  %v1528_v10 = vor.u32 %v1863_v61, %v1525_v62  ;;  %v1520_v26 = vor.u32 %v1861_v19, %v1517_v20  ;;  %v1573_v35 = vld [vmem:[%s2877_s1 + $0x2d8] sm:$0xf0]  ;;  %v1891_v41 = vld [vmem:[%s2877_s1 + $0x354] sm:$0xf] }
  0x42   :  { %1007 = vmatpush.bf16.msrb.mxu2 %v1596_v22  ;;  %v1304_v22 = vor.u32 %v1807_v15, %v1301_v16  ;;  %v1845_v15 = vld [vmem:[%s2877_s1 + $0x1e4] sm:$0xf]  ;;  %v1637_v42 = vld [vmem:[%s2877_s1 + $0x358] sm:$0xf0]  ;;  %v1835_v19 = vld [vmem:[%s2877_s1 + $0x194] sm:$0xf] }
  0x43   :  { %1020 = vmatpush.bf16.msrb.mxu3 %v1660_v32  ;;  %982 = vmatmul.bf16.vlgmr.msrb.gmra.mxu0 %v2399_v36  ;;  %v1357_v32 = vld [vmem:[%s2877_s1 + $0x128] sm:$0xf0]  ;;  %v1640_v50 = vor.u32 %v1891_v41, %v1637_v42  ;;  %v1717_v41 = vld [vmem:[%s2877_s1 + $0x3f8] sm:$0xf0] }
  0x44   :  { %1026 = vmatpush.bf16.msra.mxu0 %v1780_v23  ;;  %995 = vmatmul.bf16.vlgmr.msrb.gmra.mxu1 %v2409_v43  ;;  %v1739_v23 = vld [vmem:[%s2877_s1 + $0x420] sm:$0xf] }
  0x45   :  { %1039 = vmatpush.bf16.msra.mxu1 %v1272_v27  ;;  %1008 = vmatmul.bf16.vlgmr.msrb.gmra.mxu2 %v2401_v39  ;;  %v1805_v27 = vld [vmem:[%s2877_s1 + $0xa4] sm:$0xf]  ;;  %v1740_v30 = vor.u32 %v1918_v24, %v1739_v23  ;;  %v1581_v23 = vld [vmem:[%s2877_s1 + $0x2e8] sm:$0xf0]  ;;  %v1656_v24 = vor.u32 %v1895_v13, %v1653_v14 }
  0x46   :  { %1052 = vmatpush.bf16.msra.mxu2 %v1336_v28  ;;  %1021 = vmatmul.bf16.vlgmr.msrb.gmra.mxu3 %v2421_v49  ;;  %v1293_v28 = vld [vmem:[%s2877_s1 + $0xa8] sm:$0xf0] }
  0x47   :  { %1065 = vmatpush.bf16.msra.mxu3 %v1400_v38  ;;  %v1296_v34 = vor.u32 %v1805_v27, %v1293_v28  ;;  %v1787_v38 = vld [vmem:[%s2877_s1 + $0x14] sm:$0xf]  ;;  %v1893_v27 = vld [vmem:[%s2877_s1 + $0x364] sm:$0xf]  ;;  %v1645_v28 = vld [vmem:[%s2877_s1 + $0x368] sm:$0xf0] }
  0x48   :  { %1027 = vmatpush.bf16.msra.mxu0 %v1772_v40  ;;  %v1221_v40 = vld [vmem:[%s2877_s1 + $0x18] sm:$0xf0]  ;;  %v1648_v37 = vor.u32 %v1893_v27, %v1645_v28  ;;  %v1883_v27 = vld [vmem:[%s2877_s1 + $0x314] sm:$0xf] }
  0x49   :  { %1040 = vmatpush.bf16.msra.mxu1 %v1264_v44  ;;  %v1360_v44 = vor.u32 %v1821_v31, %v1357_v32  ;;  %v1224_v51 = vor.u32 %v1787_v38, %v1221_v40  ;;  %v1445_v31 = vld [vmem:[%s2877_s1 + $0x1d8] sm:$0xf0]  ;;  %v1859_v32 = vld [vmem:[%s2877_s1 + $0x254] sm:$0xf] }
  0x4a   :  { %1053 = vmatpush.bf16.msra.mxu2 %v1328_v45  ;;  %v1819_v45 = vld [vmem:[%s2877_s1 + $0x114] sm:$0xf] }
  0x4b   :  { %1066 = vmatpush.bf16.msra.mxu3 %v1392_v53  ;;  %v1914_v53 = vld [vmem:[%s2877_s1 + $0x404] sm:$0xf0]  ;;  %v1352_v59 = vor.u32 %v1819_v45, %v1349_v47  ;;  %v1857_v45 = vld [vmem:[%s2877_s1 + $0x244] sm:$0xf] }
  0x4c   :  { %1028 = vmatpush.bf16.msra.mxu0 %v1764_v54  ;;  %v1785_v54 = vld [vmem:[%s2877_s1 + $0x4] sm:$0xf]  ;;  %v1724_v0 = vor.u32 %v1914_v53, %v1723_v48  ;;  %v1565_v48 = vld [vmem:[%s2877_s1 + $0x2c8] sm:$0xf0] }
  0x4d   :  { %1041 = vmatpush.bf16.msra.mxu1 %v1256_v57  ;;  %v1277_v57 = vld [vmem:[%s2877_s1 + $0x88] sm:$0xf0]  ;;  %v1216_v3 = vor.u32 %v1785_v54, %v1213_v55  ;;  %v1873_v47 = vld [vmem:[%s2877_s1 + $0x2c4] sm:$0xf]  ;;  %v1839_v54 = vld [vmem:[%s2877_s1 + $0x1b4] sm:$0xf] }
  0x4e   :  { %1054 = vmatpush.bf16.msra.mxu2 %v1320_v58  ;;  %v1847_v58 = vld [vmem:[%s2877_s1 + $0x1f4] sm:$0xf]  ;;  %v1280_v4 = vor.u32 %v1801_v56, %v1277_v57  ;;  %v1889_v53 = vld [vmem:[%s2877_s1 + $0x344] sm:$0xf]  ;;  %v1568_v55 = vor.u32 %v1873_v47, %v1565_v48  ;;  %v1429_v56 = vld [vmem:[%s2877_s1 + $0x1b8] sm:$0xf0] }
  0x4f   :  { %1067 = vmatpush.bf16.msra.mxu3 %v1384_v1  ;;  %v1879_v1 = vld [vmem:[%s2877_s1 + $0x2f4] sm:$0xf]  ;;  %v1464_v9 = vor.u32 %v1847_v58, %v1461_v60  ;;  %v1493_v58 = vld [vmem:[%s2877_s1 + $0x238] sm:$0xf0]  ;;  %v1432_v62 = vor.u32 %v1839_v54, %v1429_v56  ;;  %v1597_v47 = vld [vmem:[%s2877_s1 + $0x308] sm:$0xf0] }
  0x50   :  { %1029 = vmatpush.bf16.msra.mxu0 %v1756_v2  ;;  %v1589_v2 = vld [vmem:[%s2877_s1 + $0x2f8] sm:$0xf0]  ;;  %v1855_v57 = vld [vmem:[%s2877_s1 + $0x234] sm:$0xf]  ;;  %v1925_v54 = vld [vmem:[%s2877_s1 + $0x464] sm:$0xf] }
  0x51   :  { %1042 = vmatpush.bf16.msra.mxu1 %v1248_v5  ;;  %v1817_v5 = vld [vmem:[%s2877_s1 + $0x104] sm:$0xf]  ;;  %v1592_v16 = vor.u32 %v1879_v1, %v1589_v2  ;;  %v1557_v60 = vld [vmem:[%s2877_s1 + $0x2b8] sm:$0xf0] }
  0x52   :  { %1055 = vmatpush.bf16.msra.mxu2 %v1312_v6  ;;  %v1341_v6 = vld [vmem:[%s2877_s1 + $0x108] sm:$0xf0]  ;;  %v1621_v1 = vld [vmem:[%s2877_s1 + $0x338] sm:$0xf0]  ;;  %v1837_v2 = vld [vmem:[%s2877_s1 + $0x1a4] sm:$0xf] }
  0x53   :  { %1068 = vmatpush.bf16.msra.mxu3 %v1376_v17  ;;  %v2591_v17 = vpack.c.b16 %v183_v63, %v183_v63  ;;  %v1496_v63 = vor.u32 %v1855_v57, %v1493_v58  ;;  %v1907_v58 = vld [vmem:[%s2877_s1 + $0x3d4] sm:$0xf] }
  0x54   :  { %1030 = vmatpush.bf16.msra.mxu0 %v1748_v18  ;;  %v1453_v18 = vld [vmem:[%s2877_s1 + $0x1e8] sm:$0xf0] }
  0x55   :  { %1043 = vmatpush.bf16.msra.mxu1 %v1240_v21  ;;  %v1344_v21 = vor.u32 %v1817_v5, %v1341_v6  ;;  %v1456_v25 = vor.u32 %v1845_v15, %v1453_v18  ;;  %v1853_v5 = vld [vmem:[%s2877_s1 + $0x224] sm:$0xf]  ;;  %v1485_v6 = vld [vmem:[%s2877_s1 + $0x228] sm:$0xf0] }
  0x56   :  { %1056 = vmatpush.bf16.msra.mxu2 %v1304_v22  ;;  %v1877_v22 = vld [vmem:[%s2877_s1 + $0x2e4] sm:$0xf]  ;;  %v1488_v15 = vor.u32 %v1853_v5, %v1485_v6  ;;  %v1613_v18 = vld [vmem:[%s2877_s1 + $0x328] sm:$0xf0]  ;;  %v1749_v5 = vld [vmem:[%s2877_s1 + $0x438] sm:$0xf0] }
  0x57   :  { %1069 = vmatpush.bf16.msra.mxu3 %v1368_v29  ;;  %v1843_v29 = vld [vmem:[%s2877_s1 + $0x1d4] sm:$0xf] }
  0x58   :  { %1031 = vmatpush.bf16.msra.mxu0 %v1740_v30  ;;  %v1584_v30 = vor.u32 %v1877_v22, %v1581_v23  ;;  %v1448_v38 = vor.u32 %v1843_v29, %v1445_v31  ;;  %v1851_v22 = vld [vmem:[%s2877_s1 + $0x214] sm:$0xf]  ;;  %v1477_v23 = vld [vmem:[%s2877_s1 + $0x218] sm:$0xf0]  ;;  %v1833_v31 = vld [vmem:[%s2877_s1 + $0x184] sm:$0xf] }
  0x59   :  { %1044 = vmatpush.bf16.msra.mxu1 %v1232_v33  ;;  %v1509_v33 = vld [vmem:[%s2877_s1 + $0x258] sm:$0xf0]  ;;  %v1480_v29 = vor.u32 %v1851_v22, %v1477_v23 }
  0x5a   :  { %1057 = vmatpush.bf16.msra.mxu2 %v1296_v34  ;;  %v1875_v34 = vld [vmem:[%s2877_s1 + $0x2d4] sm:$0xf]  ;;  %v1512_v40 = vor.u32 %v1859_v32, %v1509_v33  ;;  %v1405_v32 = vld [vmem:[%s2877_s1 + $0x188] sm:$0xf0]  ;;  %v1733_v22 = vld [vmem:[%s2877_s1 + $0x418] sm:$0xf0] }
  0x5b   :  { %1070 = vmatpush.bf16.msra.mxu3 %v1360_v44  ;;  %v1576_v44 = vor.u32 %v1875_v34, %v1573_v35  ;;  %v1849_v34 = vld [vmem:[%s2877_s1 + $0x204] sm:$0xf]  ;;  %v1469_v35 = vld [vmem:[%s2877_s1 + $0x208] sm:$0xf0] }
  0x5c   :  { %1032 = vmatpush.bf16.msra.mxu0 %v1732_v46  ;;  %v1501_v46 = vld [vmem:[%s2877_s1 + $0x248] sm:$0xf0] }
  0x5d   :  { %1045 = vmatpush.bf16.msra.mxu1 %v1224_v51 }
  0x5e   :  { %1058 = vmatpush.bf16.msra.mxu2 %v1288_v52  ;;  %v1504_v52 = vor.u32 %v1857_v45, %v1501_v46  ;;  %v1472_v45 = vor.u32 %v1849_v34, %v1469_v35  ;;  %v1881_v46 = vld [vmem:[%s2877_s1 + $0x304] sm:$0xf] }
  0x5f   :  { %1071 = vmatpush.bf16.msra.mxu3 %v1352_v59  ;;  %v1871_v59 = vld [vmem:[%s2877_s1 + $0x2b4] sm:$0xf] }
  0x60   :  { %1033 = vmatpush.bf16.msra.mxu0 %v1724_v0  ;;  %v1887_v0 = vld [vmem:[%s2877_s1 + $0x334] sm:$0xf] }
  0x61   :  { %1046 = vmatpush.bf16.msra.mxu1 %v1216_v3  ;;  %v1560_v3 = vor.u32 %v1871_v59, %v1557_v60  ;;  %v1624_v13 = vor.u32 %v1887_v0, %v1621_v1  ;;  %v1701_v59 = vld [vmem:[%s2877_s1 + $0x3d8] sm:$0xf0]  ;;  %v1923_v60 = vld [vmem:[%s2877_s1 + $0x454] sm:$0xf]  ;;  %v1693_v0 = vld [vmem:[%s2877_s1 + $0x3c8] sm:$0xf0] }
  0x62   :  { %1059 = vmatpush.bf16.msra.mxu2 %v1280_v4  ;;  %v1421_v4 = vld [vmem:[%s2877_s1 + $0x1a8] sm:$0xf0] }
  0x63   :  { %1034 = vmatmul.bf16.vlgmr.msra.gmra.mxu0 %v2591_v17  ;;  %1072 = vmatpush.bf16.msra.mxu3 %v1344_v21  ;;  %v1424_v14 = vor.u32 %v1837_v2, %v1421_v4  ;;  %v1413_v21 = vld [vmem:[%s2877_s1 + $0x198] sm:$0xf0]  ;;  %v1903_v2 = vld [vmem:[%s2877_s1 + $0x3b4] sm:$0xf] }
  0x64   :  { %1078 = vmatpush.bf16.msrb.mxu0 %v1464_v9  ;;  %1047 = vmatmul.bf16.vlgmr.msra.gmra.mxu1 %v2226_v11  ;;  %v1437_v11 = vld [vmem:[%s2877_s1 + $0x1c8] sm:$0xf0]  ;;  %v1869_v9 = vld [vmem:[%s2877_s1 + $0x2a4] sm:$0xf]  ;;  %v1416_v28 = vor.u32 %v1835_v19, %v1413_v21  ;;  %v1919_v4 = vld [vmem:[%s2877_s1 + $0x434] sm:$0xf] }
  0x65   :  { %1091 = vmatpush.bf16.msrb.mxu1 %v1528_v10  ;;  %1060 = vmatmul.bf16.vlgmr.msra.gmra.mxu2 %v2228_v12  ;;  %v1841_v12 = vld [vmem:[%s2877_s1 + $0x1c4] sm:$0xf]  ;;  %v1549_v10 = vld [vmem:[%s2877_s1 + $0x2a8] sm:$0xf0]  ;;  %v1899_v19 = vld [vmem:[%s2877_s1 + $0x394] sm:$0xf] }
  0x66   :  { %1104 = vmatpush.bf16.msrb.mxu2 %v1592_v16  ;;  %1073 = vmatmul.bf16.vlgmr.msra.gmra.mxu3 %v2219_v7  ;;  %v1440_v51 = vor.u32 %v1841_v12, %v1437_v11  ;;  %v1629_v7 = vld [vmem:[%s2877_s1 + $0x348] sm:$0xf0]  ;;  %v1885_v16 = vld [vmem:[%s2877_s1 + $0x324] sm:$0xf]  ;;  %v1552_v20 = vor.u32 %v1869_v9, %v1549_v10  ;;  %v1927_v12 = vld [vmem:[%s2877_s1 + $0x474] sm:$0xf]  ;;  %v1408_v11 = vor.u32 %v1833_v31, %v1405_v32 }
  0x67   :  { %1117 = vmatpush.bf16.msrb.mxu3 %v1656_v24  ;;  %v1632_v61 = vor.u32 %v1889_v53, %v1629_v7  ;;  %v1867_v24 = vld [vmem:[%s2877_s1 + $0x294] sm:$0xf]  ;;  %v1709_v53 = vld [vmem:[%s2877_s1 + $0x3e8] sm:$0xf0]  ;;  %v1600_v7 = vor.u32 %v1881_v46, %v1597_v47  ;;  %v1752_v9 = vor.u32 %v1919_v4, %v1749_v5  ;;  %v1901_v10 = vld [vmem:[%s2877_s1 + $0x3a4] sm:$0xf] }
  0x68   :  { %1079 = vmatpush.bf16.msrb.mxu0 %v1456_v25  ;;  %v1541_v25 = vld [vmem:[%s2877_s1 + $0x298] sm:$0xf0]  ;;  %v1915_v21 = vld [vmem:[%s2877_s1 + $0x414] sm:$0xf] }
  0x69   :  { %1092 = vmatpush.bf16.msrb.mxu1 %v1520_v26  ;;  %v1616_v26 = vor.u32 %v1885_v16, %v1613_v18  ;;  %v1544_v33 = vor.u32 %v1867_v24, %v1541_v25  ;;  %v1736_v24 = vor.u32 %v1915_v21, %v1733_v22  ;;  %v1897_v25 = vld [vmem:[%s2877_s1 + $0x384] sm:$0xf] }
  0x6a   :  { %1105 = vmatpush.bf16.msrb.mxu2 %v1584_v30  ;;  %v1605_v30 = vld [vmem:[%s2877_s1 + $0x318] sm:$0xf0] }
  0x6b   :  { %1118 = vmatpush.bf16.msrb.mxu3 %v1648_v37  ;;  %v1865_v37 = vld [vmem:[%s2877_s1 + $0x284] sm:$0xf]  ;;  %v1608_v42 = vor.u32 %v1883_v27, %v1605_v30 }
  0x6c   :  { %1080 = vmatpush.bf16.msrb.mxu0 %v1448_v38  ;;  %v1533_v38 = vld [vmem:[%s2877_s1 + $0x288] sm:$0xf0]  ;;  %v1913_v27 = vld [vmem:[%s2877_s1 + $0x404] sm:$0xf] }
  0x6d   :  { %1093 = vmatpush.bf16.msrb.mxu1 %v1512_v40  ;;  %v1911_v40 = vld [vmem:[%s2877_s1 + $0x3f4] sm:$0xf]  ;;  %v1536_v48 = vor.u32 %v1865_v37, %v1533_v38 }
  0x6e   :  { %1106 = vmatpush.bf16.msrb.mxu2 %v1576_v44  ;;  %v1781_v44 = vld [vmem:[%s2877_s1 + $0x478] sm:$0xf0] }
  0x6f   :  { %1119 = vmatpush.bf16.msrb.mxu3 %v1640_v50  ;;  %v1720_v50 = vor.u32 %v1911_v40, %v1717_v41 }
  0x70   :  { %1081 = vmatpush.bf16.msrb.mxu0 %v1440_v51  ;;  %v1784_v51 = vor.u32 %v1927_v12, %v1781_v44 }
  0x71   :  { %1094 = vmatpush.bf16.msrb.mxu1 %v1504_v52  ;;  %v1909_v52 = vld [vmem:[%s2877_s1 + $0x3e4] sm:$0xf] }
  0x72   :  { %1107 = vmatpush.bf16.msrb.mxu2 %v1568_v55  ;;  %v1773_v55 = vld [vmem:[%s2877_s1 + $0x468] sm:$0xf0]  ;;  %v1712_v56 = vor.u32 %v1909_v52, %v1709_v53 }
  0x73   :  { %1120 = vmatpush.bf16.msrb.mxu3 %v1632_v61  ;;  %v1776_v57 = vor.u32 %v1925_v54, %v1773_v55  ;;  %v1765_v61 = vld [vmem:[%s2877_s1 + $0x458] sm:$0xf0] }
  0x74   :  { %1082 = vmatpush.bf16.msrb.mxu0 %v1432_v62  ;;  %v1704_v62 = vor.u32 %v1907_v58, %v1701_v59 }
  0x75   :  { %1095 = vmatpush.bf16.msrb.mxu1 %v1496_v63  ;;  %v1768_v63 = vor.u32 %v1923_v60, %v1765_v61 }
  0x76   :  { %1108 = vmatpush.bf16.msrb.mxu2 %v1560_v3  ;;  %v1685_v3 = vld [vmem:[%s2877_s1 + $0x3b8] sm:$0xf0] }
  0x77   :  { %1121 = vmatpush.bf16.msrb.mxu3 %v1624_v13  ;;  %v1688_v6 = vor.u32 %v1903_v2, %v1685_v3  ;;  %v1677_v13 = vld [vmem:[%s2877_s1 + $0x3a8] sm:$0xf0] }
  0x78   :  { %1083 = vmatpush.bf16.msrb.mxu0 %v1424_v14  ;;  %v1917_v14 = vld [vmem:[%s2877_s1 + $0x424] sm:$0xf]  ;;  %v1680_v16 = vor.u32 %v1901_v10, %v1677_v13 }
  0x79   :  { %1096 = vmatpush.bf16.msrb.mxu1 %v1488_v15  ;;  %v1741_v15 = vld [vmem:[%s2877_s1 + $0x428] sm:$0xf0] }
  0x7a   :  { %1109 = vmatpush.bf16.msrb.mxu2 %v1552_v20  ;;  %v1744_v18 = vor.u32 %v1917_v14, %v1741_v15  ;;  %v1669_v20 = vld [vmem:[%s2877_s1 + $0x398] sm:$0xf0] }
  0x7b   :  { %1122 = vmatpush.bf16.msrb.mxu3 %v1616_v26  ;;  %v1672_v23 = vor.u32 %v1899_v19, %v1669_v20  ;;  %v1661_v26 = vld [vmem:[%s2877_s1 + $0x388] sm:$0xf0] }
  0x7c   :  { %1084 = vmatpush.bf16.msrb.mxu0 %v1416_v28  ;;  %v1725_v28 = vld [vmem:[%s2877_s1 + $0x408] sm:$0xf0] }
  0x7d   :  { %1097 = vmatpush.bf16.msrb.mxu1 %v1480_v29  ;;  %v1664_v29 = vor.u32 %v1897_v25, %v1661_v26  ;;  %v1728_v30 = vor.u32 %v1913_v27, %v1725_v28 }
  0x7e   :  { %1110 = vmatpush.bf16.msrb.mxu2 %v1544_v33 }
  0x7f   :  { %1123 = vmatpush.bf16.msrb.mxu3 %v1608_v42 }
  0x80   :  { %1085 = vmatpush.bf16.msrb.mxu0 %v1408_v11 }
  0x81   :  { %1098 = vmatpush.bf16.msrb.mxu1 %v1472_v45 }
  0x82   :  { %1111 = vmatpush.bf16.msrb.mxu2 %v1536_v48 }
  0x83   :  { %1124 = vmatpush.bf16.msrb.mxu3 %v1600_v7  ;;  %1086 = vmatmul.bf16.vlgmr.msrb.gmra.mxu0 %v2221_v8  ;;  %v1905_v8 = vld [vmem:[%s2877_s1 + $0x3c4] sm:$0xf] }
  0x84   :  { %1130 = vmatpush.bf16.msra.mxu0 %v1720_v50  ;;  %1099 = vmatmul.bf16.vlgmr.msrb.gmra.mxu1 %v2399_v36  ;;  %v1757_v36 = vld [vmem:[%s2877_s1 + $0x448] sm:$0xf0]  ;;  %v1696_v1 = vor.u32 %v1905_v8, %v1693_v0 }
  0x85   :  { %1143 = vmatpush.bf16.msra.mxu1 %v1784_v51  ;;  %1112 = vmatmul.bf16.vlgmr.msrb.gmra.mxu2 %v2409_v43  ;;  %v1921_v43 = vld [vmem:[%s2877_s1 + $0x444] sm:$0xf] }
  0x86   :  { %1125 = vmatmul.bf16.vlgmr.msrb.gmra.mxu3 %v2401_v39  ;;  %v1760_v39 = vor.u32 %v1921_v43, %v1757_v36 }
  0x88   :  { %1131 = vmatpush.bf16.msra.mxu0 %v1712_v56 }
  0x89   :  { %1144 = vmatpush.bf16.msra.mxu1 %v1776_v57 }
  0x8c   :  { %1132 = vmatpush.bf16.msra.mxu0 %v1704_v62 }
  0x8d   :  { %1145 = vmatpush.bf16.msra.mxu1 %v1768_v63 }
  0x90   :  { %1133 = vmatpush.bf16.msra.mxu0 %v1696_v1 }
  0x91   :  { %1146 = vmatpush.bf16.msra.mxu1 %v1760_v39 }
  0x94   :  { %1134 = vmatpush.bf16.msra.mxu0 %v1688_v6 }
  0x95   :  { %1147 = vmatpush.bf16.msra.mxu1 %v1752_v9 }
  0x98   :  { %1135 = vmatpush.bf16.msra.mxu0 %v1680_v16 }
  0x99   :  { %1148 = vmatpush.bf16.msra.mxu1 %v1744_v18 }
  0x9c   :  { %1136 = vmatpush.bf16.msra.mxu0 %v1672_v23 }
  0x9d   :  { %1149 = vmatpush.bf16.msra.mxu1 %v1736_v24 }
  0xa0   :  { %1137 = vmatpush.bf16.msra.mxu0 %v1664_v29  ;;  %v931_v31 = vpop.f32.mrf.mxu0 }
  0xa1   :  { %1150 = vmatpush.bf16.msra.mxu1 %v1728_v30  ;;  %v944_v32 = vpop.f32.mrf.mxu1 }
  0xa2   :  { %v945_v12 = vadd.f32 %v944_v32, %v931_v31 }
  0xa3   :  { %1138 = vmatmul.bf16.vlgmr.msra.gmra.mxu0 %v2421_v49 }
  0xa4   :  { %1151 = vmatmul.bf16.vlgmr.msra.gmra.mxu1 %v2591_v17 }
  0xa8   :  { %v957_v34 = vpop.f32.mrf.mxu2  ;;  %v933_v35 = vpop.f32.mrf.mxu0 }
  0xa9   :  { %v970_v33 = vpop.f32.mrf.mxu3  ;;  %v946_v37 = vpop.f32.mrf.mxu1  ;;  %v958_v11 = vadd.f32 %v957_v34, %v945_v12 }
  0xab   :  { %v971_v48 = vadd.f32 %v970_v33, %v958_v11 }
  0xb0   :  { %v959_v40 = vpop.f32.mrf.mxu2 }
  0xb1   :  { %v972_v38 = vpop.f32.mrf.mxu3 }
  0xc0   :  { %v983_v41 = vpop.f32.mrf.mxu0 }
  0xc1   :  { %v996_v42 = vpop.f32.mrf.mxu1  ;;  %v984_v50 = vadd.f32 %v983_v41, %v971_v48 }
  0xc3   :  { %v997_v51 = vadd.f32 %v996_v42, %v984_v50 }
  0xc8   :  { %v1009_v44 = vpop.f32.mrf.mxu2  ;;  %v985_v45 = vpop.f32.mrf.mxu0 }
  0xc9   :  { %v1022_v46 = vpop.f32.mrf.mxu3  ;;  %v998_v47 = vpop.f32.mrf.mxu1  ;;  %v1010_v52 = vadd.f32 %v1009_v44, %v997_v51 }
  0xcb   :  { %v1023_v53 = vadd.f32 %v1022_v46, %v1010_v52 }
  0xd0   :  { %v1011_v49 = vpop.f32.mrf.mxu2 }
  0xd1   :  { %v1024_v17 = vpop.f32.mrf.mxu3 }
  0xe0   :  { %v1035_v7 = vpop.f32.mrf.mxu0 }
  0xe1   :  { %v1036_v54 = vadd.f32 %v1035_v7, %v1023_v53  ;;  %v1048_v55 = vpop.f32.mrf.mxu1 }
  0xe3   :  { %v1167_v56 = vrot.slane %v1036_v54, 4  ;;  %v1179_v57 = vmul.f32 %v1036_v54, %v1036_v54 }
  0xe5   :  { %v1168_v58 = vadd.f32 %v1167_v56, %v1036_v54  ;;  %v1181_v59 = vrot.slane %v1179_v57, 4 }
  0xe7   :  { %v1169_v60 = vrot.slane %v1168_v58, 2  ;;  %v1182_v61 = vadd.f32 %v1181_v59, %v1179_v57 }
  0xe8   :  { %v1061_v62 = vpop.f32.mrf.mxu2  ;;  %v1037_v63 = vpop.f32.mrf.mxu0 }
  0xe9   :  { %v1170_v8 = vadd.f32 %v1169_v60, %v1168_v58  ;;  %v1183_v0 = vrot.slane %v1182_v61, 2  ;;  %v1074_v43 = vpop.f32.mrf.mxu3  ;;  %v1050_v36 = vpop.f32.mrf.mxu1  ;;  %v1062_v16 = vadd.f32 %v1061_v62, %v1048_v55 }
  0xeb   :  { %v1171_v1 = vrot.slane %v1170_v8, 1  ;;  %v1184_v39 = vadd.f32 %v1183_v0, %v1182_v61  ;;  %v1075_v21 = vadd.f32 %v1074_v43, %v1062_v16 }
  0xed   :  { %v1185_v2 = vrot.slane %v1184_v39, 1  ;;  %v1172_v3 = vadd.f32 %v1171_v1, %v1170_v8 }
  0xef   :  { %v1186_v4 = vadd.f32 %v1185_v2, %v1184_v39 }
  0xf0   :  { %v1063_v5 = vpop.f32.mrf.mxu2 }
  0xf1   :  { %v1194_v6 = vsel %vm1193_vm0, %v1172_v3, %v1186_v4  ;;  %v1076_v10 = vpop.f32.mrf.mxu3 }
  0xf2   :  { %v1197_v9 = vsel %vm1196_vm1, %v1194_v6, 0.0 }
  0xf3   :  { %1199 = vst [vmem:[%s2879_s3] sm:$0xff] %v1197_v9 }
 0x100   :  { %v1087_v13 = vpop.f32.mrf.mxu0 }
 0x101   :  { %v1100_v14 = vpop.f32.mrf.mxu1  ;;  %v1088_v23 = vadd.f32 %v1087_v13, %v1075_v21 }
 0x103   :  { %v1101_v25 = vadd.f32 %v1100_v14, %v1088_v23 }
 0x108   :  { %v1113_v15 = vpop.f32.mrf.mxu2  ;;  %v1089_v18 = vpop.f32.mrf.mxu0 }
 0x109   :  { %v1126_v19 = vpop.f32.mrf.mxu3  ;;  %v1102_v20 = vpop.f32.mrf.mxu1  ;;  %v1114_v26 = vadd.f32 %v1113_v15, %v1101_v25 }
 0x10b   :  { %v1127_v27 = vadd.f32 %v1126_v19, %v1114_v26 }
 0x110   :  { %v1115_v22 = vpop.f32.mrf.mxu2 }
 0x111   :  { %v1128_v24 = vpop.f32.mrf.mxu3 }
 0x120   :  { %v1139_v28 = vpop.f32.mrf.mxu0 }
 0x121   :  { %v1140_v29 = vadd.f32 %v1139_v28, %v1127_v27  ;;  %v1152_v30 = vpop.f32.mrf.mxu1 }
 0x123   :  { %v1153_v31 = vadd.f32 %v1152_v30, %v1140_v29 }
 0x125   :  { %v1165_v32 = vpack.c.bf16 %v1153_v31, %v1036_v54  ;;  %v1173_v33 = vrot.slane %v1153_v31, 4  ;;  %v1180_v34 = vmul.f32 %v1153_v31, %v1153_v31 }
 0x127   :  { %1166 = vst [vmem:[%s2880_s2] sm:$0xff] %v1165_v32  ;;  %v1174_v35 = vadd.f32 %v1173_v33, %v1153_v31  ;;  %v1187_v37 = vrot.slane %v1180_v34, 4 }
 0x128   :  { %v1141_v38 = vpop.f32.mrf.mxu0 }
 0x129   :  { %v1175_v40 = vrot.slane %v1174_v35, 2  ;;  %v1188_v41 = vadd.f32 %v1187_v37, %v1180_v34  ;;  %v1154_v42 = vpop.f32.mrf.mxu1 }
 0x12b   :  { %v1176_v12 = vadd.f32 %v1175_v40, %v1174_v35  ;;  %v1189_v44 = vrot.slane %v1188_v41, 2 }
 0x12d   :  { %v1177_v11 = vrot.slane %v1176_v12, 1  ;;  %v1190_v45 = vadd.f32 %v1189_v44, %v1188_v41 }
 0x12f   :  { %v1191_v46 = vrot.slane %v1190_v45, 1  ;;  %v1178_v47 = vadd.f32 %v1177_v11, %v1176_v12 }
 0x131   :  { %v1192_v48 = vadd.f32 %v1191_v46, %v1190_v45 }
 0x133   :  { %v1195_v49 = vsel %vm1193_vm0, %v1178_v47, %v1192_v48 }
 0x134   :  { %v1198_v50 = vsel %vm1196_vm1, %v1195_v49, 0.0 }
 0x135   :  { %1200 = vst [vmem:[%s2879_s3 + $0x8] sm:$0xff] %v1198_v50 }

// kernel: resnet34_forward.114
= control target key start
LH: loop header
LB: loop body
LE: loop exit
PB: predicated region body
PF: predicated region fallthrough
CT: control target
= control target key end

     0   :  { %s71_s0 = inlined_call_operand.vmem [shape: bf16[8,256], index: 0, kind: input, shape index: {}]   ;;  %s72_s1 = inlined_call_operand.vmem [shape: f32[1,256], index: 1, kind: input, shape index: {}]   ;;  %s73_s2 = inlined_call_operand.vmem [shape: f32[1,256], index: 2, kind: input, shape index: {}]   ;;  %s74_s3 = inlined_call_operand.vmem [shape: bf16[8,256], index: 3, kind: output, shape index: {}]  }
   0x1   :  { %v14_v0 = vld [vmem:[%s71_s0] sm:$0xff] }
   0x2   :  { %v17_v1 = vld [vmem:[%s72_s1] sm:$0x3]  ;;  %v15_v3 = vunpack.c.l.bf16 %v14_v0  ;;  %v16_v4 = vunpack.c.h.bf16 %v14_v0 }
   0x3   :  { %v25_v2 = vld [vmem:[%s73_s2] sm:$0x3]  ;;  %v19_v5 = vperm.slane %v17_v1, 0  ;;  %v20_v6 = vperm.slane %v17_v1, 1 }
   0x4   :  { %v27_v7 = vperm.slane %v25_v2, 0  ;;  %v28_v8 = vperm.slane %v25_v2, 1 }
   0x5   :  { %v23_v9 = vmul.f32 %v19_v5, %v15_v3  ;;  %v24_v10 = vmul.f32 %v20_v6, %v16_v4 }
   0x7   :  { %v31_v11 = vadd.f32 %v27_v7, %v23_v9  ;;  %v32_v12 = vadd.f32 %v28_v8, %v24_v10 }
   0x9   :  { %v33_v13 = vpack.c.bf16 %v32_v12, %v31_v11 }
   0xb   :  { %34 = vst [vmem:[%s74_s3] sm:$0xff] %v33_v13 }

// kernel: resnet34_forward.116
= control target key start
LH: loop header
LB: loop body
LE: loop exit
PB: predicated region body
PF: predicated region fallthrough
CT: control target
= control target key end

     0   :  { %s89_s0 = inlined_call_operand.vmem [shape: bf16[8,256], index: 0, kind: input, shape index: {}]   ;;  %s90_s1 = inlined_call_operand.vmem [shape: f32[1,256], index: 1, kind: input, shape index: {}]   ;;  %s91_s2 = inlined_call_operand.vmem [shape: f32[1,256], index: 2, kind: input, shape index: {}]   ;;  %s92_s3 = inlined_call_operand.vmem [shape: bf16[8,256], index: 3, kind: input, shape index: {}]   ;;  %s93_s4 = inlined_call_operand.vmem [shape: bf16[8,256], index: 4, kind: output, shape index: {}]  }
   0x1   :  { %v17_v0 = vld [vmem:[%s89_s0] sm:$0xff] }
   0x2   :  { %v20_v1 = vld [vmem:[%s90_s1] sm:$0x3]  ;;  %v18_v3 = vunpack.c.l.bf16 %v17_v0  ;;  %v19_v4 = vunpack.c.h.bf16 %v17_v0 }
   0x3   :  { %v28_v2 = vld [vmem:[%s91_s2] sm:$0x3]  ;;  %v22_v5 = vperm.slane %v20_v1, 0  ;;  %v23_v6 = vperm.slane %v20_v1, 1 }
   0x4   :  { %v36_v7 = vld [vmem:[%s92_s3] sm:$0xff]  ;;  %v30_v8 = vperm.slane %v28_v2, 0  ;;  %v31_v9 = vperm.slane %v28_v2, 1 }
   0x5   :  { %v26_v10 = vmul.f32 %v22_v5, %v18_v3  ;;  %v27_v11 = vmul.f32 %v23_v6, %v19_v4  ;;  %v37_v12 = vunpack.c.l.bf16 %v36_v7  ;;  %v38_v13 = vunpack.c.h.bf16 %v36_v7 }
   0x7   :  { %v34_v14 = vadd.f32 %v30_v8, %v26_v10  ;;  %v35_v15 = vadd.f32 %v31_v9, %v27_v11 }
   0x9   :  { %v39_v16 = vadd.f32 %v37_v12, %v34_v14  ;;  %v40_v17 = vadd.f32 %v38_v13, %v35_v15 }
   0xb   :  { %v41_v18 = vmax.f32 %v39_v16, 0.0  ;;  %v42_v19 = vmax.f32 %v40_v17, 0.0 }
   0xd   :  { %v43_v20 = vpack.c.bf16 %v42_v19, %v41_v18 }
   0xf   :  { %44 = vst [vmem:[%s93_s4] sm:$0xff] %v43_v20 }

// kernel: resnet34_forward.115
= control target key start
LH: loop header
LB: loop body
LE: loop exit
PB: predicated region body
PF: predicated region fallthrough
CT: control target
= control target key end

     0   :  { %s1400_s12 = smov 0   ;;  %s1402_s13 = smov 0   ;;  %s1598_s0 = inlined_call_operand.vmem [shape: bf16[8,2560], index: 0, kind: input, shape index: {}]   ;;  %s1599_s1 = inlined_call_operand.vmem [shape: bf16[2560,256], index: 1, kind: input, shape index: {}]   ;;  %s1600_s2 = inlined_call_operand.vmem [shape: bf16[8,256], index: 2, kind: output, shape index: {0}]   ;;  %s1601_s3 = inlined_call_operand.vmem [shape: f32[1,8,256], index: 3, kind: output, shape index: {1}]  }
   0x1   :  { %s1404_s14 = smov 0  }
   0x2 LB: > { %s26_s15 = sadd.s32 1, %s1373_s13  ;;  %p995_p0 = scmp.ge.s32.totalorder %s1377_s14, 1  ;;  %s1377_s14 = sphi %s1404_s14, %s14_s14   ;;  %s1373_s13 = sphi %s1402_s13, %s1603_s13   ;;  %s1369_s12 = sphi %s1400_s12, %s1602_s12  }
   0x3   : > { %p27_p1 = scmp.ge.s32.totalorder %s26_s15, 5  ;;  %p189_p2 = scmp.lt.s32.totalorder %s1377_s14, 6 }
   0x5   : > { %s1605_s15 = smov (%p27_p1, %s26_s15), 0  ;;  %p190_p3 = pnand %p995_p0, %p189_p2 }
   0x6   : > { %s996_s16 = sshll.u32 (!%p190_p3), %s1369_s12, 2  ;;  %s998_s17 = sshll.u32 (!%p190_p3), %s1369_s12, 6 }
   0x7   : > { %193 = sbr.rel (%p190_p3) target bundleno = 254 (0xfe), region = 28  ;;  %p243_p4 = scmp.lt.s32.totalorder (!%p190_p3), %s996_s16, 19 }
   0x8   : > { %p252_p5 = scmp.lt.s32.totalorder (!%p190_p3), %s998_s17, 319  ;;  %p1001_p6 = scmp.ne.s32.totalorder (!%p190_p3), %s1369_s12, 0 }
   0xc   : > { %s1607_s16 = smov (!%p243_p4, %s996_s16), 19  ;;  %s1609_s17 = smov (!%p252_p5, %s998_s17), 319 }
   0xd   : > { %s997_s18 = sshll.u32 %s1607_s16, 2  ;;  %s1265_s22 = sshll.u32 %s1609_s17, 3 }
   0xe   : > { %s1425_s21 = scalar_lea.vmem %s1598_s0, %s997_s18  ;;  %s1430_s25 = scalar_lea.vmem %s1599_s1, %s1265_s22 }
   0xf   : > { %285 = sbr.rel (%p1001_p6) target bundleno = 23 (0x17), region = 32 }
  0x14   : > { %v1379_v0 = vmov 0.0  }
  0x15   : > { %286 = vst [vmem:[#allocation2] sm:$0xff] %v1379_v0 }
  0x16   : > { %287 = vst [vmem:[#allocation2 + $0x8] sm:$0xff] %v1379_v0 }
  0x17 PF: > { %v1060_v1 = vld [vmem:[%s1430_s25 + $0x70] sm:$0xf]  ;;  %v1281_v2 = vld [vmem:[%s1430_s25 + $0x74] sm:$0xf0]  ;;  %v1052_v12 = vld [vmem:[%s1430_s25 + $0x60] sm:$0xf] }
  0x18   : > { %v1124_v3 = vld [vmem:[%s1430_s25 + $0xf0] sm:$0xf]  ;;  %v1061_v4 = vor.u32 %v1281_v2, %v1060_v1  ;;  %v1297_v5 = vld [vmem:[%s1430_s25 + $0xf4] sm:$0xf0]  ;;  %v1279_v14 = vld [vmem:[%s1430_s25 + $0x64] sm:$0xf0] }
  0x19   : > { %v1188_v6 = vld [vmem:[%s1430_s25 + $0x170] sm:$0xf]  ;;  %v1313_v7 = vld [vmem:[%s1430_s25 + $0x174] sm:$0xf0]  ;;  %v1125_v8 = vor.u32 %v1297_v5, %v1124_v3  ;;  %v1116_v15 = vld [vmem:[%s1430_s25 + $0xe0] sm:$0xf]  ;;  %v1053_v17 = vor.u32 %v1279_v14, %v1052_v12 }
  0x1a   : > { %v1189_v9 = vor.u32 %v1313_v7, %v1188_v6  ;;  %v1252_v10 = vld [vmem:[%s1430_s25 + $0x1f0] sm:$0xf]  ;;  %v1329_v11 = vld [vmem:[%s1430_s25 + $0x1f4] sm:$0xf0]  ;;  %690 = vmatpush.bf16.msra.mxu0 %v1061_v4  ;;  %v1295_v16 = vld [vmem:[%s1430_s25 + $0xe4] sm:$0xf0] }
  0x1b   : > { %v1253_v13 = vor.u32 %v1329_v11, %v1252_v10  ;;  %703 = vmatpush.bf16.msra.mxu1 %v1125_v8  ;;  %v1117_v18 = vor.u32 %v1295_v16, %v1116_v15  ;;  %v1180_v19 = vld [vmem:[%s1430_s25 + $0x160] sm:$0xf]  ;;  %v1311_v20 = vld [vmem:[%s1430_s25 + $0x164] sm:$0xf0]  ;;  %v1044_v24 = vld [vmem:[%s1430_s25 + $0x50] sm:$0xf] }
  0x1c   : > { %716 = vmatpush.bf16.msra.mxu2 %v1189_v9  ;;  %v1244_v21 = vld [vmem:[%s1430_s25 + $0x1e0] sm:$0xf]  ;;  %v1181_v22 = vor.u32 %v1311_v20, %v1180_v19  ;;  %v1327_v23 = vld [vmem:[%s1430_s25 + $0x1e4] sm:$0xf0]  ;;  %v1277_v25 = vld [vmem:[%s1430_s25 + $0x54] sm:$0xf0] }
  0x1d   : > { %729 = vmatpush.bf16.msra.mxu3 %v1253_v13  ;;  %v1245_v26 = vor.u32 %v1327_v23, %v1244_v21  ;;  %v1108_v27 = vld [vmem:[%s1430_s25 + $0xd0] sm:$0xf]  ;;  %v1293_v28 = vld [vmem:[%s1430_s25 + $0xd4] sm:$0xf0]  ;;  %v1045_v30 = vor.u32 %v1277_v25, %v1044_v24  ;;  %v1036_v36 = vld [vmem:[%s1430_s25 + $0x40] sm:$0xf] }
  0x1e   : > { %v1172_v29 = vld [vmem:[%s1430_s25 + $0x150] sm:$0xf]  ;;  %691 = vmatpush.bf16.msra.mxu0 %v1053_v17  ;;  %v1309_v31 = vld [vmem:[%s1430_s25 + $0x154] sm:$0xf0]  ;;  %v1109_v34 = vor.u32 %v1293_v28, %v1108_v27  ;;  %v1275_v37 = vld [vmem:[%s1430_s25 + $0x44] sm:$0xf0] }
  0x1f   : > { %v1236_v32 = vld [vmem:[%s1430_s25 + $0x1d0] sm:$0xf]  ;;  %v1325_v33 = vld [vmem:[%s1430_s25 + $0x1d4] sm:$0xf0]  ;;  %704 = vmatpush.bf16.msra.mxu1 %v1117_v18  ;;  %v1173_v35 = vor.u32 %v1309_v31, %v1172_v29  ;;  %v1100_v38 = vld [vmem:[%s1430_s25 + $0xc0] sm:$0xf]  ;;  %v1037_v45 = vor.u32 %v1275_v37, %v1036_v36 }
  0x20   : > { %717 = vmatpush.bf16.msra.mxu2 %v1181_v22  ;;  %v1237_v39 = vor.u32 %v1325_v33, %v1236_v32  ;;  %v1291_v40 = vld [vmem:[%s1430_s25 + $0xc4] sm:$0xf0]  ;;  %v1164_v41 = vld [vmem:[%s1430_s25 + $0x140] sm:$0xf]  ;;  %v1028_v48 = vld [vmem:[%s1430_s25 + $0x30] sm:$0xf] }
  0x21   : > { %730 = vmatpush.bf16.msra.mxu3 %v1245_v26  ;;  %v1307_v42 = vld [vmem:[%s1430_s25 + $0x144] sm:$0xf0]  ;;  %v1228_v43 = vld [vmem:[%s1430_s25 + $0x1c0] sm:$0xf]  ;;  %v1101_v46 = vor.u32 %v1291_v40, %v1100_v38  ;;  %v1273_v49 = vld [vmem:[%s1430_s25 + $0x34] sm:$0xf0] }
  0x22   : > { %v1323_v44 = vld [vmem:[%s1430_s25 + $0x1c4] sm:$0xf0]  ;;  %692 = vmatpush.bf16.msra.mxu0 %v1045_v30  ;;  %v1165_v47 = vor.u32 %v1307_v42, %v1164_v41  ;;  %v1092_v50 = vld [vmem:[%s1430_s25 + $0xb0] sm:$0xf]  ;;  %v1289_v52 = vld [vmem:[%s1430_s25 + $0xb4] sm:$0xf0]  ;;  %v1029_v57 = vor.u32 %v1273_v49, %v1028_v48 }
  0x23   : > { %705 = vmatpush.bf16.msra.mxu1 %v1109_v34  ;;  %v1229_v51 = vor.u32 %v1323_v44, %v1228_v43  ;;  %v1156_v53 = vld [vmem:[%s1430_s25 + $0x130] sm:$0xf]  ;;  %v1305_v54 = vld [vmem:[%s1430_s25 + $0x134] sm:$0xf0]  ;;  %v1093_v58 = vor.u32 %v1289_v52, %v1092_v50  ;;  %v1020_v60 = vld [vmem:[%s1430_s25 + $0x20] sm:$0xf] }
  0x24   : > { %718 = vmatpush.bf16.msra.mxu2 %v1173_v35  ;;  %v1220_v55 = vld [vmem:[%s1430_s25 + $0x1b0] sm:$0xf]  ;;  %v1321_v56 = vld [vmem:[%s1430_s25 + $0x1b4] sm:$0xf0]  ;;  %v1157_v59 = vor.u32 %v1305_v54, %v1156_v53  ;;  %v1271_v61 = vld [vmem:[%s1430_s25 + $0x24] sm:$0xf0] }
  0x25   : > { %731 = vmatpush.bf16.msra.mxu3 %v1237_v39  ;;  %v1084_v62 = vld [vmem:[%s1430_s25 + $0xa0] sm:$0xf]  ;;  %v1221_v63 = vor.u32 %v1321_v56, %v1220_v55  ;;  %v1287_v0 = vld [vmem:[%s1430_s25 + $0xa4] sm:$0xf0]  ;;  %v1021_v5 = vor.u32 %v1271_v61, %v1020_v60  ;;  %v1012_v8 = vld [vmem:[%s1430_s25 + $0x10] sm:$0xf] }
  0x26   : > { %693 = vmatpush.bf16.msra.mxu0 %v1037_v45  ;;  %v1148_v1 = vld [vmem:[%s1430_s25 + $0x120] sm:$0xf]  ;;  %v1303_v2 = vld [vmem:[%s1430_s25 + $0x124] sm:$0xf0]  ;;  %v1085_v6 = vor.u32 %v1287_v0, %v1084_v62  ;;  %v1269_v9 = vld [vmem:[%s1430_s25 + $0x14] sm:$0xf0] }
  0x27   : > { %706 = vmatpush.bf16.msra.mxu1 %v1101_v46  ;;  %v1212_v3 = vld [vmem:[%s1430_s25 + $0x1a0] sm:$0xf]  ;;  %v1319_v4 = vld [vmem:[%s1430_s25 + $0x1a4] sm:$0xf0]  ;;  %v1149_v7 = vor.u32 %v1303_v2, %v1148_v1  ;;  %v1076_v10 = vld [vmem:[%s1430_s25 + $0x90] sm:$0xf]  ;;  %v1013_v17 = vor.u32 %v1269_v9, %v1012_v8 }
  0x28   : > { %719 = vmatpush.bf16.msra.mxu2 %v1165_v47  ;;  %v1213_v11 = vor.u32 %v1319_v4, %v1212_v3  ;;  %v1285_v12 = vld [vmem:[%s1430_s25 + $0x94] sm:$0xf0]  ;;  %v1140_v13 = vld [vmem:[%s1430_s25 + $0x110] sm:$0xf]  ;;  %v1004_v18 = vld [vmem:[%s1430_s25] sm:$0xf] }
  0x29   : > { %732 = vmatpush.bf16.msra.mxu3 %v1229_v51  ;;  %v1301_v14 = vld [vmem:[%s1430_s25 + $0x114] sm:$0xf0]  ;;  %v1204_v15 = vld [vmem:[%s1430_s25 + $0x190] sm:$0xf]  ;;  %v1267_v19 = vld [vmem:[%s1430_s25 + $0x4] sm:$0xf0]  ;;  %v1077_v21 = vor.u32 %v1285_v12, %v1076_v10 }
  0x2a   : > { %694 = vmatpush.bf16.msra.mxu0 %v1029_v57  ;;  %v1317_v16 = vld [vmem:[%s1430_s25 + $0x194] sm:$0xf0]  ;;  %v1068_v20 = vld [vmem:[%s1430_s25 + $0x80] sm:$0xf]  ;;  %v1141_v22 = vor.u32 %v1301_v14, %v1140_v13  ;;  %v1283_v23 = vld [vmem:[%s1430_s25 + $0x84] sm:$0xf0]  ;;  %v1005_v33 = vor.u32 %v1267_v19, %v1004_v18 }
  0x2b   : > { %707 = vmatpush.bf16.msra.mxu1 %v1093_v58  ;;  %v1132_v24 = vld [vmem:[%s1430_s25 + $0x100] sm:$0xf]  ;;  %v1299_v25 = vld [vmem:[%s1430_s25 + $0x104] sm:$0xf0]  ;;  %v1205_v26 = vor.u32 %v1317_v16, %v1204_v15  ;;  %v1280_v29 = vld [vmem:[%s1430_s25 + $0x74] sm:$0xf]  ;;  %v1069_v38 = vor.u32 %v1283_v23, %v1068_v20 }
  0x2c   : > { %720 = vmatpush.bf16.msra.mxu2 %v1157_v59  ;;  %v1196_v27 = vld [vmem:[%s1430_s25 + $0x180] sm:$0xf]  ;;  %v1315_v28 = vld [vmem:[%s1430_s25 + $0x184] sm:$0xf0]  ;;  %v1062_v30 = vld [vmem:[%s1430_s25 + $0x78] sm:$0xf0]  ;;  %v1133_v39 = vor.u32 %v1299_v25, %v1132_v24 }
  0x2d   : > { %733 = vmatpush.bf16.msra.mxu3 %v1221_v63  ;;  %v1296_v31 = vld [vmem:[%s1430_s25 + $0xf4] sm:$0xf]  ;;  %v291_v32 = vld [vmem:[%s1425_s21 + $0x8] sm:$0xff]  ;;  %v1126_v34 = vld [vmem:[%s1430_s25 + $0xf8] sm:$0xf0]  ;;  %v1197_v43 = vor.u32 %v1315_v28, %v1196_v27  ;;  %v1065_v44 = vor.u32 %v1280_v29, %v1062_v30  ;;  %p1258_p7 = scmp.ne.s32.totalorder %s1369_s12, 4 }
  0x2e   : > { %695 = vmatpush.bf16.msra.mxu0 %v1021_v5  ;;  %v1312_v35 = vld [vmem:[%s1430_s25 + $0x174] sm:$0xf]  ;;  %v1190_v36 = vld [vmem:[%s1430_s25 + $0x178] sm:$0xf0]  ;;  %v360_v37 = vunpack.c.l.b16 %v291_v32  ;;  %v361_v42 = vunpack.c.h.b16 %v291_v32  ;;  %v290_v45 = vld [vmem:[%s1425_s21] sm:$0xff]  ;;  %v1129_v46 = vor.u32 %v1296_v31, %v1126_v34 }
  0x2f   : > { %708 = vmatpush.bf16.msra.mxu1 %v1085_v6  ;;  %v1328_v40 = vld [vmem:[%s1430_s25 + $0x1f4] sm:$0xf]  ;;  %v1254_v41 = vld [vmem:[%s1430_s25 + $0x1f8] sm:$0xf0]  ;;  %v1193_v47 = vor.u32 %v1312_v35, %v1190_v36  ;;  %v1278_v48 = vld [vmem:[%s1430_s25 + $0x64] sm:$0xf]  ;;  %v358_v51 = vunpack.c.l.b16 %v290_v45  ;;  %v359_v52 = vunpack.c.h.b16 %v290_v45 }
  0x30   : > { %721 = vmatpush.bf16.msra.mxu2 %v1149_v7  ;;  %v1054_v49 = vld [vmem:[%s1430_s25 + $0x68] sm:$0xf0]  ;;  %v1294_v50 = vld [vmem:[%s1430_s25 + $0xe4] sm:$0xf]  ;;  %v1257_v53 = vor.u32 %v1328_v40, %v1254_v41  ;;  %v1513_v57 = vpack.c.b16 %v360_v37, %v360_v37  ;;  %v1517_v60 = vpack.c.b16 %v361_v42, %v361_v42  ;;  %v1276_v2 = vld [vmem:[%s1430_s25 + $0x54] sm:$0xf] }
  0x31   : > { %734 = vmatpush.bf16.msra.mxu3 %v1213_v11  ;;  %v1118_v54 = vld [vmem:[%s1430_s25 + $0xe8] sm:$0xf0]  ;;  %v1310_v55 = vld [vmem:[%s1430_s25 + $0x164] sm:$0xf]  ;;  %v1519_v61 = vpack.c.b16 %v358_v51, %v358_v51  ;;  %v1057_v62 = vor.u32 %v1278_v48, %v1054_v49  ;;  %v1521_v63 = vpack.c.b16 %v359_v52, %v359_v52  ;;  %v1046_v3 = vld [vmem:[%s1430_s25 + $0x58] sm:$0xf0] }
  0x32   : > { %696 = vmatpush.bf16.msra.mxu0 %v1013_v17  ;;  %v1182_v56 = vld [vmem:[%s1430_s25 + $0x168] sm:$0xf0]  ;;  %v1326_v58 = vld [vmem:[%s1430_s25 + $0x1e4] sm:$0xf]  ;;  %v1121_v0 = vor.u32 %v1294_v50, %v1118_v54  ;;  %v1292_v4 = vld [vmem:[%s1430_s25 + $0xd4] sm:$0xf]  ;;  %v1049_v11 = vor.u32 %v1276_v2, %v1046_v3 }
  0x33   : > { %709 = vmatpush.bf16.msra.mxu1 %v1077_v21  ;;  %v1246_v59 = vld [vmem:[%s1430_s25 + $0x1e8] sm:$0xf0]  ;;  %v1185_v1 = vor.u32 %v1310_v55, %v1182_v56  ;;  %v1110_v6 = vld [vmem:[%s1430_s25 + $0xd8] sm:$0xf0]  ;;  %v1308_v7 = vld [vmem:[%s1430_s25 + $0x154] sm:$0xf] }
  0x34   : > { %722 = vmatpush.bf16.msra.mxu2 %v1141_v22  ;;  %v1249_v5 = vor.u32 %v1326_v58, %v1246_v59  ;;  %v1174_v8 = vld [vmem:[%s1430_s25 + $0x158] sm:$0xf0]  ;;  %v1324_v9 = vld [vmem:[%s1430_s25 + $0x1d4] sm:$0xf]  ;;  %v1113_v12 = vor.u32 %v1292_v4, %v1110_v6  ;;  %v1274_v14 = vld [vmem:[%s1430_s25 + $0x44] sm:$0xf] }
  0x35   : > { %735 = vmatpush.bf16.msra.mxu3 %v1205_v26  ;;  %v1238_v10 = vld [vmem:[%s1430_s25 + $0x1d8] sm:$0xf0]  ;;  %v1177_v13 = vor.u32 %v1308_v7, %v1174_v8  ;;  %v1038_v15 = vld [vmem:[%s1430_s25 + $0x48] sm:$0xf0]  ;;  %v1290_v16 = vld [vmem:[%s1430_s25 + $0xc4] sm:$0xf] }
  0x36   : > { %697 = vmatpush.bf16.msra.mxu0 %v1005_v33  ;;  %v1241_v17 = vor.u32 %v1324_v9, %v1238_v10  ;;  %v1102_v18 = vld [vmem:[%s1430_s25 + $0xc8] sm:$0xf0]  ;;  %v1306_v19 = vld [vmem:[%s1430_s25 + $0x144] sm:$0xf]  ;;  %v1041_v23 = vor.u32 %v1274_v14, %v1038_v15  ;;  %v1272_v26 = vld [vmem:[%s1430_s25 + $0x34] sm:$0xf] }
  0x37   : > { %710 = vmatpush.bf16.msra.mxu1 %v1069_v38  ;;  %v1166_v20 = vld [vmem:[%s1430_s25 + $0x148] sm:$0xf0]  ;;  %v1322_v21 = vld [vmem:[%s1430_s25 + $0x1c4] sm:$0xf]  ;;  %v1105_v24 = vor.u32 %v1290_v16, %v1102_v18  ;;  %v1030_v27 = vld [vmem:[%s1430_s25 + $0x38] sm:$0xf0] }
  0x38   : > { %723 = vmatpush.bf16.msra.mxu2 %v1133_v39  ;;  %v1230_v22 = vld [vmem:[%s1430_s25 + $0x1c8] sm:$0xf0]  ;;  %v1169_v25 = vor.u32 %v1306_v19, %v1166_v20  ;;  %v1288_v28 = vld [vmem:[%s1430_s25 + $0xb4] sm:$0xf]  ;;  %v1094_v30 = vld [vmem:[%s1430_s25 + $0xb8] sm:$0xf0]  ;;  %v1033_v35 = vor.u32 %v1272_v26, %v1030_v27 }
  0x39   : > { %736 = vmatpush.bf16.msra.mxu3 %v1197_v43  ;;  %698 = vmatmul.bf16.vlgmr.msra.gmra.mxu0 %v1519_v61  ;;  %v1233_v29 = vor.u32 %v1322_v21, %v1230_v22  ;;  %v1304_v31 = vld [vmem:[%s1430_s25 + $0x134] sm:$0xf]  ;;  %v1158_v32 = vld [vmem:[%s1430_s25 + $0x138] sm:$0xf0]  ;;  %v1097_v36 = vor.u32 %v1288_v28, %v1094_v30  ;;  %v1270_v38 = vld [vmem:[%s1430_s25 + $0x24] sm:$0xf] }
  0x3a   : > { %742 = vmatpush.bf16.msrb.mxu0 %v1065_v44  ;;  %711 = vmatmul.bf16.vlgmr.msra.gmra.mxu1 %v1521_v63  ;;  %v1320_v33 = vld [vmem:[%s1430_s25 + $0x1b4] sm:$0xf]  ;;  %v1222_v34 = vld [vmem:[%s1430_s25 + $0x1b8] sm:$0xf0]  ;;  %v1161_v37 = vor.u32 %v1304_v31, %v1158_v32  ;;  %v1022_v39 = vld [vmem:[%s1430_s25 + $0x28] sm:$0xf0] }
  0x3b   : > { %755 = vmatpush.bf16.msrb.mxu1 %v1129_v46  ;;  %724 = vmatmul.bf16.vlgmr.msra.gmra.mxu2 %v1513_v57  ;;  %v1286_v40 = vld [vmem:[%s1430_s25 + $0xa4] sm:$0xf]  ;;  %v1225_v41 = vor.u32 %v1320_v33, %v1222_v34  ;;  %v1086_v42 = vld [vmem:[%s1430_s25 + $0xa8] sm:$0xf0]  ;;  %v1268_v50 = vld [vmem:[%s1430_s25 + $0x14] sm:$0xf] }
  0x3c   : > { %768 = vmatpush.bf16.msrb.mxu2 %v1193_v47  ;;  %737 = vmatmul.bf16.vlgmr.msra.gmra.mxu3 %v1517_v60  ;;  %v1302_v43 = vld [vmem:[%s1430_s25 + $0x124] sm:$0xf]  ;;  %v1150_v44 = vld [vmem:[%s1430_s25 + $0x128] sm:$0xf0]  ;;  %v1025_v47 = vor.u32 %v1270_v38, %v1022_v39  ;;  %v1089_v48 = vor.u32 %v1286_v40, %v1086_v42  ;;  %v1014_v51 = vld [vmem:[%s1430_s25 + $0x18] sm:$0xf0] }
  0x3d   : > { %781 = vmatpush.bf16.msrb.mxu3 %v1257_v53  ;;  %v1318_v45 = vld [vmem:[%s1430_s25 + $0x1a4] sm:$0xf]  ;;  %v1214_v46 = vld [vmem:[%s1430_s25 + $0x1a8] sm:$0xf0]  ;;  %v1153_v49 = vor.u32 %v1302_v43, %v1150_v44  ;;  %v1284_v52 = vld [vmem:[%s1430_s25 + $0x94] sm:$0xf] }
  0x3e   : > { %743 = vmatpush.bf16.msrb.mxu0 %v1057_v62  ;;  %v1217_v53 = vor.u32 %v1318_v45, %v1214_v46  ;;  %v1078_v54 = vld [vmem:[%s1430_s25 + $0x98] sm:$0xf0]  ;;  %v1300_v55 = vld [vmem:[%s1430_s25 + $0x114] sm:$0xf]  ;;  %v1017_v62 = vor.u32 %v1268_v50, %v1014_v51  ;;  %v1266_v2 = vld [vmem:[%s1430_s25 + $0x4] sm:$0xf] }
  0x3f   : > { %756 = vmatpush.bf16.msrb.mxu1 %v1121_v0  ;;  %v1142_v56 = vld [vmem:[%s1430_s25 + $0x118] sm:$0xf0]  ;;  %v1316_v58 = vld [vmem:[%s1430_s25 + $0x194] sm:$0xf]  ;;  %v1081_v0 = vor.u32 %v1284_v52, %v1078_v54  ;;  %v1006_v3 = vld [vmem:[%s1430_s25 + $0x8] sm:$0xf0] }
  0x40   : > { %769 = vmatpush.bf16.msrb.mxu2 %v1185_v1  ;;  %v1206_v59 = vld [vmem:[%s1430_s25 + $0x198] sm:$0xf0]  ;;  %v1145_v1 = vor.u32 %v1300_v55, %v1142_v56  ;;  %v1282_v4 = vld [vmem:[%s1430_s25 + $0x84] sm:$0xf]  ;;  %v1070_v6 = vld [vmem:[%s1430_s25 + $0x88] sm:$0xf0] }
  0x41   : > { %782 = vmatpush.bf16.msrb.mxu3 %v1249_v5  ;;  %v1209_v5 = vor.u32 %v1316_v58, %v1206_v59  ;;  %v1298_v7 = vld [vmem:[%s1430_s25 + $0x104] sm:$0xf]  ;;  %v1134_v8 = vld [vmem:[%s1430_s25 + $0x108] sm:$0xf0] }
  0x42   : > { %744 = vmatpush.bf16.msrb.mxu0 %v1049_v11  ;;  %v1314_v9 = vld [vmem:[%s1430_s25 + $0x184] sm:$0xf]  ;;  %v1198_v10 = vld [vmem:[%s1430_s25 + $0x188] sm:$0xf0]  ;;  %v1009_v11 = vor.u32 %v1266_v2, %v1006_v3 }
  0x43   : > { %757 = vmatpush.bf16.msrb.mxu1 %v1113_v12  ;;  %v1073_v12 = vor.u32 %v1282_v4, %v1070_v6  ;;  %v1201_v14 = vor.u32 %v1314_v9, %v1198_v10  ;;  %v288_v21 = vld [vmem:[#allocation2] sm:$0xff]  ;;  %v289_v31 = vld [vmem:[#allocation2 + $0x8] sm:$0xff] }
  0x44   : > { %770 = vmatpush.bf16.msrb.mxu2 %v1177_v13  ;;  %v1137_v13 = vor.u32 %v1298_v7, %v1134_v8 }
  0x45   : > { %783 = vmatpush.bf16.msrb.mxu3 %v1241_v17 }
  0x46   : > { %745 = vmatpush.bf16.msrb.mxu0 %v1041_v23 }
  0x47   : > { %758 = vmatpush.bf16.msrb.mxu1 %v1105_v24 }
  0x48   : > { %771 = vmatpush.bf16.msrb.mxu2 %v1169_v25 }
  0x49   : > { %784 = vmatpush.bf16.msrb.mxu3 %v1233_v29 }
  0x4a   : > { %746 = vmatpush.bf16.msrb.mxu0 %v1033_v35 }
  0x4b   : > { %759 = vmatpush.bf16.msrb.mxu1 %v1097_v36 }
  0x4c   : > { %772 = vmatpush.bf16.msrb.mxu2 %v1161_v37 }
  0x4d   : > { %785 = vmatpush.bf16.msrb.mxu3 %v1225_v41 }
  0x4e   : > { %747 = vmatpush.bf16.msrb.mxu0 %v1025_v47 }
  0x4f   : > { %760 = vmatpush.bf16.msrb.mxu1 %v1089_v48 }
  0x50   : > { %773 = vmatpush.bf16.msrb.mxu2 %v1153_v49 }
  0x51   : > { %786 = vmatpush.bf16.msrb.mxu3 %v1217_v53 }
  0x52   : > { %748 = vmatpush.bf16.msrb.mxu0 %v1017_v62 }
  0x53   : > { %761 = vmatpush.bf16.msrb.mxu1 %v1081_v0 }
  0x54   : > { %774 = vmatpush.bf16.msrb.mxu2 %v1145_v1 }
  0x55   : > { %787 = vmatpush.bf16.msrb.mxu3 %v1209_v5 }
  0x56   : > { %749 = vmatpush.bf16.msrb.mxu0 %v1009_v11 }
  0x57   : > { %762 = vmatpush.bf16.msrb.mxu1 %v1073_v12 }
  0x58   : > { %775 = vmatpush.bf16.msrb.mxu2 %v1137_v13 }
  0x59   : > { %788 = vmatpush.bf16.msrb.mxu3 %v1201_v14  ;;  %750 = vmatmul.bf16.vlgmr.msrb.gmra.mxu0 %v1519_v61 }
  0x5a   : > { %763 = vmatmul.bf16.vlgmr.msrb.gmra.mxu1 %v1521_v63 }
  0x5b   : > { %776 = vmatmul.bf16.vlgmr.msrb.gmra.mxu2 %v1513_v57 }
  0x5c   : > { %789 = vmatmul.bf16.vlgmr.msrb.gmra.mxu3 %v1517_v60 }
  0xb6   : > { %v699_v15 = vpop.f32.mrf.mxu0 }
  0xb7   : > { %v712_v16 = vpop.f32.mrf.mxu1 }
  0xb8   : > { %v713_v17 = vadd.f32 %v712_v16, %v699_v15 }
  0xbe   : > { %v725_v18 = vpop.f32.mrf.mxu2  ;;  %v701_v23 = vpop.f32.mrf.mxu0 }
  0xbf   : > { %v726_v19 = vadd.f32 %v725_v18, %v713_v17  ;;  %v738_v20 = vpop.f32.mrf.mxu3  ;;  %v714_v24 = vpop.f32.mrf.mxu1 }
  0xc1   : > { %v739_v22 = vadd.f32 %v738_v20, %v726_v19 }
  0xc3   : > { %v794_v25 = vadd.f32 %v739_v22, %v288_v21 }
  0xc5   : > { %796 = vst [vmem:[#allocation2] sm:$0xff] %v794_v25 }
  0xc6   : > { %v727_v26 = vpop.f32.mrf.mxu2 }
  0xc7   : > { %v740_v61 = vpop.f32.mrf.mxu3 }
  0xd6   : > { %v751_v27 = vpop.f32.mrf.mxu0 }
  0xd7   : > { %v764_v63 = vpop.f32.mrf.mxu1 }
  0xd8   : > { %v765_v28 = vadd.f32 %v764_v63, %v751_v27 }
  0xde   : > { %v777_v57 = vpop.f32.mrf.mxu2  ;;  %v753_v30 = vpop.f32.mrf.mxu0 }
  0xdf   : > { %v778_v29 = vadd.f32 %v777_v57, %v765_v28  ;;  %v790_v60 = vpop.f32.mrf.mxu3  ;;  %v766_v32 = vpop.f32.mrf.mxu1 }
  0xe1   : > { %v791_v33 = vadd.f32 %v790_v60, %v778_v29 }
  0xe3   : > { %v795_v34 = vadd.f32 %v791_v33, %v289_v31  ;;  %801 = sbr.rel (%p1258_p7) target bundleno = 254 (0xfe), region = 36 }
  0xe5   : > { %797 = vst [vmem:[#allocation2 + $0x8] sm:$0xff] %v795_v34 }
  0xe6   : > { %v779_v35 = vpop.f32.mrf.mxu2 }
  0xe7   : > { %v792_v36 = vpop.f32.mrf.mxu3 }
  0xe8   : > { %v802_v37 = vld [vmem:[#allocation2] sm:$0xff]  ;;  %vm832_vm0 = vcmask 1040384   ;;  %vm835_vm1 = vcmask 1041408  }
  0xe9   : > { %v806_v40 = vrot.slane %v802_v37, 4  ;;  %v818_v42 = vmul.f32 %v802_v37, %v802_v37 }
  0xeb   : > { %v807_v44 = vadd.f32 %v806_v40, %v802_v37  ;;  %v820_v46 = vrot.slane %v818_v42, 4 }
  0xec   : > { %v803_v38 = vld [vmem:[#allocation2 + $0x8] sm:$0xff] }
  0xed   : > { %v804_v39 = vpack.c.bf16 %v803_v38, %v802_v37  ;;  %v812_v41 = vrot.slane %v803_v38, 4  ;;  %v819_v43 = vmul.f32 %v803_v38, %v803_v38  ;;  %v808_v48 = vrot.slane %v807_v44, 2 }
  0xee   : > { %v821_v49 = vadd.f32 %v820_v46, %v818_v42 }
  0xef   : > { %805 = vst [vmem:[%s1600_s2] sm:$0xff] %v804_v39  ;;  %v813_v45 = vadd.f32 %v812_v41, %v803_v38  ;;  %v826_v47 = vrot.slane %v819_v43, 4  ;;  %v809_v52 = vadd.f32 %v808_v48, %v807_v44 }
  0xf0   : > { %v822_v53 = vrot.slane %v821_v49, 2 }
  0xf1   : > { %v814_v50 = vrot.slane %v813_v45, 2  ;;  %v827_v51 = vadd.f32 %v826_v47, %v819_v43  ;;  %v810_v56 = vrot.slane %v809_v52, 1 }
  0xf2   : > { %v823_v58 = vadd.f32 %v822_v53, %v821_v49 }
  0xf3   : > { %v815_v54 = vadd.f32 %v814_v50, %v813_v45  ;;  %v828_v55 = vrot.slane %v827_v51, 2  ;;  %v811_v0 = vadd.f32 %v810_v56, %v809_v52 }
  0xf4   : > { %v824_v1 = vrot.slane %v823_v58, 1 }
  0xf5   : > { %v816_v59 = vrot.slane %v815_v54, 1  ;;  %v829_v62 = vadd.f32 %v828_v55, %v827_v51 }
  0xf6   : > { %v825_v4 = vadd.f32 %v824_v1, %v823_v58 }
  0xf7   : > { %v817_v2 = vadd.f32 %v816_v59, %v815_v54  ;;  %v830_v3 = vrot.slane %v829_v62, 1 }
  0xf8   : > { %v833_v6 = vsel %vm832_vm0, %v811_v0, %v825_v4 }
  0xf9   : > { %v831_v5 = vadd.f32 %v830_v3, %v829_v62  ;;  %v836_v7 = vsel %vm835_vm1, %v833_v6, 0.0 }
  0xfa   : > { %838 = vst [vmem:[%s1601_s3] sm:$0xff] %v836_v7 }
  0xfb   : > { %v834_v8 = vsel %vm832_vm0, %v817_v2, %v831_v5 }
  0xfc   : > { %v837_v9 = vsel %vm835_vm1, %v834_v8, 0.0 }
  0xfd   : > { %839 = vst [vmem:[%s1601_s3 + $0x8] sm:$0xff] %v837_v9 }
  0xfe PF: > { %s14_s14 = sadd.s32 1, %s1377_s14   ;;  %s1602_s12 = smov %s1373_s13 }
  0xff   : > { %p11_p8 = scmp.ge.s32.totalorder %s14_s14, 7   ;;  %s1603_s13 = smov %s1605_s15 }
 0x101   :  { %13 = sbr.rel (!%p11_p8) target bundleno = 2 (0x2), region = 81 }

// kernel: resnet34_forward.137
= control target key start
LH: loop header
LB: loop body
LE: loop exit
PB: predicated region body
PF: predicated region fallthrough
CT: control target
= control target key end

     0   :  { %s1754_s12 = smov 0   ;;  %s1756_s13 = smov 0   ;;  %s2140_s0 = inlined_call_operand.vmem [shape: bf16[8,2560], index: 0, kind: input, shape index: {}]   ;;  %s2141_s1 = inlined_call_operand.vmem [shape: bf16[2560,512], index: 1, kind: input, shape index: {}]   ;;  %s2142_s2 = inlined_call_operand.vmem [shape: bf16[8,512], index: 2, kind: output, shape index: {0}]   ;;  %s2143_s3 = inlined_call_operand.vmem [shape: f32[1,8,512], index: 3, kind: output, shape index: {1}]  }
   0x1   :  { %s1758_s14 = smov 0   ;;  %s1760_s15 = smov 0  }
   0x2   :  { %s1762_s16 = smov 0   ;;  %s1764_s17 = smov 0  }
   0x3   :  { %s1766_s18 = smov 0  }
   0x4 LB: > { %s26_s19 = sadd.s32 1, %s1723_s16  ;;  %s29_s20 = sadd.s32 1, %s1727_s17  ;;  %s1731_s18 = sphi %s1766_s18, %s14_s18   ;;  %s1727_s17 = sphi %s1764_s17, %s2149_s17   ;;  %s1723_s16 = sphi %s1762_s16, %s2148_s16   ;;  %s1719_s15 = sphi %s1760_s15, %s2147_s15   ;;  %s1715_s14 = sphi %s1758_s14, %s2146_s14   ;;  %s1711_s13 = sphi %s1756_s13, %s2145_s13   ;;  %s1707_s12 = sphi %s1754_s12, %s2144_s12  }
   0x5   : > { %p27_p0 = scmp.ge.s32.totalorder %s26_s19, 5  ;;  %p77_p1 = scmp.ne.s32.totalorder %s1711_s13, %s1707_s12 }
   0x6   : > { %p78_p2 = scmp.eq.s32.totalorder %s1731_s18, 0  ;;  %s70_s24 = sadd.s32 1, %s1711_s13 }
   0x7   : > { %s2151_s19 = smov (%p27_p0, %s26_s19), 0  ;;  %s2153_s20 = smov (!%p27_p0, %s29_s20), %s1727_s17 }
   0x8   : > { %p79_p3 = por %p78_p2, %p77_p1  ;;  %p31_p4 = scmp.ge.s32.totalorder %s2153_s20, 2 }
   0x9   : > { %s65_s21 = ssub.s32 %s1723_s16, %s2151_s19  ;;  %p1281_p6 = scmp.ge.s32.totalorder %s1731_s18, 10 }
   0xa   : > { %s2155_s20 = smov (%p31_p4, %s2153_s20), 0 }
   0xb   : > { %s66_s22 = ssub.s32 %s1727_s17, %s2155_s20  ;;  %159 = sbr.rel (%p1281_p6) target bundleno = 87 (0x57), region = 16 }
   0xc   : > { %s67_s23 = sor.u32 %s66_s22, %s65_s21 }
   0xd   : > { %p68_p5 = scmp.eq.s32.totalorder %s67_s23, 0 }
   0xf   : > { %s1805_s25 = scalar_select %p68_p5, %s1711_s13, %s70_s24  }
  0x10   : > { %175 = sbr.rel (!%p79_p3) target bundleno = 87 (0x57), region = 24  ;;  %s177_s26 = sand.u32 (%p79_p3), 1, %s1711_s13  }
  0x11   : > { %s1284_s27 = sshll.u32 (%p79_p3), %s1727_s17, 1  ;;  %s1282_s28 = sshll.u32 (%p79_p3), %s177_s26, 9 }
  0x12   : > { %s1555_s29 = sshll.u32 (%p79_p3), %s1723_s16, 8  ;;  %s1819_s8 = scalar_lea.vmem (%p79_p3), [#allocation3], %s1282_s28 }
  0x13   : > { %s183_s30 = sadd.s32 (%p79_p3), %s1555_s29, %s1284_s27 }
  0x14   : > { %s1286_s4 = sshll.u32 (%p79_p3), %s183_s30, 2 }
  0x15   : > { %s1814_s7 = scalar_lea.vmem %s2141_s1, %s1286_s4 }
  0x16   : > { %v340_v0 = vld [vmem:[%s1814_s7] sm:$0xff]  ;;  %v342_v1 = vld [vmem:[%s1814_s7 + $0x10] sm:$0xff] }
  0x17   : > { %v344_v2 = vld [vmem:[%s1814_s7 + $0x20] sm:$0xff]  ;;  %341 = vst [vmem:[%s1819_s8] sm:$0xff] %v340_v0  ;;  %v346_v3 = vld [vmem:[%s1814_s7 + $0x30] sm:$0xff] }
  0x18   : > { %343 = vst [vmem:[%s1819_s8 + $0x8] sm:$0xff] %v342_v1  ;;  %v348_v4 = vld [vmem:[%s1814_s7 + $0x40] sm:$0xff]  ;;  %v350_v5 = vld [vmem:[%s1814_s7 + $0x50] sm:$0xff] }
  0x19   : > { %345 = vst [vmem:[%s1819_s8 + $0x10] sm:$0xff] %v344_v2  ;;  %v352_v6 = vld [vmem:[%s1814_s7 + $0x60] sm:$0xff]  ;;  %v354_v7 = vld [vmem:[%s1814_s7 + $0x70] sm:$0xff] }
  0x1a   : > { %347 = vst [vmem:[%s1819_s8 + $0x18] sm:$0xff] %v346_v3  ;;  %v356_v8 = vld [vmem:[%s1814_s7 + $0x80] sm:$0xff]  ;;  %v358_v9 = vld [vmem:[%s1814_s7 + $0x90] sm:$0xff] }
  0x1b   : > { %349 = vst [vmem:[%s1819_s8 + $0x20] sm:$0xff] %v348_v4  ;;  %v360_v10 = vld [vmem:[%s1814_s7 + $0xa0] sm:$0xff]  ;;  %v362_v11 = vld [vmem:[%s1814_s7 + $0xb0] sm:$0xff] }
  0x1c   : > { %351 = vst [vmem:[%s1819_s8 + $0x28] sm:$0xff] %v350_v5  ;;  %v364_v12 = vld [vmem:[%s1814_s7 + $0xc0] sm:$0xff]  ;;  %v366_v13 = vld [vmem:[%s1814_s7 + $0xd0] sm:$0xff] }
  0x1d   : > { %353 = vst [vmem:[%s1819_s8 + $0x30] sm:$0xff] %v352_v6  ;;  %v368_v14 = vld [vmem:[%s1814_s7 + $0xe0] sm:$0xff]  ;;  %v370_v15 = vld [vmem:[%s1814_s7 + $0xf0] sm:$0xff] }
  0x1e   : > { %355 = vst [vmem:[%s1819_s8 + $0x38] sm:$0xff] %v354_v7  ;;  %v372_v16 = vld [vmem:[%s1814_s7 + $0x100] sm:$0xff]  ;;  %v374_v17 = vld [vmem:[%s1814_s7 + $0x110] sm:$0xff] }
  0x1f   : > { %357 = vst [vmem:[%s1819_s8 + $0x40] sm:$0xff] %v356_v8  ;;  %v376_v18 = vld [vmem:[%s1814_s7 + $0x120] sm:$0xff]  ;;  %v378_v19 = vld [vmem:[%s1814_s7 + $0x130] sm:$0xff] }
  0x20   : > { %359 = vst [vmem:[%s1819_s8 + $0x48] sm:$0xff] %v358_v9  ;;  %v380_v20 = vld [vmem:[%s1814_s7 + $0x140] sm:$0xff]  ;;  %v382_v21 = vld [vmem:[%s1814_s7 + $0x150] sm:$0xff] }
  0x21   : > { %361 = vst [vmem:[%s1819_s8 + $0x50] sm:$0xff] %v360_v10  ;;  %v384_v22 = vld [vmem:[%s1814_s7 + $0x160] sm:$0xff]  ;;  %v386_v23 = vld [vmem:[%s1814_s7 + $0x170] sm:$0xff] }
  0x22   : > { %363 = vst [vmem:[%s1819_s8 + $0x58] sm:$0xff] %v362_v11  ;;  %v388_v24 = vld [vmem:[%s1814_s7 + $0x180] sm:$0xff]  ;;  %v390_v25 = vld [vmem:[%s1814_s7 + $0x190] sm:$0xff] }
  0x23   : > { %365 = vst [vmem:[%s1819_s8 + $0x60] sm:$0xff] %v364_v12  ;;  %v392_v26 = vld [vmem:[%s1814_s7 + $0x1a0] sm:$0xff]  ;;  %v394_v27 = vld [vmem:[%s1814_s7 + $0x1b0] sm:$0xff] }
  0x24   : > { %367 = vst [vmem:[%s1819_s8 + $0x68] sm:$0xff] %v366_v13  ;;  %v396_v28 = vld [vmem:[%s1814_s7 + $0x1c0] sm:$0xff]  ;;  %v398_v29 = vld [vmem:[%s1814_s7 + $0x1d0] sm:$0xff] }
  0x25   : > { %369 = vst [vmem:[%s1819_s8 + $0x70] sm:$0xff] %v368_v14  ;;  %v400_v30 = vld [vmem:[%s1814_s7 + $0x1e0] sm:$0xff]  ;;  %v402_v31 = vld [vmem:[%s1814_s7 + $0x1f0] sm:$0xff] }
  0x26   : > { %371 = vst [vmem:[%s1819_s8 + $0x78] sm:$0xff] %v370_v15  ;;  %v404_v32 = vld [vmem:[%s1814_s7 + $0x200] sm:$0xff]  ;;  %v406_v33 = vld [vmem:[%s1814_s7 + $0x210] sm:$0xff] }
  0x27   : > { %373 = vst [vmem:[%s1819_s8 + $0x80] sm:$0xff] %v372_v16  ;;  %v408_v34 = vld [vmem:[%s1814_s7 + $0x220] sm:$0xff]  ;;  %v410_v35 = vld [vmem:[%s1814_s7 + $0x230] sm:$0xff] }
  0x28   : > { %375 = vst [vmem:[%s1819_s8 + $0x88] sm:$0xff] %v374_v17  ;;  %v412_v36 = vld [vmem:[%s1814_s7 + $0x240] sm:$0xff]  ;;  %v414_v37 = vld [vmem:[%s1814_s7 + $0x250] sm:$0xff] }
  0x29   : > { %377 = vst [vmem:[%s1819_s8 + $0x90] sm:$0xff] %v376_v18  ;;  %v416_v38 = vld [vmem:[%s1814_s7 + $0x260] sm:$0xff]  ;;  %v418_v39 = vld [vmem:[%s1814_s7 + $0x270] sm:$0xff] }
  0x2a   : > { %379 = vst [vmem:[%s1819_s8 + $0x98] sm:$0xff] %v378_v19  ;;  %v420_v40 = vld [vmem:[%s1814_s7 + $0x280] sm:$0xff]  ;;  %v422_v41 = vld [vmem:[%s1814_s7 + $0x290] sm:$0xff] }
  0x2b   : > { %381 = vst [vmem:[%s1819_s8 + $0xa0] sm:$0xff] %v380_v20  ;;  %v424_v42 = vld [vmem:[%s1814_s7 + $0x2a0] sm:$0xff]  ;;  %v426_v43 = vld [vmem:[%s1814_s7 + $0x2b0] sm:$0xff] }
  0x2c   : > { %383 = vst [vmem:[%s1819_s8 + $0xa8] sm:$0xff] %v382_v21  ;;  %v428_v44 = vld [vmem:[%s1814_s7 + $0x2c0] sm:$0xff]  ;;  %v430_v45 = vld [vmem:[%s1814_s7 + $0x2d0] sm:$0xff] }
  0x2d   : > { %385 = vst [vmem:[%s1819_s8 + $0xb0] sm:$0xff] %v384_v22  ;;  %v432_v46 = vld [vmem:[%s1814_s7 + $0x2e0] sm:$0xff]  ;;  %v434_v47 = vld [vmem:[%s1814_s7 + $0x2f0] sm:$0xff] }
  0x2e   : > { %387 = vst [vmem:[%s1819_s8 + $0xb8] sm:$0xff] %v386_v23  ;;  %v436_v48 = vld [vmem:[%s1814_s7 + $0x300] sm:$0xff]  ;;  %v438_v49 = vld [vmem:[%s1814_s7 + $0x310] sm:$0xff] }
  0x2f   : > { %389 = vst [vmem:[%s1819_s8 + $0xc0] sm:$0xff] %v388_v24  ;;  %v440_v50 = vld [vmem:[%s1814_s7 + $0x320] sm:$0xff]  ;;  %v442_v51 = vld [vmem:[%s1814_s7 + $0x330] sm:$0xff] }
  0x30   : > { %391 = vst [vmem:[%s1819_s8 + $0xc8] sm:$0xff] %v390_v25  ;;  %v444_v52 = vld [vmem:[%s1814_s7 + $0x340] sm:$0xff]  ;;  %v446_v53 = vld [vmem:[%s1814_s7 + $0x350] sm:$0xff] }
  0x31   : > { %393 = vst [vmem:[%s1819_s8 + $0xd0] sm:$0xff] %v392_v26  ;;  %v448_v54 = vld [vmem:[%s1814_s7 + $0x360] sm:$0xff]  ;;  %v450_v55 = vld [vmem:[%s1814_s7 + $0x370] sm:$0xff] }
  0x32   : > { %395 = vst [vmem:[%s1819_s8 + $0xd8] sm:$0xff] %v394_v27  ;;  %v452_v56 = vld [vmem:[%s1814_s7 + $0x380] sm:$0xff]  ;;  %v454_v57 = vld [vmem:[%s1814_s7 + $0x390] sm:$0xff] }
  0x33   : > { %397 = vst [vmem:[%s1819_s8 + $0xe0] sm:$0xff] %v396_v28  ;;  %v456_v58 = vld [vmem:[%s1814_s7 + $0x3a0] sm:$0xff]  ;;  %v458_v59 = vld [vmem:[%s1814_s7 + $0x3b0] sm:$0xff] }
  0x34   : > { %399 = vst [vmem:[%s1819_s8 + $0xe8] sm:$0xff] %v398_v29  ;;  %v460_v60 = vld [vmem:[%s1814_s7 + $0x3c0] sm:$0xff]  ;;  %v462_v61 = vld [vmem:[%s1814_s7 + $0x3d0] sm:$0xff] }
  0x35   : > { %401 = vst [vmem:[%s1819_s8 + $0xf0] sm:$0xff] %v400_v30  ;;  %v464_v62 = vld [vmem:[%s1814_s7 + $0x3e0] sm:$0xff]  ;;  %v466_v63 = vld [vmem:[%s1814_s7 + $0x3f0] sm:$0xff] }
  0x36   : > { %403 = vst [vmem:[%s1819_s8 + $0xf8] sm:$0xff] %v402_v31 }
  0x37   : > { %405 = vst [vmem:[%s1819_s8 + $0x100] sm:$0xff] %v404_v32 }
  0x38   : > { %407 = vst [vmem:[%s1819_s8 + $0x108] sm:$0xff] %v406_v33 }
  0x39   : > { %409 = vst [vmem:[%s1819_s8 + $0x110] sm:$0xff] %v408_v34 }
  0x3a   : > { %411 = vst [vmem:[%s1819_s8 + $0x118] sm:$0xff] %v410_v35 }
  0x3b   : > { %413 = vst [vmem:[%s1819_s8 + $0x120] sm:$0xff] %v412_v36 }
  0x3c   : > { %415 = vst [vmem:[%s1819_s8 + $0x128] sm:$0xff] %v414_v37 }
  0x3d   : > { %417 = vst [vmem:[%s1819_s8 + $0x130] sm:$0xff] %v416_v38 }
  0x3e   : > { %419 = vst [vmem:[%s1819_s8 + $0x138] sm:$0xff] %v418_v39 }
  0x3f   : > { %421 = vst [vmem:[%s1819_s8 + $0x140] sm:$0xff] %v420_v40 }
  0x40   : > { %423 = vst [vmem:[%s1819_s8 + $0x148] sm:$0xff] %v422_v41 }
  0x41   : > { %425 = vst [vmem:[%s1819_s8 + $0x150] sm:$0xff] %v424_v42 }
  0x42   : > { %427 = vst [vmem:[%s1819_s8 + $0x158] sm:$0xff] %v426_v43 }
  0x43   : > { %429 = vst [vmem:[%s1819_s8 + $0x160] sm:$0xff] %v428_v44 }
  0x44   : > { %431 = vst [vmem:[%s1819_s8 + $0x168] sm:$0xff] %v430_v45 }
  0x45   : > { %433 = vst [vmem:[%s1819_s8 + $0x170] sm:$0xff] %v432_v46 }
  0x46   : > { %435 = vst [vmem:[%s1819_s8 + $0x178] sm:$0xff] %v434_v47 }
  0x47   : > { %437 = vst [vmem:[%s1819_s8 + $0x180] sm:$0xff] %v436_v48 }
  0x48   : > { %439 = vst [vmem:[%s1819_s8 + $0x188] sm:$0xff] %v438_v49 }
  0x49   : > { %441 = vst [vmem:[%s1819_s8 + $0x190] sm:$0xff] %v440_v50 }
  0x4a   : > { %443 = vst [vmem:[%s1819_s8 + $0x198] sm:$0xff] %v442_v51 }
  0x4b   : > { %445 = vst [vmem:[%s1819_s8 + $0x1a0] sm:$0xff] %v444_v52 }
  0x4c   : > { %447 = vst [vmem:[%s1819_s8 + $0x1a8] sm:$0xff] %v446_v53 }
  0x4d   : > { %449 = vst [vmem:[%s1819_s8 + $0x1b0] sm:$0xff] %v448_v54 }
  0x4e   : > { %451 = vst [vmem:[%s1819_s8 + $0x1b8] sm:$0xff] %v450_v55 }
  0x4f   : > { %453 = vst [vmem:[%s1819_s8 + $0x1c0] sm:$0xff] %v452_v56 }
  0x50   : > { %455 = vst [vmem:[%s1819_s8 + $0x1c8] sm:$0xff] %v454_v57 }
  0x51   : > { %457 = vst [vmem:[%s1819_s8 + $0x1d0] sm:$0xff] %v456_v58 }
  0x52   : > { %459 = vst [vmem:[%s1819_s8 + $0x1d8] sm:$0xff] %v458_v59 }
  0x53   : > { %461 = vst [vmem:[%s1819_s8 + $0x1e0] sm:$0xff] %v460_v60 }
  0x54   : > { %463 = vst [vmem:[%s1819_s8 + $0x1e8] sm:$0xff] %v462_v61 }
  0x55   : > { %465 = vst [vmem:[%s1819_s8 + $0x1f0] sm:$0xff] %v464_v62 }
  0x56   : > { %467 = vst [vmem:[%s1819_s8 + $0x1f8] sm:$0xff] %v466_v63 }
  0x57 PF: > { %p1287_p7 = scmp.ge.s32.totalorder %s1731_s18, 1  ;;  %p472_p8 = scmp.lt.s32.totalorder %s1731_s18, 11 }
  0x59   : > { %p473_p9 = pnand %p1287_p7, %p472_p8 }
  0x5a   : > { %s479_s9 = sand.u32 (!%p473_p9), 1, %s1707_s12   ;;  %s1289_s10 = sshll.u32 (!%p473_p9), %s1715_s14, 2 }
  0x5b   : > { %476 = sbr.rel (%p473_p9) target bundleno = 339 (0x153), region = 62  ;;  %s1288_s11 = sshll.u32 (!%p473_p9), %s479_s9, 9 }
  0x5c   : > { %p527_p10 = scmp.lt.s32.totalorder (!%p473_p9), %s1289_s10, 19  ;;  %s1291_s21 = sshll.u32 (!%p473_p9), %s1719_s15, 1 }
  0x5d   : > { %p539_p11 = scmp.lt.s32.totalorder (!%p473_p9), %s1291_s21, 3  ;;  %s1966_s6 = scalar_lea.vmem (!%p473_p9), [#allocation3], %s1288_s11 }
  0x5e   : > { %p1295_p12 = scmp.ne.s32.totalorder (!%p473_p9), %s1715_s14, 0 }
  0x60   : > { %s2157_s10 = smov (!%p527_p10, %s1289_s10), 19  ;;  %s2159_s21 = smov (!%p539_p11, %s1291_s21), 3 }
  0x61   : > { %s1290_s22 = sshll.u32 %s2157_s10, 2  ;;  %s1292_s27 = sshll.u32 %s2159_s21, 2 }
  0x62   : > { %s1954_s26 = scalar_lea.vmem %s2140_s0, %s1290_s22  ;;  %s1294_s28 = sshll.u32 %s2159_s21, 3 }
  0x63   : > { %s1959_s4 = scalar_lea.vmem %s2142_s2, %s1292_s27  ;;  %s1964_s15 = scalar_lea.vmem %s2143_s3, %s1294_s28 }
  0x64   : > { %559 = sbr.rel (%p1295_p12) target bundleno = 108 (0x6c), region = 70 }
  0x69   : > { %v1733_v0 = vmov 0.0  }
  0x6a   : > { %560 = vst [vmem:[#allocation2] sm:$0xff] %v1733_v0 }
  0x6b   : > { %561 = vst [vmem:[#allocation2 + $0x8] sm:$0xff] %v1733_v0 }
  0x6c PF: > { %v1354_v1 = vld [vmem:[%s1966_s6 + $0x70] sm:$0xf]  ;;  %v1571_v2 = vld [vmem:[%s1966_s6 + $0x74] sm:$0xf0]  ;;  %v1346_v12 = vld [vmem:[%s1966_s6 + $0x60] sm:$0xf] }
  0x6d   : > { %v1418_v3 = vld [vmem:[%s1966_s6 + $0xf0] sm:$0xf]  ;;  %v1355_v4 = vor.u32 %v1571_v2, %v1354_v1  ;;  %v1587_v5 = vld [vmem:[%s1966_s6 + $0xf4] sm:$0xf0]  ;;  %v1569_v14 = vld [vmem:[%s1966_s6 + $0x64] sm:$0xf0] }
  0x6e   : > { %v1482_v6 = vld [vmem:[%s1966_s6 + $0x170] sm:$0xf]  ;;  %v1603_v7 = vld [vmem:[%s1966_s6 + $0x174] sm:$0xf0]  ;;  %v1419_v8 = vor.u32 %v1587_v5, %v1418_v3  ;;  %v1410_v15 = vld [vmem:[%s1966_s6 + $0xe0] sm:$0xf]  ;;  %v1347_v17 = vor.u32 %v1569_v14, %v1346_v12 }
  0x6f   : > { %v1483_v9 = vor.u32 %v1603_v7, %v1482_v6  ;;  %v1546_v10 = vld [vmem:[%s1966_s6 + $0x1f0] sm:$0xf]  ;;  %v1619_v11 = vld [vmem:[%s1966_s6 + $0x1f4] sm:$0xf0]  ;;  %964 = vmatpush.bf16.msra.mxu0 %v1355_v4  ;;  %v1585_v16 = vld [vmem:[%s1966_s6 + $0xe4] sm:$0xf0] }
  0x70   : > { %v1547_v13 = vor.u32 %v1619_v11, %v1546_v10  ;;  %977 = vmatpush.bf16.msra.mxu1 %v1419_v8  ;;  %v1411_v18 = vor.u32 %v1585_v16, %v1410_v15  ;;  %v1474_v19 = vld [vmem:[%s1966_s6 + $0x160] sm:$0xf]  ;;  %v1601_v20 = vld [vmem:[%s1966_s6 + $0x164] sm:$0xf0]  ;;  %v1338_v24 = vld [vmem:[%s1966_s6 + $0x50] sm:$0xf] }
  0x71   : > { %990 = vmatpush.bf16.msra.mxu2 %v1483_v9  ;;  %v1538_v21 = vld [vmem:[%s1966_s6 + $0x1e0] sm:$0xf]  ;;  %v1475_v22 = vor.u32 %v1601_v20, %v1474_v19  ;;  %v1617_v23 = vld [vmem:[%s1966_s6 + $0x1e4] sm:$0xf0]  ;;  %v1567_v25 = vld [vmem:[%s1966_s6 + $0x54] sm:$0xf0] }
  0x72   : > { %1003 = vmatpush.bf16.msra.mxu3 %v1547_v13  ;;  %v1539_v26 = vor.u32 %v1617_v23, %v1538_v21  ;;  %v1402_v27 = vld [vmem:[%s1966_s6 + $0xd0] sm:$0xf]  ;;  %v1583_v28 = vld [vmem:[%s1966_s6 + $0xd4] sm:$0xf0]  ;;  %v1339_v30 = vor.u32 %v1567_v25, %v1338_v24  ;;  %v1330_v36 = vld [vmem:[%s1966_s6 + $0x40] sm:$0xf] }
  0x73   : > { %v1466_v29 = vld [vmem:[%s1966_s6 + $0x150] sm:$0xf]  ;;  %965 = vmatpush.bf16.msra.mxu0 %v1347_v17  ;;  %v1599_v31 = vld [vmem:[%s1966_s6 + $0x154] sm:$0xf0]  ;;  %v1403_v34 = vor.u32 %v1583_v28, %v1402_v27  ;;  %v1565_v37 = vld [vmem:[%s1966_s6 + $0x44] sm:$0xf0] }
  0x74   : > { %v1530_v32 = vld [vmem:[%s1966_s6 + $0x1d0] sm:$0xf]  ;;  %v1615_v33 = vld [vmem:[%s1966_s6 + $0x1d4] sm:$0xf0]  ;;  %978 = vmatpush.bf16.msra.mxu1 %v1411_v18  ;;  %v1467_v35 = vor.u32 %v1599_v31, %v1466_v29  ;;  %v1394_v38 = vld [vmem:[%s1966_s6 + $0xc0] sm:$0xf]  ;;  %v1331_v45 = vor.u32 %v1565_v37, %v1330_v36 }
  0x75   : > { %991 = vmatpush.bf16.msra.mxu2 %v1475_v22  ;;  %v1531_v39 = vor.u32 %v1615_v33, %v1530_v32  ;;  %v1581_v40 = vld [vmem:[%s1966_s6 + $0xc4] sm:$0xf0]  ;;  %v1458_v41 = vld [vmem:[%s1966_s6 + $0x140] sm:$0xf]  ;;  %v1322_v48 = vld [vmem:[%s1966_s6 + $0x30] sm:$0xf] }
  0x76   : > { %1004 = vmatpush.bf16.msra.mxu3 %v1539_v26  ;;  %v1597_v42 = vld [vmem:[%s1966_s6 + $0x144] sm:$0xf0]  ;;  %v1522_v43 = vld [vmem:[%s1966_s6 + $0x1c0] sm:$0xf]  ;;  %v1395_v46 = vor.u32 %v1581_v40, %v1394_v38  ;;  %v1563_v49 = vld [vmem:[%s1966_s6 + $0x34] sm:$0xf0] }
  0x77   : > { %v1613_v44 = vld [vmem:[%s1966_s6 + $0x1c4] sm:$0xf0]  ;;  %966 = vmatpush.bf16.msra.mxu0 %v1339_v30  ;;  %v1459_v47 = vor.u32 %v1597_v42, %v1458_v41  ;;  %v1386_v50 = vld [vmem:[%s1966_s6 + $0xb0] sm:$0xf]  ;;  %v1579_v52 = vld [vmem:[%s1966_s6 + $0xb4] sm:$0xf0]  ;;  %v1323_v57 = vor.u32 %v1563_v49, %v1322_v48 }
  0x78   : > { %979 = vmatpush.bf16.msra.mxu1 %v1403_v34  ;;  %v1523_v51 = vor.u32 %v1613_v44, %v1522_v43  ;;  %v1450_v53 = vld [vmem:[%s1966_s6 + $0x130] sm:$0xf]  ;;  %v1595_v54 = vld [vmem:[%s1966_s6 + $0x134] sm:$0xf0]  ;;  %v1387_v58 = vor.u32 %v1579_v52, %v1386_v50  ;;  %v1314_v60 = vld [vmem:[%s1966_s6 + $0x20] sm:$0xf] }
  0x79   : > { %992 = vmatpush.bf16.msra.mxu2 %v1467_v35  ;;  %v1514_v55 = vld [vmem:[%s1966_s6 + $0x1b0] sm:$0xf]  ;;  %v1611_v56 = vld [vmem:[%s1966_s6 + $0x1b4] sm:$0xf0]  ;;  %v1451_v59 = vor.u32 %v1595_v54, %v1450_v53  ;;  %v1561_v61 = vld [vmem:[%s1966_s6 + $0x24] sm:$0xf0] }
  0x7a   : > { %1005 = vmatpush.bf16.msra.mxu3 %v1531_v39  ;;  %v1378_v62 = vld [vmem:[%s1966_s6 + $0xa0] sm:$0xf]  ;;  %v1515_v63 = vor.u32 %v1611_v56, %v1514_v55  ;;  %v1577_v0 = vld [vmem:[%s1966_s6 + $0xa4] sm:$0xf0]  ;;  %v1315_v5 = vor.u32 %v1561_v61, %v1314_v60  ;;  %v1306_v8 = vld [vmem:[%s1966_s6 + $0x10] sm:$0xf] }
  0x7b   : > { %967 = vmatpush.bf16.msra.mxu0 %v1331_v45  ;;  %v1442_v1 = vld [vmem:[%s1966_s6 + $0x120] sm:$0xf]  ;;  %v1593_v2 = vld [vmem:[%s1966_s6 + $0x124] sm:$0xf0]  ;;  %v1379_v6 = vor.u32 %v1577_v0, %v1378_v62  ;;  %v1559_v9 = vld [vmem:[%s1966_s6 + $0x14] sm:$0xf0] }
  0x7c   : > { %980 = vmatpush.bf16.msra.mxu1 %v1395_v46  ;;  %v1506_v3 = vld [vmem:[%s1966_s6 + $0x1a0] sm:$0xf]  ;;  %v1609_v4 = vld [vmem:[%s1966_s6 + $0x1a4] sm:$0xf0]  ;;  %v1443_v7 = vor.u32 %v1593_v2, %v1442_v1  ;;  %v1370_v10 = vld [vmem:[%s1966_s6 + $0x90] sm:$0xf]  ;;  %v1307_v17 = vor.u32 %v1559_v9, %v1306_v8 }
  0x7d   : > { %993 = vmatpush.bf16.msra.mxu2 %v1459_v47  ;;  %v1507_v11 = vor.u32 %v1609_v4, %v1506_v3  ;;  %v1575_v12 = vld [vmem:[%s1966_s6 + $0x94] sm:$0xf0]  ;;  %v1434_v13 = vld [vmem:[%s1966_s6 + $0x110] sm:$0xf]  ;;  %v1298_v18 = vld [vmem:[%s1966_s6] sm:$0xf] }
  0x7e   : > { %1006 = vmatpush.bf16.msra.mxu3 %v1523_v51  ;;  %v1591_v14 = vld [vmem:[%s1966_s6 + $0x114] sm:$0xf0]  ;;  %v1498_v15 = vld [vmem:[%s1966_s6 + $0x190] sm:$0xf]  ;;  %v1557_v19 = vld [vmem:[%s1966_s6 + $0x4] sm:$0xf0]  ;;  %v1371_v21 = vor.u32 %v1575_v12, %v1370_v10 }
  0x7f   : > { %968 = vmatpush.bf16.msra.mxu0 %v1323_v57  ;;  %v1607_v16 = vld [vmem:[%s1966_s6 + $0x194] sm:$0xf0]  ;;  %v1362_v20 = vld [vmem:[%s1966_s6 + $0x80] sm:$0xf]  ;;  %v1435_v22 = vor.u32 %v1591_v14, %v1434_v13  ;;  %v1573_v23 = vld [vmem:[%s1966_s6 + $0x84] sm:$0xf0]  ;;  %v1299_v33 = vor.u32 %v1557_v19, %v1298_v18 }
  0x80   : > { %981 = vmatpush.bf16.msra.mxu1 %v1387_v58  ;;  %v1426_v24 = vld [vmem:[%s1966_s6 + $0x100] sm:$0xf]  ;;  %v1589_v25 = vld [vmem:[%s1966_s6 + $0x104] sm:$0xf0]  ;;  %v1499_v26 = vor.u32 %v1607_v16, %v1498_v15  ;;  %v1570_v29 = vld [vmem:[%s1966_s6 + $0x74] sm:$0xf]  ;;  %v1363_v38 = vor.u32 %v1573_v23, %v1362_v20 }
  0x81   : > { %994 = vmatpush.bf16.msra.mxu2 %v1451_v59  ;;  %v1490_v27 = vld [vmem:[%s1966_s6 + $0x180] sm:$0xf]  ;;  %v1605_v28 = vld [vmem:[%s1966_s6 + $0x184] sm:$0xf0]  ;;  %v1356_v30 = vld [vmem:[%s1966_s6 + $0x78] sm:$0xf0]  ;;  %v1427_v39 = vor.u32 %v1589_v25, %v1426_v24 }
  0x82   : > { %1007 = vmatpush.bf16.msra.mxu3 %v1515_v63  ;;  %v1586_v31 = vld [vmem:[%s1966_s6 + $0xf4] sm:$0xf]  ;;  %v565_v32 = vld [vmem:[%s1954_s26 + $0x8] sm:$0xff]  ;;  %v1491_v43 = vor.u32 %v1605_v28, %v1490_v27  ;;  %v1359_v44 = vor.u32 %v1570_v29, %v1356_v30  ;;  %v1568_v48 = vld [vmem:[%s1966_s6 + $0x64] sm:$0xf]  ;;  %p1552_p13 = scmp.ne.s32.totalorder %s1715_s14, 4 }
  0x83   : > { %969 = vmatpush.bf16.msra.mxu0 %v1315_v5  ;;  %v1420_v34 = vld [vmem:[%s1966_s6 + $0xf8] sm:$0xf0]  ;;  %v1602_v35 = vld [vmem:[%s1966_s6 + $0x174] sm:$0xf]  ;;  %v634_v37 = vunpack.c.l.b16 %v565_v32  ;;  %v635_v42 = vunpack.c.h.b16 %v565_v32  ;;  %v1348_v49 = vld [vmem:[%s1966_s6 + $0x68] sm:$0xf0] }
  0x84   : > { %982 = vmatpush.bf16.msra.mxu1 %v1379_v6  ;;  %v1484_v36 = vld [vmem:[%s1966_s6 + $0x178] sm:$0xf0]  ;;  %v1618_v40 = vld [vmem:[%s1966_s6 + $0x1f4] sm:$0xf]  ;;  %v1423_v46 = vor.u32 %v1586_v31, %v1420_v34  ;;  %v1584_v50 = vld [vmem:[%s1966_s6 + $0xe4] sm:$0xf]  ;;  %v1351_v62 = vor.u32 %v1568_v48, %v1348_v49 }
  0x85   : > { %995 = vmatpush.bf16.msra.mxu2 %v1443_v7  ;;  %v1548_v41 = vld [vmem:[%s1966_s6 + $0x1f8] sm:$0xf0]  ;;  %v564_v45 = vld [vmem:[%s1954_s26] sm:$0xff]  ;;  %v1487_v47 = vor.u32 %v1602_v35, %v1484_v36  ;;  %v1412_v54 = vld [vmem:[%s1966_s6 + $0xe8] sm:$0xf0]  ;;  %v2049_v57 = vpack.c.b16 %v634_v37, %v634_v37  ;;  %v2053_v60 = vpack.c.b16 %v635_v42, %v635_v42 }
  0x86   : > { %1008 = vmatpush.bf16.msra.mxu3 %v1507_v11  ;;  %v632_v51 = vunpack.c.l.b16 %v564_v45  ;;  %v633_v52 = vunpack.c.h.b16 %v564_v45  ;;  %v1551_v53 = vor.u32 %v1618_v40, %v1548_v41  ;;  %v1600_v55 = vld [vmem:[%s1966_s6 + $0x164] sm:$0xf]  ;;  %v1476_v56 = vld [vmem:[%s1966_s6 + $0x168] sm:$0xf0]  ;;  %v1415_v0 = vor.u32 %v1584_v50, %v1412_v54  ;;  %v1566_v2 = vld [vmem:[%s1966_s6 + $0x54] sm:$0xf] }
  0x87   : > { %970 = vmatpush.bf16.msra.mxu0 %v1307_v17  ;;  %v1616_v58 = vld [vmem:[%s1966_s6 + $0x1e4] sm:$0xf]  ;;  %v1540_v59 = vld [vmem:[%s1966_s6 + $0x1e8] sm:$0xf0]  ;;  %v1479_v1 = vor.u32 %v1600_v55, %v1476_v56  ;;  %v1340_v3 = vld [vmem:[%s1966_s6 + $0x58] sm:$0xf0] }
  0x88   : > { %983 = vmatpush.bf16.msra.mxu1 %v1371_v21  ;;  %v2055_v61 = vpack.c.b16 %v632_v51, %v632_v51  ;;  %v2057_v63 = vpack.c.b16 %v633_v52, %v633_v52  ;;  %v1582_v4 = vld [vmem:[%s1966_s6 + $0xd4] sm:$0xf]  ;;  %v1543_v5 = vor.u32 %v1616_v58, %v1540_v59  ;;  %v1404_v6 = vld [vmem:[%s1966_s6 + $0xd8] sm:$0xf0]  ;;  %v1343_v11 = vor.u32 %v1566_v2, %v1340_v3  ;;  %v1564_v14 = vld [vmem:[%s1966_s6 + $0x44] sm:$0xf] }
  0x89   : > { %996 = vmatpush.bf16.msra.mxu2 %v1435_v22  ;;  %v1598_v7 = vld [vmem:[%s1966_s6 + $0x154] sm:$0xf]  ;;  %v1468_v8 = vld [vmem:[%s1966_s6 + $0x158] sm:$0xf0]  ;;  %v1407_v12 = vor.u32 %v1582_v4, %v1404_v6  ;;  %v1332_v15 = vld [vmem:[%s1966_s6 + $0x48] sm:$0xf0] }
  0x8a   : > { %1009 = vmatpush.bf16.msra.mxu3 %v1499_v26  ;;  %v1614_v9 = vld [vmem:[%s1966_s6 + $0x1d4] sm:$0xf]  ;;  %v1532_v10 = vld [vmem:[%s1966_s6 + $0x1d8] sm:$0xf0]  ;;  %v1471_v13 = vor.u32 %v1598_v7, %v1468_v8  ;;  %v1580_v16 = vld [vmem:[%s1966_s6 + $0xc4] sm:$0xf]  ;;  %v1335_v23 = vor.u32 %v1564_v14, %v1332_v15 }
  0x8b   : > { %971 = vmatpush.bf16.msra.mxu0 %v1299_v33  ;;  %v1535_v17 = vor.u32 %v1614_v9, %v1532_v10  ;;  %v1396_v18 = vld [vmem:[%s1966_s6 + $0xc8] sm:$0xf0]  ;;  %v1596_v19 = vld [vmem:[%s1966_s6 + $0x144] sm:$0xf]  ;;  %v1562_v26 = vld [vmem:[%s1966_s6 + $0x34] sm:$0xf] }
  0x8c   : > { %984 = vmatpush.bf16.msra.mxu1 %v1363_v38  ;;  %v1460_v20 = vld [vmem:[%s1966_s6 + $0x148] sm:$0xf0]  ;;  %v1612_v21 = vld [vmem:[%s1966_s6 + $0x1c4] sm:$0xf]  ;;  %v1399_v24 = vor.u32 %v1580_v16, %v1396_v18  ;;  %v1324_v27 = vld [vmem:[%s1966_s6 + $0x38] sm:$0xf0] }
  0x8d   : > { %997 = vmatpush.bf16.msra.mxu2 %v1427_v39  ;;  %v1524_v22 = vld [vmem:[%s1966_s6 + $0x1c8] sm:$0xf0]  ;;  %v1463_v25 = vor.u32 %v1596_v19, %v1460_v20  ;;  %v1578_v28 = vld [vmem:[%s1966_s6 + $0xb4] sm:$0xf]  ;;  %v1388_v30 = vld [vmem:[%s1966_s6 + $0xb8] sm:$0xf0]  ;;  %v1327_v35 = vor.u32 %v1562_v26, %v1324_v27 }
  0x8e   : > { %1010 = vmatpush.bf16.msra.mxu3 %v1491_v43  ;;  %972 = vmatmul.bf16.vlgmr.msra.gmra.mxu0 %v2055_v61  ;;  %v1527_v29 = vor.u32 %v1612_v21, %v1524_v22  ;;  %v1594_v31 = vld [vmem:[%s1966_s6 + $0x134] sm:$0xf]  ;;  %v1452_v32 = vld [vmem:[%s1966_s6 + $0x138] sm:$0xf0]  ;;  %v1391_v36 = vor.u32 %v1578_v28, %v1388_v30  ;;  %v1560_v38 = vld [vmem:[%s1966_s6 + $0x24] sm:$0xf] }
  0x8f   : > { %1016 = vmatpush.bf16.msrb.mxu0 %v1359_v44  ;;  %985 = vmatmul.bf16.vlgmr.msra.gmra.mxu1 %v2057_v63  ;;  %v1610_v33 = vld [vmem:[%s1966_s6 + $0x1b4] sm:$0xf]  ;;  %v1516_v34 = vld [vmem:[%s1966_s6 + $0x1b8] sm:$0xf0]  ;;  %v1455_v37 = vor.u32 %v1594_v31, %v1452_v32  ;;  %v1316_v39 = vld [vmem:[%s1966_s6 + $0x28] sm:$0xf0] }
  0x90   : > { %1029 = vmatpush.bf16.msrb.mxu1 %v1423_v46  ;;  %998 = vmatmul.bf16.vlgmr.msra.gmra.mxu2 %v2049_v57  ;;  %v1576_v40 = vld [vmem:[%s1966_s6 + $0xa4] sm:$0xf]  ;;  %v1519_v41 = vor.u32 %v1610_v33, %v1516_v34  ;;  %v1380_v42 = vld [vmem:[%s1966_s6 + $0xa8] sm:$0xf0]  ;;  %v1558_v50 = vld [vmem:[%s1966_s6 + $0x14] sm:$0xf] }
  0x91   : > { %1042 = vmatpush.bf16.msrb.mxu2 %v1487_v47  ;;  %1011 = vmatmul.bf16.vlgmr.msra.gmra.mxu3 %v2053_v60  ;;  %v1592_v43 = vld [vmem:[%s1966_s6 + $0x124] sm:$0xf]  ;;  %v1444_v44 = vld [vmem:[%s1966_s6 + $0x128] sm:$0xf0]  ;;  %v1319_v47 = vor.u32 %v1560_v38, %v1316_v39  ;;  %v1383_v48 = vor.u32 %v1576_v40, %v1380_v42  ;;  %v1308_v51 = vld [vmem:[%s1966_s6 + $0x18] sm:$0xf0] }
  0x92   : > { %1055 = vmatpush.bf16.msrb.mxu3 %v1551_v53  ;;  %v1608_v45 = vld [vmem:[%s1966_s6 + $0x1a4] sm:$0xf]  ;;  %v1508_v46 = vld [vmem:[%s1966_s6 + $0x1a8] sm:$0xf0]  ;;  %v1447_v49 = vor.u32 %v1592_v43, %v1444_v44  ;;  %v1574_v52 = vld [vmem:[%s1966_s6 + $0x94] sm:$0xf] }
  0x93   : > { %1017 = vmatpush.bf16.msrb.mxu0 %v1351_v62  ;;  %v1511_v53 = vor.u32 %v1608_v45, %v1508_v46  ;;  %v1372_v54 = vld [vmem:[%s1966_s6 + $0x98] sm:$0xf0]  ;;  %v1590_v55 = vld [vmem:[%s1966_s6 + $0x114] sm:$0xf]  ;;  %v1311_v62 = vor.u32 %v1558_v50, %v1308_v51  ;;  %v1556_v2 = vld [vmem:[%s1966_s6 + $0x4] sm:$0xf] }
  0x94   : > { %1030 = vmatpush.bf16.msrb.mxu1 %v1415_v0  ;;  %v1436_v56 = vld [vmem:[%s1966_s6 + $0x118] sm:$0xf0]  ;;  %v1606_v58 = vld [vmem:[%s1966_s6 + $0x194] sm:$0xf]  ;;  %v1375_v0 = vor.u32 %v1574_v52, %v1372_v54  ;;  %v1300_v3 = vld [vmem:[%s1966_s6 + $0x8] sm:$0xf0] }
  0x95   : > { %1043 = vmatpush.bf16.msrb.mxu2 %v1479_v1  ;;  %v1500_v59 = vld [vmem:[%s1966_s6 + $0x198] sm:$0xf0]  ;;  %v1439_v1 = vor.u32 %v1590_v55, %v1436_v56  ;;  %v1572_v4 = vld [vmem:[%s1966_s6 + $0x84] sm:$0xf]  ;;  %v1364_v6 = vld [vmem:[%s1966_s6 + $0x88] sm:$0xf0] }
  0x96   : > { %1056 = vmatpush.bf16.msrb.mxu3 %v1543_v5  ;;  %v1503_v5 = vor.u32 %v1606_v58, %v1500_v59  ;;  %v1588_v7 = vld [vmem:[%s1966_s6 + $0x104] sm:$0xf]  ;;  %v1428_v8 = vld [vmem:[%s1966_s6 + $0x108] sm:$0xf0]  ;;  %v562_v21 = vld [vmem:[#allocation2] sm:$0xff] }
  0x97   : > { %1018 = vmatpush.bf16.msrb.mxu0 %v1343_v11  ;;  %v1604_v9 = vld [vmem:[%s1966_s6 + $0x184] sm:$0xf]  ;;  %v1492_v10 = vld [vmem:[%s1966_s6 + $0x188] sm:$0xf0]  ;;  %v1303_v11 = vor.u32 %v1556_v2, %v1300_v3  ;;  %v563_v31 = vld [vmem:[#allocation2 + $0x8] sm:$0xff] }
  0x98   : > { %1031 = vmatpush.bf16.msrb.mxu1 %v1407_v12  ;;  %v1367_v12 = vor.u32 %v1572_v4, %v1364_v6  ;;  %v1495_v14 = vor.u32 %v1604_v9, %v1492_v10 }
  0x99   : > { %1044 = vmatpush.bf16.msrb.mxu2 %v1471_v13  ;;  %v1431_v13 = vor.u32 %v1588_v7, %v1428_v8 }
  0x9a   : > { %1057 = vmatpush.bf16.msrb.mxu3 %v1535_v17 }
  0x9b   : > { %1019 = vmatpush.bf16.msrb.mxu0 %v1335_v23 }
  0x9c   : > { %1032 = vmatpush.bf16.msrb.mxu1 %v1399_v24 }
  0x9d   : > { %1045 = vmatpush.bf16.msrb.mxu2 %v1463_v25 }
  0x9e   : > { %1058 = vmatpush.bf16.msrb.mxu3 %v1527_v29 }
  0x9f   : > { %1020 = vmatpush.bf16.msrb.mxu0 %v1327_v35 }
  0xa0   : > { %1033 = vmatpush.bf16.msrb.mxu1 %v1391_v36 }
  0xa1   : > { %1046 = vmatpush.bf16.msrb.mxu2 %v1455_v37 }
  0xa2   : > { %1059 = vmatpush.bf16.msrb.mxu3 %v1519_v41 }
  0xa3   : > { %1021 = vmatpush.bf16.msrb.mxu0 %v1319_v47 }
  0xa4   : > { %1034 = vmatpush.bf16.msrb.mxu1 %v1383_v48 }
  0xa5   : > { %1047 = vmatpush.bf16.msrb.mxu2 %v1447_v49 }
  0xa6   : > { %1060 = vmatpush.bf16.msrb.mxu3 %v1511_v53 }
  0xa7   : > { %1022 = vmatpush.bf16.msrb.mxu0 %v1311_v62 }
  0xa8   : > { %1035 = vmatpush.bf16.msrb.mxu1 %v1375_v0 }
  0xa9   : > { %1048 = vmatpush.bf16.msrb.mxu2 %v1439_v1 }
  0xaa   : > { %1061 = vmatpush.bf16.msrb.mxu3 %v1503_v5 }
  0xab   : > { %1023 = vmatpush.bf16.msrb.mxu0 %v1303_v11 }
  0xac   : > { %1036 = vmatpush.bf16.msrb.mxu1 %v1367_v12 }
  0xad   : > { %1049 = vmatpush.bf16.msrb.mxu2 %v1431_v13 }
  0xae   : > { %1062 = vmatpush.bf16.msrb.mxu3 %v1495_v14  ;;  %1024 = vmatmul.bf16.vlgmr.msrb.gmra.mxu0 %v2055_v61 }
  0xaf   : > { %1037 = vmatmul.bf16.vlgmr.msrb.gmra.mxu1 %v2057_v63 }
  0xb0   : > { %1050 = vmatmul.bf16.vlgmr.msrb.gmra.mxu2 %v2049_v57 }
  0xb1   : > { %1063 = vmatmul.bf16.vlgmr.msrb.gmra.mxu3 %v2053_v60 }
 0x10b   : > { %v973_v15 = vpop.f32.mrf.mxu0 }
 0x10c   : > { %v986_v16 = vpop.f32.mrf.mxu1 }
 0x10d   : > { %v987_v17 = vadd.f32 %v986_v16, %v973_v15 }
 0x113   : > { %v999_v18 = vpop.f32.mrf.mxu2  ;;  %v975_v23 = vpop.f32.mrf.mxu0 }
 0x114   : > { %v1000_v19 = vadd.f32 %v999_v18, %v987_v17  ;;  %v1012_v20 = vpop.f32.mrf.mxu3  ;;  %v988_v24 = vpop.f32.mrf.mxu1 }
 0x116   : > { %v1013_v22 = vadd.f32 %v1012_v20, %v1000_v19 }
 0x118   : > { %v1068_v25 = vadd.f32 %v1013_v22, %v562_v21 }
 0x11a   : > { %1070 = vst [vmem:[#allocation2] sm:$0xff] %v1068_v25 }
 0x11b   : > { %v1001_v26 = vpop.f32.mrf.mxu2 }
 0x11c   : > { %v1014_v61 = vpop.f32.mrf.mxu3 }
 0x12b   : > { %v1025_v27 = vpop.f32.mrf.mxu0 }
 0x12c   : > { %v1038_v63 = vpop.f32.mrf.mxu1 }
 0x12d   : > { %v1039_v28 = vadd.f32 %v1038_v63, %v1025_v27 }
 0x133   : > { %v1051_v57 = vpop.f32.mrf.mxu2  ;;  %v1027_v30 = vpop.f32.mrf.mxu0 }
 0x134   : > { %v1052_v29 = vadd.f32 %v1051_v57, %v1039_v28  ;;  %v1064_v60 = vpop.f32.mrf.mxu3  ;;  %v1040_v32 = vpop.f32.mrf.mxu1 }
 0x136   : > { %v1065_v33 = vadd.f32 %v1064_v60, %v1052_v29 }
 0x138   : > { %v1069_v34 = vadd.f32 %v1065_v33, %v563_v31  ;;  %1075 = sbr.rel (%p1552_p13) target bundleno = 339 (0x153), region = 74 }
 0x13a   : > { %1071 = vst [vmem:[#allocation2 + $0x8] sm:$0xff] %v1069_v34 }
 0x13b   : > { %v1053_v35 = vpop.f32.mrf.mxu2 }
 0x13c   : > { %v1066_v36 = vpop.f32.mrf.mxu3 }
 0x13d   : > { %v1076_v37 = vld [vmem:[#allocation2] sm:$0xff]  ;;  %vm1106_vm0 = vcmask 1040384   ;;  %vm1109_vm1 = vcmask 1041408  }
 0x13e   : > { %v1080_v39 = vrot.slane %v1076_v37, 4  ;;  %v1092_v40 = vmul.f32 %v1076_v37, %v1076_v37 }
 0x140   : > { %v1081_v44 = vadd.f32 %v1080_v39, %v1076_v37  ;;  %v1094_v45 = vrot.slane %v1092_v40, 4 }
 0x141   : > { %v1077_v38 = vld [vmem:[#allocation2 + $0x8] sm:$0xff] }
 0x142   : > { %v1078_v41 = vpack.c.bf16 %v1077_v38, %v1076_v37  ;;  %v1086_v42 = vrot.slane %v1077_v38, 4  ;;  %v1093_v43 = vmul.f32 %v1077_v38, %v1077_v38  ;;  %v1082_v48 = vrot.slane %v1081_v44, 2 }
 0x143   : > { %v1095_v49 = vadd.f32 %v1094_v45, %v1092_v40 }
 0x144   : > { %1079 = vst [vmem:[%s1959_s4] sm:$0xff] %v1078_v41  ;;  %v1087_v46 = vadd.f32 %v1086_v42, %v1077_v38  ;;  %v1100_v47 = vrot.slane %v1093_v43, 4  ;;  %v1083_v52 = vadd.f32 %v1082_v48, %v1081_v44 }
 0x145   : > { %v1096_v53 = vrot.slane %v1095_v49, 2 }
 0x146   : > { %v1088_v50 = vrot.slane %v1087_v46, 2  ;;  %v1101_v51 = vadd.f32 %v1100_v47, %v1093_v43  ;;  %v1084_v56 = vrot.slane %v1083_v52, 1 }
 0x147   : > { %v1097_v58 = vadd.f32 %v1096_v53, %v1095_v49 }
 0x148   : > { %v1089_v54 = vadd.f32 %v1088_v50, %v1087_v46  ;;  %v1102_v55 = vrot.slane %v1101_v51, 2  ;;  %v1085_v0 = vadd.f32 %v1084_v56, %v1083_v52 }
 0x149   : > { %v1098_v1 = vrot.slane %v1097_v58, 1 }
 0x14a   : > { %v1090_v59 = vrot.slane %v1089_v54, 1  ;;  %v1103_v62 = vadd.f32 %v1102_v55, %v1101_v51 }
 0x14b   : > { %v1099_v4 = vadd.f32 %v1098_v1, %v1097_v58 }
 0x14c   : > { %v1091_v2 = vadd.f32 %v1090_v59, %v1089_v54  ;;  %v1104_v3 = vrot.slane %v1103_v62, 1 }
 0x14d   : > { %v1107_v6 = vsel %vm1106_vm0, %v1085_v0, %v1099_v4 }
 0x14e   : > { %v1105_v5 = vadd.f32 %v1104_v3, %v1103_v62  ;;  %v1110_v7 = vsel %vm1109_vm1, %v1107_v6, 0.0 }
 0x14f   : > { %1112 = vst [vmem:[%s1964_s15] sm:$0xff] %v1110_v7 }
 0x150   : > { %v1108_v8 = vsel %vm1106_vm0, %v1091_v2, %v1105_v5 }
 0x151   : > { %v1111_v9 = vsel %vm1109_vm1, %v1108_v8, 0.0 }
 0x152   : > { %1113 = vst [vmem:[%s1964_s15 + $0x8] sm:$0xff] %v1111_v9 }
 0x153 PF: > { %s14_s18 = sadd.s32 1, %s1731_s18   ;;  %s2144_s12 = smov %s1711_s13 }
 0x154   : > { %p11_p0 = scmp.ge.s32.totalorder %s14_s18, 12   ;;  %s2145_s13 = smov %s1805_s25 }
 0x155   : > { %s2146_s14 = smov %s1723_s16  ;;  %s2147_s15 = smov %s1727_s17 }
 0x156   : > { %s2148_s16 = smov %s2151_s19  ;;  %s2149_s17 = smov %s2155_s20 }
 0x157   :  { %13 = sbr.rel (!%p11_p0) target bundleno = 4 (0x4), region = 124 }

// kernel: resnet34_forward.138
= control target key start
LH: loop header
LB: loop body
LE: loop exit
PB: predicated region body
PF: predicated region fallthrough
CT: control target
= control target key end

     0   :  { %s98_s0 = inlined_call_operand.vmem [shape: bf16[8,512], index: 0, kind: input, shape index: {}]   ;;  %s99_s1 = inlined_call_operand.vmem [shape: f32[1,512], index: 1, kind: input, shape index: {}]   ;;  %s100_s2 = inlined_call_operand.vmem [shape: f32[1,512], index: 2, kind: input, shape index: {}]   ;;  %s101_s3 = inlined_call_operand.vmem [shape: bf16[8,512], index: 3, kind: output, shape index: {}]  }
   0x1   :  { %v14_v0 = vld [vmem:[%s98_s0] sm:$0xff]  ;;  %v15_v7 = vld [vmem:[%s98_s0 + $0x8] sm:$0xff] }
   0x2   :  { %v20_v1 = vld [vmem:[%s99_s1] sm:$0xf]  ;;  %v16_v3 = vunpack.c.l.bf16 %v14_v0  ;;  %v17_v4 = vunpack.c.h.bf16 %v14_v0  ;;  %v18_v10 = vunpack.c.l.bf16 %v15_v7  ;;  %v19_v11 = vunpack.c.h.bf16 %v15_v7 }
   0x3   :  { %v34_v2 = vld [vmem:[%s100_s2] sm:$0xf]  ;;  %v22_v5 = vperm.slane %v20_v1, 0  ;;  %v23_v6 = vperm.slane %v20_v1, 1  ;;  %v24_v14 = vperm.slane %v20_v1, 2  ;;  %v25_v15 = vperm.slane %v20_v1, 3 }
   0x4   :  { %v36_v8 = vperm.slane %v34_v2, 0  ;;  %v37_v9 = vperm.slane %v34_v2, 1  ;;  %v38_v16 = vperm.slane %v34_v2, 2  ;;  %v39_v17 = vperm.slane %v34_v2, 3 }
   0x5   :  { %v30_v12 = vmul.f32 %v22_v5, %v16_v3  ;;  %v31_v13 = vmul.f32 %v23_v6, %v17_v4  ;;  %v32_v20 = vmul.f32 %v24_v14, %v18_v10  ;;  %v33_v21 = vmul.f32 %v25_v15, %v19_v11 }
   0x7   :  { %v44_v18 = vadd.f32 %v36_v8, %v30_v12  ;;  %v45_v19 = vadd.f32 %v37_v9, %v31_v13  ;;  %v46_v24 = vadd.f32 %v38_v16, %v32_v20  ;;  %v47_v25 = vadd.f32 %v39_v17, %v33_v21 }
   0x9   :  { %v48_v22 = vmax.f32 %v44_v18, 0.0  ;;  %v49_v23 = vmax.f32 %v45_v19, 0.0  ;;  %v50_v27 = vmax.f32 %v46_v24, 0.0  ;;  %v51_v28 = vmax.f32 %v47_v25, 0.0 }
   0xb   :  { %v52_v26 = vpack.c.bf16 %v49_v23, %v48_v22  ;;  %v53_v29 = vpack.c.bf16 %v51_v28, %v50_v27 }
   0xd   :  { %54 = vst [vmem:[%s101_s3] sm:$0xff] %v52_v26 }
   0xe   :  { %55 = vst [vmem:[%s101_s3 + $0x8] sm:$0xff] %v53_v29 }

// kernel: resnet34_forward.140
= control target key start
LH: loop header
LB: loop body
LE: loop exit
PB: predicated region body
PF: predicated region fallthrough
CT: control target
= control target key end

     0   :  { %s94_s0 = inlined_call_operand.vmem [shape: bf16[8,512], index: 0, kind: input, shape index: {}]   ;;  %s95_s1 = inlined_call_operand.vmem [shape: f32[1,512], index: 1, kind: input, shape index: {}]   ;;  %s96_s2 = inlined_call_operand.vmem [shape: f32[1,512], index: 2, kind: input, shape index: {}]   ;;  %s97_s3 = inlined_call_operand.vmem [shape: bf16[8,512], index: 3, kind: output, shape index: {}]  }
   0x1   :  { %v14_v0 = vld [vmem:[%s94_s0] sm:$0xff]  ;;  %v15_v7 = vld [vmem:[%s94_s0 + $0x8] sm:$0xff] }
   0x2   :  { %v20_v1 = vld [vmem:[%s95_s1] sm:$0xf]  ;;  %v16_v3 = vunpack.c.l.bf16 %v14_v0  ;;  %v17_v4 = vunpack.c.h.bf16 %v14_v0  ;;  %v18_v10 = vunpack.c.l.bf16 %v15_v7  ;;  %v19_v11 = vunpack.c.h.bf16 %v15_v7 }
   0x3   :  { %v34_v2 = vld [vmem:[%s96_s2] sm:$0xf]  ;;  %v22_v5 = vperm.slane %v20_v1, 0  ;;  %v23_v6 = vperm.slane %v20_v1, 1  ;;  %v24_v14 = vperm.slane %v20_v1, 2  ;;  %v25_v15 = vperm.slane %v20_v1, 3 }
   0x4   :  { %v36_v8 = vperm.slane %v34_v2, 0  ;;  %v37_v9 = vperm.slane %v34_v2, 1  ;;  %v38_v16 = vperm.slane %v34_v2, 2  ;;  %v39_v17 = vperm.slane %v34_v2, 3 }
   0x5   :  { %v30_v12 = vmul.f32 %v22_v5, %v16_v3  ;;  %v31_v13 = vmul.f32 %v23_v6, %v17_v4  ;;  %v32_v20 = vmul.f32 %v24_v14, %v18_v10  ;;  %v33_v21 = vmul.f32 %v25_v15, %v19_v11 }
   0x7   :  { %v44_v18 = vadd.f32 %v36_v8, %v30_v12  ;;  %v45_v19 = vadd.f32 %v37_v9, %v31_v13  ;;  %v46_v23 = vadd.f32 %v38_v16, %v32_v20  ;;  %v47_v24 = vadd.f32 %v39_v17, %v33_v21 }
   0x9   :  { %v48_v22 = vpack.c.bf16 %v45_v19, %v44_v18  ;;  %v49_v25 = vpack.c.bf16 %v47_v24, %v46_v23 }
   0xb   :  { %50 = vst [vmem:[%s97_s3] sm:$0xff] %v48_v22 }
   0xc   :  { %51 = vst [vmem:[%s97_s3 + $0x8] sm:$0xff] %v49_v25 }

// kernel: resnet34_forward.142
= control target key start
LH: loop header
LB: loop body
LE: loop exit
PB: predicated region body
PF: predicated region fallthrough
CT: control target
= control target key end

     0   :  { %s122_s0 = inlined_call_operand.vmem [shape: bf16[8,512], index: 0, kind: input, shape index: {}]   ;;  %s123_s1 = inlined_call_operand.vmem [shape: f32[1,512], index: 1, kind: input, shape index: {}]   ;;  %s124_s2 = inlined_call_operand.vmem [shape: f32[1,512], index: 2, kind: input, shape index: {}]   ;;  %s125_s3 = inlined_call_operand.vmem [shape: bf16[8,512], index: 3, kind: input, shape index: {}]   ;;  %s126_s4 = inlined_call_operand.vmem [shape: bf16[8,512], index: 4, kind: output, shape index: {}]  }
   0x1   :  { %v17_v0 = vld [vmem:[%s122_s0] sm:$0xff]  ;;  %v18_v8 = vld [vmem:[%s122_s0 + $0x8] sm:$0xff] }
   0x2   :  { %v23_v1 = vld [vmem:[%s123_s1] sm:$0xf]  ;;  %v19_v3 = vunpack.c.l.bf16 %v17_v0  ;;  %v20_v4 = vunpack.c.h.bf16 %v17_v0  ;;  %v21_v15 = vunpack.c.l.bf16 %v18_v8  ;;  %v22_v16 = vunpack.c.h.bf16 %v18_v8  ;;  %v52_v17 = vld [vmem:[%s125_s3 + $0x8] sm:$0xff] }
   0x3   :  { %v37_v2 = vld [vmem:[%s124_s2] sm:$0xf]  ;;  %v25_v5 = vperm.slane %v23_v1, 0  ;;  %v26_v6 = vperm.slane %v23_v1, 1  ;;  %v27_v18 = vperm.slane %v23_v1, 2  ;;  %v28_v19 = vperm.slane %v23_v1, 3 }
   0x4   :  { %v51_v7 = vld [vmem:[%s125_s3] sm:$0xff]  ;;  %v39_v9 = vperm.slane %v37_v2, 0  ;;  %v40_v10 = vperm.slane %v37_v2, 1  ;;  %v41_v20 = vperm.slane %v37_v2, 2  ;;  %v42_v21 = vperm.slane %v37_v2, 3 }
   0x5   :  { %v53_v11 = vunpack.c.l.bf16 %v51_v7  ;;  %v54_v12 = vunpack.c.h.bf16 %v51_v7  ;;  %v33_v13 = vmul.f32 %v25_v5, %v19_v3  ;;  %v34_v14 = vmul.f32 %v26_v6, %v20_v4 }
   0x6   :  { %v35_v24 = vmul.f32 %v27_v18, %v21_v15  ;;  %v36_v25 = vmul.f32 %v28_v19, %v22_v16  ;;  %v55_v26 = vunpack.c.l.bf16 %v52_v17  ;;  %v56_v27 = vunpack.c.h.bf16 %v52_v17 }
   0x7   :  { %v47_v22 = vadd.f32 %v39_v9, %v33_v13  ;;  %v48_v23 = vadd.f32 %v40_v10, %v34_v14 }
   0x8   :  { %v49_v30 = vadd.f32 %v41_v20, %v35_v24  ;;  %v50_v31 = vadd.f32 %v42_v21, %v36_v25 }
   0x9   :  { %v57_v28 = vadd.f32 %v53_v11, %v47_v22  ;;  %v58_v29 = vadd.f32 %v54_v12, %v48_v23 }
   0xa   :  { %v59_v34 = vadd.f32 %v55_v26, %v49_v30  ;;  %v60_v35 = vadd.f32 %v56_v27, %v50_v31 }
   0xb   :  { %v61_v32 = vmax.f32 %v57_v28, 0.0  ;;  %v62_v33 = vmax.f32 %v58_v29, 0.0 }
   0xc   :  { %v63_v37 = vmax.f32 %v59_v34, 0.0  ;;  %v64_v38 = vmax.f32 %v60_v35, 0.0 }
   0xd   :  { %v65_v36 = vpack.c.bf16 %v62_v33, %v61_v32 }
   0xe   :  { %v66_v39 = vpack.c.bf16 %v64_v38, %v63_v37 }
   0xf   :  { %67 = vst [vmem:[%s126_s4] sm:$0xff] %v65_v36 }
  0x10   :  { %68 = vst [vmem:[%s126_s4 + $0x8] sm:$0xff] %v66_v39 }

// kernel: resnet34_forward.141
= control target key start
LH: loop header
LB: loop body
LE: loop exit
PB: predicated region body
PF: predicated region fallthrough
CT: control target
= control target key end

     0   :  { %s1754_s12 = smov 0   ;;  %s1756_s13 = smov 0   ;;  %s2140_s0 = inlined_call_operand.vmem [shape: bf16[8,4608], index: 0, kind: input, shape index: {}]   ;;  %s2141_s1 = inlined_call_operand.vmem [shape: bf16[4608,512], index: 1, kind: input, shape index: {}]   ;;  %s2142_s2 = inlined_call_operand.vmem [shape: bf16[8,512], index: 2, kind: output, shape index: {0}]   ;;  %s2143_s3 = inlined_call_operand.vmem [shape: f32[1,8,512], index: 3, kind: output, shape index: {1}]  }
   0x1   :  { %s1758_s14 = smov 0   ;;  %s1760_s15 = smov 0  }
   0x2   :  { %s1762_s16 = smov 0   ;;  %s1764_s17 = smov 0  }
   0x3   :  { %s1766_s18 = smov 0  }
   0x4 LB: > { %s26_s19 = sadd.s32 1, %s1723_s16  ;;  %s29_s20 = sadd.s32 1, %s1727_s17  ;;  %s1731_s18 = sphi %s1766_s18, %s14_s18   ;;  %s1727_s17 = sphi %s1764_s17, %s2149_s17   ;;  %s1723_s16 = sphi %s1762_s16, %s2148_s16   ;;  %s1719_s15 = sphi %s1760_s15, %s2147_s15   ;;  %s1715_s14 = sphi %s1758_s14, %s2146_s14   ;;  %s1711_s13 = sphi %s1756_s13, %s2145_s13   ;;  %s1707_s12 = sphi %s1754_s12, %s2144_s12  }
   0x5   : > { %p27_p0 = scmp.ge.s32.totalorder %s26_s19, 9  ;;  %p77_p1 = scmp.ne.s32.totalorder %s1711_s13, %s1707_s12 }
   0x6   : > { %p78_p2 = scmp.eq.s32.totalorder %s1731_s18, 0  ;;  %s70_s24 = sadd.s32 1, %s1711_s13 }
   0x7   : > { %s2151_s19 = smov (%p27_p0, %s26_s19), 0  ;;  %s2153_s20 = smov (!%p27_p0, %s29_s20), %s1727_s17 }
   0x8   : > { %p79_p3 = por %p78_p2, %p77_p1  ;;  %p31_p4 = scmp.ge.s32.totalorder %s2153_s20, 2 }
   0x9   : > { %s65_s21 = ssub.s32 %s1723_s16, %s2151_s19  ;;  %p1281_p6 = scmp.ge.s32.totalorder %s1731_s18, 18 }
   0xa   : > { %s2155_s20 = smov (%p31_p4, %s2153_s20), 0 }
   0xb   : > { %s66_s22 = ssub.s32 %s1727_s17, %s2155_s20  ;;  %159 = sbr.rel (%p1281_p6) target bundleno = 87 (0x57), region = 16 }
   0xc   : > { %s67_s23 = sor.u32 %s66_s22, %s65_s21 }
   0xd   : > { %p68_p5 = scmp.eq.s32.totalorder %s67_s23, 0 }
   0xf   : > { %s1805_s25 = scalar_select %p68_p5, %s1711_s13, %s70_s24  }
  0x10   : > { %175 = sbr.rel (!%p79_p3) target bundleno = 87 (0x57), region = 24  ;;  %s177_s26 = sand.u32 (%p79_p3), 1, %s1711_s13  }
  0x11   : > { %s1284_s27 = sshll.u32 (%p79_p3), %s1727_s17, 1  ;;  %s1282_s28 = sshll.u32 (%p79_p3), %s177_s26, 9 }
  0x12   : > { %s1555_s29 = sshll.u32 (%p79_p3), %s1723_s16, 8  ;;  %s1819_s8 = scalar_lea.vmem (%p79_p3), [#allocation3], %s1282_s28 }
  0x13   : > { %s183_s30 = sadd.s32 (%p79_p3), %s1555_s29, %s1284_s27 }
  0x14   : > { %s1286_s4 = sshll.u32 (%p79_p3), %s183_s30, 2 }
  0x15   : > { %s1814_s7 = scalar_lea.vmem %s2141_s1, %s1286_s4 }
  0x16   : > { %v340_v0 = vld [vmem:[%s1814_s7] sm:$0xff]  ;;  %v342_v1 = vld [vmem:[%s1814_s7 + $0x10] sm:$0xff] }
  0x17   : > { %v344_v2 = vld [vmem:[%s1814_s7 + $0x20] sm:$0xff]  ;;  %341 = vst [vmem:[%s1819_s8] sm:$0xff] %v340_v0  ;;  %v346_v3 = vld [vmem:[%s1814_s7 + $0x30] sm:$0xff] }
  0x18   : > { %343 = vst [vmem:[%s1819_s8 + $0x8] sm:$0xff] %v342_v1  ;;  %v348_v4 = vld [vmem:[%s1814_s7 + $0x40] sm:$0xff]  ;;  %v350_v5 = vld [vmem:[%s1814_s7 + $0x50] sm:$0xff] }
  0x19   : > { %345 = vst [vmem:[%s1819_s8 + $0x10] sm:$0xff] %v344_v2  ;;  %v352_v6 = vld [vmem:[%s1814_s7 + $0x60] sm:$0xff]  ;;  %v354_v7 = vld [vmem:[%s1814_s7 + $0x70] sm:$0xff] }
  0x1a   : > { %347 = vst [vmem:[%s1819_s8 + $0x18] sm:$0xff] %v346_v3  ;;  %v356_v8 = vld [vmem:[%s1814_s7 + $0x80] sm:$0xff]  ;;  %v358_v9 = vld [vmem:[%s1814_s7 + $0x90] sm:$0xff] }
  0x1b   : > { %349 = vst [vmem:[%s1819_s8 + $0x20] sm:$0xff] %v348_v4  ;;  %v360_v10 = vld [vmem:[%s1814_s7 + $0xa0] sm:$0xff]  ;;  %v362_v11 = vld [vmem:[%s1814_s7 + $0xb0] sm:$0xff] }
  0x1c   : > { %351 = vst [vmem:[%s1819_s8 + $0x28] sm:$0xff] %v350_v5  ;;  %v364_v12 = vld [vmem:[%s1814_s7 + $0xc0] sm:$0xff]  ;;  %v366_v13 = vld [vmem:[%s1814_s7 + $0xd0] sm:$0xff] }
  0x1d   : > { %353 = vst [vmem:[%s1819_s8 + $0x30] sm:$0xff] %v352_v6  ;;  %v368_v14 = vld [vmem:[%s1814_s7 + $0xe0] sm:$0xff]  ;;  %v370_v15 = vld [vmem:[%s1814_s7 + $0xf0] sm:$0xff] }
  0x1e   : > { %355 = vst [vmem:[%s1819_s8 + $0x38] sm:$0xff] %v354_v7  ;;  %v372_v16 = vld [vmem:[%s1814_s7 + $0x100] sm:$0xff]  ;;  %v374_v17 = vld [vmem:[%s1814_s7 + $0x110] sm:$0xff] }
  0x1f   : > { %357 = vst [vmem:[%s1819_s8 + $0x40] sm:$0xff] %v356_v8  ;;  %v376_v18 = vld [vmem:[%s1814_s7 + $0x120] sm:$0xff]  ;;  %v378_v19 = vld [vmem:[%s1814_s7 + $0x130] sm:$0xff] }
  0x20   : > { %359 = vst [vmem:[%s1819_s8 + $0x48] sm:$0xff] %v358_v9  ;;  %v380_v20 = vld [vmem:[%s1814_s7 + $0x140] sm:$0xff]  ;;  %v382_v21 = vld [vmem:[%s1814_s7 + $0x150] sm:$0xff] }
  0x21   : > { %361 = vst [vmem:[%s1819_s8 + $0x50] sm:$0xff] %v360_v10  ;;  %v384_v22 = vld [vmem:[%s1814_s7 + $0x160] sm:$0xff]  ;;  %v386_v23 = vld [vmem:[%s1814_s7 + $0x170] sm:$0xff] }
  0x22   : > { %363 = vst [vmem:[%s1819_s8 + $0x58] sm:$0xff] %v362_v11  ;;  %v388_v24 = vld [vmem:[%s1814_s7 + $0x180] sm:$0xff]  ;;  %v390_v25 = vld [vmem:[%s1814_s7 + $0x190] sm:$0xff] }
  0x23   : > { %365 = vst [vmem:[%s1819_s8 + $0x60] sm:$0xff] %v364_v12  ;;  %v392_v26 = vld [vmem:[%s1814_s7 + $0x1a0] sm:$0xff]  ;;  %v394_v27 = vld [vmem:[%s1814_s7 + $0x1b0] sm:$0xff] }
  0x24   : > { %367 = vst [vmem:[%s1819_s8 + $0x68] sm:$0xff] %v366_v13  ;;  %v396_v28 = vld [vmem:[%s1814_s7 + $0x1c0] sm:$0xff]  ;;  %v398_v29 = vld [vmem:[%s1814_s7 + $0x1d0] sm:$0xff] }
  0x25   : > { %369 = vst [vmem:[%s1819_s8 + $0x70] sm:$0xff] %v368_v14  ;;  %v400_v30 = vld [vmem:[%s1814_s7 + $0x1e0] sm:$0xff]  ;;  %v402_v31 = vld [vmem:[%s1814_s7 + $0x1f0] sm:$0xff] }
  0x26   : > { %371 = vst [vmem:[%s1819_s8 + $0x78] sm:$0xff] %v370_v15  ;;  %v404_v32 = vld [vmem:[%s1814_s7 + $0x200] sm:$0xff]  ;;  %v406_v33 = vld [vmem:[%s1814_s7 + $0x210] sm:$0xff] }
  0x27   : > { %373 = vst [vmem:[%s1819_s8 + $0x80] sm:$0xff] %v372_v16  ;;  %v408_v34 = vld [vmem:[%s1814_s7 + $0x220] sm:$0xff]  ;;  %v410_v35 = vld [vmem:[%s1814_s7 + $0x230] sm:$0xff] }
  0x28   : > { %375 = vst [vmem:[%s1819_s8 + $0x88] sm:$0xff] %v374_v17  ;;  %v412_v36 = vld [vmem:[%s1814_s7 + $0x240] sm:$0xff]  ;;  %v414_v37 = vld [vmem:[%s1814_s7 + $0x250] sm:$0xff] }
  0x29   : > { %377 = vst [vmem:[%s1819_s8 + $0x90] sm:$0xff] %v376_v18  ;;  %v416_v38 = vld [vmem:[%s1814_s7 + $0x260] sm:$0xff]  ;;  %v418_v39 = vld [vmem:[%s1814_s7 + $0x270] sm:$0xff] }
  0x2a   : > { %379 = vst [vmem:[%s1819_s8 + $0x98] sm:$0xff] %v378_v19  ;;  %v420_v40 = vld [vmem:[%s1814_s7 + $0x280] sm:$0xff]  ;;  %v422_v41 = vld [vmem:[%s1814_s7 + $0x290] sm:$0xff] }
  0x2b   : > { %381 = vst [vmem:[%s1819_s8 + $0xa0] sm:$0xff] %v380_v20  ;;  %v424_v42 = vld [vmem:[%s1814_s7 + $0x2a0] sm:$0xff]  ;;  %v426_v43 = vld [vmem:[%s1814_s7 + $0x2b0] sm:$0xff] }
  0x2c   : > { %383 = vst [vmem:[%s1819_s8 + $0xa8] sm:$0xff] %v382_v21  ;;  %v428_v44 = vld [vmem:[%s1814_s7 + $0x2c0] sm:$0xff]  ;;  %v430_v45 = vld [vmem:[%s1814_s7 + $0x2d0] sm:$0xff] }
  0x2d   : > { %385 = vst [vmem:[%s1819_s8 + $0xb0] sm:$0xff] %v384_v22  ;;  %v432_v46 = vld [vmem:[%s1814_s7 + $0x2e0] sm:$0xff]  ;;  %v434_v47 = vld [vmem:[%s1814_s7 + $0x2f0] sm:$0xff] }
  0x2e   : > { %387 = vst [vmem:[%s1819_s8 + $0xb8] sm:$0xff] %v386_v23  ;;  %v436_v48 = vld [vmem:[%s1814_s7 + $0x300] sm:$0xff]  ;;  %v438_v49 = vld [vmem:[%s1814_s7 + $0x310] sm:$0xff] }
  0x2f   : > { %389 = vst [vmem:[%s1819_s8 + $0xc0] sm:$0xff] %v388_v24  ;;  %v440_v50 = vld [vmem:[%s1814_s7 + $0x320] sm:$0xff]  ;;  %v442_v51 = vld [vmem:[%s1814_s7 + $0x330] sm:$0xff] }
  0x30   : > { %391 = vst [vmem:[%s1819_s8 + $0xc8] sm:$0xff] %v390_v25  ;;  %v444_v52 = vld [vmem:[%s1814_s7 + $0x340] sm:$0xff]  ;;  %v446_v53 = vld [vmem:[%s1814_s7 + $0x350] sm:$0xff] }
  0x31   : > { %393 = vst [vmem:[%s1819_s8 + $0xd0] sm:$0xff] %v392_v26  ;;  %v448_v54 = vld [vmem:[%s1814_s7 + $0x360] sm:$0xff]  ;;  %v450_v55 = vld [vmem:[%s1814_s7 + $0x370] sm:$0xff] }
  0x32   : > { %395 = vst [vmem:[%s1819_s8 + $0xd8] sm:$0xff] %v394_v27  ;;  %v452_v56 = vld [vmem:[%s1814_s7 + $0x380] sm:$0xff]  ;;  %v454_v57 = vld [vmem:[%s1814_s7 + $0x390] sm:$0xff] }
  0x33   : > { %397 = vst [vmem:[%s1819_s8 + $0xe0] sm:$0xff] %v396_v28  ;;  %v456_v58 = vld [vmem:[%s1814_s7 + $0x3a0] sm:$0xff]  ;;  %v458_v59 = vld [vmem:[%s1814_s7 + $0x3b0] sm:$0xff] }
  0x34   : > { %399 = vst [vmem:[%s1819_s8 + $0xe8] sm:$0xff] %v398_v29  ;;  %v460_v60 = vld [vmem:[%s1814_s7 + $0x3c0] sm:$0xff]  ;;  %v462_v61 = vld [vmem:[%s1814_s7 + $0x3d0] sm:$0xff] }
  0x35   : > { %401 = vst [vmem:[%s1819_s8 + $0xf0] sm:$0xff] %v400_v30  ;;  %v464_v62 = vld [vmem:[%s1814_s7 + $0x3e0] sm:$0xff]  ;;  %v466_v63 = vld [vmem:[%s1814_s7 + $0x3f0] sm:$0xff] }
  0x36   : > { %403 = vst [vmem:[%s1819_s8 + $0xf8] sm:$0xff] %v402_v31 }
  0x37   : > { %405 = vst [vmem:[%s1819_s8 + $0x100] sm:$0xff] %v404_v32 }
  0x38   : > { %407 = vst [vmem:[%s1819_s8 + $0x108] sm:$0xff] %v406_v33 }
  0x39   : > { %409 = vst [vmem:[%s1819_s8 + $0x110] sm:$0xff] %v408_v34 }
  0x3a   : > { %411 = vst [vmem:[%s1819_s8 + $0x118] sm:$0xff] %v410_v35 }
  0x3b   : > { %413 = vst [vmem:[%s1819_s8 + $0x120] sm:$0xff] %v412_v36 }
  0x3c   : > { %415 = vst [vmem:[%s1819_s8 + $0x128] sm:$0xff] %v414_v37 }
  0x3d   : > { %417 = vst [vmem:[%s1819_s8 + $0x130] sm:$0xff] %v416_v38 }
  0x3e   : > { %419 = vst [vmem:[%s1819_s8 + $0x138] sm:$0xff] %v418_v39 }
  0x3f   : > { %421 = vst [vmem:[%s1819_s8 + $0x140] sm:$0xff] %v420_v40 }
  0x40   : > { %423 = vst [vmem:[%s1819_s8 + $0x148] sm:$0xff] %v422_v41 }
  0x41   : > { %425 = vst [vmem:[%s1819_s8 + $0x150] sm:$0xff] %v424_v42 }
  0x42   : > { %427 = vst [vmem:[%s1819_s8 + $0x158] sm:$0xff] %v426_v43 }
  0x43   : > { %429 = vst [vmem:[%s1819_s8 + $0x160] sm:$0xff] %v428_v44 }
  0x44   : > { %431 = vst [vmem:[%s1819_s8 + $0x168] sm:$0xff] %v430_v45 }
  0x45   : > { %433 = vst [vmem:[%s1819_s8 + $0x170] sm:$0xff] %v432_v46 }
  0x46   : > { %435 = vst [vmem:[%s1819_s8 + $0x178] sm:$0xff] %v434_v47 }
  0x47   : > { %437 = vst [vmem:[%s1819_s8 + $0x180] sm:$0xff] %v436_v48 }
  0x48   : > { %439 = vst [vmem:[%s1819_s8 + $0x188] sm:$0xff] %v438_v49 }
  0x49   : > { %441 = vst [vmem:[%s1819_s8 + $0x190] sm:$0xff] %v440_v50 }
  0x4a   : > { %443 = vst [vmem:[%s1819_s8 + $0x198] sm:$0xff] %v442_v51 }
  0x4b   : > { %445 = vst [vmem:[%s1819_s8 + $0x1a0] sm:$0xff] %v444_v52 }
  0x4c   : > { %447 = vst [vmem:[%s1819_s8 + $0x1a8] sm:$0xff] %v446_v53 }
  0x4d   : > { %449 = vst [vmem:[%s1819_s8 + $0x1b0] sm:$0xff] %v448_v54 }
  0x4e   : > { %451 = vst [vmem:[%s1819_s8 + $0x1b8] sm:$0xff] %v450_v55 }
  0x4f   : > { %453 = vst [vmem:[%s1819_s8 + $0x1c0] sm:$0xff] %v452_v56 }
  0x50   : > { %455 = vst [vmem:[%s1819_s8 + $0x1c8] sm:$0xff] %v454_v57 }
  0x51   : > { %457 = vst [vmem:[%s1819_s8 + $0x1d0] sm:$0xff] %v456_v58 }
  0x52   : > { %459 = vst [vmem:[%s1819_s8 + $0x1d8] sm:$0xff] %v458_v59 }
  0x53   : > { %461 = vst [vmem:[%s1819_s8 + $0x1e0] sm:$0xff] %v460_v60 }
  0x54   : > { %463 = vst [vmem:[%s1819_s8 + $0x1e8] sm:$0xff] %v462_v61 }
  0x55   : > { %465 = vst [vmem:[%s1819_s8 + $0x1f0] sm:$0xff] %v464_v62 }
  0x56   : > { %467 = vst [vmem:[%s1819_s8 + $0x1f8] sm:$0xff] %v466_v63 }
  0x57 PF: > { %p1287_p7 = scmp.ge.s32.totalorder %s1731_s18, 1  ;;  %p472_p8 = scmp.lt.s32.totalorder %s1731_s18, 19 }
  0x59   : > { %p473_p9 = pnand %p1287_p7, %p472_p8 }
  0x5a   : > { %s479_s9 = sand.u32 (!%p473_p9), 1, %s1707_s12   ;;  %s1289_s10 = sshll.u32 (!%p473_p9), %s1715_s14, 2 }
  0x5b   : > { %476 = sbr.rel (%p473_p9) target bundleno = 339 (0x153), region = 62  ;;  %s1288_s11 = sshll.u32 (!%p473_p9), %s479_s9, 9 }
  0x5c   : > { %p527_p10 = scmp.lt.s32.totalorder (!%p473_p9), %s1289_s10, 35  ;;  %s1291_s21 = sshll.u32 (!%p473_p9), %s1719_s15, 1 }
  0x5d   : > { %p539_p11 = scmp.lt.s32.totalorder (!%p473_p9), %s1291_s21, 3  ;;  %s1966_s6 = scalar_lea.vmem (!%p473_p9), [#allocation3], %s1288_s11 }
  0x5e   : > { %p1295_p12 = scmp.ne.s32.totalorder (!%p473_p9), %s1715_s14, 0 }
  0x60   : > { %s2157_s10 = smov (!%p527_p10, %s1289_s10), 35  ;;  %s2159_s21 = smov (!%p539_p11, %s1291_s21), 3 }
  0x61   : > { %s1290_s22 = sshll.u32 %s2157_s10, 2  ;;  %s1292_s27 = sshll.u32 %s2159_s21, 2 }
  0x62   : > { %s1954_s26 = scalar_lea.vmem %s2140_s0, %s1290_s22  ;;  %s1294_s28 = sshll.u32 %s2159_s21, 3 }
  0x63   : > { %s1959_s4 = scalar_lea.vmem %s2142_s2, %s1292_s27  ;;  %s1964_s15 = scalar_lea.vmem %s2143_s3, %s1294_s28 }
  0x64   : > { %559 = sbr.rel (%p1295_p12) target bundleno = 108 (0x6c), region = 70 }
  0x69   : > { %v1733_v0 = vmov 0.0  }
  0x6a   : > { %560 = vst [vmem:[#allocation2] sm:$0xff] %v1733_v0 }
  0x6b   : > { %561 = vst [vmem:[#allocation2 + $0x8] sm:$0xff] %v1733_v0 }
  0x6c PF: > { %v1354_v1 = vld [vmem:[%s1966_s6 + $0x70] sm:$0xf]  ;;  %v1571_v2 = vld [vmem:[%s1966_s6 + $0x74] sm:$0xf0]  ;;  %v1346_v12 = vld [vmem:[%s1966_s6 + $0x60] sm:$0xf] }
  0x6d   : > { %v1418_v3 = vld [vmem:[%s1966_s6 + $0xf0] sm:$0xf]  ;;  %v1355_v4 = vor.u32 %v1571_v2, %v1354_v1  ;;  %v1587_v5 = vld [vmem:[%s1966_s6 + $0xf4] sm:$0xf0]  ;;  %v1569_v14 = vld [vmem:[%s1966_s6 + $0x64] sm:$0xf0] }
  0x6e   : > { %v1482_v6 = vld [vmem:[%s1966_s6 + $0x170] sm:$0xf]  ;;  %v1603_v7 = vld [vmem:[%s1966_s6 + $0x174] sm:$0xf0]  ;;  %v1419_v8 = vor.u32 %v1587_v5, %v1418_v3  ;;  %v1410_v15 = vld [vmem:[%s1966_s6 + $0xe0] sm:$0xf]  ;;  %v1347_v17 = vor.u32 %v1569_v14, %v1346_v12 }
  0x6f   : > { %v1483_v9 = vor.u32 %v1603_v7, %v1482_v6  ;;  %v1546_v10 = vld [vmem:[%s1966_s6 + $0x1f0] sm:$0xf]  ;;  %v1619_v11 = vld [vmem:[%s1966_s6 + $0x1f4] sm:$0xf0]  ;;  %964 = vmatpush.bf16.msra.mxu0 %v1355_v4  ;;  %v1585_v16 = vld [vmem:[%s1966_s6 + $0xe4] sm:$0xf0] }
  0x70   : > { %v1547_v13 = vor.u32 %v1619_v11, %v1546_v10  ;;  %977 = vmatpush.bf16.msra.mxu1 %v1419_v8  ;;  %v1411_v18 = vor.u32 %v1585_v16, %v1410_v15  ;;  %v1474_v19 = vld [vmem:[%s1966_s6 + $0x160] sm:$0xf]  ;;  %v1601_v20 = vld [vmem:[%s1966_s6 + $0x164] sm:$0xf0]  ;;  %v1338_v24 = vld [vmem:[%s1966_s6 + $0x50] sm:$0xf] }
  0x71   : > { %990 = vmatpush.bf16.msra.mxu2 %v1483_v9  ;;  %v1538_v21 = vld [vmem:[%s1966_s6 + $0x1e0] sm:$0xf]  ;;  %v1475_v22 = vor.u32 %v1601_v20, %v1474_v19  ;;  %v1617_v23 = vld [vmem:[%s1966_s6 + $0x1e4] sm:$0xf0]  ;;  %v1567_v25 = vld [vmem:[%s1966_s6 + $0x54] sm:$0xf0] }
  0x72   : > { %1003 = vmatpush.bf16.msra.mxu3 %v1547_v13  ;;  %v1539_v26 = vor.u32 %v1617_v23, %v1538_v21  ;;  %v1402_v27 = vld [vmem:[%s1966_s6 + $0xd0] sm:$0xf]  ;;  %v1583_v28 = vld [vmem:[%s1966_s6 + $0xd4] sm:$0xf0]  ;;  %v1339_v30 = vor.u32 %v1567_v25, %v1338_v24  ;;  %v1330_v36 = vld [vmem:[%s1966_s6 + $0x40] sm:$0xf] }
  0x73   : > { %v1466_v29 = vld [vmem:[%s1966_s6 + $0x150] sm:$0xf]  ;;  %965 = vmatpush.bf16.msra.mxu0 %v1347_v17  ;;  %v1599_v31 = vld [vmem:[%s1966_s6 + $0x154] sm:$0xf0]  ;;  %v1403_v34 = vor.u32 %v1583_v28, %v1402_v27  ;;  %v1565_v37 = vld [vmem:[%s1966_s6 + $0x44] sm:$0xf0] }
  0x74   : > { %v1530_v32 = vld [vmem:[%s1966_s6 + $0x1d0] sm:$0xf]  ;;  %v1615_v33 = vld [vmem:[%s1966_s6 + $0x1d4] sm:$0xf0]  ;;  %978 = vmatpush.bf16.msra.mxu1 %v1411_v18  ;;  %v1467_v35 = vor.u32 %v1599_v31, %v1466_v29  ;;  %v1394_v38 = vld [vmem:[%s1966_s6 + $0xc0] sm:$0xf]  ;;  %v1331_v45 = vor.u32 %v1565_v37, %v1330_v36 }
  0x75   : > { %991 = vmatpush.bf16.msra.mxu2 %v1475_v22  ;;  %v1531_v39 = vor.u32 %v1615_v33, %v1530_v32  ;;  %v1581_v40 = vld [vmem:[%s1966_s6 + $0xc4] sm:$0xf0]  ;;  %v1458_v41 = vld [vmem:[%s1966_s6 + $0x140] sm:$0xf]  ;;  %v1322_v48 = vld [vmem:[%s1966_s6 + $0x30] sm:$0xf] }
  0x76   : > { %1004 = vmatpush.bf16.msra.mxu3 %v1539_v26  ;;  %v1597_v42 = vld [vmem:[%s1966_s6 + $0x144] sm:$0xf0]  ;;  %v1522_v43 = vld [vmem:[%s1966_s6 + $0x1c0] sm:$0xf]  ;;  %v1395_v46 = vor.u32 %v1581_v40, %v1394_v38  ;;  %v1563_v49 = vld [vmem:[%s1966_s6 + $0x34] sm:$0xf0] }
  0x77   : > { %v1613_v44 = vld [vmem:[%s1966_s6 + $0x1c4] sm:$0xf0]  ;;  %966 = vmatpush.bf16.msra.mxu0 %v1339_v30  ;;  %v1459_v47 = vor.u32 %v1597_v42, %v1458_v41  ;;  %v1386_v50 = vld [vmem:[%s1966_s6 + $0xb0] sm:$0xf]  ;;  %v1579_v52 = vld [vmem:[%s1966_s6 + $0xb4] sm:$0xf0]  ;;  %v1323_v57 = vor.u32 %v1563_v49, %v1322_v48 }
  0x78   : > { %979 = vmatpush.bf16.msra.mxu1 %v1403_v34  ;;  %v1523_v51 = vor.u32 %v1613_v44, %v1522_v43  ;;  %v1450_v53 = vld [vmem:[%s1966_s6 + $0x130] sm:$0xf]  ;;  %v1595_v54 = vld [vmem:[%s1966_s6 + $0x134] sm:$0xf0]  ;;  %v1387_v58 = vor.u32 %v1579_v52, %v1386_v50  ;;  %v1314_v60 = vld [vmem:[%s1966_s6 + $0x20] sm:$0xf] }
  0x79   : > { %992 = vmatpush.bf16.msra.mxu2 %v1467_v35  ;;  %v1514_v55 = vld [vmem:[%s1966_s6 + $0x1b0] sm:$0xf]  ;;  %v1611_v56 = vld [vmem:[%s1966_s6 + $0x1b4] sm:$0xf0]  ;;  %v1451_v59 = vor.u32 %v1595_v54, %v1450_v53  ;;  %v1561_v61 = vld [vmem:[%s1966_s6 + $0x24] sm:$0xf0] }
  0x7a   : > { %1005 = vmatpush.bf16.msra.mxu3 %v1531_v39  ;;  %v1378_v62 = vld [vmem:[%s1966_s6 + $0xa0] sm:$0xf]  ;;  %v1515_v63 = vor.u32 %v1611_v56, %v1514_v55  ;;  %v1577_v0 = vld [vmem:[%s1966_s6 + $0xa4] sm:$0xf0]  ;;  %v1315_v5 = vor.u32 %v1561_v61, %v1314_v60  ;;  %v1306_v8 = vld [vmem:[%s1966_s6 + $0x10] sm:$0xf] }
  0x7b   : > { %967 = vmatpush.bf16.msra.mxu0 %v1331_v45  ;;  %v1442_v1 = vld [vmem:[%s1966_s6 + $0x120] sm:$0xf]  ;;  %v1593_v2 = vld [vmem:[%s1966_s6 + $0x124] sm:$0xf0]  ;;  %v1379_v6 = vor.u32 %v1577_v0, %v1378_v62  ;;  %v1559_v9 = vld [vmem:[%s1966_s6 + $0x14] sm:$0xf0] }
  0x7c   : > { %980 = vmatpush.bf16.msra.mxu1 %v1395_v46  ;;  %v1506_v3 = vld [vmem:[%s1966_s6 + $0x1a0] sm:$0xf]  ;;  %v1609_v4 = vld [vmem:[%s1966_s6 + $0x1a4] sm:$0xf0]  ;;  %v1443_v7 = vor.u32 %v1593_v2, %v1442_v1  ;;  %v1370_v10 = vld [vmem:[%s1966_s6 + $0x90] sm:$0xf]  ;;  %v1307_v17 = vor.u32 %v1559_v9, %v1306_v8 }
  0x7d   : > { %993 = vmatpush.bf16.msra.mxu2 %v1459_v47  ;;  %v1507_v11 = vor.u32 %v1609_v4, %v1506_v3  ;;  %v1575_v12 = vld [vmem:[%s1966_s6 + $0x94] sm:$0xf0]  ;;  %v1434_v13 = vld [vmem:[%s1966_s6 + $0x110] sm:$0xf]  ;;  %v1298_v18 = vld [vmem:[%s1966_s6] sm:$0xf] }
  0x7e   : > { %1006 = vmatpush.bf16.msra.mxu3 %v1523_v51  ;;  %v1591_v14 = vld [vmem:[%s1966_s6 + $0x114] sm:$0xf0]  ;;  %v1498_v15 = vld [vmem:[%s1966_s6 + $0x190] sm:$0xf]  ;;  %v1557_v19 = vld [vmem:[%s1966_s6 + $0x4] sm:$0xf0]  ;;  %v1371_v21 = vor.u32 %v1575_v12, %v1370_v10 }
  0x7f   : > { %968 = vmatpush.bf16.msra.mxu0 %v1323_v57  ;;  %v1607_v16 = vld [vmem:[%s1966_s6 + $0x194] sm:$0xf0]  ;;  %v1362_v20 = vld [vmem:[%s1966_s6 + $0x80] sm:$0xf]  ;;  %v1435_v22 = vor.u32 %v1591_v14, %v1434_v13  ;;  %v1573_v23 = vld [vmem:[%s1966_s6 + $0x84] sm:$0xf0]  ;;  %v1299_v33 = vor.u32 %v1557_v19, %v1298_v18 }
  0x80   : > { %981 = vmatpush.bf16.msra.mxu1 %v1387_v58  ;;  %v1426_v24 = vld [vmem:[%s1966_s6 + $0x100] sm:$0xf]  ;;  %v1589_v25 = vld [vmem:[%s1966_s6 + $0x104] sm:$0xf0]  ;;  %v1499_v26 = vor.u32 %v1607_v16, %v1498_v15  ;;  %v1570_v29 = vld [vmem:[%s1966_s6 + $0x74] sm:$0xf]  ;;  %v1363_v38 = vor.u32 %v1573_v23, %v1362_v20 }
  0x81   : > { %994 = vmatpush.bf16.msra.mxu2 %v1451_v59  ;;  %v1490_v27 = vld [vmem:[%s1966_s6 + $0x180] sm:$0xf]  ;;  %v1605_v28 = vld [vmem:[%s1966_s6 + $0x184] sm:$0xf0]  ;;  %v1356_v30 = vld [vmem:[%s1966_s6 + $0x78] sm:$0xf0]  ;;  %v1427_v39 = vor.u32 %v1589_v25, %v1426_v24 }
  0x82   : > { %1007 = vmatpush.bf16.msra.mxu3 %v1515_v63  ;;  %v1586_v31 = vld [vmem:[%s1966_s6 + $0xf4] sm:$0xf]  ;;  %v565_v32 = vld [vmem:[%s1954_s26 + $0x8] sm:$0xff]  ;;  %v1491_v43 = vor.u32 %v1605_v28, %v1490_v27  ;;  %v1359_v44 = vor.u32 %v1570_v29, %v1356_v30  ;;  %v1568_v48 = vld [vmem:[%s1966_s6 + $0x64] sm:$0xf]  ;;  %p1552_p13 = scmp.ne.s32.totalorder %s1715_s14, 8 }
  0x83   : > { %969 = vmatpush.bf16.msra.mxu0 %v1315_v5  ;;  %v1420_v34 = vld [vmem:[%s1966_s6 + $0xf8] sm:$0xf0]  ;;  %v1602_v35 = vld [vmem:[%s1966_s6 + $0x174] sm:$0xf]  ;;  %v634_v37 = vunpack.c.l.b16 %v565_v32  ;;  %v635_v42 = vunpack.c.h.b16 %v565_v32  ;;  %v1348_v49 = vld [vmem:[%s1966_s6 + $0x68] sm:$0xf0] }
  0x84   : > { %982 = vmatpush.bf16.msra.mxu1 %v1379_v6  ;;  %v1484_v36 = vld [vmem:[%s1966_s6 + $0x178] sm:$0xf0]  ;;  %v1618_v40 = vld [vmem:[%s1966_s6 + $0x1f4] sm:$0xf]  ;;  %v1423_v46 = vor.u32 %v1586_v31, %v1420_v34  ;;  %v1584_v50 = vld [vmem:[%s1966_s6 + $0xe4] sm:$0xf]  ;;  %v1351_v62 = vor.u32 %v1568_v48, %v1348_v49 }
  0x85   : > { %995 = vmatpush.bf16.msra.mxu2 %v1443_v7  ;;  %v1548_v41 = vld [vmem:[%s1966_s6 + $0x1f8] sm:$0xf0]  ;;  %v564_v45 = vld [vmem:[%s1954_s26] sm:$0xff]  ;;  %v1487_v47 = vor.u32 %v1602_v35, %v1484_v36  ;;  %v1412_v54 = vld [vmem:[%s1966_s6 + $0xe8] sm:$0xf0]  ;;  %v2049_v57 = vpack.c.b16 %v634_v37, %v634_v37  ;;  %v2053_v60 = vpack.c.b16 %v635_v42, %v635_v42 }
  0x86   : > { %1008 = vmatpush.bf16.msra.mxu3 %v1507_v11  ;;  %v632_v51 = vunpack.c.l.b16 %v564_v45  ;;  %v633_v52 = vunpack.c.h.b16 %v564_v45  ;;  %v1551_v53 = vor.u32 %v1618_v40, %v1548_v41  ;;  %v1600_v55 = vld [vmem:[%s1966_s6 + $0x164] sm:$0xf]  ;;  %v1476_v56 = vld [vmem:[%s1966_s6 + $0x168] sm:$0xf0]  ;;  %v1415_v0 = vor.u32 %v1584_v50, %v1412_v54  ;;  %v1566_v2 = vld [vmem:[%s1966_s6 + $0x54] sm:$0xf] }
  0x87   : > { %970 = vmatpush.bf16.msra.mxu0 %v1307_v17  ;;  %v1616_v58 = vld [vmem:[%s1966_s6 + $0x1e4] sm:$0xf]  ;;  %v1540_v59 = vld [vmem:[%s1966_s6 + $0x1e8] sm:$0xf0]  ;;  %v1479_v1 = vor.u32 %v1600_v55, %v1476_v56  ;;  %v1340_v3 = vld [vmem:[%s1966_s6 + $0x58] sm:$0xf0] }
  0x88   : > { %983 = vmatpush.bf16.msra.mxu1 %v1371_v21  ;;  %v2055_v61 = vpack.c.b16 %v632_v51, %v632_v51  ;;  %v2057_v63 = vpack.c.b16 %v633_v52, %v633_v52  ;;  %v1582_v4 = vld [vmem:[%s1966_s6 + $0xd4] sm:$0xf]  ;;  %v1543_v5 = vor.u32 %v1616_v58, %v1540_v59  ;;  %v1404_v6 = vld [vmem:[%s1966_s6 + $0xd8] sm:$0xf0]  ;;  %v1343_v11 = vor.u32 %v1566_v2, %v1340_v3  ;;  %v1564_v14 = vld [vmem:[%s1966_s6 + $0x44] sm:$0xf] }
  0x89   : > { %996 = vmatpush.bf16.msra.mxu2 %v1435_v22  ;;  %v1598_v7 = vld [vmem:[%s1966_s6 + $0x154] sm:$0xf]  ;;  %v1468_v8 = vld [vmem:[%s1966_s6 + $0x158] sm:$0xf0]  ;;  %v1407_v12 = vor.u32 %v1582_v4, %v1404_v6  ;;  %v1332_v15 = vld [vmem:[%s1966_s6 + $0x48] sm:$0xf0] }
  0x8a   : > { %1009 = vmatpush.bf16.msra.mxu3 %v1499_v26  ;;  %v1614_v9 = vld [vmem:[%s1966_s6 + $0x1d4] sm:$0xf]  ;;  %v1532_v10 = vld [vmem:[%s1966_s6 + $0x1d8] sm:$0xf0]  ;;  %v1471_v13 = vor.u32 %v1598_v7, %v1468_v8  ;;  %v1580_v16 = vld [vmem:[%s1966_s6 + $0xc4] sm:$0xf]  ;;  %v1335_v23 = vor.u32 %v1564_v14, %v1332_v15 }
  0x8b   : > { %971 = vmatpush.bf16.msra.mxu0 %v1299_v33  ;;  %v1535_v17 = vor.u32 %v1614_v9, %v1532_v10  ;;  %v1396_v18 = vld [vmem:[%s1966_s6 + $0xc8] sm:$0xf0]  ;;  %v1596_v19 = vld [vmem:[%s1966_s6 + $0x144] sm:$0xf]  ;;  %v1562_v26 = vld [vmem:[%s1966_s6 + $0x34] sm:$0xf] }
  0x8c   : > { %984 = vmatpush.bf16.msra.mxu1 %v1363_v38  ;;  %v1460_v20 = vld [vmem:[%s1966_s6 + $0x148] sm:$0xf0]  ;;  %v1612_v21 = vld [vmem:[%s1966_s6 + $0x1c4] sm:$0xf]  ;;  %v1399_v24 = vor.u32 %v1580_v16, %v1396_v18  ;;  %v1324_v27 = vld [vmem:[%s1966_s6 + $0x38] sm:$0xf0] }
  0x8d   : > { %997 = vmatpush.bf16.msra.mxu2 %v1427_v39  ;;  %v1524_v22 = vld [vmem:[%s1966_s6 + $0x1c8] sm:$0xf0]  ;;  %v1463_v25 = vor.u32 %v1596_v19, %v1460_v20  ;;  %v1578_v28 = vld [vmem:[%s1966_s6 + $0xb4] sm:$0xf]  ;;  %v1388_v30 = vld [vmem:[%s1966_s6 + $0xb8] sm:$0xf0]  ;;  %v1327_v35 = vor.u32 %v1562_v26, %v1324_v27 }
  0x8e   : > { %1010 = vmatpush.bf16.msra.mxu3 %v1491_v43  ;;  %972 = vmatmul.bf16.vlgmr.msra.gmra.mxu0 %v2055_v61  ;;  %v1527_v29 = vor.u32 %v1612_v21, %v1524_v22  ;;  %v1594_v31 = vld [vmem:[%s1966_s6 + $0x134] sm:$0xf]  ;;  %v1452_v32 = vld [vmem:[%s1966_s6 + $0x138] sm:$0xf0]  ;;  %v1391_v36 = vor.u32 %v1578_v28, %v1388_v30  ;;  %v1560_v38 = vld [vmem:[%s1966_s6 + $0x24] sm:$0xf] }
  0x8f   : > { %1016 = vmatpush.bf16.msrb.mxu0 %v1359_v44  ;;  %985 = vmatmul.bf16.vlgmr.msra.gmra.mxu1 %v2057_v63  ;;  %v1610_v33 = vld [vmem:[%s1966_s6 + $0x1b4] sm:$0xf]  ;;  %v1516_v34 = vld [vmem:[%s1966_s6 + $0x1b8] sm:$0xf0]  ;;  %v1455_v37 = vor.u32 %v1594_v31, %v1452_v32  ;;  %v1316_v39 = vld [vmem:[%s1966_s6 + $0x28] sm:$0xf0] }
  0x90   : > { %1029 = vmatpush.bf16.msrb.mxu1 %v1423_v46  ;;  %998 = vmatmul.bf16.vlgmr.msra.gmra.mxu2 %v2049_v57  ;;  %v1576_v40 = vld [vmem:[%s1966_s6 + $0xa4] sm:$0xf]  ;;  %v1519_v41 = vor.u32 %v1610_v33, %v1516_v34  ;;  %v1380_v42 = vld [vmem:[%s1966_s6 + $0xa8] sm:$0xf0]  ;;  %v1558_v50 = vld [vmem:[%s1966_s6 + $0x14] sm:$0xf] }
  0x91   : > { %1042 = vmatpush.bf16.msrb.mxu2 %v1487_v47  ;;  %1011 = vmatmul.bf16.vlgmr.msra.gmra.mxu3 %v2053_v60  ;;  %v1592_v43 = vld [vmem:[%s1966_s6 + $0x124] sm:$0xf]  ;;  %v1444_v44 = vld [vmem:[%s1966_s6 + $0x128] sm:$0xf0]  ;;  %v1319_v47 = vor.u32 %v1560_v38, %v1316_v39  ;;  %v1383_v48 = vor.u32 %v1576_v40, %v1380_v42  ;;  %v1308_v51 = vld [vmem:[%s1966_s6 + $0x18] sm:$0xf0] }
  0x92   : > { %1055 = vmatpush.bf16.msrb.mxu3 %v1551_v53  ;;  %v1608_v45 = vld [vmem:[%s1966_s6 + $0x1a4] sm:$0xf]  ;;  %v1508_v46 = vld [vmem:[%s1966_s6 + $0x1a8] sm:$0xf0]  ;;  %v1447_v49 = vor.u32 %v1592_v43, %v1444_v44  ;;  %v1574_v52 = vld [vmem:[%s1966_s6 + $0x94] sm:$0xf] }
  0x93   : > { %1017 = vmatpush.bf16.msrb.mxu0 %v1351_v62  ;;  %v1511_v53 = vor.u32 %v1608_v45, %v1508_v46  ;;  %v1372_v54 = vld [vmem:[%s1966_s6 + $0x98] sm:$0xf0]  ;;  %v1590_v55 = vld [vmem:[%s1966_s6 + $0x114] sm:$0xf]  ;;  %v1311_v62 = vor.u32 %v1558_v50, %v1308_v51  ;;  %v1556_v2 = vld [vmem:[%s1966_s6 + $0x4] sm:$0xf] }
  0x94   : > { %1030 = vmatpush.bf16.msrb.mxu1 %v1415_v0  ;;  %v1436_v56 = vld [vmem:[%s1966_s6 + $0x118] sm:$0xf0]  ;;  %v1606_v58 = vld [vmem:[%s1966_s6 + $0x194] sm:$0xf]  ;;  %v1375_v0 = vor.u32 %v1574_v52, %v1372_v54  ;;  %v1300_v3 = vld [vmem:[%s1966_s6 + $0x8] sm:$0xf0] }
  0x95   : > { %1043 = vmatpush.bf16.msrb.mxu2 %v1479_v1  ;;  %v1500_v59 = vld [vmem:[%s1966_s6 + $0x198] sm:$0xf0]  ;;  %v1439_v1 = vor.u32 %v1590_v55, %v1436_v56  ;;  %v1572_v4 = vld [vmem:[%s1966_s6 + $0x84] sm:$0xf]  ;;  %v1364_v6 = vld [vmem:[%s1966_s6 + $0x88] sm:$0xf0] }
  0x96   : > { %1056 = vmatpush.bf16.msrb.mxu3 %v1543_v5  ;;  %v1503_v5 = vor.u32 %v1606_v58, %v1500_v59  ;;  %v1588_v7 = vld [vmem:[%s1966_s6 + $0x104] sm:$0xf]  ;;  %v1428_v8 = vld [vmem:[%s1966_s6 + $0x108] sm:$0xf0]  ;;  %v562_v21 = vld [vmem:[#allocation2] sm:$0xff] }
  0x97   : > { %1018 = vmatpush.bf16.msrb.mxu0 %v1343_v11  ;;  %v1604_v9 = vld [vmem:[%s1966_s6 + $0x184] sm:$0xf]  ;;  %v1492_v10 = vld [vmem:[%s1966_s6 + $0x188] sm:$0xf0]  ;;  %v1303_v11 = vor.u32 %v1556_v2, %v1300_v3  ;;  %v563_v31 = vld [vmem:[#allocation2 + $0x8] sm:$0xff] }
  0x98   : > { %1031 = vmatpush.bf16.msrb.mxu1 %v1407_v12  ;;  %v1367_v12 = vor.u32 %v1572_v4, %v1364_v6  ;;  %v1495_v14 = vor.u32 %v1604_v9, %v1492_v10 }
  0x99   : > { %1044 = vmatpush.bf16.msrb.mxu2 %v1471_v13  ;;  %v1431_v13 = vor.u32 %v1588_v7, %v1428_v8 }
  0x9a   : > { %1057 = vmatpush.bf16.msrb.mxu3 %v1535_v17 }
  0x9b   : > { %1019 = vmatpush.bf16.msrb.mxu0 %v1335_v23 }
  0x9c   : > { %1032 = vmatpush.bf16.msrb.mxu1 %v1399_v24 }
  0x9d   : > { %1045 = vmatpush.bf16.msrb.mxu2 %v1463_v25 }
  0x9e   : > { %1058 = vmatpush.bf16.msrb.mxu3 %v1527_v29 }
  0x9f   : > { %1020 = vmatpush.bf16.msrb.mxu0 %v1327_v35 }
  0xa0   : > { %1033 = vmatpush.bf16.msrb.mxu1 %v1391_v36 }
  0xa1   : > { %1046 = vmatpush.bf16.msrb.mxu2 %v1455_v37 }
  0xa2   : > { %1059 = vmatpush.bf16.msrb.mxu3 %v1519_v41 }
  0xa3   : > { %1021 = vmatpush.bf16.msrb.mxu0 %v1319_v47 }
  0xa4   : > { %1034 = vmatpush.bf16.msrb.mxu1 %v1383_v48 }
  0xa5   : > { %1047 = vmatpush.bf16.msrb.mxu2 %v1447_v49 }
  0xa6   : > { %1060 = vmatpush.bf16.msrb.mxu3 %v1511_v53 }
  0xa7   : > { %1022 = vmatpush.bf16.msrb.mxu0 %v1311_v62 }
  0xa8   : > { %1035 = vmatpush.bf16.msrb.mxu1 %v1375_v0 }
  0xa9   : > { %1048 = vmatpush.bf16.msrb.mxu2 %v1439_v1 }
  0xaa   : > { %1061 = vmatpush.bf16.msrb.mxu3 %v1503_v5 }
  0xab   : > { %1023 = vmatpush.bf16.msrb.mxu0 %v1303_v11 }
  0xac   : > { %1036 = vmatpush.bf16.msrb.mxu1 %v1367_v12 }
  0xad   : > { %1049 = vmatpush.bf16.msrb.mxu2 %v1431_v13 }
  0xae   : > { %1062 = vmatpush.bf16.msrb.mxu3 %v1495_v14  ;;  %1024 = vmatmul.bf16.vlgmr.msrb.gmra.mxu0 %v2055_v61 }
  0xaf   : > { %1037 = vmatmul.bf16.vlgmr.msrb.gmra.mxu1 %v2057_v63 }
  0xb0   : > { %1050 = vmatmul.bf16.vlgmr.msrb.gmra.mxu2 %v2049_v57 }
  0xb1   : > { %1063 = vmatmul.bf16.vlgmr.msrb.gmra.mxu3 %v2053_v60 }
 0x10b   : > { %v973_v15 = vpop.f32.mrf.mxu0 }
 0x10c   : > { %v986_v16 = vpop.f32.mrf.mxu1 }
 0x10d   : > { %v987_v17 = vadd.f32 %v986_v16, %v973_v15 }
 0x113   : > { %v999_v18 = vpop.f32.mrf.mxu2  ;;  %v975_v23 = vpop.f32.mrf.mxu0 }
 0x114   : > { %v1000_v19 = vadd.f32 %v999_v18, %v987_v17  ;;  %v1012_v20 = vpop.f32.mrf.mxu3  ;;  %v988_v24 = vpop.f32.mrf.mxu1 }
 0x116   : > { %v1013_v22 = vadd.f32 %v1012_v20, %v1000_v19 }
 0x118   : > { %v1068_v25 = vadd.f32 %v1013_v22, %v562_v21 }
 0x11a   : > { %1070 = vst [vmem:[#allocation2] sm:$0xff] %v1068_v25 }
 0x11b   : > { %v1001_v26 = vpop.f32.mrf.mxu2 }
 0x11c   : > { %v1014_v61 = vpop.f32.mrf.mxu3 }
 0x12b   : > { %v1025_v27 = vpop.f32.mrf.mxu0 }
 0x12c   : > { %v1038_v63 = vpop.f32.mrf.mxu1 }
 0x12d   : > { %v1039_v28 = vadd.f32 %v1038_v63, %v1025_v27 }
 0x133   : > { %v1051_v57 = vpop.f32.mrf.mxu2  ;;  %v1027_v30 = vpop.f32.mrf.mxu0 }
 0x134   : > { %v1052_v29 = vadd.f32 %v1051_v57, %v1039_v28  ;;  %v1064_v60 = vpop.f32.mrf.mxu3  ;;  %v1040_v32 = vpop.f32.mrf.mxu1 }
 0x136   : > { %v1065_v33 = vadd.f32 %v1064_v60, %v1052_v29 }
 0x138   : > { %v1069_v34 = vadd.f32 %v1065_v33, %v563_v31  ;;  %1075 = sbr.rel (%p1552_p13) target bundleno = 339 (0x153), region = 74 }
 0x13a   : > { %1071 = vst [vmem:[#allocation2 + $0x8] sm:$0xff] %v1069_v34 }
 0x13b   : > { %v1053_v35 = vpop.f32.mrf.mxu2 }
 0x13c   : > { %v1066_v36 = vpop.f32.mrf.mxu3 }
 0x13d   : > { %v1076_v37 = vld [vmem:[#allocation2] sm:$0xff]  ;;  %vm1106_vm0 = vcmask 1040384   ;;  %vm1109_vm1 = vcmask 1041408  }
 0x13e   : > { %v1080_v39 = vrot.slane %v1076_v37, 4  ;;  %v1092_v40 = vmul.f32 %v1076_v37, %v1076_v37 }
 0x140   : > { %v1081_v44 = vadd.f32 %v1080_v39, %v1076_v37  ;;  %v1094_v45 = vrot.slane %v1092_v40, 4 }
 0x141   : > { %v1077_v38 = vld [vmem:[#allocation2 + $0x8] sm:$0xff] }
 0x142   : > { %v1078_v41 = vpack.c.bf16 %v1077_v38, %v1076_v37  ;;  %v1086_v42 = vrot.slane %v1077_v38, 4  ;;  %v1093_v43 = vmul.f32 %v1077_v38, %v1077_v38  ;;  %v1082_v48 = vrot.slane %v1081_v44, 2 }
 0x143   : > { %v1095_v49 = vadd.f32 %v1094_v45, %v1092_v40 }
 0x144   : > { %1079 = vst [vmem:[%s1959_s4] sm:$0xff] %v1078_v41  ;;  %v1087_v46 = vadd.f32 %v1086_v42, %v1077_v38  ;;  %v1100_v47 = vrot.slane %v1093_v43, 4  ;;  %v1083_v52 = vadd.f32 %v1082_v48, %v1081_v44 }
 0x145   : > { %v1096_v53 = vrot.slane %v1095_v49, 2 }
 0x146   : > { %v1088_v50 = vrot.slane %v1087_v46, 2  ;;  %v1101_v51 = vadd.f32 %v1100_v47, %v1093_v43  ;;  %v1084_v56 = vrot.slane %v1083_v52, 1 }
 0x147   : > { %v1097_v58 = vadd.f32 %v1096_v53, %v1095_v49 }
 0x148   : > { %v1089_v54 = vadd.f32 %v1088_v50, %v1087_v46  ;;  %v1102_v55 = vrot.slane %v1101_v51, 2  ;;  %v1085_v0 = vadd.f32 %v1084_v56, %v1083_v52 }
 0x149   : > { %v1098_v1 = vrot.slane %v1097_v58, 1 }
 0x14a   : > { %v1090_v59 = vrot.slane %v1089_v54, 1  ;;  %v1103_v62 = vadd.f32 %v1102_v55, %v1101_v51 }
 0x14b   : > { %v1099_v4 = vadd.f32 %v1098_v1, %v1097_v58 }
 0x14c   : > { %v1091_v2 = vadd.f32 %v1090_v59, %v1089_v54  ;;  %v1104_v3 = vrot.slane %v1103_v62, 1 }
 0x14d   : > { %v1107_v6 = vsel %vm1106_vm0, %v1085_v0, %v1099_v4 }
 0x14e   : > { %v1105_v5 = vadd.f32 %v1104_v3, %v1103_v62  ;;  %v1110_v7 = vsel %vm1109_vm1, %v1107_v6, 0.0 }
 0x14f   : > { %1112 = vst [vmem:[%s1964_s15] sm:$0xff] %v1110_v7 }
 0x150   : > { %v1108_v8 = vsel %vm1106_vm0, %v1091_v2, %v1105_v5 }
 0x151   : > { %v1111_v9 = vsel %vm1109_vm1, %v1108_v8, 0.0 }
 0x152   : > { %1113 = vst [vmem:[%s1964_s15 + $0x8] sm:$0xff] %v1111_v9 }
 0x153 PF: > { %s14_s18 = sadd.s32 1, %s1731_s18   ;;  %s2144_s12 = smov %s1711_s13 }
 0x154   : > { %p11_p0 = scmp.ge.s32.totalorder %s14_s18, 20   ;;  %s2145_s13 = smov %s1805_s25 }
 0x155   : > { %s2146_s14 = smov %s1723_s16  ;;  %s2147_s15 = smov %s1727_s17 }
 0x156   : > { %s2148_s16 = smov %s2151_s19  ;;  %s2149_s17 = smov %s2155_s20 }
 0x157   :  { %13 = sbr.rel (!%p11_p0) target bundleno = 4 (0x4), region = 124 }

// kernel: resnet34_forward.151
= control target key start
LH: loop header
LB: loop body
LE: loop exit
PB: predicated region body
PF: predicated region fallthrough
CT: control target
= control target key end

     0   :  { %s464_s0 = inlined_call_operand.vmem [shape: bf16[2,1,512], index: 0, kind: input, shape index: {}]   ;;  %s465_s1 = inlined_call_operand.vmem [shape: f32[512,10], index: 1, kind: input, shape index: {}]   ;;  %s466_s2 = inlined_call_operand.vmem [shape: f32[1,10], index: 2, kind: input, shape index: {}]   ;;  %s467_s3 = inlined_call_operand.hbm [shape: f32[2,10], index: 3, kind: output, shape index: {}]  }
   0x1   :  { %v68_v0 = vld [vmem:[%s465_s1 + $0x178] sm:$0xff]  ;;  %v67_v2 = vld [vmem:[%s465_s1 + $0x170] sm:$0xff]  ;;  %v66_v6 = vld [vmem:[%s465_s1 + $0x168] sm:$0xff] }
   0x2   :  { %v36_v1 = vld [vmem:[%s465_s1 + $0x78] sm:$0xff]  ;;  %148 = vmatpush.msra.mxu2 %v68_v0  ;;  %v35_v4 = vld [vmem:[%s465_s1 + $0x70] sm:$0xff]  ;;  %v34_v8 = vld [vmem:[%s465_s1 + $0x68] sm:$0xff] }
   0x3   :  { %108 = vmatpush.msra.mxu0 %v36_v1  ;;  %v84_v3 = vld [vmem:[%s465_s1 + $0x1f8] sm:$0xff]  ;;  %v83_v7 = vld [vmem:[%s465_s1 + $0x1f0] sm:$0xff]  ;;  %v82_v10 = vld [vmem:[%s465_s1 + $0x1e8] sm:$0xff] }
   0x4   :  { %v52_v5 = vld [vmem:[%s465_s1 + $0xf8] sm:$0xff]  ;;  %168 = vmatpush.msra.mxu3 %v84_v3  ;;  %149 = vmatpush.msra.mxu2 %v67_v2  ;;  %v51_v9 = vld [vmem:[%s465_s1 + $0xf0] sm:$0xff]  ;;  %v65_v11 = vld [vmem:[%s465_s1 + $0x160] sm:$0xff] }
   0x5   :  { %128 = vmatpush.msra.mxu1 %v52_v5  ;;  %109 = vmatpush.msra.mxu0 %v35_v4  ;;  %v33_v12 = vld [vmem:[%s465_s1 + $0x60] sm:$0xff]  ;;  %v50_v13 = vld [vmem:[%s465_s1 + $0xe8] sm:$0xff]  ;;  %v64_v16 = vld [vmem:[%s465_s1 + $0x158] sm:$0xff] }
   0x6   :  { %169 = vmatpush.msra.mxu3 %v83_v7  ;;  %150 = vmatpush.msra.mxu2 %v66_v6  ;;  %v81_v14 = vld [vmem:[%s465_s1 + $0x1e0] sm:$0xff]  ;;  %v32_v17 = vld [vmem:[%s465_s1 + $0x58] sm:$0xff]  ;;  %v63_v20 = vld [vmem:[%s465_s1 + $0x150] sm:$0xff] }
   0x7   :  { %129 = vmatpush.msra.mxu1 %v51_v9  ;;  %110 = vmatpush.msra.mxu0 %v34_v8  ;;  %v49_v15 = vld [vmem:[%s465_s1 + $0xe0] sm:$0xff]  ;;  %v80_v18 = vld [vmem:[%s465_s1 + $0x1d8] sm:$0xff]  ;;  %v31_v21 = vld [vmem:[%s465_s1 + $0x50] sm:$0xff] }
   0x8   :  { %170 = vmatpush.msra.mxu3 %v82_v10  ;;  %151 = vmatpush.msra.mxu2 %v65_v11  ;;  %v48_v19 = vld [vmem:[%s465_s1 + $0xd8] sm:$0xff]  ;;  %v79_v22 = vld [vmem:[%s465_s1 + $0x1d0] sm:$0xff]  ;;  %v62_v24 = vld [vmem:[%s465_s1 + $0x148] sm:$0xff] }
   0x9   :  { %130 = vmatpush.msra.mxu1 %v50_v13  ;;  %111 = vmatpush.msra.mxu0 %v33_v12  ;;  %v47_v23 = vld [vmem:[%s465_s1 + $0xd0] sm:$0xff]  ;;  %v30_v25 = vld [vmem:[%s465_s1 + $0x48] sm:$0xff]  ;;  %v61_v28 = vld [vmem:[%s465_s1 + $0x140] sm:$0xff] }
   0xa   :  { %171 = vmatpush.msra.mxu3 %v81_v14  ;;  %152 = vmatpush.msra.mxu2 %v64_v16  ;;  %v78_v26 = vld [vmem:[%s465_s1 + $0x1c8] sm:$0xff]  ;;  %v29_v29 = vld [vmem:[%s465_s1 + $0x40] sm:$0xff]  ;;  %v60_v32 = vld [vmem:[%s465_s1 + $0x138] sm:$0xff] }
   0xb   :  { %131 = vmatpush.msra.mxu1 %v49_v15  ;;  %112 = vmatpush.msra.mxu0 %v32_v17  ;;  %v46_v27 = vld [vmem:[%s465_s1 + $0xc8] sm:$0xff]  ;;  %v77_v30 = vld [vmem:[%s465_s1 + $0x1c0] sm:$0xff]  ;;  %v28_v33 = vld [vmem:[%s465_s1 + $0x38] sm:$0xff] }
   0xc   :  { %172 = vmatpush.msra.mxu3 %v80_v18  ;;  %153 = vmatpush.msra.mxu2 %v63_v20  ;;  %v45_v31 = vld [vmem:[%s465_s1 + $0xc0] sm:$0xff]  ;;  %v76_v34 = vld [vmem:[%s465_s1 + $0x1b8] sm:$0xff]  ;;  %v59_v36 = vld [vmem:[%s465_s1 + $0x130] sm:$0xff] }
   0xd   :  { %132 = vmatpush.msra.mxu1 %v48_v19  ;;  %113 = vmatpush.msra.mxu0 %v31_v21  ;;  %v44_v35 = vld [vmem:[%s465_s1 + $0xb8] sm:$0xff]  ;;  %v27_v37 = vld [vmem:[%s465_s1 + $0x30] sm:$0xff]  ;;  %v58_v40 = vld [vmem:[%s465_s1 + $0x128] sm:$0xff] }
   0xe   :  { %173 = vmatpush.msra.mxu3 %v79_v22  ;;  %154 = vmatpush.msra.mxu2 %v62_v24  ;;  %v75_v38 = vld [vmem:[%s465_s1 + $0x1b0] sm:$0xff]  ;;  %v26_v41 = vld [vmem:[%s465_s1 + $0x28] sm:$0xff]  ;;  %v57_v44 = vld [vmem:[%s465_s1 + $0x120] sm:$0xff] }
   0xf   :  { %133 = vmatpush.msra.mxu1 %v47_v23  ;;  %114 = vmatpush.msra.mxu0 %v30_v25  ;;  %v43_v39 = vld [vmem:[%s465_s1 + $0xb0] sm:$0xff]  ;;  %v74_v42 = vld [vmem:[%s465_s1 + $0x1a8] sm:$0xff]  ;;  %v25_v45 = vld [vmem:[%s465_s1 + $0x20] sm:$0xff] }
  0x10   :  { %174 = vmatpush.msra.mxu3 %v78_v26  ;;  %155 = vmatpush.msra.mxu2 %v61_v28  ;;  %v42_v43 = vld [vmem:[%s465_s1 + $0xa8] sm:$0xff]  ;;  %v207_v46 = vld [vmem:[%s464_s0] sm:$0xff]   ;;  %v56_v51 = vld [vmem:[%s465_s1 + $0x118] sm:$0xff] }
  0x11   :  { %134 = vmatpush.msra.mxu1 %v46_v27  ;;  %115 = vmatpush.msra.mxu0 %v29_v29  ;;  %v73_v47 = vld [vmem:[%s465_s1 + $0x1a0] sm:$0xff]  ;;  %v208_v49 = vunpack.c.l.bf16 %v207_v46  ;;  %v209_v50 = vunpack.c.h.bf16 %v207_v46  ;;  %v24_v52 = vld [vmem:[%s465_s1 + $0x18] sm:$0xff] }
  0x12   :  { %175 = vmatpush.msra.mxu3 %v77_v30  ;;  %156 = vmatpush.msra.mxu2 %v60_v32  ;;  %v41_v48 = vld [vmem:[%s465_s1 + $0xa0] sm:$0xff] }
  0x13   :  { %135 = vmatpush.msra.mxu1 %v45_v31  ;;  %116 = vmatpush.msra.mxu0 %v28_v33 }
  0x14   :  { %176 = vmatpush.msra.mxu3 %v76_v34  ;;  %157 = vmatpush.msra.mxu2 %v59_v36 }
  0x15   :  { %136 = vmatpush.msra.mxu1 %v44_v35  ;;  %117 = vmatpush.msra.mxu0 %v27_v37 }
  0x16   :  { %177 = vmatpush.msra.mxu3 %v75_v38  ;;  %158 = vmatpush.msra.mxu2 %v58_v40 }
  0x17   :  { %137 = vmatpush.msra.mxu1 %v43_v39  ;;  %118 = vmatpush.msra.mxu0 %v26_v41 }
  0x18   :  { %178 = vmatpush.msra.mxu3 %v74_v42 }
  0x19   :  { %138 = vmatpush.msra.mxu1 %v42_v43 }
  0x1a   :  { %8 = vsyncpa [#allocation3], 0  ;;  %159 = vmatpush.msra.mxu2 %v57_v44  ;;  %119 = vmatpush.msra.mxu0 %v25_v45  ;;  %v72_v53 = vld [vmem:[%s465_s1 + $0x198] sm:$0xff]  ;;  %v55_v55 = vld [vmem:[%s465_s1 + $0x110] sm:$0xff]  ;;  %v93_v59 = vperm.slane %v208_v49, 4  ;;  %v97_v60 = vperm.slane %v209_v50, 4 }
  0x1b   :  { %v40_v54 = vld [vmem:[%s465_s1 + $0x98] sm:$0xff]  ;;  %179 = vmatpush.msra.mxu3 %v73_v47  ;;  %139 = vmatpush.msra.mxu1 %v41_v48  ;;  %v23_v56 = vld [vmem:[%s465_s1 + $0x10] sm:$0xff]  ;;  %vm99_vm0 = vcmask 1041409   ;;  %v54_v61 = vld [vmem:[%s465_s1 + $0x108] sm:$0xff]  ;;  %v91_v63 = vperm.slane %v208_v49, 0  ;;  %v95_v0 = vperm.slane %v209_v50, 0 }
  0x1c   :  { %160 = vmatpush.msra.mxu2 %v56_v51  ;;  %120 = vmatpush.msra.mxu0 %v24_v52  ;;  %v71_v57 = vld [vmem:[%s465_s1 + $0x190] sm:$0xff]  ;;  %v22_v62 = vld [vmem:[%s465_s1 + $0x8] sm:$0xff]  ;;  %v94_v1 = vperm.slane %v208_v49, 6  ;;  %v98_v2 = vperm.slane %v209_v50, 6  ;;  %v53_v5 = vld [vmem:[%s465_s1 + $0x100] sm:$0xff]  ;;  %v92_v7 = vperm.slane %v208_v49, 2  ;;  %v102_v9 = vsel %vm99_vm0, %v97_v60, %v93_v59 }
  0x1d   :  { %v39_v58 = vld [vmem:[%s465_s1 + $0x90] sm:$0xff]  ;;  %180 = vmatpush.msra.mxu3 %v72_v53  ;;  %140 = vmatpush.msra.mxu1 %v40_v54  ;;  %v70_v3 = vld [vmem:[%s465_s1 + $0x188] sm:$0xff]  ;;  %v21_v6 = vld [vmem:[%s465_s1] sm:$0xff]  ;;  %v96_v8 = vperm.slane %v209_v50, 2  ;;  %v100_v11 = vsel %vm99_vm0, %v95_v0, %v91_v63  ;;  %s238_s7 = smov [#allocation2]   ;;  %s197_s10 = sshll.u32 %s467_s3, 4  ;;  %s198_s10 = int_to_ptr.hbm [resolvable:$true] %s197_s10 }
  0x1e   :  { %161 = vmatpush.msra.mxu2 %v55_v55  ;;  %121 = vmatpush.msra.mxu0 %v23_v56  ;;  %v38_v4 = vld [vmem:[%s465_s1 + $0x88] sm:$0xff]  ;;  %v69_v10 = vld [vmem:[%s465_s1 + $0x180] sm:$0xff]  ;;  %v103_v12 = vsel %vm99_vm0, %v98_v2, %v94_v1  ;;  %s195_s8 = sshll.u32 %s238_s7, 4  ;;  %vm188_vm1 = vcmask 74752   ;;  %s196_s8 = int_to_ptr.vmem [resolvable:$true] %s195_s8 }
  0x1f   :  { %181 = vmatpush.msra.mxu3 %v71_v57  ;;  %141 = vmatpush.msra.mxu1 %v39_v58  ;;  %v37_v13 = vld [vmem:[%s465_s1 + $0x80] sm:$0xff]  ;;  %v101_v14 = vsel %vm99_vm0, %v96_v8, %v92_v7 }
  0x20   :  { %162 = vmatpush.msra.mxu2 %v54_v61  ;;  %122 = vmatpush.msra.mxu0 %v22_v62  ;;  %v211_v15 = vld [vmem:[%s466_s2] ss:$0 sm:$0xff] }
  0x21   :  { %182 = vmatpush.msra.mxu3 %v70_v3  ;;  %142 = vmatpush.msra.mxu1 %v38_v4 }
  0x22   :  { %163 = vmatpush.msra.mxu2 %v53_v5  ;;  %123 = vmatpush.msra.mxu0 %v21_v6 }
  0x23   :  { %164 = vmatmul.f32.vlgmr.msra.gmra.mxu2 %v102_v9  ;;  %183 = vmatpush.msra.mxu3 %v69_v10 }
  0x24   :  { %124 = vmatmul.f32.vlgmr.msra.gmra.mxu0 %v100_v11  ;;  %184 = vmatmul.f32.vlgmr.msra.gmra.mxu3 %v103_v12 }
  0x25   :  { %143 = vmatpush.msra.mxu1 %v37_v13 }
  0x26   :  { %144 = vmatmul.f32.vlgmr.msra.gmra.mxu1 %v101_v14 }
  0xa1   :  { %v125_v16 = vpop.f32.mrf.mxu0 }
  0xa2   :  { %v126_v17 = vadd.f32 %v211_v15, %v125_v16 }
  0xa3   :  { %v145_v18 = vpop.f32.mrf.mxu1 }
  0xa4   :  { %v146_v19 = vadd.f32 %v145_v18, %v126_v17 }
  0xa6   :  { %v165_v20 = vpop.f32.mrf.mxu2 }
  0xa7   :  { %v166_v21 = vadd.f32 %v165_v20, %v146_v19  ;;  %v185_v22 = vpop.f32.mrf.mxu3 }
  0xa9   :  { %v186_v23 = vadd.f32 %v185_v22, %v166_v21 }
  0xab   :  { %189 = vst.msk [vmem:[#allocation2] sm:$0x3] %vm188_vm1, %v186_v23 }
  0xac   :  { %200 = dma.vmem_to_hbm [thread:$0]  %s196_s8, 32, %s198_s10, [#allocation3]  }
  0xad   :  { %236 = dma.done.wait [#allocation3], 32  }
  0xae   :  { %237 = vsyncadd [#allocation3], 4294967264 }
  0xaf   :  { %205 = vsyncpa [#allocation3], 1 }

</bundles_post_ra>
